<compile_context>
chip_gen: v5e
topology: v5e:2x2
jax: 0.10.0
libtpu: 0.0.40
codegen_flags: <defaults>
</compile_context>

<pallas_src>
import functools

import jax
import jax.numpy as jnp
from jax.experimental import pallas as pl
from jax.experimental.pallas import tpu as pltpu


_DIMS = (3, 64, 128, 256, 128, 64, 2)
_FLOPS_PER_ROW = 2 * sum(_DIMS[i] * _DIMS[i + 1] for i in range(6))  # ~164K


def _mlp_kernel(x_ref,
                w1_ref, b1_ref, w2_ref, b2_ref, w3_ref, b3_ref,
                w4_ref, b4_ref, w5_ref, b5_ref, w6d_ref, b6d_ref,
                o_ref):
    # ---- layer 1 (3 -> 64) on the VPU: outer-product broadcast FMAs over the
    # K=3 contraction.  Everything here is f32.
    x = x_ref[...]                                   # (3, tile)   f32
    w1 = w1_ref[...]                                 # (64, 3)     f32
    h = (w1[:, 0:1] * x[0:1, :]
         + w1[:, 1:2] * x[1:2, :]
         + w1[:, 2:3] * x[2:3, :]) + b1_ref[...]     # (64, tile)  f32
    h = jnp.maximum(h, 0.0).astype(jnp.bfloat16)     # carry bf16

    def linear_relu(h_bf16, w_ref, b_ref):
        # bf16 MXU inputs, f32 accumulation; bias/ReLU in f32; carry bf16.
        acc = jnp.dot(w_ref[...], h_bf16, preferred_element_type=jnp.float32)
        return jnp.maximum(acc + b_ref[...], 0.0).astype(jnp.bfloat16)

    h = linear_relu(h, w2_ref, b2_ref)               # (128, tile)
    h = linear_relu(h, w3_ref, b3_ref)               # (256, tile)
    # dropout(p=0.3): identity in eval mode.
    h = linear_relu(h, w4_ref, b4_ref)               # (128, tile)
    h = linear_relu(h, w5_ref, b5_ref)               # (64, tile)

    # ---- 64 -> 2 head off the MXU: only the logit difference matters.
    # d = (w6[1,:] - w6[0,:]) . h + (b6[1] - b6[0])   -> (1, tile)
    d = jnp.sum(w6d_ref[...] * h.astype(jnp.float32), axis=0, keepdims=True)
    d = d + b6d_ref[...]

    # Stable 2-class log_softmax: [l0, l1] - lse == [-softplus(d), -softplus(-d)]
    sp = jnp.maximum(d, 0.0) + jnp.log(1.0 + jnp.exp(-jnp.abs(d)))
    o_ref[...] = jnp.concatenate([-sp, d - sp], axis=0)   # (2, tile)


def _pick_tile(m, tile_max):
    """Lane tile: multiple of 128, aim for >=2 grid steps and low padding."""
    half = -(-m // 2)                       # ceil(M/2)
    half = -(-half // 128) * 128            # rounded up to a multiple of 128
    tile = max(128, min(tile_max, half))
    return (tile // 128) * 128


@functools.partial(jax.jit, static_argnames=("tile_max",))
def pointnet_segmentation(x, params, *, tile_max=2048):
    """x: (..., 3) float32 point coordinates.
    params: PyTorch-layout weights w{k}: (out, in) and biases b{k}: (out,).
    Returns (..., 2) log-probabilities."""
    lead_shape = x.shape[:-1]
    xf = x.reshape(-1, 3).astype(jnp.float32)
    M = xf.shape[0]

    tile = _pick_tile(M, tile_max)
    Mp = -(-M // tile) * tile

    x_t = xf.T                                       # (3, M): points on lanes
    if Mp != M:
        x_t = jnp.pad(x_t, ((0, 0), (0, Mp - M)))    # zero rows: harmless, sliced off

    # Operands: layer-1 weight f32 (VPU path), layers 2..5 bf16 (MXU), biases as
    # f32 columns, plus the precomputed 64->2 head difference vectors.
    ops = [params["w1"].astype(jnp.float32),
           params["b1"].reshape(-1, 1).astype(jnp.float32)]
    for k in range(2, 6):
        ops.append(params[f"w{k}"].astype(jnp.bfloat16))
        ops.append(params[f"b{k}"].reshape(-1, 1).astype(jnp.float32))
    w6 = params["w6"].astype(jnp.float32)            # (2, 64)
    b6 = params["b6"].astype(jnp.float32)            # (2,)
    ops.append((w6[1] - w6[0]).reshape(-1, 1))       # (64, 1)  f32
    ops.append((b6[1] - b6[0]).reshape(1, 1))        # (1, 1)   f32

    in_specs = [pl.BlockSpec((3, tile), lambda i: (0, i))]
    # Weights / biases: full-array blocks, resident in VMEM across all steps.
    in_specs += [pl.BlockSpec(a.shape, lambda i: (0, 0)) for a in ops]

    weight_bytes = sum(int(a.size) * a.dtype.itemsize for a in ops)
    cost = pl.CostEstimate(
        flops=int(Mp) * _FLOPS_PER_ROW,
        transcendentals=2 * int(Mp),                 # exp + log per point
        bytes_accessed=int(Mp) * (3 + 2) * 4 + weight_bytes,
    )

    out = pl.pallas_call(
        _mlp_kernel,
        out_shape=jax.ShapeDtypeStruct((2, Mp), jnp.float32),
        grid_spec=pltpu.PrefetchScalarGridSpec(
            num_scalar_prefetch=0,
            grid=(Mp // tile,),
            in_specs=in_specs,
            out_specs=pl.BlockSpec((2, tile), lambda i: (0, i)),
        ),
        compiler_params=pltpu.CompilerParams(
            dimension_semantics=("parallel",),
            # Footprint at tile=2048: ~3 MiB bf16 intermediates + 2x double-
            # buffered lane-dense I/O blocks (~0.25 MiB) + ~0.4 MiB weights
            # (double-buffered) -- far under 32 MiB, which is also <= the scoped
            # default on every generation (and half of v7x physical VMEM).
            vmem_limit_bytes=32 * 1024 * 1024,
        ),
        cost_estimate=cost,
    )(x_t, *ops)

    return out[:, :M].T.reshape(*lead_shape, 2)


def init_params(key):
    """PyTorch nn.Linear-style init: U(-1/sqrt(fan_in), 1/sqrt(fan_in));
    weights stored (out, in), biases (out,) — same layout as the spec module."""
    params = {}
    for k in range(1, 7):
        fan_in, fan_out = _DIMS[k - 1], _DIMS[k]
        key, kw, kb = jax.random.split(key, 3)
        bound = 1.0 / (fan_in ** 0.5)
        params[f"w{k}"] = jax.random.uniform(
            kw, (fan_out, fan_in), jnp.float32, -bound, bound)
        params[f"b{k}"] = jax.random.uniform(
            kb, (fan_out,), jnp.float32, -bound, bound)
    return params


def reference_forward(x_flat, params):
    """Plain-JAX f32 reference (eval-mode dropout = identity)."""
    h = x_flat
    for k in range(1, 6):
        h = jnp.maximum(h @ params[f"w{k}"].T + params[f"b{k}"], 0.0)
    logits = h @ params["w6"].T + params["b6"]
    return jax.nn.log_softmax(logits, axis=-1)


if __name__ == "__main__":
    key = jax.random.PRNGKey(0)
    k_x, k_p = jax.random.split(key)

    batch, num_points = 2, 1024            # input point cloud: (2, 1024, 3)
    x = jax.random.normal(k_x, (batch, num_points, 3), jnp.float32)
    params = init_params(k_p)

    out = pointnet_segmentation(x, params)
    jax.block_until_ready(out)
    assert out.shape == (batch, num_points, 2)

    # Correctness vs pure-f32 reference; tolerance loosened for bf16 MXU inputs
    # / bf16-carried intermediates with f32 accumulation.
    ref = reference_forward(x.reshape(-1, 3), params).reshape(batch, num_points, 2)
    max_err = float(jnp.max(jnp.abs(out - ref)))
    assert jnp.allclose(out, ref, atol=5e-2, rtol=5e-2), (
        f"mismatch vs reference (max abs err {max_err})")

    print("KERNEL_OK")
</pallas_src>

<mosaic_0001>
module attributes {stable_mosaic.version = 11 : i64} {
  func.func @_mlp_kernel(%arg0: i32, %arg1: memref<3x1024xf32, #tpu.memory_space<vmem>>, %arg2: memref<64x3xf32, #tpu.memory_space<vmem>>, %arg3: memref<64x1xf32, #tpu.memory_space<vmem>>, %arg4: memref<128x64xbf16, #tpu.memory_space<vmem>>, %arg5: memref<128x1xf32, #tpu.memory_space<vmem>>, %arg6: memref<256x128xbf16, #tpu.memory_space<vmem>>, %arg7: memref<256x1xf32, #tpu.memory_space<vmem>>, %arg8: memref<128x256xbf16, #tpu.memory_space<vmem>>, %arg9: memref<128x1xf32, #tpu.memory_space<vmem>>, %arg10: memref<64x128xbf16, #tpu.memory_space<vmem>>, %arg11: memref<64x1xf32, #tpu.memory_space<vmem>>, %arg12: memref<64x1xf32, #tpu.memory_space<vmem>>, %arg13: memref<1x1xf32, #tpu.memory_space<vmem>>, %arg14: memref<2x1024xf32, #tpu.memory_space<vmem>>) attributes {dimension_semantics = [#tpu.dimension_semantics<parallel>], iteration_bounds = array<i64: 2>, scalar_prefetch = 0 : i64, scratch_operands = 0 : i64, tpu.core_type = #tpu.core_type<tc>, window_params = [{transform_indices = @transform_0, window_bounds = array<i64: 3, 1024>}, {pipeline_mode = #tpu.pipeline_mode<synchronous>, transform_indices = @transform_1, window_bounds = array<i64: 64, 3>}, {pipeline_mode = #tpu.pipeline_mode<synchronous>, transform_indices = @transform_2, window_bounds = array<i64: 64, 1>}, {pipeline_mode = #tpu.pipeline_mode<synchronous>, transform_indices = @transform_3, window_bounds = array<i64: 128, 64>}, {pipeline_mode = #tpu.pipeline_mode<synchronous>, transform_indices = @transform_4, window_bounds = array<i64: 128, 1>}, {pipeline_mode = #tpu.pipeline_mode<synchronous>, transform_indices = @transform_5, window_bounds = array<i64: 256, 128>}, {pipeline_mode = #tpu.pipeline_mode<synchronous>, transform_indices = @transform_6, window_bounds = array<i64: 256, 1>}, {pipeline_mode = #tpu.pipeline_mode<synchronous>, transform_indices = @transform_7, window_bounds = array<i64: 128, 256>}, {pipeline_mode = #tpu.pipeline_mode<synchronous>, transform_indices = @transform_8, window_bounds = array<i64: 128, 1>}, {pipeline_mode = #tpu.pipeline_mode<synchronous>, transform_indices = @transform_9, window_bounds = array<i64: 64, 128>}, {pipeline_mode = #tpu.pipeline_mode<synchronous>, transform_indices = @transform_10, window_bounds = array<i64: 64, 1>}, {pipeline_mode = #tpu.pipeline_mode<synchronous>, transform_indices = @transform_11, window_bounds = array<i64: 64, 1>}, {pipeline_mode = #tpu.pipeline_mode<synchronous>, transform_indices = @transform_12, window_bounds = array<i64: 1, 1>}, {transform_indices = @transform_13, window_bounds = array<i64: 2, 1024>}]} {
    %c0 = arith.constant 0 : index
    %c0_0 = arith.constant 0 : index
    %0 = vector.load %arg1[%c0, %c0_0] : memref<3x1024xf32, #tpu.memory_space<vmem>>, vector<3x1024xf32>
    %c0_1 = arith.constant 0 : index
    %c0_2 = arith.constant 0 : index
    %1 = vector.load %arg2[%c0_1, %c0_2] : memref<64x3xf32, #tpu.memory_space<vmem>>, vector<64x3xf32>
    %2 = vector.extract_strided_slice %1 {offsets = [0, 0], sizes = [64, 1], strides = [1, 1]} : vector<64x3xf32> to vector<64x1xf32>
    %3 = vector.extract_strided_slice %0 {offsets = [0, 0], sizes = [1, 1024], strides = [1, 1]} : vector<3x1024xf32> to vector<1x1024xf32>
    %4 = vector.broadcast %2 : vector<64x1xf32> to vector<64x1024xf32>
    %5 = vector.broadcast %3 : vector<1x1024xf32> to vector<64x1024xf32>
    %6 = arith.mulf %4, %5 : vector<64x1024xf32>
    %7 = vector.extract_strided_slice %1 {offsets = [0, 1], sizes = [64, 1], strides = [1, 1]} : vector<64x3xf32> to vector<64x1xf32>
    %8 = vector.extract_strided_slice %0 {offsets = [1, 0], sizes = [1, 1024], strides = [1, 1]} : vector<3x1024xf32> to vector<1x1024xf32>
    %9 = vector.broadcast %7 : vector<64x1xf32> to vector<64x1024xf32>
    %10 = vector.broadcast %8 : vector<1x1024xf32> to vector<64x1024xf32>
    %11 = arith.mulf %9, %10 : vector<64x1024xf32>
    %12 = arith.addf %6, %11 : vector<64x1024xf32>
    %13 = vector.extract_strided_slice %1 {offsets = [0, 2], sizes = [64, 1], strides = [1, 1]} : vector<64x3xf32> to vector<64x1xf32>
    %14 = vector.extract_strided_slice %0 {offsets = [2, 0], sizes = [1, 1024], strides = [1, 1]} : vector<3x1024xf32> to vector<1x1024xf32>
    %15 = vector.broadcast %13 : vector<64x1xf32> to vector<64x1024xf32>
    %16 = vector.broadcast %14 : vector<1x1024xf32> to vector<64x1024xf32>
    %17 = arith.mulf %15, %16 : vector<64x1024xf32>
    %18 = arith.addf %12, %17 : vector<64x1024xf32>
    %c0_3 = arith.constant 0 : index
    %c0_4 = arith.constant 0 : index
    %19 = vector.load %arg3[%c0_3, %c0_4] : memref<64x1xf32, #tpu.memory_space<vmem>>, vector<64x1xf32>
    %20 = vector.broadcast %19 : vector<64x1xf32> to vector<64x1024xf32>
    %21 = arith.addf %18, %20 : vector<64x1024xf32>
    %cst = arith.constant 0.000000e+00 : f32
    %22 = vector.broadcast %cst : f32 to vector<64x1024xf32>
    %23 = arith.maximumf %21, %22 : vector<64x1024xf32>
    %24 = arith.truncf %23 : vector<64x1024xf32> to vector<64x1024xbf16>
    %c0_5 = arith.constant 0 : index
    %c0_6 = arith.constant 0 : index
    %25 = vector.load %arg4[%c0_5, %c0_6] : memref<128x64xbf16, #tpu.memory_space<vmem>>, vector<128x64xbf16>
    %cst_7 = arith.constant dense<0.000000e+00> : vector<128x1024xf32>
    %26 = tpu.matmul %25, %24, %cst_7 {dimension_numbers = #tpu.dot_dimension_numbers<[1], [0], [0], [1], [0, 0, 1, 1], [], []>} : vector<128x64xbf16>, vector<64x1024xbf16>, vector<128x1024xf32> -> vector<128x1024xf32>
    %c0_8 = arith.constant 0 : index
    %c0_9 = arith.constant 0 : index
    %27 = vector.load %arg5[%c0_8, %c0_9] : memref<128x1xf32, #tpu.memory_space<vmem>>, vector<128x1xf32>
    %28 = vector.broadcast %27 : vector<128x1xf32> to vector<128x1024xf32>
    %29 = arith.addf %26, %28 : vector<128x1024xf32>
    %cst_10 = arith.constant 0.000000e+00 : f32
    %30 = vector.broadcast %cst_10 : f32 to vector<128x1024xf32>
    %31 = arith.maximumf %29, %30 : vector<128x1024xf32>
    %32 = arith.truncf %31 : vector<128x1024xf32> to vector<128x1024xbf16>
    %c0_11 = arith.constant 0 : index
    %c0_12 = arith.constant 0 : index
    %33 = vector.load %arg6[%c0_11, %c0_12] : memref<256x128xbf16, #tpu.memory_space<vmem>>, vector<256x128xbf16>
    %cst_13 = arith.constant dense<0.000000e+00> : vector<256x1024xf32>
    %34 = tpu.matmul %33, %32, %cst_13 {dimension_numbers = #tpu.dot_dimension_numbers<[1], [0], [0], [1], [0, 0, 1, 1], [], []>} : vector<256x128xbf16>, vector<128x1024xbf16>, vector<256x1024xf32> -> vector<256x1024xf32>
    %c0_14 = arith.constant 0 : index
    %c0_15 = arith.constant 0 : index
    %35 = vector.load %arg7[%c0_14, %c0_15] : memref<256x1xf32, #tpu.memory_space<vmem>>, vector<256x1xf32>
    %36 = vector.broadcast %35 : vector<256x1xf32> to vector<256x1024xf32>
    %37 = arith.addf %34, %36 : vector<256x1024xf32>
    %cst_16 = arith.constant 0.000000e+00 : f32
    %38 = vector.broadcast %cst_16 : f32 to vector<256x1024xf32>
    %39 = arith.maximumf %37, %38 : vector<256x1024xf32>
    %40 = arith.truncf %39 : vector<256x1024xf32> to vector<256x1024xbf16>
    %c0_17 = arith.constant 0 : index
    %c0_18 = arith.constant 0 : index
    %41 = vector.load %arg8[%c0_17, %c0_18] : memref<128x256xbf16, #tpu.memory_space<vmem>>, vector<128x256xbf16>
    %cst_19 = arith.constant dense<0.000000e+00> : vector<128x1024xf32>
    %42 = tpu.matmul %41, %40, %cst_19 {dimension_numbers = #tpu.dot_dimension_numbers<[1], [0], [0], [1], [0, 0, 1, 1], [], []>} : vector<128x256xbf16>, vector<256x1024xbf16>, vector<128x1024xf32> -> vector<128x1024xf32>
    %c0_20 = arith.constant 0 : index
    %c0_21 = arith.constant 0 : index
    %43 = vector.load %arg9[%c0_20, %c0_21] : memref<128x1xf32, #tpu.memory_space<vmem>>, vector<128x1xf32>
    %44 = vector.broadcast %43 : vector<128x1xf32> to vector<128x1024xf32>
    %45 = arith.addf %42, %44 : vector<128x1024xf32>
    %cst_22 = arith.constant 0.000000e+00 : f32
    %46 = vector.broadcast %cst_22 : f32 to vector<128x1024xf32>
    %47 = arith.maximumf %45, %46 : vector<128x1024xf32>
    %48 = arith.truncf %47 : vector<128x1024xf32> to vector<128x1024xbf16>
    %c0_23 = arith.constant 0 : index
    %c0_24 = arith.constant 0 : index
    %49 = vector.load %arg10[%c0_23, %c0_24] : memref<64x128xbf16, #tpu.memory_space<vmem>>, vector<64x128xbf16>
    %cst_25 = arith.constant dense<0.000000e+00> : vector<64x1024xf32>
    %50 = tpu.matmul %49, %48, %cst_25 {dimension_numbers = #tpu.dot_dimension_numbers<[1], [0], [0], [1], [0, 0, 1, 1], [], []>} : vector<64x128xbf16>, vector<128x1024xbf16>, vector<64x1024xf32> -> vector<64x1024xf32>
    %c0_26 = arith.constant 0 : index
    %c0_27 = arith.constant 0 : index
    %51 = vector.load %arg11[%c0_26, %c0_27] : memref<64x1xf32, #tpu.memory_space<vmem>>, vector<64x1xf32>
    %52 = vector.broadcast %51 : vector<64x1xf32> to vector<64x1024xf32>
    %53 = arith.addf %50, %52 : vector<64x1024xf32>
    %cst_28 = arith.constant 0.000000e+00 : f32
    %54 = vector.broadcast %cst_28 : f32 to vector<64x1024xf32>
    %55 = arith.maximumf %53, %54 : vector<64x1024xf32>
    %56 = arith.truncf %55 : vector<64x1024xf32> to vector<64x1024xbf16>
    %c0_29 = arith.constant 0 : index
    %c0_30 = arith.constant 0 : index
    %57 = vector.load %arg12[%c0_29, %c0_30] : memref<64x1xf32, #tpu.memory_space<vmem>>, vector<64x1xf32>
    %58 = arith.extf %56 : vector<64x1024xbf16> to vector<64x1024xf32>
    %59 = vector.broadcast %57 : vector<64x1xf32> to vector<64x1024xf32>
    %60 = arith.mulf %59, %58 : vector<64x1024xf32>
    %cst_31 = arith.constant dense<0.000000e+00> : vector<1024xf32>
    %61 = vector.multi_reduction <add>, %60, %cst_31 [0] : vector<64x1024xf32> to vector<1024xf32>
    %62 = vector.shape_cast %61 : vector<1024xf32> to vector<1x1024xf32>
    %c0_32 = arith.constant 0 : index
    %c0_33 = arith.constant 0 : index
    %63 = vector.load %arg13[%c0_32, %c0_33] : memref<1x1xf32, #tpu.memory_space<vmem>>, vector<1x1xf32>
    %64 = vector.broadcast %63 : vector<1x1xf32> to vector<1x1024xf32>
    %65 = arith.addf %62, %64 : vector<1x1024xf32>
    %cst_34 = arith.constant 0.000000e+00 : f32
    %66 = vector.broadcast %cst_34 : f32 to vector<1x1024xf32>
    %67 = arith.maximumf %65, %66 : vector<1x1024xf32>
    %68 = math.absf %65 : vector<1x1024xf32>
    %cst_35 = arith.constant 0.000000e+00 : f32
    %69 = vector.broadcast %cst_35 : f32 to vector<1x1024xf32>
    %70 = arith.subf %69, %68 : vector<1x1024xf32>
    %71 = math.exp %70 : vector<1x1024xf32>
    %cst_36 = arith.constant 1.000000e+00 : f32
    %72 = vector.broadcast %cst_36 : f32 to vector<1x1024xf32>
    %73 = arith.addf %72, %71 : vector<1x1024xf32>
    %74 = math.log %73 : vector<1x1024xf32>
    %75 = arith.addf %67, %74 : vector<1x1024xf32>
    %cst_37 = arith.constant 0.000000e+00 : f32
    %76 = vector.broadcast %cst_37 : f32 to vector<1x1024xf32>
    %77 = arith.subf %76, %75 : vector<1x1024xf32>
    %78 = arith.subf %65, %75 : vector<1x1024xf32>
    %79 = tpu.concatenate %77, %78 in 0 : vector<1x1024xf32>, vector<1x1024xf32> -> vector<2x1024xf32>
    %c0_38 = arith.constant 0 : index
    %c0_39 = arith.constant 0 : index
    %80 = vector.load %arg14[%c0_38, %c0_39] : memref<2x1024xf32, #tpu.memory_space<vmem>>, vector<2x1024xf32>
    tpu.vector_store %arg14[%c0_38, %c0_39], %79 {strides = array<i32>} : memref<2x1024xf32, #tpu.memory_space<vmem>>, vector<2x1024xf32>,
    return
  }
  func.func @transform_0(%arg0: i32) -> (i32, i32) {
    %c0_i32 = arith.constant 0 : i32
    %c0_i32_0 = arith.constant 0 : i32
    return %c0_i32, %arg0 : i32, i32
  }
  func.func @transform_1(%arg0: i32) -> (i32, i32) {
    %c0_i32 = arith.constant 0 : i32
    %c0_i32_0 = arith.constant 0 : i32
    %c0_i32_1 = arith.constant 0 : i32
    return %c0_i32, %c0_i32_0 : i32, i32
  }
  func.func @transform_2(%arg0: i32) -> (i32, i32) {
    %c0_i32 = arith.constant 0 : i32
    %c0_i32_0 = arith.constant 0 : i32
    %c0_i32_1 = arith.constant 0 : i32
    return %c0_i32, %c0_i32_0 : i32, i32
  }
  func.func @transform_3(%arg0: i32) -> (i32, i32) {
    %c0_i32 = arith.constant 0 : i32
    %c0_i32_0 = arith.constant 0 : i32
    %c0_i32_1 = arith.constant 0 : i32
    return %c0_i32, %c0_i32_0 : i32, i32
  }
  func.func @transform_4(%arg0: i32) -> (i32, i32) {
    %c0_i32 = arith.constant 0 : i32
    %c0_i32_0 = arith.constant 0 : i32
    %c0_i32_1 = arith.constant 0 : i32
    return %c0_i32, %c0_i32_0 : i32, i32
  }
  func.func @transform_5(%arg0: i32) -> (i32, i32) {
    %c0_i32 = arith.constant 0 : i32
    %c0_i32_0 = arith.constant 0 : i32
    %c0_i32_1 = arith.constant 0 : i32
    return %c0_i32, %c0_i32_0 : i32, i32
  }
  func.func @transform_6(%arg0: i32) -> (i32, i32) {
    %c0_i32 = arith.constant 0 : i32
    %c0_i32_0 = arith.constant 0 : i32
    %c0_i32_1 = arith.constant 0 : i32
    return %c0_i32, %c0_i32_0 : i32, i32
  }
  func.func @transform_7(%arg0: i32) -> (i32, i32) {
    %c0_i32 = arith.constant 0 : i32
    %c0_i32_0 = arith.constant 0 : i32
    %c0_i32_1 = arith.constant 0 : i32
    return %c0_i32, %c0_i32_0 : i32, i32
  }
  func.func @transform_8(%arg0: i32) -> (i32, i32) {
    %c0_i32 = arith.constant 0 : i32
    %c0_i32_0 = arith.constant 0 : i32
    %c0_i32_1 = arith.constant 0 : i32
    return %c0_i32, %c0_i32_0 : i32, i32
  }
  func.func @transform_9(%arg0: i32) -> (i32, i32) {
    %c0_i32 = arith.constant 0 : i32
    %c0_i32_0 = arith.constant 0 : i32
    %c0_i32_1 = arith.constant 0 : i32
    return %c0_i32, %c0_i32_0 : i32, i32
  }
  func.func @transform_10(%arg0: i32) -> (i32, i32) {
    %c0_i32 = arith.constant 0 : i32
    %c0_i32_0 = arith.constant 0 : i32
    %c0_i32_1 = arith.constant 0 : i32
    return %c0_i32, %c0_i32_0 : i32, i32
  }
  func.func @transform_11(%arg0: i32) -> (i32, i32) {
    %c0_i32 = arith.constant 0 : i32
    %c0_i32_0 = arith.constant 0 : i32
    %c0_i32_1 = arith.constant 0 : i32
    return %c0_i32, %c0_i32_0 : i32, i32
  }
  func.func @transform_12(%arg0: i32) -> (i32, i32) {
    %c0_i32 = arith.constant 0 : i32
    %c0_i32_0 = arith.constant 0 : i32
    %c0_i32_1 = arith.constant 0 : i32
    return %c0_i32, %c0_i32_0 : i32, i32
  }
  func.func @transform_13(%arg0: i32) -> (i32, i32) {
    %c0_i32 = arith.constant 0 : i32
    %c0_i32_0 = arith.constant 0 : i32
    return %c0_i32, %arg0 : i32, i32
  }
}

</mosaic_0001>

<bundles_post_ra>
// kernel: pointnet_segmentation.1
= control target key start
LH: loop header
LB: loop body
LE: loop exit
PB: predicated region body
PF: predicated region fallthrough
CT: control target
= control target key end

     0   :  { %s10476_s0 = inlined_call_operand.vmem [shape: f32[3,2048], index: 0, kind: input, shape index: {}]   ;;  %s10477_s1 = inlined_call_operand.vmem [shape: f32[64,3], index: 1, kind: input, shape index: {}]   ;;  %s10478_s2 = inlined_call_operand.vmem [shape: f32[64,1], index: 2, kind: input, shape index: {}]   ;;  %s10479_s3 = inlined_call_operand.vmem [shape: bf16[128,64], index: 3, kind: input, shape index: {}]   ;;  %s10480_s4 = inlined_call_operand.vmem [shape: f32[128,1], index: 4, kind: input, shape index: {}]   ;;  %s10481_s5 = inlined_call_operand.vmem [shape: bf16[256,128], index: 5, kind: input, shape index: {}]   ;;  %s10482_s6 = inlined_call_operand.vmem [shape: f32[256,1], index: 6, kind: input, shape index: {}]   ;;  %s10483_s7 = inlined_call_operand.vmem [shape: bf16[128,256], index: 7, kind: input, shape index: {}]   ;;  %s10484_s8 = inlined_call_operand.vmem [shape: f32[128,1], index: 8, kind: input, shape index: {}]   ;;  %s10485_s9 = inlined_call_operand.vmem [shape: bf16[64,128], index: 9, kind: input, shape index: {}]   ;;  %s10486_s10 = inlined_call_operand.vmem [shape: f32[64,1], index: 10, kind: input, shape index: {}]   ;;  %s10487_s11 = inlined_call_operand.vmem [shape: f32[64,1], index: 11, kind: input, shape index: {}]   ;;  %s10488_s12 = inlined_call_operand.<no memory space> [shape: f32[1,1], index: 12, kind: input, shape index: {}]   ;;  %s10489_s13 = inlined_call_operand.hbm [shape: f32[2,2048], index: 13, kind: output, shape index: {}]  }
   0x1   :  { %10695 = sst [smem:[#allocation56_spill]] %s10477_s1  ;;  %v18_v0 = vstv %s10488_s12 }
   0x2   :  { %10696 = sst [smem:[#allocation57_spill]] %s10478_s2  ;;  %19 = vst [vmem:[#allocation2] sm:$0x1] %v18_v0 }
   0x3   :  { %20 = vsyncpa [#allocation4], 0 }
   0x4   :  { %22 = vsyncpa [#allocation4 + $0x1], 0  ;;  %s5961_s27 = smov 0   ;;  %s5963_s28 = smov 0  }
   0x5   :  { %s5965_s29 = smov 0   ;;  %s5967_s30 = smov 0  }
   0x6 LB: > { %s5982_s12 = sadd.s32 4294967295, %s5883_s30   ;;  %s5413_s14 = sadd.s32 4294967294, %s5883_s30   ;;  %s5883_s30 = sphi %s5967_s30, %s11113_s30   ;;  %s5879_s29 = sphi %s5965_s29, %s11112_s29   ;;  %s5875_s28 = sphi %s5963_s28, %s11111_s28   ;;  %s5871_s27 = sphi %s5961_s27, %s11110_s27  }
   0x7   : > { %s5986_s15 = sadd.s32 1, %s5883_s30   ;;  %s313_s16 = sadd.s32 1, %s5879_s29 }
   0x8   : > { %s310_s17 = ssub.s32 %s5883_s30, %s5986_s15  ;;  %p323_p0 = scmp.ne.s32.totalorder %s5879_s29, %s5875_s28 }
   0x9   : > { %p311_p1 = scmp.eq.s32.totalorder %s310_s17, 0  ;;  %p324_p2 = scmp.eq.s32.totalorder %s5982_s12, 1 }
   0xa   : > { %p329_p3 = scmp.ne.s32.totalorder %s5875_s28, %s5871_s27  ;;  %p330_p4 = scmp.eq.s32.totalorder %s5413_s14, 1 }
   0xb   : > { %s5997_s18 = scalar_select %p311_p1, %s5879_s29, %s313_s16  }
   0xc   : > { %p5999_p5 = por %p324_p2, %p323_p0  ;;  %p6003_p6 = por %p330_p4, %p329_p3 }
   0xd   : > { %p5416_p7 = scmp.ge.s32.totalorder %s5883_s30, 1  ;;  %p393_p8 = scmp.lt.s32.totalorder %s5883_s30, 3 }
   0xf   : > { %p394_p9 = pnand %p5416_p7, %p393_p8 }
  0x11   : > { %397 = sbr.rel (%p394_p9) target bundleno = 1981 (0x7bd), region = 72 }
  0x16   : > { %s10699_s1 = sld [smem:[#allocation56_spill]]  ;;  %v5885_v3 = vmov 2   ;;  %v5886_v4 = vmov 1   ;;  %v5887_v9 = vmov 0   ;;  %v1193_v16 = vld [vmem:[%s10480_s4 + $0x60] sm:$0xff]  ;;  %v1192_v18 = vld [vmem:[%s10480_s4 + $0x58] sm:$0xff] }
  0x17   : > { %5763 = vset.pattern.permute.xlu0 %v5885_v3  ;;  %5753 = vset.pattern.permute.xlu2 %v5885_v3  ;;  %s10700_s2 = sld [smem:[#allocation57_spill]]  ;;  %v1187_v19 = vld [vmem:[%s10480_s4 + $0x30] sm:$0xff]  ;;  %v1186_v21 = vld [vmem:[%s10480_s4 + $0x28] sm:$0xff]  ;;  %s5418_s21 = sshll.u32 %s5982_s12, 3  ;;  %v1181_v25 = vld [vmem:[%s10480_s4] sm:$0xff]  ;;  %vm1317_vm0 = vcmask 523264  }
  0x18   : > { %5752 = vset.pattern.permute.xlu1 %v5886_v4  ;;  %p438_p10 = scmp.lt.s32.totalorder %s5418_s21, 15  ;;  %v1195_v27 = vld [vmem:[%s10480_s4 + $0x70] sm:$0xff]  ;;  %v1196_v28 = vld [vmem:[%s10480_s4 + $0x78] sm:$0xff]  ;;  %v1194_v33 = vld [vmem:[%s10480_s4 + $0x68] sm:$0xff]  ;;  %vm5301_vm1 = vcmask 1040384   ;;  %vm5324_vm2 = vcmask 1041408  }
  0x19   : > { %v1973_v29 = vld [vmem:[%s10482_s6 + $0x78] sm:$0xff]  ;;  %v1191_v34 = vld [vmem:[%s10480_s4 + $0x50] sm:$0xff]  ;;  %v1970_v38 = vld [vmem:[%s10482_s6 + $0x60] sm:$0xff]  ;;  %vm5326_vm3 = vcmask 1045508   ;;  %vm5328_vm4 = vcmask 1043456   ;;  %s5841_s17 = scalar_lea.hbm %s10489_s13, 32 }
  0x1a   : > { %s11115_s21 = smov (!%p438_p10, %s5418_s21), 15  ;;  %v1189_v55 = vld [vmem:[%s10480_s4 + $0x40] sm:$0xff]  ;;  %v1190_v60 = vld [vmem:[%s10480_s4 + $0x48] sm:$0xff] }
  0x1b   : > { %s5419_s22 = sshll.u32 %s11115_s21, 2 }
  0x1c   : > { %v455_v1 = vld [vmem:[%s10699_s1 + $0x30] sm:$0xff]  ;;  %v452_v2 = vld [vmem:[%s10699_s1 + $0x18] sm:$0xff]  ;;  %v454_v6 = vld [vmem:[%s10699_s1 + $0x28] sm:$0xff] }
  0x1d   : > { %798 = vperm.xlu2 %5753, %v455_v1   ;;  %614 = vperm.xlu1 %5752, %v455_v1   ;;  %v456_v5 = vld [vmem:[%s10699_s1 + $0x38] sm:$0xff]  ;;  %v453_v7 = vld [vmem:[%s10699_s1 + $0x20] sm:$0xff]  ;;  %v963_v10 = vld [vmem:[%s10700_s2 + $0x30] sm:$0xff] }
  0x1e   : > { %786 = vperm.xlu0 %5763, %v452_v2   ;;  %v449_v8 = vld [vmem:[%s10699_s1] sm:$0xff]  ;;  %v964_v11 = vld [vmem:[%s10700_s2 + $0x38] sm:$0xff]  ;;  %v451_v12 = vld [vmem:[%s10699_s1 + $0x10] sm:$0xff] }
  0x1f   : > { %v960_v13 = vld [vmem:[%s10700_s2 + $0x18] sm:$0xff]  ;;  %v961_v14 = vld [vmem:[%s10700_s2 + $0x20] sm:$0xff]  ;;  %v962_v15 = vld [vmem:[%s10700_s2 + $0x28] sm:$0xff] }
  0x20   : > { %v450_v17 = vld [vmem:[%s10699_s1 + $0x8] sm:$0xff]  ;;  %v959_v20 = vld [vmem:[%s10700_s2 + $0x10] sm:$0xff]  ;;  %v957_v23 = vld [vmem:[%s10700_s2] sm:$0xff]  ;;  %s5709_s1 = sshll.u32 %s5982_s12, 4 }
  0x21   : > { %v958_v24 = vld [vmem:[%s10700_s2 + $0x8] sm:$0xff]  ;;  %s441_s2 = scalar_lea.vmem %s10476_s0, %s5419_s22  ;;  %s5349_s22 = scalar_lea.hbm %s10489_s13, %s5709_s1 }
  0x22   : > { %v445_v31 = vld [vmem:[%s441_s2] sm:$0x77]  ;;  %v446_v32 = vld [vmem:[%s441_s2 + $0x8] sm:$0x77]  ;;  %v6107_v44 = vld [vmem:[%s441_s2 + $0x10] sm:$0x77] }
  0x23   : > { %v805_v35 = vperm.slane %v445_v31, 2  ;;  %v806_v36 = vperm.slane %v445_v31, 6  ;;  %v807_v37 = vperm.slane %v446_v32, 2  ;;  %v621_v39 = vperm.slane %v445_v31, 1  ;;  %v6126_v54 = vld [vmem:[%s441_s2 + $0x18] sm:$0x77] }
  0x24   : > { %v808_v40 = vperm.slane %v446_v32, 6  ;;  %v622_v41 = vperm.slane %v445_v31, 5  ;;  %v623_v42 = vperm.slane %v446_v32, 1  ;;  %v624_v43 = vperm.slane %v446_v32, 5  ;;  %s434_s2 = sand.u32 1, %s5875_s28   ;;  %s5353_s24 = sshll.u32 %s5349_s22, 4  ;;  %s5354_s24 = int_to_ptr.hbm [resolvable:$true] %s5353_s24 }
  0x25   : > { %802 = vperm.xlu2 %5753, %v456_v5   ;;  %618 = vperm.xlu1 %5752, %v456_v5   ;;  %v6113_v47 = vperm.slane %v805_v35, 2  ;;  %v6115_v48 = vperm.slane %v806_v36, 2  ;;  %v6117_v49 = vperm.slane %v807_v37, 2  ;;  %v6121_v51 = vperm.slane %v621_v39, 1  ;;  %v1185_v37 = vld [vmem:[%s10480_s4 + $0x20] sm:$0xff]  ;;  %s5417_s21 = sshll.u32 %s434_s2, 4 }
  0x26   : > { %5764 = vset.pattern.permute.xlu0 %v5886_v4  ;;  %v6123_v52 = vperm.slane %v808_v40, 2  ;;  %v809_v53 = vperm.slane %v6107_v44, 2  ;;  %v6131_v56 = vperm.slane %v622_v41, 1  ;;  %v6133_v57 = vperm.slane %v623_v42, 1  ;;  %s10345_s16 = scalar_lea.vmem [#allocation3], %s5417_s21  ;;  %s5338_s25 = scalar_lea.sflag [#allocation4], %s434_s2 }
  0x27   : > { %610 = vperm.xlu0 %5764, %v454_v6   ;;  %v6135_v58 = vperm.slane %v624_v43, 1  ;;  %v625_v59 = vperm.slane %v6107_v44, 1  ;;  %v501_v61 = vperm.slane %v445_v31, 0  ;;  %v502_v63 = vperm.slane %v445_v31, 4  ;;  %v1188_v31 = vld [vmem:[%s10480_s4 + $0x38] sm:$0xff]  ;;  %s5351_s12 = sshll.u32 %s10345_s16, 4  ;;  %s5352_s12 = int_to_ptr.vmem [resolvable:$true] %s5351_s12 }
  0x28   : > { %v812_v41 = vperm.slane %v6126_v54, 6  ;;  %s5835_s26 = sshra.s32 %s5354_s24, 4  ;;  %s5836_s26 = int_to_ptr.hbm [resolvable:$true] %s5835_s26 }
  0x29   : > { %s5837_s14 = scalar_lea.hbm %s5836_s26, 16  ;;  %p5842_p0 = scmp.lt.s32.totalorder %s5836_s26, %s10489_s13 }
  0x2a   : > { %p5838_p11 = scmp.ne.s32.totalorder %s5836_s26, %s5837_s14  ;;  %p5843_p1 = scmp.lt.s32.totalorder %s5841_s17, %s5837_s14 }
  0x2c   : > { %p5839_p12 = pnand %p5838_p11, %p5999_p5  ;;  %p5844_p2 = por %p5843_p1, %p5842_p0 }
  0x2d   : > { %5755 = vset.pattern.permute.xlu2 %v5886_v4  ;;  %5754 = vset.pattern.permute.xlu1 %v5887_v9 }
  0x2e   : > { %606 = vperm.xlu2 %5755, %v453_v7   ;;  %484 = vperm.xlu1 %5754, %v454_v6   ;;  %p5840_p13 = pneg %p5839_p12 }
  0x2f   : > { %590 = vperm.xlu0 %5764, %v449_v8  }
  0x30   : > { %p5845_p3 = pnand %p5844_p2, %p5840_p13 }
  0x36   : > { %5757 = vset.pattern.permute.xlu2 %v5885_v3  ;;  %5756 = vset.pattern.permute.xlu1 %v5885_v3 }
  0x37   : > { %5767 = vset.pattern.permute.xlu0 %v5887_v9  ;;  %790 = vperm.xlu1 %5756, %v453_v7  }
  0x38   : > { %794 = vperm.xlu2 %5757, %v454_v6   ;;  %489 = vperm.xlu0 %5767, %v455_v1   ;;  %v503_v1 = vperm.slane %v446_v32, 0  ;;  %v504_v6 = vperm.slane %v446_v32, 4 }
  0x3f   : > { %5758 = vset.pattern.permute.xlu1 %v5887_v9 }
  0x40   : > { %5759 = vset.pattern.permute.xlu2 %v5887_v9  ;;  %494 = vperm.xlu0 %5767, %v456_v5   ;;  %v1987_v5 = vld [vmem:[%s10482_s6 + $0xe8] sm:$0xff] }
  0x41   : > { %997 = vperm.xlu1 %5758, %v963_v10   ;;  %1002 = vperm.xlu2 %5759, %v964_v11   ;;  %v6169_v11 = vperm.slane %v625_v59, 1  ;;  %v1984_v59 = vld [vmem:[%s10482_s6 + $0xd0] sm:$0xff] }
  0x43   : > { %10706 = vst [vmem:[#allocation11_spill] sm:$0xff] %v6169_v11 }
  0x48   : > { %479 = vperm.xlu0 %5767, %v453_v7  }
  0x49   : > { %474 = vperm.xlu1 %5758, %v452_v2   ;;  %5760 = vset.pattern.permute.xlu2 %v5886_v4 }
  0x4a   : > { %598 = vperm.xlu2 %5760, %v451_v12  }
  0x50   : > { %469 = vperm.xlu0 %5767, %v451_v12  }
  0x51   : > { %5761 = vset.pattern.permute.xlu1 %v5886_v4 }
  0x52   : > { %602 = vperm.xlu1 %5761, %v452_v2   ;;  %5762 = vset.pattern.permute.xlu2 %v5885_v3 }
  0x53   : > { %782 = vperm.xlu2 %5762, %v451_v12   ;;  %v626_v12 = vperm.slane %v6107_v44, 5 }
  0x58   : > { %982 = vperm.xlu0 %5767, %v960_v13   ;;  %v627_v13 = vperm.slane %v6126_v54, 1 }
  0x5a   : > { %5765 = vset.pattern.permute.xlu1 %v5887_v9  ;;  %v6221_v35 = vperm.slane %v627_v13, 1 }
  0x5b   : > { %987 = vperm.xlu1 %5765, %v961_v14   ;;  %5766 = vset.pattern.permute.xlu2 %v5887_v9 }
  0x5c   : > { %992 = vperm.xlu2 %5766, %v962_v15   ;;  %v6175_v15 = vperm.slane %v501_v61, 0  ;;  %10716 = vst [vmem:[#allocation21_spill] sm:$0xff] %v6221_v35 }
  0x60   : > { %1259 = vperm.xlu0 %5767, %v1193_v16   ;;  %v6177_v16 = vperm.slane %v502_v63, 0 }
  0x63   : > { %459 = vperm.xlu1 %5765, %v449_v8  }
  0x64   : > { %464 = vperm.xlu2 %5766, %v450_v17  }
  0x68   : > { %1254 = vperm.xlu0 %5767, %v1192_v18  }
  0x6b   : > { %5768 = vset.pattern.permute.xlu1 %v5886_v4  ;;  %v811_v4 = vperm.slane %v6126_v54, 2 }
  0x6c   : > { %594 = vperm.xlu1 %5768, %v450_v17   ;;  %5769 = vset.pattern.permute.xlu2 %v5885_v3 }
  0x6d   : > { %774 = vperm.xlu2 %5769, %v449_v8   ;;  %v505_v8 = vperm.slane %v6107_v44, 0 }
  0x70   : > { %1229 = vperm.xlu0 %5767, %v1187_v19  }
  0x74   : > { %5770 = vset.pattern.permute.xlu1 %v5885_v3  ;;  %v810_v3 = vperm.slane %v6107_v44, 6 }
  0x75   : > { %778 = vperm.xlu1 %5770, %v450_v17   ;;  %5771 = vset.pattern.permute.xlu2 %v5887_v9 }
  0x76   : > { %977 = vperm.xlu2 %5771, %v959_v20   ;;  %v6189_v20 = vperm.slane %v503_v1, 0 }
  0x77   : > { %v6070_v22 = vpop.permute.xlu2 %798 }
  0x78   : > { %1224 = vperm.xlu0 %5767, %v1186_v21   ;;  %v6143_v62 = vmul.f32 %v6113_v47, %v6070_v22  ;;  %v6147_v0 = vmul.f32 %v6115_v48, %v6070_v22  ;;  %v6151_v2 = vmul.f32 %v6117_v49, %v6070_v22  ;;  %v6160_v7 = vmul.f32 %v6123_v52, %v6070_v22 }
  0x79   : > { %v6191_v21 = vperm.slane %v810_v3, 2 }
  0x7b   : > { %10710 = vst [vmem:[#allocation15_spill] sm:$0xff] %v6191_v21  ;;  %v6243_v42 = vmul.f32 %v6191_v21, %v6070_v22 }
  0x7d   : > { %5772 = vset.pattern.permute.xlu1 %v5887_v9  ;;  %v6163_v9 = vperm.slane %v809_v53, 2 }
  0x7e   : > { %967 = vperm.xlu1 %5772, %v957_v23   ;;  %972 = vperm.xlu2 %5771, %v958_v24   ;;  %v6193_v23 = vperm.slane %v811_v4, 2  ;;  %v628_v24 = vperm.slane %v6126_v54, 5 }
  0x7f   : > { %v6082_v26 = vpop.permute.xlu2 %802  ;;  %10704 = vst [vmem:[#allocation9_spill] sm:$0xff] %v6163_v9 }
  0x80   : > { %1199 = vperm.xlu0 %5767, %v1181_v25   ;;  %v6167_v10 = vmul.f32 %v6113_v47, %v6082_v26  ;;  %v6181_v17 = vmul.f32 %v6115_v48, %v6082_v26  ;;  %v6185_v18 = vmul.f32 %v6117_v49, %v6082_v26  ;;  %10711 = vst [vmem:[#allocation16_spill] sm:$0xff] %v6193_v23  ;;  %v6196_v25 = vperm.slane %v504_v6, 0 }
  0x81   : > { %v6247_v43 = vmul.f32 %v6191_v21, %v6082_v26  ;;  %v6251_v53 = vmul.f32 %v6193_v23, %v6070_v22  ;;  %v6272_v1 = vmul.f32 %v6193_v23, %v6082_v26 }
  0x82   : > { %10705 = vst [vmem:[#allocation10_spill] sm:$0xff] %v6167_v10 }
  0x83   : > { %10707 = vst [vmem:[#allocation12_spill] sm:$0xff] %v6181_v17 }
  0x84   : > { %10708 = vst [vmem:[#allocation13_spill] sm:$0xff] %v6185_v18 }
  0x85   : > { %10721 = vst [vmem:[#allocation26_spill] sm:$0xff] %v6247_v43 }
  0x86   : > { %1269 = vperm.xlu1 %5772, %v1195_v27   ;;  %1274 = vperm.xlu2 %5771, %v1196_v28   ;;  %v6200_v27 = vmul.f32 %v6123_v52, %v6082_v26  ;;  %v6202_v28 = vperm.slane %v505_v8, 0  ;;  %10723 = vst [vmem:[#allocation28_spill] sm:$0xff] %v6272_v1 }
  0x88   : > { %v6096_v30 = vpop.permute.xlu2 %606  ;;  %2067 = vperm.xlu0 %5767, %v1973_v29   ;;  %10712 = vst [vmem:[#allocation17_spill] sm:$0xff] %v6200_v27  ;;  %v6206_v29 = vmul.f32 %v6163_v9, %v6070_v22 }
  0x89   : > { %10701 = vst [vmem:[#allocation6_spill] sm:$0xff] %v6096_v30  ;;  %v6213_v32 = vmul.f32 %v6121_v51, %v6096_v30  ;;  %v6234_v39 = vmul.f32 %v6133_v57, %v6096_v30  ;;  %v6238_v40 = vmul.f32 %v6135_v58, %v6096_v30 }
  0x8b   : > { %10713 = vst [vmem:[#allocation18_spill] sm:$0xff] %v6213_v32  ;;  %v507_v32 = vperm.slane %v6126_v54, 0 }
  0x8c   : > { %10719 = vst [vmem:[#allocation24_spill] sm:$0xff] %v6234_v39  ;;  %v1184_v39 = vld [vmem:[%s10480_s4 + $0x18] sm:$0xff] }
  0x8d   : > { %10720 = vst [vmem:[#allocation25_spill] sm:$0xff] %v6238_v40 }
  0x8e   : > { %1264 = vperm.xlu1 %5772, %v1194_v33   ;;  %1249 = vperm.xlu2 %5771, %v1191_v34   ;;  %v6217_v33 = vmul.f32 %v6163_v9, %v6082_v26  ;;  %v6219_v34 = vperm.slane %v626_v12, 1 }
  0x8f   : > { %v6109_v45 = vpop.permute.xlu1 %614 }
  0x90   : > { %v6111_v46 = vpop.permute.xlu0 %786  ;;  %2052 = vperm.xlu0 %5767, %v1970_v38   ;;  %10714 = vst [vmem:[#allocation19_spill] sm:$0xff] %v6217_v33  ;;  %v6230_v38 = vmul.f32 %v6131_v56, %v6096_v30  ;;  %v6264_v61 = vmul.f32 %v6131_v56, %v6109_v45  ;;  %v6268_v63 = vmul.f32 %v6133_v57, %v6109_v45  ;;  %v1183_v33 = vld [vmem:[%s10480_s4 + $0x10] sm:$0xff] }
  0x91   : > { %10702 = vst [vmem:[#allocation7_spill] sm:$0xff] %v6111_v46  ;;  %v6276_v3 = vmul.f32 %v6135_v58, %v6109_v45  ;;  %v6280_v4 = vmul.f32 %v6169_v11, %v6109_v45  ;;  %v6288_v6 = vmul.f32 %v6221_v35, %v6109_v45  ;;  %v6306_v21 = vmul.f32 %v6113_v47, %v6111_v46 }
  0x92   : > { %v6119_v50 = vpop.permute.xlu2 %794  ;;  %10715 = vst [vmem:[#allocation20_spill] sm:$0xff] %v6219_v34  ;;  %v6310_v9 = vmul.f32 %v6115_v48, %v6111_v46 }
  0x93   : > { %10703 = vst [vmem:[#allocation8_spill] sm:$0xff] %v6119_v50  ;;  %v869_v8 = vmul.f32 %v6113_v47, %v6119_v50  ;;  %v870_v12 = vmul.f32 %v6115_v48, %v6119_v50  ;;  %v871_v13 = vmul.f32 %v6117_v49, %v6119_v50  ;;  %v872_v23 = vmul.f32 %v6123_v52, %v6119_v50 }
  0x94   : > { %10718 = vst [vmem:[#allocation23_spill] sm:$0xff] %v6230_v38  ;;  %v506_v38 = vperm.slane %v6107_v44, 4 }
  0x95   : > { %10727 = vst [vmem:[#allocation32_spill] sm:$0xff] %v6306_v21 }
  0x96   : > { %1239 = vperm.xlu1 %5772, %v1189_v55   ;;  %1244 = vperm.xlu2 %5771, %v1190_v60   ;;  %v6253_v55 = vperm.slane %v628_v24, 1  ;;  %v6260_v60 = vmul.f32 %v6121_v51, %v6109_v45  ;;  %v6296_v24 = vperm.slane %v812_v41, 2  ;;  %10728 = vst [vmem:[#allocation33_spill] sm:$0xff] %v6310_v9 }
  0x97   : > { %v6173_v14 = vpop.permute.xlu1 %618 }
  0x98   : > { %2137 = vperm.xlu0 %5767, %v1987_v5   ;;  %10722 = vst [vmem:[#allocation27_spill] sm:$0xff] %v6253_v55  ;;  %v6284_v5 = vmul.f32 %v6219_v34, %v6109_v45  ;;  %v6314_v41 = vmul.f32 %v6253_v55, %v6109_v45  ;;  %v6346_v27 = vmul.f32 %v6296_v24, %v6082_v26  ;;  %v1967_v26 = vld [vmem:[%s10482_s6 + $0x48] sm:$0xff] }
  0x99   : > { %v6187_v19 = vpop.permute.xlu0 %610  ;;  %10724 = vst [vmem:[#allocation29_spill] sm:$0xff] %v6296_v24  ;;  %v6352_v17 = vmul.f32 %v6121_v51, %v6173_v14  ;;  %v6356_v10 = vmul.f32 %v6131_v56, %v6173_v14  ;;  %v6360_v44 = vmul.f32 %v6133_v57, %v6173_v14 }
  0x9a   : > { %10709 = vst [vmem:[#allocation14_spill] sm:$0xff] %v6187_v19  ;;  %v685_v1 = vmul.f32 %v6121_v51, %v6187_v19  ;;  %v686_v43 = vmul.f32 %v6131_v56, %v6187_v19  ;;  %v687_v9 = vmul.f32 %v6133_v57, %v6187_v19  ;;  %v688_v40 = vmul.f32 %v6135_v58, %v6187_v19 }
  0x9b   : > { %v6223_v36 = vpop.permute.xlu2 %1002  ;;  %10730 = vst [vmem:[#allocation35_spill] sm:$0xff] %v6346_v27  ;;  %v6372_v19 = vmul.f32 %v6117_v49, %v6111_v46 }
  0x9c   : > { %10717 = vst [vmem:[#allocation22_spill] sm:$0xff] %v6223_v36  ;;  %v6342_v36 = vmul.f32 %v6296_v24, %v6070_v22  ;;  %v508_v22 = vperm.slane %v6126_v54, 4  ;;  %v6368_v24 = vmul.f32 %v6135_v58, %v6173_v14  ;;  %v6376_v54 = vmul.f32 %v6123_v52, %v6111_v46 }
  0x9d   : > { %10732 = vst [vmem:[#allocation37_spill] sm:$0xff] %v6360_v44 }
  0x9e   : > { %1234 = vperm.xlu1 %5772, %v1188_v31   ;;  %1219 = vperm.xlu2 %5771, %v1185_v37   ;;  %10729 = vst [vmem:[#allocation34_spill] sm:$0xff] %v6342_v36 }
  0xa0   : > { %2122 = vperm.xlu0 %5767, %v1984_v59   ;;  %v6298_v31 = vpop.permute.xlu1 %484 }
  0xa1   : > { %10725 = vst [vmem:[#allocation30_spill] sm:$0xff] %v6298_v31  ;;  %v6300_v37 = vpop.permute.xlu0 %590  ;;  %v565_v59 = vmul.f32 %v6175_v15, %v6298_v31  ;;  %v566_v50 = vmul.f32 %v6177_v16, %v6298_v31  ;;  %v567_v45 = vmul.f32 %v6189_v20, %v6298_v31  ;;  %v568_v21 = vmul.f32 %v6196_v25, %v6298_v31 }
  0xa2   : > { %10726 = vst [vmem:[#allocation31_spill] sm:$0xff] %v6300_v37  ;;  %v6382_v31 = vperm.slane %v506_v38, 0  ;;  %v6402_v38 = vperm.slane %v508_v22, 0 }
  0xa3   : > { %v749_v27 = vadd.f32 %v685_v1, %v565_v59  ;;  %v750_v36 = vadd.f32 %v686_v43, %v566_v50  ;;  %v751_v30 = vadd.f32 %v687_v9, %v567_v45  ;;  %v752_v44 = vadd.f32 %v688_v40, %v568_v21 }
  0xa4   : > { %v6348_v18 = vpop.permute.xlu2 %598  ;;  %10733 = vst [vmem:[#allocation38_spill] sm:$0xff] %v6382_v31  ;;  %v6386_v50 = vmul.f32 %v6219_v34, %v6173_v14  ;;  %v6388_v43 = vperm.slane %v507_v32, 0  ;;  %v6392_v9 = vmul.f32 %v6221_v35, %v6173_v14  ;;  %v6396_v21 = vmul.f32 %v6121_v51, %v6300_v37 }
  0xa5   : > { %10731 = vst [vmem:[#allocation36_spill] sm:$0xff] %v6348_v18  ;;  %v6406_v40 = vmul.f32 %v6253_v55, %v6173_v14  ;;  %v6410_v1 = vadd.f32 %v869_v8, %v749_v27  ;;  %v6412_v59 = vadd.f32 %v870_v12, %v750_v36  ;;  %v6416_v45 = vmul.f32 %v6133_v57, %v6300_v37  ;;  %v1972_v8 = vld [vmem:[%s10482_s6 + $0x70] sm:$0xff] }
  0xa6   : > { %1209 = vperm.xlu1 %5772, %v1183_v33   ;;  %1214 = vperm.xlu2 %5771, %v1184_v39   ;;  %v6380_v33 = vmul.f32 %v6169_v11, %v6173_v14  ;;  %10734 = vst [vmem:[#allocation39_spill] sm:$0xff] %v6386_v50  ;;  %v6400_v39 = vmul.f32 %v6131_v56, %v6300_v37  ;;  %v1182_v14 = vld [vmem:[%s10480_s4 + $0x8] sm:$0xff] }
  0xa7   : > { %10735 = vst [vmem:[#allocation40_spill] sm:$0xff] %v6388_v43  ;;  %v6425_v46 = vadd.f32 %v871_v13, %v751_v30  ;;  %v6427_v55 = vadd.f32 %v872_v23, %v752_v44  ;;  %v6431_v27 = vmul.f32 %v6121_v51, %v6348_v18  ;;  %v6435_v36 = vmul.f32 %v6131_v56, %v6348_v18 }
  0xa8   : > { %10736 = vst [vmem:[#allocation41_spill] sm:$0xff] %v6392_v9  ;;  %2037 = vperm.xlu0 %5767, %v1967_v26   ;;  %v6420_v26 = vmul.f32 %v6135_v58, %v6300_v37  ;;  %v6446_v13 = vmul.f32 %v6133_v57, %v6348_v18 }
  0xa9   : > { %10737 = vst [vmem:[#allocation42_spill] sm:$0xff] %v6396_v21  ;;  %v6408_v32 = vpop.permute.xlu1 %790 }
  0xaa   : > { %10738 = vst [vmem:[#allocation43_spill] sm:$0xff] %v6400_v39  ;;  %v490_v22 = vpop.permute.xlu0 %489  ;;  %v6462_v50 = vmul.f32 %v6113_v47, %v6408_v32 }
  0xab   : > { %10739 = vst [vmem:[#allocation44_spill] sm:$0xff] %v6402_v38  ;;  %v573_v12 = vmul.f32 %v6175_v15, %v490_v22  ;;  %v574_v37 = vmul.f32 %v6177_v16, %v490_v22  ;;  %v575_v30 = vmul.f32 %v6189_v20, %v490_v22  ;;  %v576_v23 = vmul.f32 %v6196_v25, %v490_v22 }
  0xac   : > { %10740 = vst [vmem:[#allocation45_spill] sm:$0xff] %v6406_v40  ;;  %v577_v44 = vmul.f32 %v6202_v28, %v490_v22  ;;  %v578_v35 = vmul.f32 %v6382_v31, %v490_v22  ;;  %v579_v34 = vmul.f32 %v6388_v43, %v490_v22  ;;  %v6470_v43 = vmul.f32 %v6135_v58, %v6348_v18 }
  0xad   : > { %10741 = vst [vmem:[#allocation46_spill] sm:$0xff] %v6408_v32  ;;  %v6451_v40 = vpop.permute.xlu2 %782  ;;  %v758_v39 = vadd.f32 %v6264_v61, %v574_v37  ;;  %v759_v21 = vadd.f32 %v6268_v63, %v575_v30  ;;  %v760_v9 = vadd.f32 %v6276_v3, %v576_v23  ;;  %v6475_v61 = vmul.f32 %v6117_v49, %v6408_v32 }
  0xae   : > { %10742 = vst [vmem:[#allocation47_spill] sm:$0xff] %v6416_v45  ;;  %1204 = vperm.xlu1 %5772, %v1182_v14   ;;  %v757_v45 = vadd.f32 %v6260_v60, %v573_v12  ;;  %2062 = vperm.xlu2 %5771, %v1972_v8   ;;  %v6466_v14 = vmul.f32 %v6115_v48, %v6408_v32 }
  0xaf   : > { %10743 = vst [vmem:[#allocation48_spill] sm:$0xff] %v6420_v26  ;;  %v1964_v26 = vld [vmem:[%s10482_s6 + $0x30] sm:$0xff]  ;;  %v580_v60 = vmul.f32 %v6402_v38, %v490_v22  ;;  %v6479_v63 = vmul.f32 %v6123_v52, %v6408_v32  ;;  %v6483_v3 = vmul.f32 %v6113_v47, %v6451_v40  ;;  %v6487_v37 = vmul.f32 %v6115_v48, %v6451_v40 }
  0xb0   : > { %10744 = vst [vmem:[#allocation49_spill] sm:$0xff] %v6451_v40  ;;  %2022 = vperm.xlu0 %5767, %v1964_v26   ;;  %v6491_v22 = vmul.f32 %v6117_v49, %v6451_v40  ;;  %v761_v8 = vadd.f32 %v6280_v4, %v577_v44  ;;  %v762_v12 = vadd.f32 %v6284_v5, %v578_v35  ;;  %v1988_v4 = vld [vmem:[%s10482_s6 + $0xf0] sm:$0xff]  ;;  %v10748_v44 = vld [vmem:[#allocation30_spill] sm:$0xff] }
  0xb1   : > { %v763_v30 = vadd.f32 %v6288_v6, %v579_v34  ;;  %v941_v23 = vadd.f32 %v6143_v62, %v757_v45  ;;  %v942_v18 = vadd.f32 %v6147_v0, %v758_v39  ;;  %v943_v32 = vadd.f32 %v6151_v2, %v759_v21  ;;  %v1989_v2 = vld [vmem:[%s10482_s6 + $0xf8] sm:$0xff] }
  0xb2   : > { %v944_v38 = vadd.f32 %v6160_v7, %v760_v9  ;;  %v6500_v31 = vpop.permute.xlu0 %494  ;;  %v6508_v35 = vadd.f32 %v6206_v29, %v761_v8  ;;  %v6511_v34 = vadd.f32 %v6243_v42, %v762_v12  ;;  %v6517_v0 = vadd.f32 %v6314_v41, %v580_v60  ;;  %v1981_v21 = vld [vmem:[%s10482_s6 + $0xb8] sm:$0xff] }
  0xb3   : > { %v6502_v26 = vpop.permute.xlu1 %997  ;;  %v6514_v62 = vadd.f32 %v6251_v53, %v763_v30  ;;  %v581_v7 = vmul.f32 %v6175_v15, %v6500_v31  ;;  %v582_v29 = vmul.f32 %v6177_v16, %v6500_v31  ;;  %v583_v53 = vmul.f32 %v6189_v20, %v6500_v31  ;;  %v10752_v30 = vld [vmem:[#allocation6_spill] sm:$0xff] }
  0xb4   : > { %10745 = vst [vmem:[#allocation50_spill] sm:$0xff] %v6511_v34  ;;  %v1053_v5 = vadd.f32 %v6502_v26, %v941_v23  ;;  %v1054_v42 = vadd.f32 %v6502_v26, %v942_v18  ;;  %v1055_v6 = vadd.f32 %v6502_v26, %v943_v32  ;;  %v584_v41 = vmul.f32 %v6196_v25, %v6500_v31  ;;  %v10766_v34 = vld [vmem:[#allocation25_spill] sm:$0xff] }
  0xb5   : > { %10746 = vst [vmem:[#allocation51_spill] sm:$0xff] %v6514_v62  ;;  %v1056_v9 = vadd.f32 %v6502_v26, %v944_v38  ;;  %v765_v39 = vadd.f32 %v6352_v17, %v581_v7  ;;  %v766_v45 = vadd.f32 %v6356_v10, %v582_v29  ;;  %v6541_v18 = vmul.f32 %v6123_v52, %v6451_v40  ;;  %v10751_v38 = vld [vmem:[#allocation37_spill] sm:$0xff]  ;;  %v10754_v10 = vld [vmem:[#allocation14_spill] sm:$0xff]  ;;  %v10757_v40 = vld [vmem:[#allocation12_spill] sm:$0xff] }
  0xb6   : > { %10747 = vst [vmem:[#allocation52_spill] sm:$0xff] %v6517_v0  ;;  %2142 = vperm.xlu1 %5772, %v1988_v4   ;;  %v6545_v32 = vmul.f32 %v6202_v28, %v10748_v44  ;;  %v6547_v60 = vpop.permute.xlu2 %992  ;;  %2147 = vperm.xlu2 %5771, %v1989_v2   ;;  %v767_v8 = vadd.f32 %v10751_v38, %v583_v53  ;;  %v10756_v4 = vld [vmem:[#allocation10_spill] sm:$0xff]  ;;  %v1117_v29 = vmax.f32 %v1053_v5, 0.0  ;;  %v10758_v2 = vld [vmem:[#allocation13_spill] sm:$0xff]  ;;  %v1119_v53 = vmax.f32 %v1055_v6, 0.0 }
  0xb7   : > { %10750 = vst [vmem:[#allocation54_spill] sm:$0xff] %v6547_v60  ;;  %v768_v12 = vadd.f32 %v6368_v24, %v584_v41  ;;  %v6553_v17 = vmul.f32 %v6169_v11, %v10752_v30  ;;  %v6557_v23 = vmul.f32 %v6169_v11, %v10754_v10  ;;  %v949_v7 = vadd.f32 %v10756_v4, %v765_v39  ;;  %v10759_v38 = vld [vmem:[#allocation17_spill] sm:$0xff]  ;;  %v10760_v62 = vld [vmem:[#allocation22_spill] sm:$0xff] }
  0xb8   : > { %10749 = vst [vmem:[#allocation53_spill] sm:$0xff] %v6545_v32  ;;  %v950_v44 = vadd.f32 %v10757_v40, %v766_v45  ;;  %v1118_v32 = vmax.f32 %v1054_v42, 0.0  ;;  %2107 = vperm.xlu0 %5767, %v1981_v21   ;;  %v951_v0 = vadd.f32 %v10758_v2, %v767_v8  ;;  %v1120_v41 = vmax.f32 %v1056_v9, 0.0  ;;  %v1971_v6 = vld [vmem:[%s10482_s6 + $0x68] sm:$0xff]  ;;  %v1986_v39 = vld [vmem:[%s10482_s6 + $0xe0] sm:$0xff] }
  0xb9   : > { %10753 = vst [vmem:[#allocation37_spill] sm:$0xff] %v6553_v17  ;;  %v952_v24 = vadd.f32 %v10759_v38, %v768_v12  ;;  %v1061_v30 = vadd.f32 %v10760_v62, %v949_v7  ;;  %v6567_v11 = vadd.f32 %v6547_v60, %v6410_v1  ;;  %v6571_v5 = vadd.f32 %v6547_v60, %v6412_v59  ;;  %v10763_v38 = vld [vmem:[#allocation18_spill] sm:$0xff] }
  0xba   : > { %10755 = vst [vmem:[#allocation55_spill] sm:$0xff] %v6557_v23  ;;  %v1062_v17 = vadd.f32 %v10760_v62, %v950_v44  ;;  %v6573_v40 = vpop.permute.xlu0 %479  ;;  %v1063_v9 = vadd.f32 %v10760_v62, %v951_v0  ;;  %v6584_v1 = vadd.f32 %v6547_v60, %v6425_v46  ;;  %v6588_v59 = vadd.f32 %v6547_v60, %v6427_v55 }
  0xbb   : > { %10761 = vst [vmem:[#allocation10_spill] sm:$0xff] %v6573_v40  ;;  %v6575_v42 = vpop.permute.xlu1 %474  ;;  %v1064_v21 = vadd.f32 %v10760_v62, %v952_v24  ;;  %v1125_v45 = vmax.f32 %v1061_v30, 0.0  ;;  %v557_v8 = vmul.f32 %v6175_v15, %v6573_v40  ;;  %v558_v0 = vmul.f32 %v6177_v16, %v6573_v40 }
  0xbc   : > { %10762 = vst [vmem:[#allocation12_spill] sm:$0xff] %v6575_v42  ;;  %v1126_v44 = vmax.f32 %v1062_v17, 0.0  ;;  %v1127_v12 = vmax.f32 %v1063_v9, 0.0  ;;  %v559_v46 = vmul.f32 %v6189_v20, %v6573_v40  ;;  %v560_v55 = vmul.f32 %v6196_v25, %v6573_v40  ;;  %v10764_v17 = vld [vmem:[#allocation23_spill] sm:$0xff]  ;;  %v1978_v9 = vld [vmem:[%s10482_s6 + $0xa0] sm:$0xff] }
  0xbd   : > { %v1128_v4 = vmax.f32 %v1064_v21, 0.0  ;;  %v1157_v7 = vpack.c.bf16 %v1125_v45, %v1117_v29  ;;  %v741_v30 = vadd.f32 %v10763_v38, %v557_v8  ;;  %v742_v24 = vadd.f32 %v10764_v17, %v558_v0  ;;  %v10765_v21 = vld [vmem:[#allocation24_spill] sm:$0xff] }
  0xbe   : > { %2057 = vperm.xlu1 %5772, %v1971_v6   ;;  %v1158_v2 = vpack.c.bf16 %v1126_v44, %v1118_v32  ;;  %2132 = vperm.xlu2 %5771, %v1986_v39   ;;  %v1159_v10 = vpack.c.bf16 %v1127_v12, %v1119_v53  ;;  %v6603_v23 = vpop.permute.xlu2 %464  ;;  %v743_v62 = vadd.f32 %v10765_v21, %v559_v46  ;;  %v1969_v12 = vld [vmem:[%s10482_s6 + $0x58] sm:$0xff] }
  0xbf   : > { %v1160_v60 = vpack.c.bf16 %v1128_v4, %v1120_v41  ;;  %v744_v40 = vadd.f32 %v10766_v34, %v560_v55  ;;  %1346 = vmatpush.bf16.msra.mxu0 %v1157_v7  ;;  %v6611_v32 = vadd.f32 %v6462_v50, %v741_v30  ;;  %v6617_v6 = vadd.f32 %v6466_v14, %v742_v24  ;;  %v1961_v41 = vld [vmem:[%s10482_s6 + $0x18] sm:$0xff] }
  0xc0   : > { %1395 = vmatpush.bf16.msra.mxu1 %v1158_v2  ;;  %1444 = vmatpush.bf16.msra.mxu2 %v1159_v10  ;;  %v6620_v39 = vadd.f32 %v6475_v61, %v743_v62  ;;  %v549_v50 = vmul.f32 %v6175_v15, %v6575_v42  ;;  %v550_v44 = vmul.f32 %v6177_v16, %v6575_v42  ;;  %v1968_v62 = vld [vmem:[%s10482_s6 + $0x50] sm:$0xff] }
  0xc1   : > { %1493 = vmatpush.bf16.msra.mxu3 %v1160_v60  ;;  %2092 = vperm.xlu0 %5767, %v1978_v9   ;;  %v6626_v45 = vadd.f32 %v6479_v63, %v744_v40  ;;  %v551_v60 = vmul.f32 %v6189_v20, %v6575_v42  ;;  %v552_v14 = vmul.f32 %v6196_v25, %v6575_v42 }
  0xc2   : > { %v6634_v61 = vpop.permute.xlu0 %469  ;;  %v6641_v10 = vmul.f32 %v6175_v15, %v6603_v23  ;;  %v6645_v63 = vmul.f32 %v6177_v16, %v6603_v23  ;;  %v6649_v40 = vmul.f32 %v6189_v20, %v6603_v23  ;;  %v585_v8 = vmul.f32 %v6202_v28, %v6500_v31 }
  0xc3   : > { %10767 = vst [vmem:[#allocation13_spill] sm:$0xff] %v6634_v61  ;;  %v541_v4 = vmul.f32 %v6175_v15, %v6634_v61  ;;  %v542_v46 = vmul.f32 %v6177_v16, %v6634_v61  ;;  %v543_v55 = vmul.f32 %v6189_v20, %v6634_v61  ;;  %v544_v7 = vmul.f32 %v6196_v25, %v6634_v61 }
  0xc4   : > { %10768 = vst [vmem:[#allocation17_spill] sm:$0xff] %v6649_v40  ;;  %v6653_v0 = vpop.permute.xlu1 %602 }
  0xc5   : > { %v669_v2 = vmul.f32 %v6121_v51, %v6653_v0  ;;  %v670_v38 = vmul.f32 %v6131_v56, %v6653_v0  ;;  %v671_v30 = vmul.f32 %v6133_v57, %v6653_v0  ;;  %v672_v17 = vmul.f32 %v6135_v58, %v6653_v0 }
  0xc6   : > { %2042 = vperm.xlu1 %5772, %v1968_v62   ;;  %v725_v24 = vadd.f32 %v6431_v27, %v541_v4  ;;  %v726_v9 = vadd.f32 %v6435_v36, %v542_v46  ;;  %v727_v21 = vadd.f32 %v6446_v13, %v543_v55  ;;  %v728_v34 = vadd.f32 %v6470_v43, %v544_v7  ;;  %v10770_v13 = vld [vmem:[#allocation32_spill] sm:$0xff]  ;;  %v10771_v4 = vld [vmem:[#allocation33_spill] sm:$0xff] }
  0xc7   : > { %2047 = vperm.xlu2 %5771, %v1969_v12   ;;  %v733_v53 = vadd.f32 %v669_v2, %v549_v50  ;;  %v734_v29 = vadd.f32 %v670_v38, %v550_v44  ;;  %v735_v42 = vadd.f32 %v671_v30, %v551_v60  ;;  %v736_v61 = vadd.f32 %v672_v17, %v552_v14  ;;  %v6681_v40 = vpop.permute.xlu2 %774  ;;  %v10775_v2 = vld [vmem:[#allocation19_spill] sm:$0xff] }
  0xc8   : > { %10769 = vst [vmem:[#allocation18_spill] sm:$0xff] %v6681_v40  ;;  %v909_v62 = vadd.f32 %v6483_v3, %v725_v24  ;;  %v910_v27 = vadd.f32 %v6487_v37, %v726_v9  ;;  %v911_v36 = vadd.f32 %v6491_v22, %v727_v21  ;;  %v6688_v43 = vadd.f32 %v6502_v26, %v6508_v35  ;;  %v10776_v30 = vld [vmem:[#allocation39_spill] sm:$0xff]  ;;  %v10777_v24 = vld [vmem:[#allocation40_spill] sm:$0xff] }
  0xc9   : > { %v917_v12 = vadd.f32 %v10770_v13, %v733_v53  ;;  %v918_v46 = vadd.f32 %v10771_v4, %v734_v29  ;;  %v919_v50 = vadd.f32 %v6372_v19, %v735_v42  ;;  %v920_v44 = vadd.f32 %v6376_v54, %v736_v61  ;;  %2007 = vperm.xlu0 %5767, %v1961_v41   ;;  %v1985_v19 = vld [vmem:[%s10482_s6 + $0xd8] sm:$0xff]  ;;  %v10773_v42 = vld [vmem:[#allocation38_spill] sm:$0xff] }
  0xca   : > { %v912_v60 = vadd.f32 %v6541_v18, %v728_v34  ;;  %v6697_v3 = vmul.f32 %v6113_v47, %v6681_v40  ;;  %v6701_v37 = vmul.f32 %v6115_v48, %v6681_v40  ;;  %v6705_v22 = vmul.f32 %v6117_v49, %v6681_v40  ;;  %v6707_v35 = vpop.permute.xlu0 %982  ;;  %v10774_v53 = vld [vmem:[#allocation50_spill] sm:$0xff] }
  0xcb   : > { %10772 = vst [vmem:[#allocation23_spill] sm:$0xff] %v6707_v35  ;;  %v6714_v54 = vmul.f32 %v6123_v52, %v6681_v40  ;;  %v769_v18 = vadd.f32 %v6380_v33, %v585_v8  ;;  %v586_v29 = vmul.f32 %v10773_v42, %v6500_v31  ;;  %v6721_v41 = vadd.f32 %v6502_v26, %v10774_v53  ;;  %v1966_v34 = vld [vmem:[%s10482_s6 + $0x40] sm:$0xff] }
  0xcc   : > { %v1029_v14 = vadd.f32 %v6707_v35, %v917_v12  ;;  %v1030_v61 = vadd.f32 %v6707_v35, %v918_v46  ;;  %v1031_v55 = vadd.f32 %v6707_v35, %v919_v50  ;;  %v1032_v8 = vadd.f32 %v6707_v35, %v920_v44  ;;  %v1958_v46 = vld [vmem:[%s10482_s6] sm:$0xff] }
  0xcd   : > { %v6730_v33 = vpop.permute.xlu1 %987  ;;  %v953_v38 = vadd.f32 %v10775_v2, %v769_v18  ;;  %v770_v17 = vadd.f32 %v10776_v30, %v586_v29  ;;  %v587_v9 = vmul.f32 %v10777_v24, %v6500_v31  ;;  %v10778_v30 = vld [vmem:[#allocation22_spill] sm:$0xff]  ;;  %v10780_v40 = vld [vmem:[#allocation41_spill] sm:$0xff] }
  0xce   : > { %2127 = vperm.xlu1 %5772, %v1985_v19   ;;  %v1037_v21 = vadd.f32 %v6730_v33, %v6611_v32  ;;  %v1038_v13 = vadd.f32 %v6730_v33, %v6617_v6  ;;  %v1039_v12 = vadd.f32 %v6730_v33, %v6620_v39  ;;  %v1040_v4 = vadd.f32 %v6730_v33, %v6626_v45  ;;  %v10779_v45 = vld [vmem:[#allocation26_spill] sm:$0xff] }
  0xcf   : > { %2032 = vperm.xlu2 %5771, %v1966_v34   ;;  %v1093_v50 = vmax.f32 %v1029_v14, 0.0  ;;  %v1094_v44 = vmax.f32 %v1030_v61, 0.0  ;;  %v1095_v19 = vmax.f32 %v1031_v55, 0.0  ;;  %v1096_v39 = vmax.f32 %v1032_v8, 0.0  ;;  %v1982_v8 = vld [vmem:[%s10482_s6 + $0xc0] sm:$0xff] }
  0xd0   : > { %v1101_v32 = vmax.f32 %v1037_v21, 0.0  ;;  %v1102_v29 = vmax.f32 %v1038_v13, 0.0  ;;  %v1103_v53 = vmax.f32 %v1039_v12, 0.0  ;;  %v1104_v6 = vmax.f32 %v1040_v4, 0.0  ;;  %v6749_v2 = vpop.permute.xlu2 %977 }
  0xd1   : > { %v1065_v7 = vadd.f32 %v10778_v30, %v953_v38  ;;  %v954_v34 = vadd.f32 %v10779_v45, %v770_v17  ;;  %v771_v35 = vadd.f32 %v10780_v40, %v587_v9  ;;  %1992 = vperm.xlu0 %5767, %v1958_v46   ;;  %v10781_v14 = vmax.f32 %v6567_v11, 0.0  ;;  %v10785_v9 = vld [vmem:[#allocation28_spill] sm:$0xff]  ;;  %v1975_v45 = vld [vmem:[%s10482_s6 + $0x88] sm:$0xff] }
  0xd2   : > { %v10782_v55 = vmax.f32 %v6571_v5, 0.0  ;;  %v10783_v21 = vmax.f32 %v6584_v1, 0.0  ;;  %v10784_v12 = vmax.f32 %v6588_v59, 0.0  ;;  %v1021_v38 = vadd.f32 %v6749_v2, %v909_v62  ;;  %v1983_v5 = vld [vmem:[%s10482_s6 + $0xc8] sm:$0xff] }
  0xd3   : > { %v1149_v61 = vpack.c.bf16 %v10781_v14, %v1101_v32  ;;  %v1022_v40 = vadd.f32 %v6749_v2, %v910_v27  ;;  %v1023_v11 = vadd.f32 %v6749_v2, %v911_v36  ;;  %v1024_v17 = vadd.f32 %v6749_v2, %v912_v60  ;;  %v10786_v32 = vld [vmem:[#allocation51_spill] sm:$0xff] }
  0xd4   : > { %v1150_v18 = vpack.c.bf16 %v10782_v55, %v1102_v29  ;;  %v1151_v13 = vpack.c.bf16 %v10783_v21, %v1103_v53  ;;  %v1152_v4 = vpack.c.bf16 %v10784_v12, %v1104_v6  ;;  %v1129_v1 = vmax.f32 %v1065_v7, 0.0  ;;  %v10787_v21 = vld [vmem:[#allocation42_spill] sm:$0xff] }
  0xd5   : > { %1347 = vmatpush.bf16.msra.mxu0 %v1149_v61  ;;  %v1066_v59 = vadd.f32 %v10778_v30, %v954_v34  ;;  %v955_v46 = vadd.f32 %v10785_v9, %v771_v35  ;;  %v1059_v62 = vadd.f32 %v6502_v26, %v10786_v32  ;;  %v6776_v27 = vpop.permute.xlu1 %459  ;;  %v1085_v36 = vmax.f32 %v1021_v38, 0.0 }
  0xd6   : > { %1396 = vmatpush.bf16.msra.mxu1 %v1150_v18  ;;  %1445 = vmatpush.bf16.msra.mxu2 %v1151_v13  ;;  %v1086_v60 = vmax.f32 %v1022_v40, 0.0  ;;  %v1087_v29 = vmax.f32 %v1023_v11, 0.0  ;;  %v1088_v18 = vmax.f32 %v1024_v17, 0.0  ;;  %v525_v53 = vmul.f32 %v6175_v15, %v6776_v27  ;;  %v10788_v13 = vld [vmem:[#allocation43_spill] sm:$0xff] }
  0xd7   : > { %1494 = vmatpush.bf16.msra.mxu3 %v1152_v4  ;;  %2112 = vperm.xlu1 %5772, %v1982_v8   ;;  %v526_v7 = vmul.f32 %v6177_v16, %v6776_v27  ;;  %v527_v35 = vmul.f32 %v6189_v20, %v6776_v27  ;;  %v528_v6 = vmul.f32 %v6196_v25, %v6776_v27  ;;  %v10789_v16 = vld [vmem:[#allocation47_spill] sm:$0xff]  ;;  %v10790_v8 = vld [vmem:[#allocation48_spill] sm:$0xff]  ;;  %v10791_v38 = vmax.f32 %v6688_v43, 0.0 }
  0xd8   : > { %2117 = vperm.xlu2 %5771, %v1983_v5   ;;  %v1141_v34 = vpack.c.bf16 %v1093_v50, %v1085_v36  ;;  %v1142_v14 = vpack.c.bf16 %v1094_v44, %v1086_v60  ;;  %v1143_v61 = vpack.c.bf16 %v1095_v19, %v1087_v29  ;;  %v1144_v55 = vpack.c.bf16 %v1096_v39, %v1088_v18  ;;  %v10792_v44 = vld [vmem:[#allocation44_spill] sm:$0xff]  ;;  %v10796_v36 = vld [vmem:[#allocation34_spill] sm:$0xff]  ;;  %v10798_v18 = vld [vmem:[#allocation53_spill] sm:$0xff] }
  0xd9   : > { %v709_v15 = vadd.f32 %v10787_v21, %v525_v53  ;;  %v710_v12 = vadd.f32 %v10788_v13, %v526_v7  ;;  %v711_v4 = vadd.f32 %v10789_v16, %v527_v35  ;;  %v712_v20 = vadd.f32 %v10790_v8, %v528_v6  ;;  %2077 = vperm.xlu0 %5767, %v1975_v45   ;;  %v10797_v29 = vld [vmem:[#allocation10_spill] sm:$0xff]  ;;  %v10800_v35 = vld [vmem:[#allocation35_spill] sm:$0xff] }
  0xda   : > { %1348 = vmatpush.bf16.msra.mxu0 %v1141_v34  ;;  %1397 = vmatpush.bf16.msra.mxu1 %v1142_v14  ;;  %v6795_v40 = vpack.c.bf16 %v1129_v1, %v10791_v38  ;;  %v1130_v11 = vmax.f32 %v1066_v59, 0.0  ;;  %v1067_v50 = vadd.f32 %v10778_v30, %v955_v46  ;;  %v588_v19 = vmul.f32 %v10792_v44, %v6500_v31  ;;  %v1965_v1 = vld [vmem:[%s10482_s6 + $0x38] sm:$0xff]  ;;  %v10801_v45 = vld [vmem:[#allocation46_spill] sm:$0xff] }
  0xdb   : > { %1446 = vmatpush.bf16.msra.mxu2 %v1143_v61  ;;  %v6801_v39 = vadd.f32 %v6697_v3, %v709_v15  ;;  %v6804_v17 = vadd.f32 %v6701_v37, %v710_v12  ;;  %v536_v5 = vmul.f32 %v6196_v25, %v6603_v23  ;;  %v1123_v43 = vmax.f32 %v1059_v62, 0.0  ;;  %1495 = vmatpush.bf16.msra.mxu3 %v1144_v55  ;;  %v10794_v46 = vld [vmem:[#allocation45_spill] sm:$0xff]  ;;  %v1980_v25 = vld [vmem:[%s10482_s6 + $0xb0] sm:$0xff]  ;;  %v10805_v16 = vld [vmem:[#allocation30_spill] sm:$0xff] }
  0xdc   : > { %v6812_v59 = vadd.f32 %v6705_v22, %v711_v4  ;;  %v10793_v31 = vmax.f32 %v6721_v41, 0.0  ;;  %v1131_v3 = vmax.f32 %v1067_v50, 0.0  ;;  %v772_v37 = vadd.f32 %v10794_v46, %v588_v19  ;;  %v10795_v62 = vld [vmem:[#allocation52_spill] sm:$0xff]  ;;  %v10799_v41 = vld [vmem:[#allocation55_spill] sm:$0xff]  ;;  %v10802_v34 = vld [vmem:[#allocation9_spill] sm:$0xff] }
  0xdd   : > { %v6823_v32 = vadd.f32 %v6714_v54, %v712_v20  ;;  %v948_v60 = vadd.f32 %v10796_v36, %v10795_v62  ;;  %v561_v22 = vmul.f32 %v6202_v28, %v10797_v29  ;;  %v753_v53 = vadd.f32 %v10799_v41, %v10798_v18  ;;  %v10803_v61 = vld [vmem:[#allocation8_spill] sm:$0xff]  ;;  %v10804_v15 = vld [vmem:[#allocation37_spill] sm:$0xff]  ;;  %v10808_v36 = vld [vmem:[#allocation6_spill] sm:$0xff] }
  0xde   : > { %v6816_v9 = vpack.c.bf16 %v1130_v11, %v10793_v31  ;;  %v6831_v7 = vpack.c.bf16 %v1131_v3, %v1123_v43  ;;  %v956_v6 = vadd.f32 %v10800_v35, %v772_v37  ;;  %v865_v14 = vmul.f32 %v10802_v34, %v10801_v45  ;;  %v6838_v55 = vpop.permute.xlu1 %594  ;;  %v3370_v8 = vld [vmem:[%s10484_s8 + $0x60] sm:$0xff] }
  0xdf   : > { %v873_v54 = vmul.f32 %v10802_v34, %v10803_v61  ;;  %2027 = vperm.xlu1 %5772, %v1965_v1   ;;  %v1060_v21 = vadd.f32 %v6502_v26, %v948_v60  ;;  %v745_v13 = vadd.f32 %v10804_v15, %v561_v22  ;;  %v562_v12 = vmul.f32 %v10773_v42, %v10797_v29  ;;  %v10806_v46 = vld [vmem:[#allocation17_spill] sm:$0xff]  ;;  %v10810_v22 = vld [vmem:[#allocation14_spill] sm:$0xff] }
  0xe0   : > { %v570_v4 = vmul.f32 %v10773_v42, %v10805_v16  ;;  %2102 = vperm.xlu2 %5771, %v1980_v25   ;;  %v653_v20 = vmul.f32 %v6121_v51, %v6838_v55  ;;  %v654_v38 = vmul.f32 %v6131_v56, %v6838_v55  ;;  %v655_v26 = vmul.f32 %v6133_v57, %v6838_v55  ;;  %v10807_v57 = vld [vmem:[#allocation54_spill] sm:$0xff] }
  0xe1   : > { %v656_v11 = vmul.f32 %v6135_v58, %v6838_v55  ;;  %v1068_v50 = vadd.f32 %v10778_v30, %v956_v6  ;;  %v1124_v19 = vmax.f32 %v1060_v21, 0.0  ;;  %v929_v43 = vadd.f32 %v865_v14, %v745_v13  ;;  %3436 = vperm.xlu0 %5767, %v3370_v8   ;;  %v10809_v58 = vld [vmem:[#allocation20_spill] sm:$0xff]  ;;  %v1962_v30 = vld [vmem:[%s10482_s6 + $0x20] sm:$0xff] }
  0xe2   : > { %v937_v1 = vadd.f32 %v873_v54, %v753_v53  ;;  %v717_v31 = vadd.f32 %v653_v20, %v6641_v10  ;;  %v718_v3 = vadd.f32 %v654_v38, %v6645_v63  ;;  %v719_v51 = vadd.f32 %v655_v26, %v10806_v46  ;;  %v10811_v63 = vld [vmem:[#allocation15_spill] sm:$0xff]  ;;  %v10812_v13 = vld [vmem:[#allocation21_spill] sm:$0xff] }
  0xe3   : > { %v720_v37 = vadd.f32 %v656_v11, %v536_v5  ;;  %v1132_v56 = vmax.f32 %v1068_v50, 0.0  ;;  %v1041_v25 = vadd.f32 %v6730_v33, %v929_v43  ;;  %v682_v60 = vmul.f32 %v10809_v58, %v10808_v36  ;;  %v1963_v53 = vld [vmem:[%s10482_s6 + $0x28] sm:$0xff]  ;;  %v10813_v11 = vld [vmem:[#allocation16_spill] sm:$0xff] }
  0xe4   : > { %v1049_v62 = vadd.f32 %v10807_v57, %v937_v1  ;;  %v690_v10 = vmul.f32 %v10809_v58, %v10810_v22  ;;  %v866_v18 = vmul.f32 %v10811_v63, %v10801_v45  ;;  %v874_v5 = vmul.f32 %v10811_v63, %v10803_v61 }
  0xe5   : > { %v563_v41 = vmul.f32 %v10777_v24, %v10797_v29  ;;  %v6879_v35 = vpack.c.bf16 %v1132_v56, %v1124_v19  ;;  %v1105_v6 = vmax.f32 %v1041_v25, 0.0  ;;  %v746_v54 = vadd.f32 %v682_v60, %v562_v12  ;;  %v3369_v19 = vld [vmem:[%s10484_s8 + $0x58] sm:$0xff] }
  0xe6   : > { %v1113_v14 = vmax.f32 %v1049_v62, 0.0  ;;  %v754_v21 = vadd.f32 %v690_v10, %v570_v4  ;;  %v571_v15 = vmul.f32 %v10777_v24, %v10805_v16  ;;  %v683_v8 = vmul.f32 %v10812_v13, %v10808_v36 }
  0xe7   : > { %v691_v20 = vmul.f32 %v10812_v13, %v10810_v22  ;;  %2012 = vperm.xlu1 %5772, %v1962_v30   ;;  %v930_v26 = vadd.f32 %v866_v18, %v746_v54  ;;  %v867_v50 = vmul.f32 %v10813_v11, %v10801_v45  ;;  %v875_v12 = vmul.f32 %v10813_v11, %v10803_v61  ;;  %v6893_v4 = vpop.permute.xlu1 %778 }
  0xe8   : > { %v6887_v38 = vpack.c.bf16 %v1113_v14, %v1105_v6  ;;  %2017 = vperm.xlu2 %5771, %v1963_v53   ;;  %v938_v43 = vadd.f32 %v874_v5, %v754_v21  ;;  %v747_v1 = vadd.f32 %v683_v8, %v563_v41  ;;  %v564_v56 = vmul.f32 %v10792_v44, %v10797_v29  ;;  %v6910_v14 = vpop.permute.xlu2 %972 }
  0xe9   : > { %v755_v46 = vadd.f32 %v691_v20, %v571_v15  ;;  %v837_v25 = vmul.f32 %v6113_v47, %v6893_v4  ;;  %v838_v62 = vmul.f32 %v6115_v48, %v6893_v4  ;;  %v839_v60 = vmul.f32 %v6117_v49, %v6893_v4  ;;  %3431 = vperm.xlu0 %5767, %v3369_v19   ;;  %v1979_v48 = vld [vmem:[%s10482_s6 + $0xa8] sm:$0xff]  ;;  %v1960_v15 = vld [vmem:[%s10482_s6 + $0x10] sm:$0xff] }
  0xea   : > { %v840_v30 = vmul.f32 %v6123_v52, %v6893_v4  ;;  %v1042_v10 = vadd.f32 %v6730_v33, %v930_v26  ;;  %v1050_v18 = vadd.f32 %v10807_v57, %v938_v43  ;;  %v931_v5 = vadd.f32 %v867_v50, %v747_v1 }
  0xeb   : > { %v939_v41 = vadd.f32 %v875_v12, %v755_v46  ;;  %v901_v29 = vadd.f32 %v837_v25, %v717_v31  ;;  %v902_v53 = vadd.f32 %v838_v62, %v718_v3  ;;  %v903_v6 = vadd.f32 %v839_v60, %v719_v51  ;;  %v3364_v46 = vld [vmem:[%s10484_s8 + $0x30] sm:$0xff] }
  0xec   : > { %v904_v47 = vadd.f32 %v840_v30, %v720_v37  ;;  %v1106_v49 = vmax.f32 %v1042_v10, 0.0  ;;  %v1114_v54 = vmax.f32 %v1050_v18, 0.0  ;;  %v1043_v52 = vadd.f32 %v6730_v33, %v931_v5  ;;  %v10814_v62 = vld [vmem:[#allocation27_spill] sm:$0xff] }
  0xed   : > { %v1051_v21 = vadd.f32 %v10807_v57, %v939_v41  ;;  %v1013_v31 = vadd.f32 %v6910_v14, %v901_v29  ;;  %v1014_v3 = vadd.f32 %v6910_v14, %v902_v53  ;;  %v1015_v51 = vadd.f32 %v6910_v14, %v903_v6  ;;  %v10816_v41 = vld [vmem:[#allocation13_spill] sm:$0xff]  ;;  %v10817_v53 = vld [vmem:[#allocation12_spill] sm:$0xff] }
  0xee   : > { %v1016_v37 = vadd.f32 %v6910_v14, %v904_v47  ;;  %v6924_v8 = vpack.c.bf16 %v1114_v54, %v1106_v49  ;;  %v1107_v20 = vmax.f32 %v1043_v52, 0.0  ;;  %v572_v50 = vmul.f32 %v10792_v44, %v10805_v16  ;;  %v10815_v16 = vld [vmem:[#allocation29_spill] sm:$0xff]  ;;  %v10818_v47 = vld [vmem:[#allocation36_spill] sm:$0xff] }
  0xef   : > { %v1115_v26 = vmax.f32 %v1051_v21, 0.0  ;;  %2097 = vperm.xlu1 %5772, %v1979_v48   ;;  %v1077_v12 = vmax.f32 %v1013_v31, 0.0  ;;  %v1078_v19 = vmax.f32 %v1014_v3, 0.0  ;;  %v1079_v43 = vmax.f32 %v1015_v51, 0.0  ;;  %v10819_v48 = vld [vmem:[#allocation11_spill] sm:$0xff] }
  0xf0   : > { %v1080_v1 = vmax.f32 %v1016_v37, 0.0  ;;  %2002 = vperm.xlu2 %5771, %v1960_v15   ;;  %v684_v60 = vmul.f32 %v10814_v62, %v10808_v36  ;;  %v692_v30 = vmul.f32 %v10814_v62, %v10810_v22  ;;  %v868_v10 = vmul.f32 %v10815_v16, %v10801_v45  ;;  %v6939_v18 = vpop.permute.xlu1 %967 }
  0xf1   : > { %v6931_v25 = vpack.c.bf16 %v1115_v26, %v1107_v20  ;;  %v876_v5 = vmul.f32 %v10815_v16, %v10803_v61  ;;  %v545_v29 = vmul.f32 %v6202_v28, %v10816_v41  ;;  %v553_v6 = vmul.f32 %v6202_v28, %v10817_v53  ;;  %3406 = vperm.xlu0 %5767, %v3364_v46   ;;  %v10820_v20 = vld [vmem:[#allocation49_spill] sm:$0xff] }
  0xf2   : > { %v665_v36 = vmul.f32 %v10819_v48, %v10818_v47  ;;  %v1005_v22 = vadd.f32 %v6939_v18, %v6801_v39  ;;  %v1006_v45 = vadd.f32 %v6939_v18, %v6804_v17  ;;  %v1007_v49 = vadd.f32 %v6939_v18, %v6812_v59  ;;  %v1976_v39 = vld [vmem:[%s10482_s6 + $0x90] sm:$0xff]  ;;  %v1977_v59 = vld [vmem:[%s10482_s6 + $0x98] sm:$0xff] }
  0xf3   : > { %v1008_v61 = vadd.f32 %v6939_v18, %v6823_v32  ;;  %v748_v54 = vadd.f32 %v684_v60, %v564_v56  ;;  %v756_v52 = vadd.f32 %v692_v30, %v572_v50  ;;  %v673_v21 = vmul.f32 %v10819_v48, %v6653_v0 }
  0xf4   : > { %v729_v15 = vadd.f32 %v665_v36, %v545_v29  ;;  %v1069_v31 = vmax.f32 %v1005_v22, 0.0  ;;  %v1070_v3 = vmax.f32 %v1006_v45, 0.0  ;;  %v1071_v17 = vmax.f32 %v1007_v49, 0.0  ;;  %v10821_v22 = vld [vmem:[#allocation7_spill] sm:$0xff] }
  0xf5   : > { %v1072_v51 = vmax.f32 %v1008_v61, 0.0  ;;  %v932_v32 = vadd.f32 %v868_v10, %v748_v54  ;;  %v940_v37 = vadd.f32 %v876_v5, %v756_v52  ;;  %v737_v56 = vadd.f32 %v673_v21, %v553_v6  ;;  %v3363_v10 = vld [vmem:[%s10484_s8 + $0x28] sm:$0xff] }
  0xf6   : > { %v849_v26 = vmul.f32 %v10802_v34, %v10820_v20  ;;  %v1133_v50 = vpack.c.bf16 %v1077_v12, %v1069_v31  ;;  %v1134_v46 = vpack.c.bf16 %v1078_v19, %v1070_v3  ;;  %v1135_v60 = vpack.c.bf16 %v1079_v43, %v1071_v17 }
  0xf7   : > { %v1136_v30 = vpack.c.bf16 %v1080_v1, %v1072_v51  ;;  %2082 = vperm.xlu1 %5772, %v1976_v39   ;;  %v1044_v29 = vadd.f32 %v6730_v33, %v932_v32  ;;  %v1052_v36 = vadd.f32 %v10807_v57, %v940_v37  ;;  %v857_v45 = vmul.f32 %v10802_v34, %v10821_v22  ;;  %v6983_v57 = vld [vmem:[%s10479_s3] sm:$0xff]  ;;  %v1959_v37 = vld [vmem:[%s10482_s6 + $0x8] sm:$0xff] }
  0xf8   : > { %v913_v49 = vadd.f32 %v849_v26, %v729_v15  ;;  %2087 = vperm.xlu2 %5771, %v1977_v59   ;;  %1349 = vmatpush.bf16.msra.mxu0 %v1133_v50  ;;  %v546_v12 = vmul.f32 %v10773_v42, %v10816_v41  ;;  %v554_v19 = vmul.f32 %v10773_v42, %v10817_v53  ;;  %v10822_v15 = vld [vmem:[#allocation23_spill] sm:$0xff]  ;;  %v1974_v32 = vld [vmem:[%s10482_s6 + $0x80] sm:$0xff] }
  0xf9   : > { %v666_v33 = vmul.f32 %v10809_v58, %v10818_v47  ;;  %1398 = vmatpush.bf16.msra.mxu1 %v1134_v46  ;;  %1447 = vmatpush.bf16.msra.mxu2 %v1135_v60  ;;  %v1108_v43 = vmax.f32 %v1044_v29, 0.0  ;;  %v1116_v1 = vmax.f32 %v1052_v36, 0.0  ;;  %v921_v5 = vadd.f32 %v857_v45, %v737_v56  ;;  %v3358_v29 = vld [vmem:[%s10484_s8] sm:$0xff] }
  0xfa   : > { %v1025_v6 = vadd.f32 %v6749_v2, %v913_v49  ;;  %1496 = vmatpush.bf16.msra.mxu3 %v1136_v30  ;;  %v674_v61 = vmul.f32 %v10809_v58, %v6653_v0  ;;  %v850_v52 = vmul.f32 %v10811_v63, %v10820_v20  ;;  %3401 = vperm.xlu0 %5767, %v3363_v10  }
  0xfb   : > { %v730_v54 = vadd.f32 %v666_v33, %v546_v12  ;;  %v1156_v21 = vpack.c.bf16 %v1116_v1, %v1108_v43  ;;  %v1033_v39 = vadd.f32 %v10822_v15, %v921_v5  ;;  %v858_v3 = vmul.f32 %v10811_v63, %v10821_v22  ;;  %5452 = vmatmul.msk.bf16.vlgmr.msra.gmra.mxu0 %vm1317_vm0, %v6983_v57 }
  0xfc   : > { %1542 = vmatpush.bf16.msrb.mxu0 %v6795_v40  ;;  %v1089_v31 = vmax.f32 %v1025_v6, 0.0  ;;  %v738_v40 = vadd.f32 %v674_v61, %v554_v19  ;;  %v547_v51 = vmul.f32 %v10777_v24, %v10816_v41  ;;  %5460 = vmatmul.msk.bf16.vlgmr.msra.gmra.mxu1 %vm1317_vm0, %v6983_v57  ;;  %v555_v59 = vmul.f32 %v10777_v24, %v10817_v53 }
  0xfd   : > { %1591 = vmatpush.bf16.msrb.mxu1 %v6816_v9  ;;  %1640 = vmatpush.bf16.msrb.mxu2 %v6831_v7  ;;  %v914_v17 = vadd.f32 %v850_v52, %v730_v54  ;;  %v1097_v9 = vmax.f32 %v1033_v39, 0.0  ;;  %v667_v7 = vmul.f32 %v10812_v13, %v10818_v47  ;;  %v851_v50 = vmul.f32 %v10813_v11, %v10820_v20  ;;  %v10823_v52 = vld [vmem:[#allocation31_spill] sm:$0xff] }
  0xfe   : > { %1689 = vmatpush.bf16.msrb.mxu3 %v6879_v35  ;;  %v675_v35 = vmul.f32 %v10812_v13, %v6653_v0  ;;  %5468 = vmatmul.msk.bf16.vlgmr.msra.gmra.mxu2 %vm1317_vm0, %v6983_v57  ;;  %v922_v56 = vadd.f32 %v858_v3, %v738_v40  ;;  %v859_v49 = vmul.f32 %v10813_v11, %v10821_v22  ;;  %v10824_v3 = vld [vmem:[#allocation18_spill] sm:$0xff] }
  0xff   : > { %5476 = vmatmul.msk.bf16.vlgmr.msra.gmra.mxu3 %vm1317_vm0, %v6983_v57  ;;  %v1026_v26 = vadd.f32 %v6749_v2, %v914_v17  ;;  %v1145_v46 = vpack.c.bf16 %v1097_v9, %v1089_v31  ;;  %v731_v60 = vadd.f32 %v667_v7, %v547_v51  ;;  %1997 = vperm.xlu1 %5772, %v1959_v37   ;;  %v3373_v17 = vld [vmem:[%s10484_s8 + $0x78] sm:$0xff] }
 0x100   : > { %1543 = vmatpush.bf16.msrb.mxu0 %v6887_v38  ;;  %v739_v30 = vadd.f32 %v675_v35, %v555_v59  ;;  %v1034_v36 = vadd.f32 %v10822_v15, %v922_v56  ;;  %v548_v38 = vmul.f32 %v10792_v44, %v10816_v41  ;;  %2072 = vperm.xlu2 %5771, %v1974_v32   ;;  %v4519_v56 = vld [vmem:[%s10486_s10 + $0x8] sm:$0xff] }
 0x101   : > { %1592 = vmatpush.bf16.msrb.mxu1 %v6924_v8  ;;  %1641 = vmatpush.bf16.msrb.mxu2 %v6931_v25  ;;  %v1090_v45 = vmax.f32 %v1026_v26, 0.0  ;;  %v915_v8 = vadd.f32 %v851_v50, %v731_v60  ;;  %v556_v25 = vmul.f32 %v10792_v44, %v10817_v53  ;;  %v668_v10 = vmul.f32 %v10814_v62, %v10818_v47 }
 0x102   : > { %1690 = vmatpush.bf16.msrb.mxu3 %v1156_v21  ;;  %v1098_v12 = vmax.f32 %v1034_v36, 0.0  ;;  %v923_v19 = vadd.f32 %v859_v49, %v739_v30  ;;  %v676_v33 = vmul.f32 %v10814_v62, %v6653_v0  ;;  %v852_v43 = vmul.f32 %v10815_v16, %v10820_v20  ;;  %3376 = vperm.xlu0 %5767, %v3358_v29  }
 0x103   : > { %v1027_v41 = vadd.f32 %v6749_v2, %v915_v8  ;;  %v732_v1 = vadd.f32 %v668_v10, %v548_v38  ;;  %v860_v5 = vmul.f32 %v10815_v16, %v10821_v22  ;;  %v529_v61 = vmul.f32 %v6202_v28, %v6776_v27 }
 0x104   : > { %1544 = vmatpush.bf16.msrb.mxu0 %v1145_v46  ;;  %v1146_v53 = vpack.c.bf16 %v1098_v12, %v1090_v45  ;;  %v1035_v6 = vadd.f32 %v10822_v15, %v923_v19  ;;  %v740_v47 = vadd.f32 %v676_v33, %v556_v25  ;;  %v537_v20 = vmul.f32 %v6202_v28, %v6603_v23  ;;  %v3372_v28 = vld [vmem:[%s10484_s8 + $0x70] sm:$0xff] }
 0x105   : > { %v1091_v54 = vmax.f32 %v1027_v41, 0.0  ;;  %v916_v0 = vadd.f32 %v852_v43, %v732_v1  ;;  %v649_v21 = vmul.f32 %v10819_v48, %v10823_v52  ;;  %v657_v22 = vmul.f32 %v10819_v48, %v6838_v55  ;;  %v3371_v1 = vld [vmem:[%s10484_s8 + $0x68] sm:$0xff] }
 0x106   : > { %1593 = vmatpush.bf16.msrb.mxu1 %v1146_v53  ;;  %v1099_v39 = vmax.f32 %v1035_v6, 0.0  ;;  %v924_v31 = vadd.f32 %v860_v5, %v740_v47  ;;  %v833_v40 = vmul.f32 %v10802_v34, %v10824_v3  ;;  %v841_v59 = vmul.f32 %v10802_v34, %v6893_v4 }
 0x107   : > { %v1028_v51 = vadd.f32 %v6749_v2, %v916_v0  ;;  %v713_v9 = vadd.f32 %v649_v21, %v529_v61  ;;  %v530_v48 = vmul.f32 %v10773_v42, %v6776_v27  ;;  %v721_v32 = vadd.f32 %v657_v22, %v537_v20  ;;  %3446 = vperm.xlu1 %5772, %v3372_v28   ;;  %v4522_v20 = vld [vmem:[%s10486_s10 + $0x20] sm:$0xff] }
 0x108   : > { %v1147_v7 = vpack.c.bf16 %v1099_v39, %v1091_v54  ;;  %v1036_v35 = vadd.f32 %v10822_v15, %v924_v31  ;;  %v538_v37 = vmul.f32 %v10773_v42, %v6603_v23  ;;  %v650_v50 = vmul.f32 %v10809_v58, %v10823_v52  ;;  %3451 = vperm.xlu2 %5771, %v3373_v17   ;;  %v7079_v15 = vld [vmem:[%s10479_s3 + $0x8] sm:$0xff] }
 0x109   : > { %v1092_v26 = vmax.f32 %v1028_v51, 0.0  ;;  %v897_v2 = vadd.f32 %v833_v40, %v713_v9  ;;  %v658_v34 = vmul.f32 %v10809_v58, %v6838_v55  ;;  %v905_v46 = vadd.f32 %v841_v59, %v721_v32 }
 0x10a   : > { %1642 = vmatpush.bf16.msrb.mxu2 %v1147_v7  ;;  %v1100_v42 = vmax.f32 %v1036_v35, 0.0  ;;  %v834_v60 = vmul.f32 %v10811_v63, %v10824_v3  ;;  %v842_v30 = vmul.f32 %v10811_v63, %v6893_v4  ;;  %v714_v36 = vadd.f32 %v650_v50, %v530_v48  ;;  %4533 = vperm.xlu0 %5767, %v4519_v56   ;;  %v3367_v48 = vld [vmem:[%s10484_s8 + $0x48] sm:$0xff]  ;;  %v3365_v56 = vld [vmem:[%s10484_s8 + $0x38] sm:$0xff]  ;;  %v3360_v50 = vld [vmem:[%s10484_s8 + $0x10] sm:$0xff] }
 0x10b   : > { %v1009_v29 = vadd.f32 %v6939_v18, %v897_v2  ;;  %v722_v58 = vadd.f32 %v658_v34, %v538_v37  ;;  %v531_v45 = vmul.f32 %v10777_v24, %v6776_v27  ;;  %v1017_v38 = vadd.f32 %v6910_v14, %v905_v46  ;;  %5453 = vmatmul.msk.bf16.gmra.mxu0 %vm1317_vm0, %v7079_v15  ;;  %v4919_v35 = vld [vmem:[%s10487_s11 + $0x8] sm:$0xff]  ;;  %v3361_v2 = vld [vmem:[%s10484_s8 + $0x18] sm:$0xff]  ;;  %v4518_v46 = vld [vmem:[%s10486_s10] sm:$0xff] }
 0x10c   : > { %v1148_v49 = vpack.c.bf16 %v1100_v42, %v1092_v26  ;;  %v539_v8 = vmul.f32 %v10777_v24, %v6603_v23  ;;  %v651_v25 = vmul.f32 %v10812_v13, %v10823_v52  ;;  %v898_v12 = vadd.f32 %v834_v60, %v714_v36  ;;  %5461 = vmatmul.msk.bf16.gmra.mxu1 %vm1317_vm0, %v7079_v15  ;;  %v4525_v26 = vld [vmem:[%s10486_s10 + $0x38] sm:$0xff]  ;;  %v4923_v34 = vld [vmem:[%s10487_s11 + $0x28] sm:$0xff]  ;;  %v4520_v36 = vld [vmem:[%s10486_s10 + $0x10] sm:$0xff] }
 0x10d   : > { %v1073_v10 = vmax.f32 %v1009_v29, 0.0  ;;  %v906_v63 = vadd.f32 %v842_v30, %v722_v58  ;;  %v659_v19 = vmul.f32 %v10812_v13, %v6838_v55  ;;  %v1081_v33 = vmax.f32 %v1017_v38, 0.0  ;;  %v3368_v13 = vld [vmem:[%s10484_s8 + $0x50] sm:$0xff]  ;;  %v7177_v42 = vld [vmem:[%s10479_s3 + $0x18] sm:$0xff]  ;;  %v3359_v60 = vld [vmem:[%s10484_s8 + $0x8] sm:$0xff] }
 0x10e   : > { %1691 = vmatpush.bf16.msrb.mxu3 %v1148_v49  ;;  %v715_v43 = vadd.f32 %v651_v25, %v531_v45  ;;  %v835_v24 = vmul.f32 %v10813_v11, %v10824_v3  ;;  %v843_v41 = vmul.f32 %v10813_v11, %v6893_v4  ;;  %5469 = vmatmul.msk.bf16.gmra.mxu2 %vm1317_vm0, %v7079_v15  ;;  %v5198_v30 = vld [vmem:[#allocation2] sm:$0x1]  ;;  %v4521_v29 = vld [vmem:[%s10486_s10 + $0x18] sm:$0xff]  ;;  %v4523_v49 = vld [vmem:[%s10486_s10 + $0x28] sm:$0xff] }
 0x10f   : > { %v1010_v5 = vadd.f32 %v6939_v18, %v898_v12  ;;  %v1018_v53 = vadd.f32 %v6910_v14, %v906_v63  ;;  %v723_v6 = vadd.f32 %v659_v19, %v539_v8  ;;  %v532_v47 = vmul.f32 %v10792_v44, %v6776_v27  ;;  %5477 = vmatmul.msk.bf16.gmra.mxu3 %vm1317_vm0, %v7079_v15  ;;  %v7202_v58 = vld [vmem:[%s10479_s3 + $0x20] sm:$0xff]  ;;  %v4920_v38 = vld [vmem:[%s10487_s11 + $0x10] sm:$0xff]  ;;  %v7227_v25 = vld [vmem:[%s10479_s3 + $0x28] sm:$0xff] }
 0x110   : > { %v1137_v11 = vpack.c.bf16 %v1081_v33, %v1073_v10  ;;  %v899_v61 = vadd.f32 %v835_v24, %v715_v43  ;;  %v540_v54 = vmul.f32 %v10792_v44, %v6603_v23  ;;  %v652_v0 = vmul.f32 %v10814_v62, %v10823_v52  ;;  %3426 = vperm.xlu2 %5771, %v3368_v13   ;;  %v4918_v45 = vld [vmem:[%s10487_s11] sm:$0xff]  ;;  %v4524_v8 = vld [vmem:[%s10486_s10 + $0x30] sm:$0xff]  ;;  %v4921_v12 = vld [vmem:[%s10487_s11 + $0x18] sm:$0xff]  ;;  %v7275_v13 = vpop.permute.xlu1 %1269 }
 0x111   : > { %v1074_v21 = vmax.f32 %v1010_v5, 0.0  ;;  %v1082_v39 = vmax.f32 %v1018_v53, 0.0  ;;  %v907_v31 = vadd.f32 %v843_v41, %v723_v6  ;;  %v660_v27 = vmul.f32 %v10814_v62, %v6838_v55  ;;  %3441 = vperm.xlu1 %5772, %v3371_v1   ;;  %v4922_v10 = vld [vmem:[%s10487_s11 + $0x20] sm:$0xff]  ;;  %v4925_v63 = vld [vmem:[%s10487_s11 + $0x38] sm:$0xff]  ;;  %v4924_v19 = vld [vmem:[%s10487_s11 + $0x30] sm:$0xff] }
 0x112   : > { %1545 = vmatpush.bf16.msrb.mxu0 %v1137_v11  ;;  %v1011_v22 = vadd.f32 %v6939_v18, %v899_v61  ;;  %v716_v40 = vadd.f32 %v652_v0, %v532_v47  ;;  %v836_v23 = vmul.f32 %v10815_v16, %v10824_v3  ;;  %v844_v44 = vmul.f32 %v10815_v16, %v6893_v4  ;;  %v3366_v4 = vld [vmem:[%s10484_s8 + $0x40] sm:$0xff]  ;;  %v7252_v33 = vld [vmem:[%s10479_s3 + $0x30] sm:$0xff]  ;;  %v7265_v43 = vld [vmem:[%s10479_s3 + $0x38] sm:$0xff]  ;;  %v7291_v11 = vpop.permute.xlu0 %1259 }
 0x113   : > { %v1138_v52 = vpack.c.bf16 %v1082_v39, %v1074_v21  ;;  %v1019_v17 = vadd.f32 %v6910_v14, %v907_v31  ;;  %v724_v28 = vadd.f32 %v660_v27, %v540_v54  ;;  %4548 = vperm.xlu0 %5767, %v4522_v20  }
 0x114   : > { %v1075_v51 = vmax.f32 %v1011_v22, 0.0  ;;  %v900_v9 = vadd.f32 %v836_v23, %v716_v40  ;;  %v7317_v40 = vpop.permute.xlu2 %1274 }
 0x115   : > { %1594 = vmatpush.bf16.msrb.mxu1 %v1138_v52  ;;  %v1083_v55 = vmax.f32 %v1019_v17, 0.0  ;;  %v908_v62 = vadd.f32 %v844_v44, %v724_v28  ;;  %10825 = vst [vmem:[#allocation24_spill] sm:$0xff] %v7317_v40 }
 0x116   : > { %v1012_v59 = vadd.f32 %v6939_v18, %v900_v9  ;;  %v7146_v18 = vld [vmem:[%s10479_s3 + $0x10] sm:$0xff] }
 0x117   : > { %v1139_v3 = vpack.c.bf16 %v1083_v55, %v1075_v51  ;;  %v1020_v7 = vadd.f32 %v6910_v14, %v908_v62  ;;  %v3362_v14 = vld [vmem:[%s10484_s8 + $0x20] sm:$0xff] }
 0x118   : > { %v1076_v16 = vmax.f32 %v1012_v59, 0.0  ;;  %3421 = vperm.xlu2 %5771, %v3367_v48   ;;  %v7289_v47 = vpop.permute.xlu1 %1264 }
 0x119   : > { %1643 = vmatpush.bf16.msrb.mxu2 %v1139_v3  ;;  %v1084_v32 = vmax.f32 %v1020_v7, 0.0  ;;  %3416 = vperm.xlu1 %5772, %v3366_v4  }
 0x11a   : > { %v7313_v27 = vpop.permute.xlu0 %1254 }
 0x11b   : > { %v1140_v37 = vpack.c.bf16 %v1084_v32, %v1076_v16  ;;  %4997 = vperm.xlu0 %5767, %v4919_v35   ;;  %5454 = vmatmul.msk.bf16.gmra.mxu0 %vm1317_vm0, %v7146_v18 }
 0x11c   : > { %5462 = vmatmul.msk.bf16.gmra.mxu1 %vm1317_vm0, %v7146_v18  ;;  %v7339_v51 = vpop.permute.xlu2 %1249 }
 0x11d   : > { %1692 = vmatpush.bf16.msrb.mxu3 %v1140_v37 }
 0x11e   : > { %5470 = vmatmul.msk.bf16.gmra.mxu2 %vm1317_vm0, %v7146_v18 }
 0x11f   : > { %5478 = vmatmul.msk.bf16.gmra.mxu3 %vm1317_vm0, %v7146_v18 }
 0x120   : > { %3396 = vperm.xlu2 %5771, %v3362_v14  }
 0x121   : > { %3411 = vperm.xlu1 %5772, %v3365_v56  }
 0x122   : > { %v7329_v28 = vpop.permute.xlu0 %1229 }
 0x123   : > { %4563 = vperm.xlu0 %5767, %v4525_v26   ;;  %10827 = vst [vmem:[#allocation32_spill] sm:$0xff] %v7329_v28 }
 0x124   : > { %v7359_v35 = vpop.permute.xlu2 %1244 }
 0x128   : > { %3391 = vperm.xlu2 %5771, %v3361_v2  }
 0x129   : > { %3386 = vperm.xlu1 %5772, %v3360_v50  }
 0x12a   : > { %v7351_v3 = vpop.permute.xlu0 %1224 }
 0x12b   : > { %5017 = vperm.xlu0 %5767, %v4923_v34   ;;  %5455 = vmatmul.msk.bf16.gmra.mxu0 %vm1317_vm0, %v7177_v42  ;;  %10829 = vst [vmem:[#allocation38_spill] sm:$0xff] %v7351_v3 }
 0x12c   : > { %5463 = vmatmul.msk.bf16.gmra.mxu1 %vm1317_vm0, %v7177_v42 }
 0x12e   : > { %5471 = vmatmul.msk.bf16.gmra.mxu2 %vm1317_vm0, %v7177_v42 }
 0x12f   : > { %5479 = vmatmul.msk.bf16.gmra.mxu3 %vm1317_vm0, %v7177_v42 }
 0x130   : > { %4528 = vperm.xlu2 %5771, %v4518_v46  }
 0x131   : > { %3381 = vperm.xlu1 %5772, %v3359_v60  }
 0x132   : > { %v7375_v56 = vpop.permute.xlu0 %1199 }
 0x133   : > { %5201 = vperm.xlu0 %5767, %v5198_v30   ;;  %10831 = vst [vmem:[#allocation19_spill] sm:$0xff] %v7375_v56 }
 0x138   : > { %4543 = vperm.xlu2 %5771, %v4521_v29   ;;  %v7387_v29 = vpop.permute.xlu2 %1219 }
 0x139   : > { %4538 = vperm.xlu1 %5772, %v4520_v36   ;;  %10832 = vst [vmem:[#allocation39_spill] sm:$0xff] %v7387_v29 }
 0x13b   : > { %5456 = vmatmul.msk.bf16.gmra.mxu0 %vm1317_vm0, %v7202_v58 }
 0x13c   : > { %5464 = vmatmul.msk.bf16.gmra.mxu1 %vm1317_vm0, %v7202_v58 }
 0x13e   : > { %5472 = vmatmul.msk.bf16.gmra.mxu2 %vm1317_vm0, %v7202_v58 }
 0x13f   : > { %5480 = vmatmul.msk.bf16.gmra.mxu3 %vm1317_vm0, %v7202_v58 }
 0x140   : > { %4992 = vperm.xlu2 %5771, %v4918_v45  }
 0x141   : > { %4553 = vperm.xlu1 %5772, %v4523_v49  }
 0x148   : > { %5002 = vperm.xlu2 %5771, %v4920_v38  }
 0x149   : > { %4558 = vperm.xlu1 %5772, %v4524_v8  }
 0x14b   : > { %5457 = vmatmul.msk.bf16.gmra.mxu0 %vm1317_vm0, %v7227_v25 }
 0x14c   : > { %5465 = vmatmul.msk.bf16.gmra.mxu1 %vm1317_vm0, %v7227_v25 }
 0x14e   : > { %5473 = vmatmul.msk.bf16.gmra.mxu2 %vm1317_vm0, %v7227_v25 }
 0x14f   : > { %5481 = vmatmul.msk.bf16.gmra.mxu3 %vm1317_vm0, %v7227_v25 }
 0x150   : > { %5012 = vperm.xlu2 %5771, %v4922_v10  }
 0x151   : > { %5007 = vperm.xlu1 %5772, %v4921_v12  }
 0x158   : > { %5027 = vperm.xlu2 %5771, %v4925_v63  }
 0x159   : > { %5022 = vperm.xlu1 %5772, %v4924_v19  }
 0x15b   : > { %5458 = vmatmul.msk.bf16.gmra.mxu0 %vm1317_vm0, %v7252_v33 }
 0x15c   : > { %5466 = vmatmul.msk.bf16.gmra.mxu1 %vm1317_vm0, %v7252_v33 }
 0x15e   : > { %5474 = vmatmul.msk.bf16.gmra.mxu2 %vm1317_vm0, %v7252_v33 }
 0x15f   : > { %5482 = vmatmul.msk.bf16.gmra.mxu3 %vm1317_vm0, %v7252_v33 }
 0x16b   : > { %5459 = vmatmul.msk.bf16.gmra.mxu0 %vm1317_vm0, %v7265_v43 }
 0x16c   : > { %5467 = vmatmul.msk.bf16.gmra.mxu1 %vm1317_vm0, %v7265_v43 }
 0x16e   : > { %5475 = vmatmul.msk.bf16.gmra.mxu2 %vm1317_vm0, %v7265_v43 }
 0x16f   : > { %5483 = vmatmul.msk.bf16.gmra.mxu3 %vm1317_vm0, %v7265_v43 }
 0x178   : > { %v1351_v24 = vpop.f32.mrf.mxu0 }
 0x179   : > { %v1400_v41 = vpop.f32.mrf.mxu1  ;;  %v1352_v2 = vadd.f32 %v1351_v24, %v7375_v56 }
 0x17a   : > { %v1401_v50 = vadd.f32 %v1400_v41, %v7375_v56 }
 0x17b   : > { %5484 = vmatmul.msk.bf16.vlgmr.msrb.gmra.mxu0 %vm1317_vm0, %v6983_v57  ;;  %v1734_v36 = vmax.f32 %v1352_v2, 0.0 }
 0x17c   : > { %5492 = vmatmul.msk.bf16.vlgmr.msrb.gmra.mxu1 %vm1317_vm0, %v6983_v57  ;;  %v1735_v45 = vmax.f32 %v1401_v50, 0.0 }
 0x17e   : > { %5500 = vmatmul.msk.bf16.vlgmr.msrb.gmra.mxu2 %vm1317_vm0, %v6983_v57 }
 0x17f   : > { %5508 = vmatmul.msk.bf16.vlgmr.msrb.gmra.mxu3 %vm1317_vm0, %v6983_v57  ;;  %v7305_v57 = vpop.permute.xlu1 %1239 }
 0x180   : > { %v1353_v53 = vpop.f32.mrf.mxu0 }
 0x181   : > { %v7285_v1 = vpop.f32.mrf.mxu2  ;;  %v1402_v6 = vpop.f32.mrf.mxu1 }
 0x182   : > { %v7287_v5 = vpop.f32.mrf.mxu3  ;;  %v1450_v8 = vadd.f32 %v7285_v1, %v7375_v56 }
 0x183   : > { %v1499_v10 = vadd.f32 %v7287_v5, %v7375_v56 }
 0x188   : > { %v7293_v0 = vpop.f32.mrf.mxu0 }
 0x189   : > { %v1451_v61 = vpop.f32.mrf.mxu2  ;;  %v7295_v20 = vpop.f32.mrf.mxu1 }
 0x18a   : > { %v1500_v54 = vpop.f32.mrf.mxu3 }
 0x18b   : > { %5485 = vmatmul.msk.bf16.gmra.mxu0 %vm1317_vm0, %v7079_v15 }
 0x18c   : > { %5493 = vmatmul.msk.bf16.gmra.mxu1 %vm1317_vm0, %v7079_v15 }
 0x18e   : > { %5501 = vmatmul.msk.bf16.gmra.mxu2 %vm1317_vm0, %v7079_v15 }
 0x18f   : > { %5509 = vmatmul.msk.bf16.gmra.mxu3 %vm1317_vm0, %v7079_v15  ;;  %v7325_v15 = vpop.permute.xlu1 %1234 }
 0x190   : > { %v7311_v31 = vpop.f32.mrf.mxu0  ;;  %10826 = vst [vmem:[#allocation25_spill] sm:$0xff] %v7325_v15 }
 0x191   : > { %v7307_v21 = vpop.f32.mrf.mxu2  ;;  %v7315_v22 = vpop.f32.mrf.mxu1 }
 0x192   : > { %v7309_v39 = vpop.f32.mrf.mxu3 }
 0x197   : > { %v7349_v48 = vpop.permute.xlu1 %1209 }
 0x198   : > { %v7323_v52 = vpop.f32.mrf.mxu0  ;;  %10828 = vst [vmem:[#allocation33_spill] sm:$0xff] %v7349_v48 }
 0x199   : > { %v7319_v23 = vpop.f32.mrf.mxu2  ;;  %v7327_v17 = vpop.f32.mrf.mxu1 }
 0x19a   : > { %v7321_v44 = vpop.f32.mrf.mxu3 }
 0x19b   : > { %5486 = vmatmul.msk.bf16.gmra.mxu0 %vm1317_vm0, %v7146_v18 }
 0x19c   : > { %5494 = vmatmul.msk.bf16.gmra.mxu1 %vm1317_vm0, %v7146_v18 }
 0x19e   : > { %5502 = vmatmul.msk.bf16.gmra.mxu2 %vm1317_vm0, %v7146_v18 }
 0x19f   : > { %5510 = vmatmul.msk.bf16.gmra.mxu3 %vm1317_vm0, %v7146_v18  ;;  %v7369_v18 = vpop.permute.xlu1 %1204 }
 0x1a0   : > { %v7345_v62 = vpop.f32.mrf.mxu0  ;;  %10830 = vst [vmem:[#allocation50_spill] sm:$0xff] %v7369_v18  ;;  %v1354_v37 = vadd.f32 %v1353_v53, %v7369_v18  ;;  %v1403_v14 = vadd.f32 %v1402_v6, %v7369_v18  ;;  %v1452_v49 = vadd.f32 %v1451_v61, %v7369_v18  ;;  %v1501_v38 = vadd.f32 %v1500_v54, %v7369_v18 }
 0x1a1   : > { %v7341_v9 = vpop.f32.mrf.mxu2  ;;  %v7347_v59 = vpop.f32.mrf.mxu1  ;;  %v1736_v54 = vmax.f32 %v1450_v8, 0.0 }
 0x1a2   : > { %v7343_v55 = vpop.f32.mrf.mxu3  ;;  %v1742_v30 = vmax.f32 %v1354_v37, 0.0  ;;  %v1744_v24 = vmax.f32 %v1452_v49, 0.0  ;;  %v1745_v41 = vmax.f32 %v1501_v38, 0.0  ;;  %v1737_v37 = vmax.f32 %v1499_v10, 0.0 }
 0x1a4   : > { %v7395_v12 = vpack.c.bf16 %v1742_v30, %v1734_v36  ;;  %v7413_v1 = vpack.c.bf16 %v1744_v24, %v1736_v54  ;;  %v7415_v5 = vpack.c.bf16 %v1745_v41, %v1737_v37  ;;  %v1406_v36 = vadd.f32 %v7295_v20, %v7349_v48 }
 0x1a5   : > { %v1504_v20 = vadd.f32 %v7309_v39, %v7349_v48 }
 0x1a6   : > { %10833 = vst [vmem:[#allocation40_spill] sm:$0xff] %v7413_v1  ;;  %v1751_v10 = vmax.f32 %v1406_v36, 0.0 }
 0x1a7   : > { %10834 = vst [vmem:[#allocation22_spill] sm:$0xff] %v7415_v5 }
 0x1a8   : > { %v7357_v16 = vpop.f32.mrf.mxu0 }
 0x1a9   : > { %v7353_v7 = vpop.f32.mrf.mxu2  ;;  %v7361_v32 = vpop.f32.mrf.mxu1 }
 0x1aa   : > { %v7355_v4 = vpop.f32.mrf.mxu3 }
 0x1ab   : > { %5487 = vmatmul.msk.bf16.gmra.mxu0 %vm1317_vm0, %v7177_v42 }
 0x1ac   : > { %5495 = vmatmul.msk.bf16.gmra.mxu1 %vm1317_vm0, %v7177_v42 }
 0x1ae   : > { %5503 = vmatmul.msk.bf16.gmra.mxu2 %vm1317_vm0, %v7177_v42 }
 0x1af   : > { %5511 = vmatmul.msk.bf16.gmra.mxu3 %vm1317_vm0, %v7177_v42  ;;  %v1743_v42 = vmax.f32 %v1403_v14, 0.0  ;;  %v7417_v14 = vpop.permute.xlu2 %1214 }
 0x1b0   : > { %v7383_v46 = vpop.f32.mrf.mxu0  ;;  %10835 = vst [vmem:[#allocation26_spill] sm:$0xff] %v7417_v14  ;;  %v1359_v2 = vadd.f32 %v7311_v31, %v7417_v14  ;;  %v1408_v50 = vadd.f32 %v7315_v22, %v7417_v14  ;;  %v1457_v22 = vadd.f32 %v7319_v23, %v7417_v14  ;;  %v1506_v24 = vadd.f32 %v7321_v44, %v7417_v14 }
 0x1b1   : > { %v7377_v26 = vpop.f32.mrf.mxu2  ;;  %v7385_v60 = vpop.f32.mrf.mxu1  ;;  %v7397_v63 = vpack.c.bf16 %v1743_v42, %v1735_v45  ;;  %v1357_v42 = vadd.f32 %v7293_v0, %v7349_v48  ;;  %v1455_v0 = vadd.f32 %v7307_v21, %v7349_v48  ;;  %v1753_v14 = vmax.f32 %v1504_v20, 0.0 }
 0x1b2   : > { %v7381_v34 = vpop.f32.mrf.mxu3  ;;  %v1759_v8 = vmax.f32 %v1408_v50, 0.0  ;;  %v1761_v50 = vmax.f32 %v1506_v24, 0.0 }
 0x1b3   : > { %v1750_v31 = vmax.f32 %v1357_v42, 0.0  ;;  %v1752_v44 = vmax.f32 %v1455_v0, 0.0 }
 0x1b4   : > { %v7447_v54 = vpack.c.bf16 %v1759_v8, %v1751_v10  ;;  %v7465_v39 = vpack.c.bf16 %v1761_v50, %v1753_v14  ;;  %v1413_v8 = vadd.f32 %v7347_v59, %v7351_v3  ;;  %v1362_v10 = vadd.f32 %v7323_v52, %v7387_v29 }
 0x1b5   : > { %v1462_v59 = vadd.f32 %v7353_v7, %v7351_v3  ;;  %v1511_v50 = vadd.f32 %v7355_v4, %v7351_v3  ;;  %v1460_v52 = vadd.f32 %v7341_v9, %v7387_v29 }
 0x1b6   : > { %v1775_v20 = vmax.f32 %v1413_v8, 0.0 }
 0x1b7   : > { %v1776_v8 = vmax.f32 %v1462_v59, 0.0  ;;  %v1768_v56 = vmax.f32 %v1460_v52, 0.0 }
 0x1b8   : > { %v7403_v6 = vpop.f32.mrf.mxu0 }
 0x1b9   : > { %v7399_v19 = vpop.f32.mrf.mxu2  ;;  %v7405_v61 = vpop.f32.mrf.mxu1  ;;  %v7507_v9 = vpack.c.bf16 %v1776_v8, %v1768_v56  ;;  %v1416_v56 = vadd.f32 %v7361_v32, %v7329_v28  ;;  %v1465_v32 = vadd.f32 %v7377_v26, %v7329_v28 }
 0x1ba   : > { %v7401_v53 = vpop.f32.mrf.mxu3 }
 0x1bb   : > { %5488 = vmatmul.msk.bf16.gmra.mxu0 %vm1317_vm0, %v7202_v58 }
 0x1bc   : > { %5496 = vmatmul.msk.bf16.gmra.mxu1 %vm1317_vm0, %v7202_v58 }
 0x1be   : > { %5504 = vmatmul.msk.bf16.gmra.mxu2 %vm1317_vm0, %v7202_v58 }
 0x1bf   : > { %5512 = vmatmul.msk.bf16.gmra.mxu3 %vm1317_vm0, %v7202_v58  ;;  %v1758_v58 = vmax.f32 %v1359_v2, 0.0  ;;  %v1760_v2 = vmax.f32 %v1457_v22, 0.0  ;;  %v1411_v22 = vadd.f32 %v7327_v17, %v7387_v29  ;;  %v1509_v17 = vadd.f32 %v7343_v55, %v7387_v29 }
 0x1c0   : > { %v7433_v49 = vpop.f32.mrf.mxu0 }
 0x1c1   : > { %v7425_v30 = vpop.f32.mrf.mxu2  ;;  %v7435_v38 = vpop.f32.mrf.mxu1  ;;  %v7445_v41 = vpack.c.bf16 %v1758_v58, %v1750_v31  ;;  %v7463_v21 = vpack.c.bf16 %v1760_v2, %v1752_v44  ;;  %v1364_v58 = vadd.f32 %v7345_v62, %v7351_v3  ;;  %v1766_v62 = vmax.f32 %v1362_v10, 0.0 }
 0x1c2   : > { %v7431_v45 = vpop.f32.mrf.mxu3  ;;  %v1767_v2 = vmax.f32 %v1411_v22, 0.0  ;;  %v1777_v10 = vmax.f32 %v1511_v50, 0.0  ;;  %v1769_v4 = vmax.f32 %v1509_v17, 0.0  ;;  %v1514_v3 = vadd.f32 %v7381_v34, %v7329_v28 }
 0x1c4   : > { %v7495_v48 = vpack.c.bf16 %v1775_v20, %v1767_v2  ;;  %v7509_v55 = vpack.c.bf16 %v1777_v10, %v1769_v4  ;;  %v1418_v20 = vadd.f32 %v7385_v60, %v7325_v15  ;;  %v1367_v2 = vadd.f32 %v7357_v16, %v7329_v28 }
 0x1c5   : > { %v1783_v10 = vmax.f32 %v1416_v56, 0.0  ;;  %v1516_v60 = vadd.f32 %v7401_v53, %v7325_v15  ;;  %v1785_v1 = vmax.f32 %v1514_v3, 0.0 }
 0x1c6   : > { %v1782_v8 = vmax.f32 %v1367_v2, 0.0 }
 0x1c7   : > { %v1793_v29 = vmax.f32 %v1516_v60, 0.0 }
 0x1c8   : > { %v7453_v23 = vpop.f32.mrf.mxu0 }
 0x1c9   : > { %v7449_v37 = vpop.f32.mrf.mxu2  ;;  %v7455_v36 = vpop.f32.mrf.mxu1  ;;  %v7547_v34 = vpack.c.bf16 %v1793_v29, %v1785_v1 }
 0x1ca   : > { %v7451_v42 = vpop.f32.mrf.mxu3 }
 0x1cb   : > { %5489 = vmatmul.msk.bf16.gmra.mxu0 %vm1317_vm0, %v7227_v25 }
 0x1cc   : > { %5497 = vmatmul.msk.bf16.gmra.mxu1 %vm1317_vm0, %v7227_v25 }
 0x1ce   : > { %5505 = vmatmul.msk.bf16.gmra.mxu2 %vm1317_vm0, %v7227_v25 }
 0x1cf   : > { %5513 = vmatmul.msk.bf16.gmra.mxu3 %vm1317_vm0, %v7227_v25  ;;  %v1774_v25 = vmax.f32 %v1364_v58, 0.0 }
 0x1d0   : > { %v7481_v14 = vpop.f32.mrf.mxu0 }
 0x1d1   : > { %v7473_v31 = vpop.f32.mrf.mxu2  ;;  %v7483_v0 = vpop.f32.mrf.mxu1  ;;  %v7493_v44 = vpack.c.bf16 %v1774_v25, %v1766_v62  ;;  %v1369_v25 = vadd.f32 %v7383_v46, %v7325_v15  ;;  %v1467_v46 = vadd.f32 %v7399_v19, %v7325_v15  ;;  %v1784_v19 = vmax.f32 %v1465_v32, 0.0 }
 0x1d2   : > { %v7479_v24 = vpop.f32.mrf.mxu3  ;;  %v7555_v32 = vadd.f32 %v7403_v6, %v7305_v57  ;;  %v1379_v6 = vadd.f32 %v7481_v14, %v7313_v27  ;;  %v1426_v14 = vadd.f32 %v7455_v36, %v7339_v51 }
 0x1d3   : > { %v1790_v17 = vmax.f32 %v1369_v25, 0.0  ;;  %v1792_v56 = vmax.f32 %v1467_v46, 0.0 }
 0x1d5   : > { %v7529_v4 = vpack.c.bf16 %v1790_v17, %v1782_v8  ;;  %v7545_v26 = vpack.c.bf16 %v1792_v56, %v1784_v19 }
 0x1d8   : > { %v1381_v7 = vpop.f32.mrf.mxu0 }
 0x1d9   : > { %v7497_v58 = vpop.f32.mrf.mxu2  ;;  %v1430_v18 = vpop.f32.mrf.mxu1 }
 0x1da   : > { %v7499_v22 = vpop.f32.mrf.mxu3  ;;  %v1431_v19 = vadd.f32 %v1430_v18, %v7291_v11  ;;  %v1377_v18 = vadd.f32 %v7453_v23, %v7339_v51 }
 0x1db   : > { %5490 = vmatmul.msk.bf16.gmra.mxu0 %vm1317_vm0, %v7252_v33 }
 0x1dc   : > { %5498 = vmatmul.msk.bf16.gmra.mxu1 %vm1317_vm0, %v7252_v33 }
 0x1de   : > { %5506 = vmatmul.msk.bf16.gmra.mxu2 %vm1317_vm0, %v7252_v33 }
 0x1df   : > { %5514 = vmatmul.msk.bf16.gmra.mxu3 %vm1317_vm0, %v7252_v33  ;;  %v1791_v33 = vmax.f32 %v1418_v20, 0.0 }
 0x1e0   : > { %v1383_v50 = vpop.f32.mrf.mxu0 }
 0x1e1   : > { %v7517_v62 = vpop.f32.mrf.mxu2  ;;  %v1432_v52 = vpop.f32.mrf.mxu1  ;;  %v7531_v16 = vpack.c.bf16 %v1791_v33, %v1783_v10  ;;  %v1384_v10 = vadd.f32 %v1383_v50, %v7289_v47  ;;  %v1382_v50 = vadd.f32 %v1381_v7, %v7291_v11 }
 0x1e2   : > { %v7523_v59 = vpop.f32.mrf.mxu3  ;;  %v1433_v29 = vadd.f32 %v1432_v52, %v7289_v47  ;;  %v7573_v52 = vadd.f32 %v7435_v38, %v7359_v35 }
 0x1e8   : > { %v1386_v2 = vpop.f32.mrf.mxu0 }
 0x1e9   : > { %v1481_v25 = vpop.f32.mrf.mxu2  ;;  %v1435_v5 = vpop.f32.mrf.mxu1  ;;  %v1387_v53 = vadd.f32 %v1386_v2, %v7275_v13 }
 0x1ea   : > { %v1530_v20 = vpop.f32.mrf.mxu3  ;;  %v1436_v3 = vadd.f32 %v1435_v5, %v7275_v13  ;;  %v7565_v5 = vadd.f32 %v7405_v61, %v7305_v57  ;;  %v1838_v61 = vmax.f32 %v1384_v10, 0.0  ;;  %v1831_v10 = vmax.f32 %v1431_v19, 0.0 }
 0x1eb   : > { %5491 = vmatmul.msk.bf16.gmra.mxu0 %vm1317_vm0, %v7265_v43  ;;  %v1846_v2 = vmax.f32 %v1387_v53, 0.0  ;;  %v1839_v53 = vmax.f32 %v1433_v29, 0.0  ;;  %v1531_v23 = vadd.f32 %v1530_v20, %v7289_v47  ;;  %v1477_v20 = vadd.f32 %v7497_v58, %v7313_v27 }
 0x1ec   : > { %5499 = vmatmul.msk.bf16.gmra.mxu1 %vm1317_vm0, %v7265_v43  ;;  %v1524_v58 = vadd.f32 %v7479_v24, %v7339_v51  ;;  %v1521_v24 = vadd.f32 %v7451_v42, %v7359_v35 }
 0x1ee   : > { %5507 = vmatmul.msk.bf16.gmra.mxu2 %vm1317_vm0, %v7265_v43 }
 0x1ef   : > { %5515 = vmatmul.msk.bf16.gmra.mxu3 %vm1317_vm0, %v7265_v43  ;;  %v7559_v43 = vadd.f32 %v7433_v49, %v7359_v35 }
 0x1f0   : > { %v1388_v8 = vpop.f32.mrf.mxu0 }
 0x1f1   : > { %v1484_v17 = vpop.f32.mrf.mxu2  ;;  %v1389_v46 = vadd.f32 %v1388_v8, %v7317_v40  ;;  %v1437_v60 = vpop.f32.mrf.mxu1  ;;  %v1847_v8 = vmax.f32 %v1436_v3, 0.0  ;;  %v1806_v7 = vmax.f32 %v7559_v43, 0.0  ;;  %v1830_v3 = vmax.f32 %v1382_v50, 0.0 }
 0x1f2   : > { %v1533_v33 = vpop.f32.mrf.mxu3  ;;  %v1438_v1 = vadd.f32 %v1437_v60, %v7317_v40  ;;  %v1428_v60 = vadd.f32 %v7483_v0, %v7313_v27  ;;  %v1822_v0 = vmax.f32 %v1379_v6, 0.0 }
 0x1f3   : > { %v1854_v56 = vmax.f32 %v1389_v46, 0.0  ;;  %v1485_v46 = vadd.f32 %v1484_v17, %v7275_v13  ;;  %v1534_v38 = vadd.f32 %v1533_v33, %v7275_v13  ;;  %v1910_v33 = vpack.c.bf16 %v1838_v61, %v1830_v3 }
 0x1f4   : > { %v1855_v49 = vmax.f32 %v1438_v1, 0.0  ;;  %v1841_v61 = vmax.f32 %v1531_v23, 0.0 }
 0x1f5   : > { %v1918_v15 = vpack.c.bf16 %v1854_v56, %v1846_v2  ;;  %v1482_v2 = vadd.f32 %v1481_v25, %v7289_v47  ;;  %v1823_v56 = vmax.f32 %v1428_v60, 0.0  ;;  %v1848_v6 = vmax.f32 %v1485_v46, 0.0 }
 0x1f6   : > { %v1919_v28 = vpack.c.bf16 %v1855_v49, %v1847_v8  ;;  %v1911_v25 = vpack.c.bf16 %v1839_v53, %v1831_v10  ;;  %v1814_v8 = vmax.f32 %v1377_v18, 0.0  ;;  %v1849_v49 = vmax.f32 %v1534_v38, 0.0 }
 0x1f7   : > { %2246 = vmatpush.bf16.msra.mxu0 %v1918_v15  ;;  %v1480_v15 = vadd.f32 %v7517_v62, %v7291_v11  ;;  %v1815_v60 = vmax.f32 %v1426_v14, 0.0  ;;  %v1526_v62 = vadd.f32 %v7499_v22, %v7313_v27  ;;  %v1807_v18 = vmax.f32 %v7573_v52, 0.0 }
 0x1f8   : > { %2335 = vmatpush.bf16.msra.mxu1 %v1919_v28  ;;  %v7586_v17 = vpop.f32.mrf.mxu0  ;;  %v1529_v28 = vadd.f32 %v7523_v59, %v7291_v11  ;;  %v1902_v53 = vpack.c.bf16 %v1822_v0, %v1814_v8  ;;  %v1475_v59 = vadd.f32 %v7473_v31, %v7339_v51  ;;  %v1798_v38 = vmax.f32 %v7555_v32, 0.0 }
 0x1f9   : > { %v1486_v1 = vpop.f32.mrf.mxu2  ;;  %v7590_v50 = vpop.f32.mrf.mxu1  ;;  %v1832_v3 = vmax.f32 %v1480_v15, 0.0  ;;  %v1903_v14 = vpack.c.bf16 %v1823_v56, %v1815_v60  ;;  %v1799_v22 = vmax.f32 %v7565_v5, 0.0  ;;  %v1472_v52 = vadd.f32 %v7449_v37, %v7359_v35 }
 0x1fa   : > { %v1487_v43 = vadd.f32 %v1486_v1, %v7317_v40  ;;  %v1535_v29 = vpop.f32.mrf.mxu3  ;;  %v1833_v10 = vmax.f32 %v1529_v28, 0.0  ;;  %v1824_v0 = vmax.f32 %v1477_v20, 0.0  ;;  %v1470_v5 = vadd.f32 %v7425_v30, %v7305_v57 }
 0x1fb   : > { %v1536_v36 = vadd.f32 %v1535_v29, %v7317_v40  ;;  %2247 = vmatpush.bf16.msra.mxu0 %v1910_v33  ;;  %v1840_v29 = vmax.f32 %v1482_v2, 0.0  ;;  %v1816_v33 = vmax.f32 %v1475_v59, 0.0  ;;  %v1895_v37 = vpack.c.bf16 %v1807_v18, %v1799_v22 }
 0x1fc   : > { %v1856_v19 = vmax.f32 %v1487_v43, 0.0  ;;  %2336 = vmatpush.bf16.msra.mxu1 %v1911_v25  ;;  %v1825_v43 = vmax.f32 %v1526_v62, 0.0  ;;  %v1913_v23 = vpack.c.bf16 %v1841_v61, %v1833_v10  ;;  %v1519_v15 = vadd.f32 %v7431_v45, %v7305_v57 }
 0x1fd   : > { %v1857_v1 = vmax.f32 %v1536_v36, 0.0  ;;  %v1912_v32 = vpack.c.bf16 %v1840_v29, %v1832_v3  ;;  %v1894_v36 = vpack.c.bf16 %v1806_v7, %v1798_v38  ;;  %v1904_v42 = vpack.c.bf16 %v1824_v0, %v1816_v33 }
 0x1fe   : > { %v1920_v40 = vpack.c.bf16 %v1856_v19, %v1848_v6  ;;  %v1817_v6 = vmax.f32 %v1524_v58, 0.0  ;;  %v1808_v19 = vmax.f32 %v1472_v52, 0.0  ;;  %v1809_v25 = vmax.f32 %v1521_v24, 0.0  ;;  %v5675_v58 = vld [vmem:[%s10481_s5 + $0x10] sm:$0xff] }
 0x1ff   : > { %v1921_v46 = vpack.c.bf16 %v1857_v1, %v1849_v49  ;;  %2248 = vmatpush.bf16.msra.mxu0 %v1902_v53  ;;  %v1800_v28 = vmax.f32 %v1470_v5, 0.0  ;;  %v1801_v7 = vmax.f32 %v1519_v15, 0.0 }
 0x200   : > { %2424 = vmatpush.bf16.msra.mxu2 %v1920_v40  ;;  %2337 = vmatpush.bf16.msra.mxu1 %v1903_v14  ;;  %v7613_v40 = vpop.f32.mrf.mxu0  ;;  %v1905_v8 = vpack.c.bf16 %v1825_v43, %v1817_v6 }
 0x201   : > { %2513 = vmatpush.bf16.msra.mxu3 %v1921_v46  ;;  %v7606_v2 = vpop.f32.mrf.mxu2  ;;  %v7617_v56 = vpop.f32.mrf.mxu1  ;;  %v1896_v1 = vpack.c.bf16 %v1808_v19, %v1800_v28  ;;  %v1897_v20 = vpack.c.bf16 %v1809_v25, %v1801_v7 }
 0x202   : > { %10836 = vst [vmem:[#allocation41_spill] sm:$0xff] %v7606_v2  ;;  %v7611_v31 = vpop.f32.mrf.mxu3 }
 0x203   : > { %10837 = vst [vmem:[#allocation28_spill] sm:$0xff] %v7611_v31  ;;  %2249 = vmatpush.bf16.msra.mxu0 %v1894_v36  ;;  %v5676_v36 = vld [vmem:[%s10481_s5 + $0x18] sm:$0xff] }
 0x204   : > { %2425 = vmatpush.bf16.msra.mxu2 %v1912_v32  ;;  %2338 = vmatpush.bf16.msra.mxu1 %v1895_v37 }
 0x205   : > { %2514 = vmatpush.bf16.msra.mxu3 %v1913_v23 }
 0x207   : > { %2250 = vmatpush.bf16.msra.mxu0 %v7529_v4 }
 0x208   : > { %2426 = vmatpush.bf16.msra.mxu2 %v1904_v42  ;;  %2339 = vmatpush.bf16.msra.mxu1 %v7531_v16  ;;  %v7629_v45 = vpop.f32.mrf.mxu0 }
 0x209   : > { %2515 = vmatpush.bf16.msra.mxu3 %v1905_v8  ;;  %v7623_v49 = vpop.f32.mrf.mxu2  ;;  %v7631_v60 = vpop.f32.mrf.mxu1  ;;  %v5677_v8 = vld [vmem:[%s10481_s5 + $0x20] sm:$0xff] }
 0x20a   : > { %10838 = vst [vmem:[#allocation51_spill] sm:$0xff] %v7623_v49  ;;  %v7626_v30 = vpop.f32.mrf.mxu3  ;;  %v10851_v49 = vld [vmem:[#allocation19_spill] sm:$0xff] }
 0x20b   : > { %10839 = vst [vmem:[#allocation42_spill] sm:$0xff] %v7626_v30  ;;  %2251 = vmatpush.bf16.msra.mxu0 %v7493_v44 }
 0x20c   : > { %2427 = vmatpush.bf16.msra.mxu2 %v1896_v1  ;;  %2340 = vmatpush.bf16.msra.mxu1 %v7495_v48  ;;  %v5673_v48 = vld [vmem:[%s10481_s5] sm:$0xff] }
 0x20d   : > { %2516 = vmatpush.bf16.msra.mxu3 %v1897_v20 }
 0x20f   : > { %2252 = vmatpush.bf16.msra.mxu0 %v7445_v41 }
 0x210   : > { %2428 = vmatpush.bf16.msra.mxu2 %v7545_v26  ;;  %2341 = vmatpush.bf16.msra.mxu1 %v7447_v54  ;;  %v7643_v29 = vpop.f32.mrf.mxu0  ;;  %v10844_v26 = vld [vmem:[#allocation40_spill] sm:$0xff] }
 0x211   : > { %2517 = vmatpush.bf16.msra.mxu3 %v7547_v34  ;;  %v7637_v4 = vpop.f32.mrf.mxu2  ;;  %v7645_v62 = vpop.f32.mrf.mxu1  ;;  %v5674_v34 = vld [vmem:[%s10481_s5 + $0x8] sm:$0xff] }
 0x212   : > { %10840 = vst [vmem:[#allocation43_spill] sm:$0xff] %v7637_v4  ;;  %v7640_v16 = vpop.f32.mrf.mxu3  ;;  %v10854_v4 = vld [vmem:[#allocation50_spill] sm:$0xff] }
 0x213   : > { %10841 = vst [vmem:[#allocation47_spill] sm:$0xff] %v7640_v16  ;;  %2253 = vmatpush.bf16.msra.mxu0 %v7395_v12  ;;  %v7753_v16 = vadd.f32 %v7590_v50, %v10851_v49  ;;  %v10861_v50 = vld [vmem:[#allocation26_spill] sm:$0xff] }
 0x214   : > { %2429 = vmatpush.bf16.msra.mxu2 %v7507_v9  ;;  %2342 = vmatpush.bf16.msra.mxu1 %v7397_v63 }
 0x215   : > { %2518 = vmatpush.bf16.msra.mxu3 %v7509_v55  ;;  %v10845_v55 = vld [vmem:[#allocation22_spill] sm:$0xff]  ;;  %10853 = vst [vmem:[#allocation35_spill] sm:$0xff] %v7753_v16 }
 0x216   : > { %2254 = vmatmul.bf16.vlgmr.msra.gmra.mxu0 %v5673_v48 }
 0x217   : > { %2343 = vmatmul.bf16.vlgmr.msra.gmra.mxu1 %v5673_v48 }
 0x218   : > { %2430 = vmatpush.bf16.msra.mxu2 %v7463_v21  ;;  %v7660_v44 = vpop.f32.mrf.mxu0 }
 0x219   : > { %2519 = vmatpush.bf16.msra.mxu3 %v7465_v39  ;;  %v7656_v41 = vpop.f32.mrf.mxu2  ;;  %v7662_v9 = vpop.f32.mrf.mxu1 }
 0x21a   : > { %10842 = vst [vmem:[#allocation48_spill] sm:$0xff] %v7656_v41  ;;  %v7658_v54 = vpop.f32.mrf.mxu3  ;;  %v7761_v41 = vadd.f32 %v7617_v56, %v10854_v4  ;;  %v7781_v56 = vpop.permute.xlu0 %2067 }
 0x21b   : > { %10843 = vst [vmem:[#allocation44_spill] sm:$0xff] %v7658_v54  ;;  %v7757_v54 = vadd.f32 %v7613_v40, %v10854_v4  ;;  %v7779_v40 = vadd.f32 %v7645_v62, %v10861_v50 }
 0x21c   : > { %2431 = vmatpush.bf16.msra.mxu2 %v10844_v26  ;;  %10856 = vst [vmem:[#allocation9_spill] sm:$0xff] %v7761_v41  ;;  %v10868_v41 = vld [vmem:[#allocation25_spill] sm:$0xff] }
 0x21d   : > { %2520 = vmatpush.bf16.msra.mxu3 %v10845_v55  ;;  %10855 = vst [vmem:[#allocation46_spill] sm:$0xff] %v7757_v54 }
 0x21e   : > { %10862 = vst [vmem:[#allocation17_spill] sm:$0xff] %v7779_v40 }
 0x21f   : > { %2432 = vmatmul.bf16.vlgmr.msra.gmra.mxu2 %v5673_v48  ;;  %10863 = vst [vmem:[#allocation54_spill] sm:$0xff] %v7781_v56 }
 0x220   : > { %2521 = vmatmul.bf16.vlgmr.msra.gmra.mxu3 %v5673_v48  ;;  %v7670_v21 = vpop.f32.mrf.mxu0 }
 0x221   : > { %v7666_v12 = vpop.f32.mrf.mxu2  ;;  %v7672_v39 = vpop.f32.mrf.mxu1 }
 0x222   : > { %10846 = vst [vmem:[#allocation45_spill] sm:$0xff] %v7666_v12  ;;  %v7668_v63 = vpop.f32.mrf.mxu3  ;;  %v10858_v12 = vld [vmem:[#allocation33_spill] sm:$0xff] }
 0x223   : > { %10847 = vst [vmem:[#allocation52_spill] sm:$0xff] %v7668_v63  ;;  %v7763_v63 = vpop.permute.xlu1 %2142 }
 0x224   : > { %10857 = vst [vmem:[#allocation8_spill] sm:$0xff] %v7763_v63  ;;  %v10864_v63 = vld [vmem:[#allocation39_spill] sm:$0xff] }
 0x225   : > { %v7785_v4 = vadd.f32 %v7660_v44, %v10864_v63 }
 0x226   : > { %2259 = vmatmul.bf16.gmra.mxu0 %v5674_v34 }
 0x227   : > { %2348 = vmatmul.bf16.gmra.mxu1 %v5674_v34 }
 0x228   : > { %v7681_v53 = vpop.f32.mrf.mxu0 }
 0x229   : > { %v7677_v61 = vpop.f32.mrf.mxu2  ;;  %v7683_v18 = vpop.f32.mrf.mxu1 }
 0x22a   : > { %10848 = vst [vmem:[#allocation34_spill] sm:$0xff] %v7677_v61  ;;  %v7679_v46 = vpop.f32.mrf.mxu3 }
 0x22b   : > { %10849 = vst [vmem:[#allocation10_spill] sm:$0xff] %v7679_v46  ;;  %v7767_v46 = vadd.f32 %v7629_v45, %v10858_v12  ;;  %v7789_v45 = vadd.f32 %v7662_v9, %v10864_v63 }
 0x22d   : > { %10859 = vst [vmem:[#allocation37_spill] sm:$0xff] %v7767_v46 }
 0x22e   : > { %10865 = vst [vmem:[#allocation6_spill] sm:$0xff] %v7789_v45 }
 0x22f   : > { %2437 = vmatmul.bf16.gmra.mxu2 %v5674_v34 }
 0x230   : > { %2526 = vmatmul.bf16.gmra.mxu3 %v5674_v34  ;;  %v7689_v14 = vpop.f32.mrf.mxu0 }
 0x231   : > { %v7685_v59 = vpop.f32.mrf.mxu2  ;;  %v7691_v38 = vpop.f32.mrf.mxu1 }
 0x232   : > { %v7687_v3 = vpop.f32.mrf.mxu3 }
 0x233   : > { %10850 = vst [vmem:[#allocation53_spill] sm:$0xff] %v7687_v3 }
 0x236   : > { %2264 = vmatmul.bf16.gmra.mxu0 %v5675_v58 }
 0x237   : > { %2353 = vmatmul.bf16.gmra.mxu1 %v5675_v58 }
 0x238   : > { %v7700_v52 = vpop.f32.mrf.mxu0 }
 0x239   : > { %v7696_v10 = vpop.f32.mrf.mxu2  ;;  %v7702_v0 = vpop.f32.mrf.mxu1 }
 0x23a   : > { %v7698_v22 = vpop.f32.mrf.mxu3 }
 0x23f   : > { %2442 = vmatmul.bf16.gmra.mxu2 %v5675_v58 }
 0x240   : > { %2531 = vmatmul.bf16.gmra.mxu3 %v5675_v58  ;;  %v7708_v43 = vpop.f32.mrf.mxu0  ;;  %v5678_v58 = vld [vmem:[%s10481_s5 + $0x28] sm:$0xff] }
 0x241   : > { %v7704_v32 = vpop.f32.mrf.mxu2  ;;  %v7710_v23 = vpop.f32.mrf.mxu1 }
 0x242   : > { %v7706_v24 = vpop.f32.mrf.mxu3 }
 0x246   : > { %2269 = vmatmul.bf16.gmra.mxu0 %v5676_v36 }
 0x247   : > { %2358 = vmatmul.bf16.gmra.mxu1 %v5676_v36 }
 0x248   : > { %v7719_v37 = vpop.f32.mrf.mxu0 }
 0x249   : > { %v7715_v5 = vpop.f32.mrf.mxu2  ;;  %v7721_v15 = vpop.f32.mrf.mxu1 }
 0x24a   : > { %v7717_v33 = vpop.f32.mrf.mxu3 }
 0x24f   : > { %2447 = vmatmul.bf16.gmra.mxu2 %v5676_v36 }
 0x250   : > { %2536 = vmatmul.bf16.gmra.mxu3 %v5676_v36  ;;  %v1574_v42 = vpop.f32.mrf.mxu0 }
 0x251   : > { %v7723_v6 = vpop.f32.mrf.mxu2  ;;  %v7727_v25 = vpop.f32.mrf.mxu1  ;;  %v1575_v40 = vadd.f32 %v1574_v42, %v7313_v27  ;;  %v1573_v42 = vadd.f32 %v7719_v37, %v7339_v51 }
 0x252   : > { %v7725_v19 = vpop.f32.mrf.mxu3 }
 0x256   : > { %2274 = vmatmul.bf16.gmra.mxu0 %v5677_v8 }
 0x257   : > { %2363 = vmatmul.bf16.gmra.mxu1 %v5677_v8 }
 0x258   : > { %v1577_v1 = vpop.f32.mrf.mxu0 }
 0x259   : > { %v7732_v28 = vpop.f32.mrf.mxu2  ;;  %v1626_v20 = vpop.f32.mrf.mxu1 }
 0x25a   : > { %v7734_v7 = vpop.f32.mrf.mxu3 }
 0x25f   : > { %2452 = vmatmul.bf16.gmra.mxu2 %v5677_v8 }
 0x260   : > { %2541 = vmatmul.bf16.gmra.mxu3 %v5677_v8  ;;  %v1579_v55 = vpop.f32.mrf.mxu0  ;;  %v7749_v8 = vadd.f32 %v7586_v17, %v10851_v49  ;;  %v7771_v17 = vadd.f32 %v7631_v60, %v10858_v12  ;;  %v7775_v49 = vadd.f32 %v7643_v29, %v10861_v50  ;;  %v10866_v60 = vld [vmem:[#allocation38_spill] sm:$0xff] }
 0x261   : > { %v7736_v48 = vpop.f32.mrf.mxu2  ;;  %v1628_v34 = vpop.f32.mrf.mxu1  ;;  %v7793_v16 = vadd.f32 %v7670_v21, %v10866_v60  ;;  %v7798_v62 = vadd.f32 %v7672_v39, %v10866_v60  ;;  %v7815_v39 = vadd.f32 %v7691_v38, %v10868_v41  ;;  %v1580_v50 = vadd.f32 %v1579_v55, %v7289_v47  ;;  %v5679_v38 = vld [vmem:[%s10481_s5 + $0x30] sm:$0xff] }
 0x262   : > { %v7738_v26 = vpop.f32.mrf.mxu3  ;;  %10852 = vst [vmem:[#allocation55_spill] sm:$0xff] %v7749_v8  ;;  %v7834_v55 = vadd.f32 %v7702_v0, %v7305_v57  ;;  %v1624_v60 = vadd.f32 %v7727_v25, %v7313_v27  ;;  %v1826_v25 = vmax.f32 %v1575_v40, 0.0  ;;  %v1676_v40 = vadd.f32 %v7736_v48, %v7291_v11 }
 0x263   : > { %10860 = vst [vmem:[#allocation30_spill] sm:$0xff] %v7771_v17  ;;  %v1842_v45 = vmax.f32 %v1580_v50, 0.0  ;;  %v1722_v48 = vadd.f32 %v7734_v7, %v7313_v27 }
 0x264   : > { %v1827_v37 = vmax.f32 %v1624_v60, 0.0 }
 0x266   : > { %2279 = vmatmul.bf16.gmra.mxu0 %v5678_v58 }
 0x267   : > { %2368 = vmatmul.bf16.gmra.mxu1 %v5678_v58 }
 0x268   : > { %v1582_v2 = vpop.f32.mrf.mxu0 }
 0x269   : > { %v7743_v36 = vpop.f32.mrf.mxu2  ;;  %v1631_v30 = vpop.f32.mrf.mxu1  ;;  %v1583_v29 = vadd.f32 %v1582_v2, %v7275_v13  ;;  %v7811_v2 = vadd.f32 %v7689_v14, %v10868_v41  ;;  %v1629_v14 = vadd.f32 %v1628_v34, %v7289_v47 }
 0x26a   : > { %v7745_v31 = vpop.f32.mrf.mxu3  ;;  %v1632_v9 = vadd.f32 %v1631_v30, %v7275_v13  ;;  %v7825_v30 = vadd.f32 %v7708_v43, %v7359_v35  ;;  %v1627_v43 = vadd.f32 %v1626_v20, %v7291_v11 }
 0x26c   : > { %v1851_v61 = vmax.f32 %v1632_v9, 0.0  ;;  %v1810_v3 = vmax.f32 %v7825_v30, 0.0  ;;  %v1835_v50 = vmax.f32 %v1627_v43, 0.0 }
 0x26f   : > { %2457 = vmatmul.bf16.gmra.mxu2 %v5678_v58 }
 0x270   : > { %2546 = vmatmul.bf16.gmra.mxu3 %v5678_v58  ;;  %v10867_v58 = vld [vmem:[#allocation32_spill] sm:$0xff]  ;;  %v1584_v21 = vpop.f32.mrf.mxu0 }
 0x271   : > { %v1680_v8 = vpop.f32.mrf.mxu2  ;;  %v7802_v56 = vadd.f32 %v7681_v53, %v10867_v58  ;;  %v7806_v44 = vadd.f32 %v7683_v18, %v10867_v58  ;;  %v10869_v53 = vld [vmem:[#allocation24_spill] sm:$0xff]  ;;  %v1633_v46 = vpop.f32.mrf.mxu1  ;;  %v7821_v18 = vadd.f32 %v7700_v52, %v7305_v57  ;;  %v1850_v52 = vmax.f32 %v1583_v29, 0.0 }
 0x272   : > { %v1729_v12 = vpop.f32.mrf.mxu3  ;;  %v1585_v17 = vadd.f32 %v1584_v21, %v10869_v53  ;;  %v1634_v54 = vadd.f32 %v1633_v46, %v10869_v53  ;;  %v1578_v21 = vadd.f32 %v1577_v1, %v7291_v11  ;;  %v7841_v46 = vadd.f32 %v7710_v23, %v7359_v35 }
 0x273   : > { %v1843_v1 = vmax.f32 %v1629_v14, 0.0  ;;  %v1730_v20 = vadd.f32 %v1729_v12, %v7275_v13 }
 0x274   : > { %v1858_v63 = vmax.f32 %v1585_v17, 0.0  ;;  %v1859_v34 = vmax.f32 %v1634_v54, 0.0  ;;  %v1681_v17 = vadd.f32 %v1680_v8, %v7275_v13  ;;  %v1622_v54 = vadd.f32 %v7721_v15, %v7339_v51 }
 0x275   : > { %v1834_v23 = vmax.f32 %v1578_v21, 0.0  ;;  %v1727_v15 = vadd.f32 %v7745_v31, %v7289_v47  ;;  %v7860_v21 = vpop.permute.xlu0 %2052 }
 0x276   : > { %v1922_v0 = vpack.c.bf16 %v1858_v63, %v1850_v52  ;;  %v1923_v29 = vpack.c.bf16 %v1859_v34, %v1851_v61  ;;  %2284 = vmatmul.bf16.gmra.mxu0 %v5679_v38  ;;  %v7852_v63 = vpop.permute.xlu1 %2057  ;;  %v1678_v61 = vadd.f32 %v7743_v36, %v7289_v47  ;;  %10871 = vst [vmem:[#allocation14_spill] sm:$0xff] %v7860_v21  ;;  %v1852_v52 = vmax.f32 %v1681_v17, 0.0 }
 0x277   : > { %2373 = vmatmul.bf16.gmra.mxu1 %v5679_v38  ;;  %10870 = vst [vmem:[#allocation20_spill] sm:$0xff] %v7852_v63  ;;  %v1914_v12 = vpack.c.bf16 %v1842_v45, %v1834_v23  ;;  %v1915_v34 = vpack.c.bf16 %v1843_v1, %v1835_v50  ;;  %v1818_v36 = vmax.f32 %v1573_v42, 0.0  ;;  %v1673_v47 = vadd.f32 %v7732_v28, %v7313_v27 }
 0x278   : > { %2602 = vmatpush.bf16.msrb.mxu0 %v1922_v0  ;;  %2691 = vmatpush.bf16.msrb.mxu1 %v1923_v29  ;;  %v1725_v0 = vadd.f32 %v7738_v26, %v7291_v11  ;;  %v1853_v29 = vmax.f32 %v1730_v20, 0.0  ;;  %v1844_v31 = vmax.f32 %v1678_v61, 0.0  ;;  %v1811_v42 = vmax.f32 %v7841_v46, 0.0 }
 0x279   : > { %v1682_v9 = vpop.f32.mrf.mxu2  ;;  %v1906_v1 = vpack.c.bf16 %v1826_v25, %v1818_v36  ;;  %v1671_v11 = vadd.f32 %v7723_v6, %v7339_v51  ;;  %v1836_v26 = vmax.f32 %v1676_v40, 0.0  ;;  %v1794_v28 = vmax.f32 %v7811_v2, 0.0  ;;  %v10877_v36 = vld [vmem:[#allocation34_spill] sm:$0xff] }
 0x27a   : > { %v1683_v8 = vadd.f32 %v1682_v9, %v10869_v53  ;;  %v1731_v14 = vpop.f32.mrf.mxu3  ;;  %v1819_v9 = vmax.f32 %v1622_v54, 0.0  ;;  %v1802_v23 = vmax.f32 %v7821_v18, 0.0  ;;  %v1720_v27 = vadd.f32 %v7725_v19, %v7339_v51 }
 0x27b   : > { %v1732_v13 = vadd.f32 %v1731_v14, %v10869_v53  ;;  %v1845_v53 = vmax.f32 %v1727_v15, 0.0  ;;  %v1837_v7 = vmax.f32 %v1725_v0, 0.0  ;;  %v1803_v20 = vmax.f32 %v7834_v55, 0.0 }
 0x27c   : > { %v1860_v43 = vmax.f32 %v1683_v8, 0.0  ;;  %2603 = vmatpush.bf16.msrb.mxu0 %v1914_v12  ;;  %2692 = vmatpush.bf16.msrb.mxu1 %v1915_v34  ;;  %v1907_v54 = vpack.c.bf16 %v1827_v37, %v1819_v9  ;;  %v1668_v46 = vadd.f32 %v7715_v5, %v7359_v35  ;;  %v1828_v6 = vmax.f32 %v1673_v47, 0.0  ;;  %v7892_v8 = vld [vmem:[%s10481_s5 + $0x38] sm:$0xff] }
 0x27d   : > { %v1861_v60 = vmax.f32 %v1732_v13, 0.0  ;;  %v1717_v25 = vadd.f32 %v7717_v33, %v7359_v35  ;;  %v1829_v2 = vmax.f32 %v1722_v48, 0.0  ;;  %v1917_v50 = vpack.c.bf16 %v1845_v53, %v1837_v7  ;;  %v10878_v9 = vld [vmem:[#allocation17_spill] sm:$0xff]  ;;  %v10881_v48 = vld [vmem:[#allocation39_spill] sm:$0xff] }
 0x27e   : > { %v1924_v45 = vpack.c.bf16 %v1860_v43, %v1852_v52  ;;  %v1898_v18 = vpack.c.bf16 %v1810_v3, %v1802_v23  ;;  %v7884_v51 = vpop.permute.xlu1 %2042  ;;  %v1795_v19 = vmax.f32 %v7815_v39, 0.0  ;;  %v1666_v55 = vadd.f32 %v7704_v32, %v7305_v57  ;;  %v7898_v39 = vpop.permute.xlu0 %2137  ;;  %v10882_v53 = vld [vmem:[#allocation45_spill] sm:$0xff] }
 0x27f   : > { %v1925_v17 = vpack.c.bf16 %v1861_v60, %v1853_v29  ;;  %2462 = vmatmul.bf16.gmra.mxu2 %v5679_v38  ;;  %10872 = vst [vmem:[#allocation15_spill] sm:$0xff] %v7884_v51  ;;  %v1820_v61 = vmax.f32 %v1671_v11, 0.0  ;;  %v1899_v5 = vpack.c.bf16 %v1811_v42, %v1803_v20  ;;  %v1778_v35 = vmax.f32 %v7793_v16, 0.0 }
 0x280   : > { %2551 = vmatmul.bf16.gmra.mxu3 %v5679_v38  ;;  %2780 = vmatpush.bf16.msrb.mxu2 %v1924_v45  ;;  %v1916_v38 = vpack.c.bf16 %v1844_v31, %v1836_v26  ;;  %v1786_v33 = vmax.f32 %v7802_v56, 0.0  ;;  %v1715_v3 = vadd.f32 %v7706_v24, %v7305_v57  ;;  %v1821_v30 = vmax.f32 %v1720_v27, 0.0  ;;  %10873 = vst [vmem:[#allocation21_spill] sm:$0xff] %v7898_v39  ;;  %v7920_v45 = vpop.permute.xlu2 %2062  ;;  %v10883_v26 = vld [vmem:[#allocation46_spill] sm:$0xff]  ;;  %v10885_v27 = vld [vmem:[#allocation52_spill] sm:$0xff] }
 0x281   : > { %2869 = vmatpush.bf16.msrb.mxu3 %v1925_v17  ;;  %2604 = vmatpush.bf16.msrb.mxu0 %v1906_v1  ;;  %v1787_v32 = vmax.f32 %v7806_v44, 0.0  ;;  %v1663_v14 = vadd.f32 %v7696_v10, %v10868_v41  ;;  %v1812_v37 = vmax.f32 %v1668_v46, 0.0  ;;  %v1908_v15 = vpack.c.bf16 %v1828_v6, %v1820_v61  ;;  %10880 = vst [vmem:[#allocation16_spill] sm:$0xff] %v7920_v45  ;;  %v10887_v6 = vld [vmem:[#allocation30_spill] sm:$0xff] }
 0x282   : > { %2693 = vmatpush.bf16.msrb.mxu1 %v1907_v54  ;;  %v1779_v16 = vmax.f32 %v7798_v62, 0.0  ;;  %v1712_v56 = vadd.f32 %v7698_v22, %v10868_v41  ;;  %v1813_v13 = vmax.f32 %v1717_v25, 0.0  ;;  %v1909_v57 = vpack.c.bf16 %v1829_v2, %v1821_v30  ;;  %v10874_v62 = vld [vmem:[#allocation53_spill] sm:$0xff]  ;;  %v10875_v41 = vld [vmem:[#allocation6_spill] sm:$0xff]  ;;  %v10889_v2 = vld [vmem:[#allocation48_spill] sm:$0xff] }
 0x283   : > { %v1661_v24 = vadd.f32 %v7685_v59, %v10867_v58  ;;  %v1804_v12 = vmax.f32 %v1666_v55, 0.0  ;;  %v1890_v44 = vpack.c.bf16 %v1794_v28, %v1786_v33  ;;  %v1891_v40 = vpack.c.bf16 %v1795_v19, %v1787_v32  ;;  %v10876_v59 = vld [vmem:[#allocation38_spill] sm:$0xff]  ;;  %v10884_v28 = vld [vmem:[#allocation37_spill] sm:$0xff] }
 0x284   : > { %2781 = vmatpush.bf16.msrb.mxu2 %v1916_v38  ;;  %v1762_v10 = vmax.f32 %v7775_v49, 0.0  ;;  %v1770_v52 = vmax.f32 %v7785_v4, 0.0  ;;  %v1710_v43 = vadd.f32 %v10874_v62, %v10867_v58  ;;  %v1805_v34 = vmax.f32 %v1715_v3, 0.0  ;;  %v10879_v4 = vld [vmem:[#allocation10_spill] sm:$0xff]  ;;  %v10890_v55 = vld [vmem:[#allocation9_spill] sm:$0xff] }
 0x285   : > { %2870 = vmatpush.bf16.msrb.mxu3 %v1917_v50  ;;  %2605 = vmatpush.bf16.msrb.mxu0 %v1898_v18  ;;  %v1771_v22 = vmax.f32 %v10875_v41, 0.0  ;;  %v1658_v0 = vadd.f32 %v10877_v36, %v10876_v59  ;;  %v1796_v29 = vmax.f32 %v1663_v14, 0.0  ;;  %v1900_v60 = vpack.c.bf16 %v1812_v37, %v1804_v12  ;;  %v10888_v25 = vld [vmem:[#allocation26_spill] sm:$0xff]  ;;  %v10893_v32 = vld [vmem:[#allocation33_spill] sm:$0xff]  ;;  %v10894_v14 = vld [vmem:[#allocation43_spill] sm:$0xff] }
 0x286   : > { %2694 = vmatpush.bf16.msrb.mxu1 %v1899_v5  ;;  %2289 = vmatmul.bf16.gmra.mxu0 %v7892_v8  ;;  %v1763_v49 = vmax.f32 %v10878_v9, 0.0  ;;  %v1707_v47 = vadd.f32 %v10879_v4, %v10876_v59  ;;  %v1797_v31 = vmax.f32 %v1712_v56, 0.0  ;;  %v1901_v58 = vpack.c.bf16 %v1813_v13, %v1805_v34  ;;  %v7928_v46 = vpop.permute.xlu1 %2127  ;;  %v10891_v5 = vld [vmem:[#allocation44_spill] sm:$0xff]  ;;  %v7937_v30 = vpop.permute.xlu0 %2122  ;;  %v10895_v13 = vld [vmem:[#allocation55_spill] sm:$0xff]  ;;  %v10898_v62 = vld [vmem:[#allocation50_spill] sm:$0xff] }
 0x287   : > { %2378 = vmatmul.bf16.gmra.mxu1 %v7892_v8  ;;  %v1656_v17 = vadd.f32 %v10882_v53, %v10881_v48  ;;  %v1788_v1 = vmax.f32 %v1661_v24, 0.0  ;;  %v1882_v42 = vpack.c.bf16 %v1778_v35, %v1770_v52  ;;  %v1883_v11 = vpack.c.bf16 %v1779_v16, %v1771_v22  ;;  %10886 = vst [vmem:[#allocation27_spill] sm:$0xff] %v7928_v46  ;;  %v10896_v24 = vld [vmem:[#allocation47_spill] sm:$0xff] }
 0x288   : > { %2782 = vmatpush.bf16.msrb.mxu2 %v1908_v15  ;;  %v1746_v54 = vmax.f32 %v10883_v26, 0.0  ;;  %v1754_v23 = vmax.f32 %v10884_v28, 0.0  ;;  %v1705_v7 = vadd.f32 %v10885_v27, %v10881_v48  ;;  %v1789_v20 = vmax.f32 %v1710_v43, 0.0  ;;  %10892 = vst [vmem:[#allocation29_spill] sm:$0xff] %v7937_v30  ;;  %v10899_v43 = vld [vmem:[#allocation51_spill] sm:$0xff] }
 0x289   : > { %2871 = vmatpush.bf16.msrb.mxu3 %v1909_v57  ;;  %2606 = vmatpush.bf16.msrb.mxu0 %v1890_v44  ;;  %v1755_v38 = vmax.f32 %v10887_v6, 0.0  ;;  %v1653_v50 = vadd.f32 %v10889_v2, %v10888_v25  ;;  %v1780_v18 = vmax.f32 %v1658_v0, 0.0  ;;  %v1892_v19 = vpack.c.bf16 %v1796_v29, %v1788_v1  ;;  %v10901_v0 = vld [vmem:[#allocation19_spill] sm:$0xff]  ;;  %v10902_v29 = vld [vmem:[#allocation41_spill] sm:$0xff] }
 0x28a   : > { %2695 = vmatpush.bf16.msrb.mxu1 %v1891_v40  ;;  %v1747_v61 = vmax.f32 %v10890_v55, 0.0  ;;  %v1702_v35 = vadd.f32 %v10891_v5, %v10888_v25  ;;  %v1781_v33 = vmax.f32 %v1707_v47, 0.0  ;;  %v1893_v3 = vpack.c.bf16 %v1797_v31, %v1789_v20  ;;  %v10897_v40 = vld [vmem:[#allocation35_spill] sm:$0xff]  ;;  %v5681_v47 = vld [vmem:[%s10481_s5 + $0x40] sm:$0xff]  ;;  %v10903_v31 = vld [vmem:[#allocation28_spill] sm:$0xff] }
 0x28b   : > { %v1651_v37 = vadd.f32 %v10894_v14, %v10893_v32  ;;  %v1772_v15 = vmax.f32 %v1656_v17, 0.0  ;;  %v1874_v16 = vpack.c.bf16 %v1762_v10, %v1754_v23  ;;  %v1875_v56 = vpack.c.bf16 %v1763_v49, %v1755_v38  ;;  %v7959_v17 = vpop.permute.xlu2 %2147 }
 0x28c   : > { %2783 = vmatpush.bf16.msrb.mxu2 %v1900_v60  ;;  %v1738_v57 = vmax.f32 %v10895_v13, 0.0  ;;  %v1700_v12 = vadd.f32 %v10896_v24, %v10893_v32  ;;  %v1773_v44 = vmax.f32 %v1705_v7, 0.0  ;;  %v1739_v52 = vmax.f32 %v10897_v40, 0.0  ;;  %10904 = vst [vmem:[#allocation13_spill] sm:$0xff] %v7959_v17  ;;  %v5683_v24 = vld [vmem:[%s10481_s5 + $0x50] sm:$0xff] }
 0x28d   : > { %2872 = vmatpush.bf16.msrb.mxu3 %v1901_v58  ;;  %2607 = vmatpush.bf16.msrb.mxu0 %v1882_v42  ;;  %v1648_v34 = vadd.f32 %v10899_v43, %v10898_v62  ;;  %v1764_v41 = vmax.f32 %v1653_v50, 0.0  ;;  %v1884_v22 = vpack.c.bf16 %v1780_v18, %v1772_v15  ;;  %v1765_v59 = vmax.f32 %v1702_v35, 0.0 }
 0x28e   : > { %2696 = vmatpush.bf16.msrb.mxu1 %v1883_v11  ;;  %v1885_v36 = vpack.c.bf16 %v1781_v33, %v1773_v44  ;;  %v1646_v60 = vadd.f32 %v10902_v29, %v10901_v0  ;;  %v1756_v9 = vmax.f32 %v1651_v37, 0.0  ;;  %v1866_v49 = vpack.c.bf16 %v1746_v54, %v1738_v57  ;;  %v7963_v28 = vpop.permute.xlu1 %2112  ;;  %v7965_v7 = vpop.permute.xlu0 %2037 }
 0x28f   : > { %2467 = vmatmul.bf16.gmra.mxu2 %v7892_v8  ;;  %v1867_v4 = vpack.c.bf16 %v1747_v61, %v1739_v52  ;;  %v1695_v58 = vadd.f32 %v10903_v31, %v10901_v0  ;;  %v1757_v48 = vmax.f32 %v1700_v12, 0.0  ;;  %v1748_v1 = vmax.f32 %v1648_v34, 0.0  ;;  %10905 = vst [vmem:[#allocation12_spill] sm:$0xff] %v7963_v28  ;;  %v5682_v61 = vld [vmem:[%s10481_s5 + $0x48] sm:$0xff]  ;;  %v5684_v0 = vld [vmem:[%s10481_s5 + $0x58] sm:$0xff] }
 0x290   : > { %2556 = vmatmul.bf16.gmra.mxu3 %v7892_v8  ;;  %2784 = vmatpush.bf16.msrb.mxu2 %v1892_v19  ;;  %v10900_v8 = vld [vmem:[#allocation42_spill] sm:$0xff]  ;;  %v1876_v11 = vpack.c.bf16 %v1764_v41, %v1756_v9  ;;  %v1740_v23 = vmax.f32 %v1646_v60, 0.0  ;;  %10906 = vst [vmem:[#allocation36_spill] sm:$0xff] %v7965_v7 }
 0x291   : > { %2873 = vmatpush.bf16.msrb.mxu3 %v1893_v3  ;;  %2608 = vmatpush.bf16.msrb.mxu0 %v1874_v16  ;;  %v1697_v10 = vadd.f32 %v10900_v8, %v10898_v62  ;;  %v1877_v54 = vpack.c.bf16 %v1765_v59, %v1757_v48  ;;  %v1741_v27 = vmax.f32 %v1695_v58, 0.0 }
 0x292   : > { %2697 = vmatpush.bf16.msrb.mxu1 %v1875_v56  ;;  %v1868_v20 = vpack.c.bf16 %v1748_v1, %v1740_v23 }
 0x293   : > { %v7957_v53 = vpop.f32.mrf.mxu0  ;;  %v1749_v26 = vmax.f32 %v1697_v10, 0.0  ;;  %v7967_v2 = vpop.permute.xlu2 %2132 }
 0x294   : > { %2785 = vmatpush.bf16.msrb.mxu2 %v1884_v22  ;;  %v7961_v42 = vpop.f32.mrf.mxu1  ;;  %10907 = vst [vmem:[#allocation11_spill] sm:$0xff] %v7967_v2 }
 0x295   : > { %2874 = vmatpush.bf16.msrb.mxu3 %v1885_v36  ;;  %2609 = vmatpush.bf16.msrb.mxu0 %v1866_v49  ;;  %v1869_v6 = vpack.c.bf16 %v1749_v26, %v1741_v27 }
 0x296   : > { %2698 = vmatpush.bf16.msrb.mxu1 %v1867_v4  ;;  %2294 = vmatmul.bf16.gmra.mxu0 %v5681_v47  ;;  %v7969_v50 = vpop.permute.xlu1 %2027  ;;  %v7975_v55 = vpop.permute.xlu0 %2022 }
 0x297   : > { %2383 = vmatmul.bf16.gmra.mxu1 %v5681_v47  ;;  %10908 = vst [vmem:[#allocation49_spill] sm:$0xff] %v7969_v50 }
 0x298   : > { %2786 = vmatpush.bf16.msrb.mxu2 %v1876_v11  ;;  %10909 = vst [vmem:[#allocation7_spill] sm:$0xff] %v7975_v55 }
 0x299   : > { %2875 = vmatpush.bf16.msrb.mxu3 %v1877_v54 }
 0x29b   : > { %v2257_v38 = vpop.f32.mrf.mxu0  ;;  %v7984_v33 = vpop.permute.xlu2 %2047 }
 0x29c   : > { %2787 = vmatpush.bf16.msrb.mxu2 %v1868_v20  ;;  %v2346_v25 = vpop.f32.mrf.mxu1  ;;  %10910 = vst [vmem:[#allocation23_spill] sm:$0xff] %v7984_v33 }
 0x29d   : > { %2876 = vmatpush.bf16.msrb.mxu3 %v1869_v6 }
 0x29e   : > { %v7986_v14 = vpop.permute.xlu1 %2012  ;;  %v7990_v15 = vpop.permute.xlu0 %2107 }
 0x29f   : > { %2472 = vmatmul.bf16.gmra.mxu2 %v5681_v47  ;;  %10911 = vst [vmem:[#allocation31_spill] sm:$0xff] %v7986_v14 }
 0x2a0   : > { %2561 = vmatmul.bf16.gmra.mxu3 %v5681_v47  ;;  %10912 = vst [vmem:[#allocation18_spill] sm:$0xff] %v7990_v15 }
 0x2a2   : > { %v7971_v18 = vpop.f32.mrf.mxu2 }
 0x2a3   : > { %v7973_v19 = vpop.f32.mrf.mxu3  ;;  %v7980_v5 = vpop.f32.mrf.mxu0 }
 0x2a4   : > { %v7982_v35 = vpop.f32.mrf.mxu1  ;;  %v7998_v57 = vpop.permute.xlu2 %2032 }
 0x2a5   : > { %10913 = vst [vmem:[#allocation40_spill] sm:$0xff] %v7998_v57 }
 0x2a6   : > { %2299 = vmatmul.bf16.gmra.mxu0 %v5682_v61  ;;  %v8005_v44 = vpop.permute.xlu1 %2097  ;;  %v8009_v52 = vpop.permute.xlu0 %2092 }
 0x2a7   : > { %2388 = vmatmul.bf16.gmra.mxu1 %v5682_v61  ;;  %10914 = vst [vmem:[#allocation22_spill] sm:$0xff] %v8005_v44 }
 0x2a8   : > { %10915 = vst [vmem:[#allocation32_spill] sm:$0xff] %v8009_v52 }
 0x2aa   : > { %v2435_v3 = vpop.f32.mrf.mxu2 }
 0x2ab   : > { %v2524_v32 = vpop.f32.mrf.mxu3  ;;  %v7988_v37 = vpop.f32.mrf.mxu0 }
 0x2ac   : > { %v7992_v16 = vpop.f32.mrf.mxu1  ;;  %v8017_v41 = vpop.permute.xlu2 %2117 }
 0x2ad   : > { %10916 = vst [vmem:[#allocation25_spill] sm:$0xff] %v8017_v41 }
 0x2ae   : > { %v8021_v8 = vpop.permute.xlu1 %2082  ;;  %v8023_v10 = vpop.permute.xlu0 %2007 }
 0x2af   : > { %2477 = vmatmul.bf16.gmra.mxu2 %v5682_v61  ;;  %10917 = vst [vmem:[#allocation24_spill] sm:$0xff] %v8021_v8  ;;  %v2263_v28 = vadd.f32 %v7988_v37, %v8023_v10 }
 0x2b0   : > { %2566 = vmatmul.bf16.gmra.mxu3 %v5682_v61  ;;  %10918 = vst [vmem:[#allocation53_spill] sm:$0xff] %v8023_v10 }
 0x2b1   : > { %v2982_v37 = vmax.f32 %v2263_v28, 0.0  ;;  %v5686_v28 = vld [vmem:[%s10481_s5 + $0x68] sm:$0xff] }
 0x2b2   : > { %v7994_v56 = vpop.f32.mrf.mxu2 }
 0x2b3   : > { %v7996_v13 = vpop.f32.mrf.mxu3  ;;  %v8003_v12 = vpop.f32.mrf.mxu0 }
 0x2b4   : > { %v8007_v40 = vpop.f32.mrf.mxu1  ;;  %v8036_v9 = vpop.permute.xlu2 %2102 }
 0x2b5   : > { %10919 = vst [vmem:[#allocation6_spill] sm:$0xff] %v8036_v9 }
 0x2b6   : > { %2304 = vmatmul.bf16.gmra.mxu0 %v5683_v24  ;;  %v8038_v49 = vpop.permute.xlu1 %1997  ;;  %v8046_v48 = vpop.permute.xlu0 %1992 }
 0x2b7   : > { %2393 = vmatmul.bf16.gmra.mxu1 %v5683_v24  ;;  %10920 = vst [vmem:[#allocation38_spill] sm:$0xff] %v8038_v49  ;;  %v2258_v47 = vadd.f32 %v2257_v38, %v8038_v49  ;;  %v2347_v31 = vadd.f32 %v2346_v25, %v8038_v49  ;;  %v2256_v1 = vadd.f32 %v7957_v53, %v8046_v48 }
 0x2b8   : > { %10921 = vst [vmem:[#allocation34_spill] sm:$0xff] %v8046_v48  ;;  %v2345_v11 = vadd.f32 %v7961_v42, %v8046_v48  ;;  %v5685_v42 = vld [vmem:[%s10481_s5 + $0x60] sm:$0xff] }
 0x2b9   : > { %v2966_v23 = vmax.f32 %v2258_v47, 0.0  ;;  %v2967_v27 = vmax.f32 %v2347_v31, 0.0  ;;  %v2958_v20 = vmax.f32 %v2256_v1, 0.0  ;;  %v2525_v1 = vadd.f32 %v2524_v32, %v8038_v49 }
 0x2ba   : > { %v8011_v62 = vpop.f32.mrf.mxu2  ;;  %v2959_v6 = vmax.f32 %v2345_v11, 0.0  ;;  %v2434_v11 = vadd.f32 %v7971_v18, %v8046_v48 }
 0x2bb   : > { %v8013_v43 = vpop.f32.mrf.mxu3  ;;  %v8015_v34 = vpop.f32.mrf.mxu0  ;;  %v8062_v53 = vpack.c.bf16 %v2966_v23, %v2958_v20  ;;  %v2523_v23 = vadd.f32 %v7973_v19, %v8046_v48 }
 0x2bc   : > { %v8019_v22 = vpop.f32.mrf.mxu1  ;;  %v8056_v38 = vpop.permute.xlu2 %2017 }
 0x2bd   : > { %10922 = vst [vmem:[#allocation17_spill] sm:$0xff] %v8056_v38  ;;  %v2961_v18 = vmax.f32 %v2523_v23, 0.0 }
 0x2bf   : > { %2482 = vmatmul.bf16.gmra.mxu2 %v5683_v24 }
 0x2c0   : > { %2571 = vmatmul.bf16.gmra.mxu3 %v5683_v24  ;;  %v8064_v24 = vpack.c.bf16 %v2967_v27, %v2959_v6  ;;  %v2969_v6 = vmax.f32 %v2525_v1, 0.0 }
 0x2c2   : > { %v8025_v59 = vpop.f32.mrf.mxu2  ;;  %v8099_v46 = vpack.c.bf16 %v2969_v6, %v2961_v18 }
 0x2c3   : > { %v8027_v36 = vpop.f32.mrf.mxu3  ;;  %v8032_v29 = vpop.f32.mrf.mxu0 }
 0x2c4   : > { %v8034_v60 = vpop.f32.mrf.mxu1  ;;  %v8087_v32 = vpop.permute.xlu2 %2002  ;;  %10925 = vst [vmem:[#allocation45_spill] sm:$0xff] %v8099_v46 }
 0x2c5   : > { %10923 = vst [vmem:[#allocation10_spill] sm:$0xff] %v8087_v32  ;;  %v2261_v19 = vadd.f32 %v7980_v5, %v8087_v32  ;;  %v2350_v48 = vadd.f32 %v7982_v35, %v8087_v32 }
 0x2c6   : > { %2309 = vmatmul.bf16.gmra.mxu0 %v5684_v0 }
 0x2c7   : > { %2398 = vmatmul.bf16.gmra.mxu1 %v5684_v0  ;;  %v2975_v23 = vmax.f32 %v2350_v48, 0.0  ;;  %v2530_v48 = vadd.f32 %v8013_v43, %v8023_v10 }
 0x2ca   : > { %v8040_v4 = vpop.f32.mrf.mxu2 }
 0x2cb   : > { %v8044_v58 = vpop.f32.mrf.mxu3  ;;  %v8052_v26 = vpop.f32.mrf.mxu0 }
 0x2cc   : > { %v8054_v54 = vpop.f32.mrf.mxu1 }
 0x2cf   : > { %2487 = vmatmul.bf16.gmra.mxu2 %v5684_v0 }
 0x2d0   : > { %2576 = vmatmul.bf16.gmra.mxu3 %v5684_v0  ;;  %v2436_v0 = vadd.f32 %v2435_v3, %v8038_v49  ;;  %v2352_v3 = vadd.f32 %v7992_v16, %v8023_v10  ;;  %v2960_v49 = vmax.f32 %v2434_v11, 0.0  ;;  %v2974_v11 = vmax.f32 %v2261_v19, 0.0 }
 0x2d1   : > { %v2985_v19 = vmax.f32 %v2530_v48, 0.0 }
 0x2d2   : > { %v8058_v25 = vpop.f32.mrf.mxu2  ;;  %v2968_v20 = vmax.f32 %v2436_v0, 0.0  ;;  %v2983_v30 = vmax.f32 %v2352_v3, 0.0  ;;  %v8105_v17 = vpack.c.bf16 %v2982_v37, %v2974_v11  ;;  %v2268_v37 = vadd.f32 %v8015_v34, %v8056_v38 }
 0x2d3   : > { %v8060_v61 = vpop.f32.mrf.mxu3  ;;  %v8069_v47 = vpop.f32.mrf.mxu0 }
 0x2d4   : > { %v8071_v31 = vpop.f32.mrf.mxu1  ;;  %v8097_v16 = vpack.c.bf16 %v2968_v20, %v2960_v49  ;;  %v8107_v35 = vpack.c.bf16 %v2983_v30, %v2975_v23  ;;  %v2439_v20 = vadd.f32 %v7994_v56, %v8087_v32  ;;  %v2528_v30 = vadd.f32 %v7996_v13, %v8087_v32 }
 0x2d5   : > { %v2266_v56 = vadd.f32 %v8003_v12, %v7986_v14  ;;  %v2355_v13 = vadd.f32 %v8007_v40, %v7986_v14  ;;  %v2998_v48 = vmax.f32 %v2268_v37, 0.0  ;;  %v5687_v37 = vld [vmem:[%s10481_s5 + $0x70] sm:$0xff] }
 0x2d6   : > { %2314 = vmatmul.bf16.gmra.mxu0 %v5685_v42  ;;  %10924 = vst [vmem:[#allocation39_spill] sm:$0xff] %v8097_v16  ;;  %v2976_v43 = vmax.f32 %v2439_v20, 0.0  ;;  %v2977_v23 = vmax.f32 %v2528_v30, 0.0 }
 0x2d7   : > { %2403 = vmatmul.bf16.gmra.mxu1 %v5685_v42  ;;  %v2990_v20 = vmax.f32 %v2266_v56, 0.0  ;;  %v2991_v30 = vmax.f32 %v2355_v13, 0.0 }
 0x2d9   : > { %v8148_v9 = vpack.c.bf16 %v2998_v48, %v2990_v20  ;;  %v2273_v48 = vadd.f32 %v8052_v26, %v7969_v50 }
 0x2da   : > { %v8079_v27 = vpop.f32.mrf.mxu2 }
 0x2db   : > { %v8085_v41 = vpop.f32.mrf.mxu3  ;;  %v8093_v0 = vpop.f32.mrf.mxu0 }
 0x2dc   : > { %v8095_v1 = vpop.f32.mrf.mxu1 }
 0x2df   : > { %2492 = vmatmul.bf16.gmra.mxu2 %v5685_v42 }
 0x2e0   : > { %2581 = vmatmul.bf16.gmra.mxu3 %v5685_v42  ;;  %v2441_v42 = vadd.f32 %v8011_v62, %v8023_v10  ;;  %v2357_v62 = vadd.f32 %v8019_v22, %v8056_v38  ;;  %v8142_v22 = vpack.c.bf16 %v2985_v19, %v2977_v23  ;;  %v2535_v19 = vadd.f32 %v8044_v58, %v8056_v38 }
 0x2e2   : > { %v8101_v2 = vpop.f32.mrf.mxu2  ;;  %v2984_v18 = vmax.f32 %v2441_v42, 0.0  ;;  %v2999_v10 = vmax.f32 %v2357_v62, 0.0  ;;  %10926 = vst [vmem:[#allocation46_spill] sm:$0xff] %v8142_v22  ;;  %v3001_v13 = vmax.f32 %v2535_v19, 0.0 }
 0x2e3   : > { %v8103_v5 = vpop.f32.mrf.mxu3  ;;  %v8112_v3 = vpop.f32.mrf.mxu0 }
 0x2e4   : > { %v8114_v49 = vpop.f32.mrf.mxu1  ;;  %v8140_v34 = vpack.c.bf16 %v2984_v18, %v2976_v43  ;;  %v8150_v40 = vpack.c.bf16 %v2999_v10, %v2991_v30  ;;  %v2444_v43 = vadd.f32 %v8025_v59, %v7986_v14  ;;  %v2533_v10 = vadd.f32 %v8027_v36, %v7986_v14 }
 0x2e5   : > { %v2271_v59 = vadd.f32 %v8032_v29, %v7975_v55  ;;  %v2360_v36 = vadd.f32 %v8034_v60, %v7975_v55  ;;  %v5688_v60 = vld [vmem:[%s10481_s5 + $0x78] sm:$0xff] }
 0x2e6   : > { %2319 = vmatmul.bf16.gmra.mxu0 %v5686_v28  ;;  %v2992_v58 = vmax.f32 %v2444_v43, 0.0  ;;  %v2993_v30 = vmax.f32 %v2533_v10, 0.0 }
 0x2e7   : > { %2408 = vmatmul.bf16.gmra.mxu1 %v5686_v28  ;;  %v3007_v52 = vmax.f32 %v2360_v36, 0.0 }
 0x2e8   : > { %v8179_v26 = vpack.c.bf16 %v3001_v13, %v2993_v30  ;;  %v2451_v13 = vadd.f32 %v8079_v27, %v7969_v50 }
 0x2ea   : > { %v8124_v6 = vpop.f32.mrf.mxu2  ;;  %v3016_v30 = vmax.f32 %v2451_v13, 0.0 }
 0x2eb   : > { %v8130_v11 = vpop.f32.mrf.mxu3  ;;  %v8136_v32 = vpop.f32.mrf.mxu0 }
 0x2ec   : > { %v8138_v42 = vpop.f32.mrf.mxu1 }
 0x2ef   : > { %2497 = vmatmul.bf16.gmra.mxu2 %v5686_v28 }
 0x2f0   : > { %2586 = vmatmul.bf16.gmra.mxu3 %v5686_v28  ;;  %v2446_v28 = vadd.f32 %v8040_v4, %v8056_v38  ;;  %v2362_v4 = vadd.f32 %v8054_v54, %v7969_v50  ;;  %v3006_v54 = vmax.f32 %v2271_v59, 0.0 }
 0x2f2   : > { %v8144_v39 = vpop.f32.mrf.mxu2  ;;  %v3000_v56 = vmax.f32 %v2446_v28, 0.0  ;;  %v3014_v28 = vmax.f32 %v2273_v48, 0.0  ;;  %v3015_v19 = vmax.f32 %v2362_v4, 0.0  ;;  %v2449_v4 = vadd.f32 %v8058_v25, %v7975_v55 }
 0x2f3   : > { %v8146_v12 = vpop.f32.mrf.mxu3  ;;  %v2285_v62 = vpop.f32.mrf.mxu0 }
 0x2f4   : > { %v8155_v18 = vpop.f32.mrf.mxu1  ;;  %v8177_v15 = vpack.c.bf16 %v3000_v56, %v2992_v58  ;;  %v8185_v29 = vpack.c.bf16 %v3014_v28, %v3006_v54  ;;  %v8187_v44 = vpack.c.bf16 %v3015_v19, %v3007_v52  ;;  %v2538_v52 = vadd.f32 %v8060_v61, %v7975_v55 }
 0x2f5   : > { %v3008_v27 = vmax.f32 %v2449_v4, 0.0 }
 0x2f6   : > { %2324 = vmatmul.bf16.gmra.mxu0 %v5687_v37  ;;  %v3009_v19 = vmax.f32 %v2538_v52, 0.0 }
 0x2f7   : > { %2413 = vmatmul.bf16.gmra.mxu1 %v5687_v37  ;;  %v8209_v55 = vpack.c.bf16 %v3016_v30, %v3008_v27  ;;  %v2283_v30 = vadd.f32 %v8136_v32, %v7984_v33 }
 0x2fa   : > { %v8165_v23 = vpop.f32.mrf.mxu2 }
 0x2fb   : > { %v8171_v20 = vpop.f32.mrf.mxu3  ;;  %v2287_v14 = vpop.f32.mrf.mxu0 }
 0x2fc   : > { %v2376_v38 = vpop.f32.mrf.mxu1  ;;  %v2288_v46 = vadd.f32 %v2287_v14, %v7852_v63 }
 0x2ff   : > { %2502 = vmatmul.bf16.gmra.mxu2 %v5687_v37 }
 0x300   : > { %2591 = vmatmul.bf16.gmra.mxu3 %v5687_v37  ;;  %v2540_v37 = vadd.f32 %v8085_v41, %v7969_v50  ;;  %v10927_v50 = vld [vmem:[#allocation54_spill] sm:$0xff] }
 0x302   : > { %v8181_v43 = vpop.f32.mrf.mxu2  ;;  %v3017_v59 = vmax.f32 %v2540_v37, 0.0  ;;  %v2377_v37 = vadd.f32 %v2376_v38, %v7852_v63 }
 0x303   : > { %v8183_v10 = vpop.f32.mrf.mxu3  ;;  %v2290_v48 = vpop.f32.mrf.mxu0 }
 0x304   : > { %v2379_v56 = vpop.f32.mrf.mxu1  ;;  %v2291_v28 = vadd.f32 %v2290_v48, %v7920_v45  ;;  %v8211_v13 = vpack.c.bf16 %v3017_v59, %v3009_v19  ;;  %v3062_v59 = vmax.f32 %v2288_v46, 0.0  ;;  %v3063_v38 = vmax.f32 %v2377_v37, 0.0 }
 0x305   : > { %v2380_v41 = vadd.f32 %v2379_v56, %v7920_v45  ;;  %v2286_v56 = vadd.f32 %v2285_v62, %v7860_v21  ;;  %v2281_v62 = vadd.f32 %v8112_v3, %v7884_v51  ;;  %v2370_v46 = vadd.f32 %v8114_v49, %v7884_v51 }
 0x306   : > { %2329 = vmatmul.bf16.gmra.mxu0 %v5688_v60  ;;  %v3070_v48 = vmax.f32 %v2291_v28, 0.0  ;;  %v2278_v28 = vadd.f32 %v8093_v0, %v7965_v7  ;;  %v3046_v3 = vmax.f32 %v2283_v30, 0.0  ;;  %v5805_v0 = vld [vmem:[%s10481_s5] sm:$0xff] }
 0x307   : > { %2418 = vmatmul.bf16.gmra.mxu1 %v5688_v60  ;;  %v3071_v52 = vmax.f32 %v2380_v41, 0.0  ;;  %v2545_v41 = vadd.f32 %v8130_v11, %v7965_v7  ;;  %v2543_v11 = vadd.f32 %v8103_v5, %v7998_v57 }
 0x309   : > { %v3033_v30 = vmax.f32 %v2545_v41, 0.0 }
 0x30a   : > { %v8200_v58 = vpop.f32.mrf.mxu2 }
 0x30b   : > { %v8202_v36 = vpop.f32.mrf.mxu3  ;;  %v2292_v54 = vpop.f32.mrf.mxu0 }
 0x30c   : > { %v2293_v8 = vadd.f32 %v2292_v54, %v10927_v50  ;;  %v2381_v25 = vpop.f32.mrf.mxu1  ;;  %v2375_v54 = vadd.f32 %v8155_v18, %v7860_v21 }
 0x30d   : > { %v2382_v61 = vadd.f32 %v2381_v25, %v10927_v50 }
 0x30e   : > { %v3078_v4 = vmax.f32 %v2293_v8, 0.0  ;;  %v2372_v8 = vadd.f32 %v8138_v42, %v7984_v33  ;;  %v3055_v32 = vmax.f32 %v2375_v54, 0.0  ;;  %v2456_v42 = vadd.f32 %v8124_v6, %v7965_v7 }
 0x30f   : > { %2507 = vmatmul.bf16.gmra.mxu2 %v5688_v60  ;;  %v3079_v16 = vmax.f32 %v2382_v61, 0.0  ;;  %v2367_v61 = vadd.f32 %v8095_v1, %v7965_v7  ;;  %v2454_v6 = vadd.f32 %v8101_v2, %v7998_v57  ;;  %v2365_v1 = vadd.f32 %v8071_v31, %v7998_v57 }
 0x310   : > { %2596 = vmatmul.bf16.gmra.mxu3 %v5688_v60  ;;  %v3270_v14 = vpack.c.bf16 %v3078_v4, %v3070_v48  ;;  %v3054_v60 = vmax.f32 %v2286_v56, 0.0  ;;  %v3047_v37 = vmax.f32 %v2372_v8, 0.0  ;;  %v3263_v49 = vpack.c.bf16 %v3063_v38, %v3055_v32 }
 0x311   : > { %v3271_v27 = vpack.c.bf16 %v3079_v16, %v3071_v52  ;;  %v2276_v48 = vadd.f32 %v8069_v47, %v7998_v57  ;;  %v3038_v4 = vmax.f32 %v2281_v62, 0.0  ;;  %v3039_v56 = vmax.f32 %v2370_v46, 0.0 }
 0x312   : > { %v8217_v22 = vpop.f32.mrf.mxu2  ;;  %3534 = vmatpush.bf16.msra.mxu0 %v3270_v14  ;;  %v3262_v25 = vpack.c.bf16 %v3062_v59, %v3054_v60  ;;  %v3030_v54 = vmax.f32 %v2278_v28, 0.0  ;;  %v3032_v14 = vmax.f32 %v2456_v42, 0.0  ;;  %v3024_v38 = vmax.f32 %v2454_v6, 0.0 }
 0x313   : > { %v8221_v19 = vpop.f32.mrf.mxu3  ;;  %3632 = vmatpush.bf16.msra.mxu2 %v3271_v27  ;;  %v8227_v18 = vpop.f32.mrf.mxu0  ;;  %v3254_v47 = vpack.c.bf16 %v3046_v3, %v3038_v4  ;;  %v3031_v27 = vmax.f32 %v2367_v61, 0.0  ;;  %v3255_v8 = vpack.c.bf16 %v3047_v37, %v3039_v56  ;;  %v3022_v2 = vmax.f32 %v2276_v48, 0.0 }
 0x314   : > { %v8233_v16 = vpop.f32.mrf.mxu1  ;;  %v3025_v60 = vmax.f32 %v2543_v11, 0.0  ;;  %v3023_v62 = vmax.f32 %v2365_v1, 0.0  ;;  %v8256_v46 = vpack.c.bf16 %v3032_v14, %v3024_v38  ;;  %v2558_v48 = vadd.f32 %v8221_v19, %v7920_v45 }
 0x315   : > { %v3246_v31 = vpack.c.bf16 %v3030_v54, %v3022_v2  ;;  %v2466_v11 = vadd.f32 %v8200_v58, %v7852_v63  ;;  %v2555_v1 = vadd.f32 %v8202_v36, %v7852_v63  ;;  %v2553_v58 = vadd.f32 %v8183_v10, %v7860_v21 }
 0x316   : > { %2610 = vmatmul.bf16.vlgmr.msrb.gmra.mxu0 %v5805_v0  ;;  %v8258_v28 = vpack.c.bf16 %v3033_v30, %v3025_v60  ;;  %v3247_v42 = vpack.c.bf16 %v3031_v27, %v3023_v62  ;;  %v2461_v36 = vadd.f32 %v8165_v23, %v7984_v33  ;;  %v2550_v14 = vadd.f32 %v8171_v20, %v7984_v33 }
 0x317   : > { %2699 = vmatmul.bf16.vlgmr.msrb.gmra.mxu1 %v5805_v0  ;;  %3535 = vmatpush.bf16.msra.mxu0 %v3262_v25  ;;  %v3064_v54 = vmax.f32 %v2466_v11, 0.0  ;;  %v2548_v23 = vadd.f32 %v8146_v12, %v7884_v51  ;;  %v5807_v12 = vld [vmem:[%s10481_s5 + $0x10] sm:$0xff] }
 0x318   : > { %3633 = vmatpush.bf16.msra.mxu2 %v3263_v49  ;;  %v3048_v20 = vmax.f32 %v2461_v36, 0.0  ;;  %v3049_v2 = vmax.f32 %v2550_v14, 0.0 }
 0x31a   : > { %v2470_v52 = vpop.f32.mrf.mxu2 }
 0x31b   : > { %v2559_v59 = vpop.f32.mrf.mxu3  ;;  %3536 = vmatpush.bf16.msra.mxu0 %v3254_v47  ;;  %v8252_v5 = vpop.f32.mrf.mxu0  ;;  %v2471_v37 = vadd.f32 %v2470_v52, %v10927_v50  ;;  %v3073_v52 = vmax.f32 %v2558_v48, 0.0  ;;  %v3057_v47 = vmax.f32 %v2553_v58, 0.0 }
 0x31c   : > { %3634 = vmatpush.bf16.msra.mxu2 %v3255_v8  ;;  %v8254_v32 = vpop.f32.mrf.mxu1  ;;  %v2560_v49 = vadd.f32 %v2559_v59, %v10927_v50 }
 0x31d   : > { %v3080_v4 = vmax.f32 %v2471_v37, 0.0 }
 0x31f   : > { %2788 = vmatmul.bf16.vlgmr.msrb.gmra.mxu2 %v5805_v0  ;;  %3537 = vmatpush.bf16.msra.mxu0 %v3246_v31 }
 0x320   : > { %2877 = vmatmul.bf16.vlgmr.msrb.gmra.mxu3 %v5805_v0  ;;  %3635 = vmatpush.bf16.msra.mxu2 %v3247_v42  ;;  %v5806_v0 = vld [vmem:[%s10481_s5 + $0x8] sm:$0xff] }
 0x322   : > { %v8260_v41 = vpop.f32.mrf.mxu2 }
 0x323   : > { %v8262_v3 = vpop.f32.mrf.mxu3  ;;  %3538 = vmatpush.bf16.msra.mxu0 %v8185_v29  ;;  %v8265_v25 = vpop.f32.mrf.mxu0  ;;  %v2469_v29 = vadd.f32 %v8217_v22, %v7920_v45  ;;  %v10942_v45 = vld [vmem:[#allocation11_spill] sm:$0xff] }
 0x324   : > { %3636 = vmatpush.bf16.msra.mxu2 %v8187_v44  ;;  %v8268_v61 = vpop.f32.mrf.mxu1 }
 0x325   : > { %v3072_v56 = vmax.f32 %v2469_v29, 0.0  ;;  %v8330_v29 = vpop.permute.xlu2 %2087 }
 0x326   : > { %2615 = vmatmul.bf16.gmra.mxu0 %v5806_v0  ;;  %10928 = vst [vmem:[#allocation37_spill] sm:$0xff] %v8330_v29 }
 0x327   : > { %2704 = vmatmul.bf16.gmra.mxu1 %v5806_v0  ;;  %3539 = vmatpush.bf16.msra.mxu0 %v8148_v9  ;;  %v3081_v9 = vmax.f32 %v2560_v49, 0.0 }
 0x328   : > { %3637 = vmatpush.bf16.msra.mxu2 %v8150_v40  ;;  %v2464_v40 = vadd.f32 %v8181_v43, %v7860_v21  ;;  %v3065_v43 = vmax.f32 %v2555_v1, 0.0 }
 0x329   : > { %v3273_v30 = vpack.c.bf16 %v3081_v9, %v3073_v52 }
 0x32a   : > { %v8279_v44 = vpop.f32.mrf.mxu2  ;;  %v3056_v59 = vmax.f32 %v2464_v40, 0.0  ;;  %v3265_v38 = vpack.c.bf16 %v3065_v43, %v3057_v47 }
 0x32b   : > { %v8283_v6 = vpop.f32.mrf.mxu3  ;;  %3540 = vmatpush.bf16.msra.mxu0 %v8105_v17  ;;  %v8290_v22 = vpop.f32.mrf.mxu0  ;;  %v3272_v17 = vpack.c.bf16 %v3080_v4, %v3072_v56 }
 0x32c   : > { %3638 = vmatpush.bf16.msra.mxu2 %v8107_v35  ;;  %v8295_v19 = vpop.f32.mrf.mxu1  ;;  %v2459_v35 = vadd.f32 %v8144_v39, %v7884_v51  ;;  %v3264_v8 = vpack.c.bf16 %v3064_v54, %v3056_v59  ;;  %v10933_v54 = vld [vmem:[#allocation45_spill] sm:$0xff] }
 0x32d   : > { %v8359_v40 = vpop.permute.xlu2 %2072 }
 0x32e   : > { %v3040_v39 = vmax.f32 %v2459_v35, 0.0  ;;  %10931 = vst [vmem:[#allocation30_spill] sm:$0xff] %v8359_v40  ;;  %v2296_v56 = vadd.f32 %v8227_v18, %v8359_v40  ;;  %v2385_v58 = vadd.f32 %v8233_v16, %v8359_v40 }
 0x32f   : > { %2793 = vmatmul.bf16.gmra.mxu2 %v5806_v0  ;;  %3541 = vmatpush.bf16.msra.mxu0 %v8062_v53 }
 0x330   : > { %2882 = vmatmul.bf16.gmra.mxu3 %v5806_v0  ;;  %3639 = vmatpush.bf16.msra.mxu2 %v8064_v24  ;;  %v3041_v24 = vmax.f32 %v2548_v23, 0.0  ;;  %v3256_v62 = vpack.c.bf16 %v3048_v20, %v3040_v39  ;;  %v3087_v14 = vmax.f32 %v2385_v58, 0.0  ;;  %v5809_v20 = vld [vmem:[%s10481_s5 + $0x20] sm:$0xff] }
 0x332   : > { %v8307_v10 = vpop.f32.mrf.mxu2  ;;  %v3257_v31 = vpack.c.bf16 %v3049_v2, %v3041_v24  ;;  %v2563_v2 = vadd.f32 %v8262_v3, %v8359_v40 }
 0x333   : > { %3730 = vmatpush.bf16.msrb.mxu0 %v3272_v17  ;;  %v8311_v27 = vpop.f32.mrf.mxu3  ;;  %v8313_v53 = vpop.f32.mrf.mxu0  ;;  %v3086_v17 = vmax.f32 %v2296_v56, 0.0 }
 0x334   : > { %3828 = vmatpush.bf16.msrb.mxu2 %v3273_v30  ;;  %v8315_v60 = vpop.f32.mrf.mxu1 }
 0x336   : > { %2620 = vmatmul.bf16.gmra.mxu0 %v5807_v12 }
 0x337   : > { %3731 = vmatpush.bf16.msrb.mxu0 %v3264_v8  ;;  %2709 = vmatmul.bf16.gmra.mxu1 %v5807_v12  ;;  %v2474_v8 = vadd.f32 %v8260_v41, %v8359_v40 }
 0x338   : > { %3829 = vmatpush.bf16.msrb.mxu2 %v3265_v38 }
 0x33a   : > { %v8320_v42 = vpop.f32.mrf.mxu2 }
 0x33b   : > { %3732 = vmatpush.bf16.msrb.mxu0 %v3256_v62  ;;  %v8322_v37 = vpop.f32.mrf.mxu3  ;;  %v8324_v0 = vpop.f32.mrf.mxu0  ;;  %v3088_v62 = vmax.f32 %v2474_v8, 0.0 }
 0x33c   : > { %3830 = vmatpush.bf16.msrb.mxu2 %v3257_v31  ;;  %v8326_v49 = vpop.f32.mrf.mxu1  ;;  %v3089_v31 = vmax.f32 %v2563_v2, 0.0 }
 0x33f   : > { %3733 = vmatpush.bf16.msrb.mxu0 %v8256_v46  ;;  %2798 = vmatmul.bf16.gmra.mxu2 %v5807_v12  ;;  %v5808_v46 = vld [vmem:[%s10481_s5 + $0x18] sm:$0xff] }
 0x340   : > { %3831 = vmatpush.bf16.msrb.mxu2 %v8258_v28  ;;  %2887 = vmatmul.bf16.gmra.mxu3 %v5807_v12  ;;  %v8347_v28 = vpop.permute.xlu0 %2077 }
 0x341   : > { %10929 = vst [vmem:[#allocation52_spill] sm:$0xff] %v8347_v28  ;;  %v2476_v23 = vadd.f32 %v8279_v44, %v8347_v28  ;;  %v2565_v47 = vadd.f32 %v8283_v6, %v8347_v28  ;;  %v2303_v44 = vadd.f32 %v8290_v22, %v8330_v29  ;;  %v2392_v6 = vadd.f32 %v8295_v19, %v8330_v29 }
 0x342   : > { %v8332_v48 = vpop.f32.mrf.mxu2 }
 0x343   : > { %3734 = vmatpush.bf16.msrb.mxu0 %v8209_v55  ;;  %v8335_v11 = vpop.f32.mrf.mxu3  ;;  %v8338_v4 = vpop.f32.mrf.mxu0  ;;  %v3096_v39 = vmax.f32 %v2476_v23, 0.0  ;;  %v3097_v24 = vmax.f32 %v2565_v47, 0.0  ;;  %v3111_v56 = vmax.f32 %v2392_v6, 0.0  ;;  %v2570_v23 = vadd.f32 %v8322_v37, %v8330_v29  ;;  %v5810_v47 = vld [vmem:[%s10481_s5 + $0x28] sm:$0xff] }
 0x344   : > { %3832 = vmatpush.bf16.msrb.mxu2 %v8211_v13  ;;  %v8340_v1 = vpop.f32.mrf.mxu1  ;;  %v2298_v13 = vadd.f32 %v8252_v5, %v8347_v28  ;;  %v10932_v5 = vld [vmem:[#allocation39_spill] sm:$0xff] }
 0x345   : > { %v8410_v22 = vpack.c.bf16 %v3096_v39, %v3088_v62  ;;  %v8412_v58 = vpack.c.bf16 %v3097_v24, %v3089_v31  ;;  %v3113_v24 = vmax.f32 %v2570_v23, 0.0 }
 0x346   : > { %2625 = vmatmul.bf16.gmra.mxu0 %v5808_v46  ;;  %v3094_v36 = vmax.f32 %v2298_v13, 0.0 }
 0x347   : > { %3735 = vmatpush.bf16.msrb.mxu0 %v8177_v15  ;;  %2714 = vmatmul.bf16.gmra.mxu1 %v5808_v46  ;;  %v2387_v15 = vadd.f32 %v8254_v32, %v8347_v28 }
 0x348   : > { %3833 = vmatpush.bf16.msrb.mxu2 %v8179_v26  ;;  %v10930_v26 = vld [vmem:[#allocation46_spill] sm:$0xff]  ;;  %v8375_v30 = vpack.c.bf16 %v3094_v36, %v3086_v17 }
 0x349   : > { %v3095_v32 = vmax.f32 %v2387_v15, 0.0 }
 0x34a   : > { %v8349_v55 = vpop.f32.mrf.mxu2 }
 0x34b   : > { %3736 = vmatpush.bf16.msrb.mxu0 %v8140_v34  ;;  %v8356_v9 = vpop.f32.mrf.mxu3  ;;  %v8365_v52 = vpop.f32.mrf.mxu0  ;;  %v8377_v16 = vpack.c.bf16 %v3095_v32, %v3087_v14  ;;  %v2481_v14 = vadd.f32 %v8320_v42, %v8330_v29  ;;  %v10935_v42 = vld [vmem:[#allocation22_spill] sm:$0xff] }
 0x34c   : > { %3834 = vmatpush.bf16.msrb.mxu2 %v10930_v26  ;;  %v8367_v34 = vpop.f32.mrf.mxu1  ;;  %v3110_v26 = vmax.f32 %v2303_v44, 0.0  ;;  %v2308_v44 = vadd.f32 %v8324_v0, %v10935_v42  ;;  %v2397_v37 = vadd.f32 %v8326_v49, %v10935_v42 }
 0x34d   : > { %v3112_v39 = vmax.f32 %v2481_v14, 0.0 }
 0x34f   : > { %3737 = vmatpush.bf16.msrb.mxu0 %v10932_v5  ;;  %2803 = vmatmul.bf16.gmra.mxu2 %v5808_v46 }
 0x350   : > { %3835 = vmatpush.bf16.msrb.mxu2 %v10933_v54  ;;  %2892 = vmatmul.bf16.gmra.mxu3 %v5808_v46  ;;  %v10934_v46 = vld [vmem:[#allocation24_spill] sm:$0xff] }
 0x351   : > { %v2301_v41 = vadd.f32 %v8265_v25, %v10934_v46  ;;  %v2390_v3 = vadd.f32 %v8268_v61, %v10934_v46  ;;  %v2568_v8 = vadd.f32 %v8311_v27, %v10934_v46 }
 0x352   : > { %v8371_v43 = vpop.f32.mrf.mxu2 }
 0x353   : > { %v8373_v18 = vpop.f32.mrf.mxu3  ;;  %v8379_v35 = vpop.f32.mrf.mxu0  ;;  %v3102_v19 = vmax.f32 %v2301_v41, 0.0  ;;  %v3103_v5 = vmax.f32 %v2390_v3, 0.0  ;;  %v3105_v31 = vmax.f32 %v2568_v8, 0.0  ;;  %v10936_v41 = vld [vmem:[#allocation32_spill] sm:$0xff] }
 0x354   : > { %v8381_v59 = vpop.f32.mrf.mxu1  ;;  %v2395_v27 = vadd.f32 %v8315_v60, %v10936_v41 }
 0x355   : > { %v8418_v32 = vpack.c.bf16 %v3110_v26, %v3102_v19  ;;  %v8420_v61 = vpack.c.bf16 %v3111_v56, %v3103_v5  ;;  %v3126_v56 = vmax.f32 %v2308_v44, 0.0  ;;  %v3127_v19 = vmax.f32 %v2397_v37, 0.0 }
 0x356   : > { %2630 = vmatmul.bf16.gmra.mxu0 %v5809_v20  ;;  %v8455_v5 = vpack.c.bf16 %v3113_v24, %v3105_v31  ;;  %v3119_v14 = vmax.f32 %v2395_v27, 0.0  ;;  %v2575_v24 = vadd.f32 %v8356_v9, %v10935_v42  ;;  %v2484_v44 = vadd.f32 %v8332_v48, %v10936_v41 }
 0x357   : > { %2719 = vmatmul.bf16.gmra.mxu1 %v5809_v20  ;;  %v2573_v37 = vadd.f32 %v8335_v11, %v10936_v41 }
 0x358   : > { %v8463_v60 = vpack.c.bf16 %v3127_v19, %v3119_v14  ;;  %v3120_v19 = vmax.f32 %v2484_v44, 0.0  ;;  %v10938_v14 = vld [vmem:[#allocation6_spill] sm:$0xff] }
 0x359   : > { %v2311_v48 = vadd.f32 %v8338_v4, %v10938_v14  ;;  %v2400_v11 = vadd.f32 %v8340_v1, %v10938_v14 }
 0x35a   : > { %v8394_v38 = vpop.f32.mrf.mxu2 }
 0x35b   : > { %v8400_v12 = vpop.f32.mrf.mxu3  ;;  %v8406_v13 = vpop.f32.mrf.mxu0  ;;  %v3135_v40 = vmax.f32 %v2400_v11, 0.0 }
 0x35c   : > { %v8408_v15 = vpop.f32.mrf.mxu1 }
 0x35f   : > { %2808 = vmatmul.bf16.gmra.mxu2 %v5809_v20 }
 0x360   : > { %2897 = vmatmul.bf16.gmra.mxu3 %v5809_v20  ;;  %v2479_v20 = vadd.f32 %v8307_v10, %v10934_v46  ;;  %v2306_v10 = vadd.f32 %v8313_v53, %v10936_v41 }
 0x362   : > { %v8414_v36 = vpop.f32.mrf.mxu2  ;;  %v3104_v62 = vmax.f32 %v2479_v20, 0.0  ;;  %v3118_v49 = vmax.f32 %v2306_v10, 0.0  ;;  %v3129_v10 = vmax.f32 %v2575_v24, 0.0 }
 0x363   : > { %v8416_v25 = vpop.f32.mrf.mxu3  ;;  %v8422_v54 = vpop.f32.mrf.mxu0 }
 0x364   : > { %v8424_v17 = vpop.f32.mrf.mxu1  ;;  %v8453_v0 = vpack.c.bf16 %v3112_v39, %v3104_v62  ;;  %v8461_v20 = vpack.c.bf16 %v3126_v56, %v3118_v49  ;;  %v2486_v39 = vadd.f32 %v8349_v55, %v10935_v42  ;;  %v10937_v55 = vld [vmem:[#allocation18_spill] sm:$0xff]  ;;  %v3121_v49 = vmax.f32 %v2573_v37, 0.0 }
 0x365   : > { %v2313_v27 = vadd.f32 %v8365_v52, %v10937_v55  ;;  %v2402_v9 = vadd.f32 %v8367_v34, %v10937_v55  ;;  %v3134_v34 = vmax.f32 %v2311_v48, 0.0  ;;  %v10939_v48 = vld [vmem:[#allocation8_spill] sm:$0xff] }
 0x366   : > { %2635 = vmatmul.bf16.gmra.mxu0 %v5810_v47  ;;  %v3128_v31 = vmax.f32 %v2486_v39, 0.0  ;;  %v8490_v52 = vpack.c.bf16 %v3129_v10, %v3121_v49  ;;  %v2580_v10 = vadd.f32 %v8400_v12, %v10937_v55 }
 0x367   : > { %2724 = vmatmul.bf16.gmra.mxu1 %v5810_v47  ;;  %v3142_v39 = vmax.f32 %v2313_v27, 0.0  ;;  %v3143_v24 = vmax.f32 %v2402_v9, 0.0  ;;  %v2489_v27 = vadd.f32 %v8371_v43, %v10938_v14  ;;  %v10941_v43 = vld [vmem:[#allocation13_spill] sm:$0xff] }
 0x368   : > { %v8488_v29 = vpack.c.bf16 %v3128_v31, %v3120_v19  ;;  %v2491_v31 = vadd.f32 %v8394_v38, %v10937_v55  ;;  %v3145_v49 = vmax.f32 %v2580_v10, 0.0  ;;  %v10940_v55 = vld [vmem:[#allocation21_spill] sm:$0xff] }
 0x369   : > { %v8496_v4 = vpack.c.bf16 %v3142_v39, %v3134_v34  ;;  %v8498_v28 = vpack.c.bf16 %v3143_v24, %v3135_v40  ;;  %v2578_v40 = vadd.f32 %v8373_v18, %v10938_v14  ;;  %v3136_v11 = vmax.f32 %v2489_v27, 0.0 }
 0x36a   : > { %v8437_v2 = vpop.f32.mrf.mxu2  ;;  %v3144_v19 = vmax.f32 %v2491_v31, 0.0 }
 0x36b   : > { %v8443_v6 = vpop.f32.mrf.mxu3  ;;  %v8449_v3 = vpop.f32.mrf.mxu0  ;;  %v3137_v39 = vmax.f32 %v2578_v40, 0.0 }
 0x36c   : > { %v8451_v26 = vpop.f32.mrf.mxu1  ;;  %v8521_v31 = vpack.c.bf16 %v3144_v19, %v3136_v11  ;;  %v10945_v11 = vld [vmem:[#allocation25_spill] sm:$0xff] }
 0x36d   : > { %v8523_v10 = vpack.c.bf16 %v3145_v49, %v3137_v39  ;;  %v2318_v39 = vadd.f32 %v8406_v13, %v10945_v11  ;;  %v5813_v13 = vld [vmem:[%s10481_s5 + $0x40] sm:$0xff] }
 0x36f   : > { %2813 = vmatmul.bf16.gmra.mxu2 %v5810_v47 }
 0x370   : > { %2902 = vmatmul.bf16.gmra.mxu3 %v5810_v47  ;;  %v5811_v47 = vld [vmem:[%s10481_s5 + $0x30] sm:$0xff] }
 0x372   : > { %v8457_v23 = vpop.f32.mrf.mxu2 }
 0x373   : > { %v8459_v53 = vpop.f32.mrf.mxu3  ;;  %v2325_v8 = vpop.f32.mrf.mxu0 }
 0x374   : > { %v2414_v46 = vpop.f32.mrf.mxu1 }
 0x376   : > { %2640 = vmatmul.bf16.gmra.mxu0 %v5811_v47 }
 0x377   : > { %2729 = vmatmul.bf16.gmra.mxu1 %v5811_v47 }
 0x37a   : > { %v8476_v62 = vpop.f32.mrf.mxu2 }
 0x37b   : > { %v8482_v56 = vpop.f32.mrf.mxu3  ;;  %v2327_v41 = vpop.f32.mrf.mxu0 }
 0x37c   : > { %v2416_v42 = vpop.f32.mrf.mxu1  ;;  %v2328_v33 = vadd.f32 %v2327_v41, %v10940_v55 }
 0x37d   : > { %v2417_v18 = vadd.f32 %v2416_v42, %v10940_v55 }
 0x37e   : > { %v3190_v42 = vmax.f32 %v2328_v33, 0.0 }
 0x37f   : > { %2818 = vmatmul.bf16.gmra.mxu2 %v5811_v47  ;;  %v3191_v49 = vmax.f32 %v2417_v18, 0.0 }
 0x380   : > { %2907 = vmatmul.bf16.gmra.mxu3 %v5811_v47  ;;  %v5812_v47 = vld [vmem:[%s10481_s5 + $0x38] sm:$0xff] }
 0x382   : > { %v8492_v44 = vpop.f32.mrf.mxu2 }
 0x383   : > { %v8494_v37 = vpop.f32.mrf.mxu3  ;;  %v2330_v1 = vpop.f32.mrf.mxu0 }
 0x384   : > { %v2419_v51 = vpop.f32.mrf.mxu1  ;;  %v2331_v12 = vadd.f32 %v2330_v1, %v10939_v48  ;;  %v2326_v1 = vadd.f32 %v2325_v8, %v10942_v45 }
 0x385   : > { %v2420_v24 = vadd.f32 %v2419_v51, %v10939_v48  ;;  %v2415_v51 = vadd.f32 %v2414_v46, %v10942_v45 }
 0x386   : > { %2645 = vmatmul.bf16.gmra.mxu0 %v5812_v47  ;;  %v3198_v27 = vmax.f32 %v2331_v12, 0.0  ;;  %v3182_v46 = vmax.f32 %v2326_v1, 0.0 }
 0x387   : > { %2734 = vmatmul.bf16.gmra.mxu1 %v5812_v47  ;;  %v3199_v41 = vmax.f32 %v2420_v24, 0.0 }
 0x388   : > { %v3326_v18 = vpack.c.bf16 %v3190_v42, %v3182_v46 }
 0x38a   : > { %v8511_v9 = vpop.f32.mrf.mxu2 }
 0x38b   : > { %v8513_v38 = vpop.f32.mrf.mxu3  ;;  %v2332_v34 = vpop.f32.mrf.mxu0 }
 0x38c   : > { %v2333_v21 = vadd.f32 %v2332_v34, %v10941_v43  ;;  %v2421_v63 = vpop.f32.mrf.mxu1  ;;  %v10943_v34 = vld [vmem:[#allocation27_spill] sm:$0xff] }
 0x38d   : > { %v2422_v14 = vadd.f32 %v2421_v63, %v10941_v43  ;;  %v2323_v57 = vadd.f32 %v8449_v3, %v10943_v34  ;;  %v2412_v19 = vadd.f32 %v8451_v26, %v10943_v34  ;;  %v3183_v3 = vmax.f32 %v2415_v51, 0.0 }
 0x38e   : > { %v3206_v40 = vmax.f32 %v2333_v21, 0.0  ;;  %v10944_v21 = vld [vmem:[#allocation29_spill] sm:$0xff] }
 0x38f   : > { %2823 = vmatmul.bf16.gmra.mxu2 %v5812_v47  ;;  %v3207_v50 = vmax.f32 %v2422_v14, 0.0  ;;  %v2410_v14 = vadd.f32 %v8424_v17, %v10944_v21  ;;  %v3174_v26 = vmax.f32 %v2323_v57, 0.0  ;;  %v3175_v17 = vmax.f32 %v2412_v19, 0.0 }
 0x390   : > { %2912 = vmatmul.bf16.gmra.mxu3 %v5812_v47  ;;  %v3334_v7 = vpack.c.bf16 %v3206_v40, %v3198_v27  ;;  %v2321_v47 = vadd.f32 %v8422_v54, %v10944_v21  ;;  %v2585_v54 = vadd.f32 %v8443_v6, %v10945_v11  ;;  %v3327_v1 = vpack.c.bf16 %v3191_v49, %v3183_v3  ;;  %v10946_v27 = vld [vmem:[#allocation12_spill] sm:$0xff] }
 0x391   : > { %v3335_v8 = vpack.c.bf16 %v3207_v50, %v3199_v41  ;;  %v2407_v50 = vadd.f32 %v8408_v15, %v10945_v11  ;;  %v2316_v40 = vadd.f32 %v8379_v35, %v10946_v27  ;;  %v2405_v57 = vadd.f32 %v8381_v59, %v10946_v27 }
 0x392   : > { %v8529_v63 = vpop.f32.mrf.mxu2  ;;  %3583 = vmatpush.bf16.msra.mxu1 %v3334_v7  ;;  %v2496_v7 = vadd.f32 %v8437_v2, %v10945_v11  ;;  %v3166_v51 = vmax.f32 %v2321_v47, 0.0  ;;  %v2494_v15 = vadd.f32 %v8414_v36, %v10946_v27  ;;  %v2583_v2 = vadd.f32 %v8416_v25, %v10946_v27 }
 0x393   : > { %v8533_v12 = vpop.f32.mrf.mxu3  ;;  %3681 = vmatpush.bf16.msra.mxu3 %v3335_v8  ;;  %v8539_v33 = vpop.f32.mrf.mxu0  ;;  %v3167_v6 = vmax.f32 %v2410_v14, 0.0  ;;  %v3158_v35 = vmax.f32 %v2318_v39, 0.0  ;;  %v3159_v19 = vmax.f32 %v2407_v50, 0.0  ;;  %v3161_v8 = vmax.f32 %v2585_v54, 0.0 }
 0x394   : > { %v8545_v24 = vpop.f32.mrf.mxu1  ;;  %v3318_v42 = vpack.c.bf16 %v3174_v26, %v3166_v51  ;;  %v3160_v49 = vmax.f32 %v2496_v7, 0.0  ;;  %v3150_v3 = vmax.f32 %v2316_v40, 0.0  ;;  %v3151_v59 = vmax.f32 %v2405_v57, 0.0 }
 0x395   : > { %v3319_v46 = vpack.c.bf16 %v3175_v17, %v3167_v6  ;;  %v3153_v11 = vmax.f32 %v2583_v2, 0.0  ;;  %v2506_v6 = vadd.f32 %v8511_v9, %v10940_v55  ;;  %v2590_v9 = vadd.f32 %v8482_v56, %v10943_v34 }
 0x396   : > { %2650 = vmatmul.bf16.gmra.mxu0 %v5813_v13  ;;  %3584 = vmatpush.bf16.msra.mxu1 %v3326_v18  ;;  %v3152_v18 = vmax.f32 %v2494_v15, 0.0  ;;  %v3310_v14 = vpack.c.bf16 %v3158_v35, %v3150_v3  ;;  %v2595_v15 = vadd.f32 %v8513_v38, %v10940_v55  ;;  %v2504_v38 = vadd.f32 %v8492_v44, %v10942_v45 }
 0x397   : > { %2739 = vmatmul.bf16.gmra.mxu1 %v5813_v13  ;;  %3682 = vmatpush.bf16.msra.mxu3 %v3327_v1  ;;  %v3311_v1 = vpack.c.bf16 %v3159_v19, %v3151_v59  ;;  %v8568_v26 = vpack.c.bf16 %v3161_v8, %v3153_v11  ;;  %v5814_v11 = vld [vmem:[%s10481_s5 + $0x48] sm:$0xff]  ;;  %v2499_v56 = vadd.f32 %v8457_v23, %v10944_v21  ;;  %v5815_v23 = vld [vmem:[%s10481_s5 + $0x50] sm:$0xff] }
 0x398   : > { %v8566_v39 = vpack.c.bf16 %v3160_v49, %v3152_v18 }
 0x39a   : > { %v2510_v41 = vpop.f32.mrf.mxu2  ;;  %3585 = vmatpush.bf16.msra.mxu1 %v3318_v42  ;;  %v3193_v42 = vmax.f32 %v2595_v15, 0.0 }
 0x39b   : > { %v2599_v47 = vpop.f32.mrf.mxu3  ;;  %3683 = vmatpush.bf16.msra.mxu3 %v3319_v46  ;;  %v8562_v36 = vpop.f32.mrf.mxu0  ;;  %v2511_v51 = vadd.f32 %v2510_v41, %v10941_v43 }
 0x39c   : > { %v8564_v25 = vpop.f32.mrf.mxu1  ;;  %v2600_v40 = vadd.f32 %v2599_v47, %v10941_v43  ;;  %v3184_v47 = vmax.f32 %v2504_v38, 0.0 }
 0x39e   : > { %3586 = vmatpush.bf16.msra.mxu1 %v3310_v14  ;;  %v3209_v2 = vmax.f32 %v2600_v40, 0.0 }
 0x39f   : > { %2828 = vmatmul.bf16.gmra.mxu2 %v5813_v13  ;;  %3684 = vmatpush.bf16.msra.mxu3 %v3311_v1 }
 0x3a0   : > { %2917 = vmatmul.bf16.gmra.mxu3 %v5813_v13  ;;  %v2509_v13 = vadd.f32 %v8529_v63, %v10939_v48 }
 0x3a2   : > { %v8570_v50 = vpop.f32.mrf.mxu2  ;;  %3587 = vmatpush.bf16.msra.mxu1 %v8496_v4  ;;  %v2598_v4 = vadd.f32 %v8533_v12, %v10939_v48  ;;  %v3200_v41 = vmax.f32 %v2509_v13, 0.0 }
 0x3a3   : > { %v8572_v7 = vpop.f32.mrf.mxu3  ;;  %3685 = vmatpush.bf16.msra.mxu3 %v8498_v28  ;;  %v8576_v54 = vpop.f32.mrf.mxu0 }
 0x3a4   : > { %v8578_v17 = vpop.f32.mrf.mxu1  ;;  %v3201_v35 = vmax.f32 %v2598_v4, 0.0 }
 0x3a6   : > { %2655 = vmatmul.bf16.gmra.mxu0 %v5814_v11  ;;  %3588 = vmatpush.bf16.msra.mxu1 %v8461_v20  ;;  %v2593_v20 = vadd.f32 %v8494_v37, %v10942_v45  ;;  %v3337_v19 = vpack.c.bf16 %v3209_v2, %v3201_v35  ;;  %v3192_v37 = vmax.f32 %v2506_v6, 0.0 }
 0x3a7   : > { %2744 = vmatmul.bf16.gmra.mxu1 %v5814_v11  ;;  %3686 = vmatpush.bf16.msra.mxu3 %v8463_v60  ;;  %v3208_v60 = vmax.f32 %v2511_v51, 0.0 }
 0x3a8   : > { %v3185_v8 = vmax.f32 %v2593_v20, 0.0  ;;  %v3328_v18 = vpack.c.bf16 %v3192_v37, %v3184_v47 }
 0x3a9   : > { %v3336_v49 = vpack.c.bf16 %v3208_v60, %v3200_v41 }
 0x3aa   : > { %v8589_v28 = vpop.f32.mrf.mxu2  ;;  %3589 = vmatpush.bf16.msra.mxu1 %v8418_v32  ;;  %v2588_v32 = vadd.f32 %v8459_v53, %v10944_v21  ;;  %v3329_v3 = vpack.c.bf16 %v3193_v42, %v3185_v8 }
 0x3ab   : > { %v8593_v57 = vpop.f32.mrf.mxu3  ;;  %3687 = vmatpush.bf16.msra.mxu3 %v8420_v61  ;;  %v8600_v12 = vpop.f32.mrf.mxu0  ;;  %v2501_v61 = vadd.f32 %v8476_v62, %v10943_v34  ;;  %v3177_v62 = vmax.f32 %v2590_v9, 0.0 }
 0x3ac   : > { %v8605_v63 = vpop.f32.mrf.mxu1  ;;  %v3169_v53 = vmax.f32 %v2588_v32, 0.0 }
 0x3ad   : > { %v3176_v59 = vmax.f32 %v2501_v61, 0.0 }
 0x3ae   : > { %3590 = vmatpush.bf16.msra.mxu1 %v8375_v30  ;;  %v3168_v30 = vmax.f32 %v2499_v56, 0.0  ;;  %v3321_v1 = vpack.c.bf16 %v3177_v62, %v3169_v53  ;;  %v10949_v62 = vld [vmem:[#allocation53_spill] sm:$0xff] }
 0x3af   : > { %2833 = vmatmul.bf16.gmra.mxu2 %v5814_v11  ;;  %3688 = vmatpush.bf16.msra.mxu3 %v8377_v16 }
 0x3b0   : > { %2922 = vmatmul.bf16.gmra.mxu3 %v5814_v11  ;;  %v3320_v40 = vpack.c.bf16 %v3176_v59, %v3168_v30  ;;  %v10950_v30 = vld [vmem:[#allocation10_spill] sm:$0xff] }
 0x3b2   : > { %v8617_v44 = vpop.f32.mrf.mxu2  ;;  %3779 = vmatpush.bf16.msrb.mxu1 %v3336_v49  ;;  %v5817_v49 = vld [vmem:[%s10481_s5 + $0x60] sm:$0xff] }
 0x3b3   : > { %3877 = vmatpush.bf16.msrb.mxu3 %v3337_v19  ;;  %v8621_v46 = vpop.f32.mrf.mxu3  ;;  %v8623_v16 = vpop.f32.mrf.mxu0 }
 0x3b4   : > { %v8625_v14 = vpop.f32.mrf.mxu1 }
 0x3b6   : > { %3780 = vmatpush.bf16.msrb.mxu1 %v3328_v18  ;;  %2660 = vmatmul.bf16.gmra.mxu0 %v5815_v23 }
 0x3b7   : > { %3878 = vmatpush.bf16.msrb.mxu3 %v3329_v3  ;;  %2749 = vmatmul.bf16.gmra.mxu1 %v5815_v23 }
 0x3ba   : > { %v8630_v11 = vpop.f32.mrf.mxu2  ;;  %3781 = vmatpush.bf16.msrb.mxu1 %v3320_v40 }
 0x3bb   : > { %3879 = vmatpush.bf16.msrb.mxu3 %v3321_v1  ;;  %v8632_v51 = vpop.f32.mrf.mxu3  ;;  %v8634_v4 = vpop.f32.mrf.mxu0 }
 0x3bc   : > { %v8636_v13 = vpop.f32.mrf.mxu1 }
 0x3be   : > { %3782 = vmatpush.bf16.msrb.mxu1 %v8566_v39  ;;  %v5816_v39 = vld [vmem:[%s10481_s5 + $0x58] sm:$0xff] }
 0x3bf   : > { %3880 = vmatpush.bf16.msrb.mxu3 %v8568_v26  ;;  %2838 = vmatmul.bf16.gmra.mxu2 %v5815_v23 }
 0x3c0   : > { %2927 = vmatmul.bf16.gmra.mxu3 %v5815_v23 }
 0x3c2   : > { %v8641_v15 = vpop.f32.mrf.mxu2  ;;  %3783 = vmatpush.bf16.msrb.mxu1 %v8521_v31 }
 0x3c3   : > { %3881 = vmatpush.bf16.msrb.mxu3 %v8523_v10  ;;  %v8643_v2 = vpop.f32.mrf.mxu3  ;;  %v8646_v6 = vpop.f32.mrf.mxu0  ;;  %v10947_v10 = vld [vmem:[#allocation38_spill] sm:$0xff] }
 0x3c4   : > { %v8648_v60 = vpop.f32.mrf.mxu1  ;;  %v2614_v26 = vadd.f32 %v8562_v36, %v10947_v10  ;;  %v2703_v31 = vadd.f32 %v8564_v25, %v10947_v10 }
 0x3c6   : > { %3784 = vmatpush.bf16.msrb.mxu1 %v8488_v29  ;;  %2665 = vmatmul.bf16.gmra.mxu0 %v5816_v39  ;;  %v10948_v29 = vld [vmem:[#allocation34_spill] sm:$0xff]  ;;  %v2970_v36 = vmax.f32 %v2614_v26, 0.0  ;;  %v2971_v25 = vmax.f32 %v2703_v31, 0.0 }
 0x3c7   : > { %3882 = vmatpush.bf16.msrb.mxu3 %v8490_v52  ;;  %2754 = vmatmul.bf16.gmra.mxu1 %v5816_v39  ;;  %v2612_v52 = vadd.f32 %v8539_v33, %v10948_v29  ;;  %v2701_v38 = vadd.f32 %v8545_v24, %v10948_v29  ;;  %v2790_v32 = vadd.f32 %v8570_v50, %v10948_v29 }
 0x3c8   : > { %v2879_v8 = vadd.f32 %v8572_v7, %v10948_v29  ;;  %v2617_v50 = vadd.f32 %v8576_v54, %v10950_v30  ;;  %v2706_v7 = vadd.f32 %v8578_v17, %v10950_v30 }
 0x3c9   : > { %v2962_v9 = vmax.f32 %v2612_v52, 0.0  ;;  %v2964_v18 = vmax.f32 %v2790_v32, 0.0  ;;  %v10953_v32 = vld [vmem:[#allocation17_spill] sm:$0xff] }
 0x3ca   : > { %v8660_v20 = vpop.f32.mrf.mxu2  ;;  %3785 = vmatpush.bf16.msrb.mxu1 %v8453_v0  ;;  %v2963_v0 = vmax.f32 %v2701_v38, 0.0  ;;  %v2965_v53 = vmax.f32 %v2879_v8, 0.0  ;;  %v2979_v26 = vmax.f32 %v2706_v7, 0.0 }
 0x3cb   : > { %3883 = vmatpush.bf16.msrb.mxu3 %v8455_v5  ;;  %v8662_v35 = vpop.f32.mrf.mxu3  ;;  %v8669_v41 = vpop.f32.mrf.mxu0  ;;  %v8679_v19 = vpack.c.bf16 %v2970_v36, %v2962_v9  ;;  %v2797_v36 = vadd.f32 %v8630_v11, %v10949_v62  ;;  %v5818_v9 = vld [vmem:[%s10481_s5 + $0x68] sm:$0xff]  ;;  %v2624_v11 = vadd.f32 %v8634_v4, %v10953_v32 }
 0x3cc   : > { %v8671_v5 = vpop.f32.mrf.mxu1  ;;  %v8681_v24 = vpack.c.bf16 %v2971_v25, %v2963_v0  ;;  %v2886_v25 = vadd.f32 %v8632_v51, %v10949_v62  ;;  %v2795_v0 = vadd.f32 %v8617_v44, %v10950_v30  ;;  %v2713_v51 = vadd.f32 %v8636_v13, %v10953_v32 }
 0x3cd   : > { %v3002_v4 = vmax.f32 %v2624_v11, 0.0 }
 0x3ce   : > { %3786 = vmatpush.bf16.msrb.mxu1 %v8410_v22  ;;  %v2881_v22 = vadd.f32 %v8593_v57, %v10947_v10  ;;  %v2708_v57 = vadd.f32 %v8605_v63, %v10949_v62 }
 0x3cf   : > { %3884 = vmatpush.bf16.msrb.mxu3 %v8412_v58  ;;  %2843 = vmatmul.bf16.gmra.mxu2 %v5816_v39  ;;  %v2792_v58 = vadd.f32 %v8589_v28, %v10947_v10  ;;  %v2619_v28 = vadd.f32 %v8600_v12, %v10949_v62  ;;  %v2978_v10 = vmax.f32 %v2617_v50, 0.0 }
 0x3d0   : > { %2932 = vmatmul.bf16.gmra.mxu3 %v5816_v39  ;;  %v2973_v47 = vmax.f32 %v2881_v22, 0.0  ;;  %v2987_v40 = vmax.f32 %v2708_v57, 0.0  ;;  %v2988_v22 = vmax.f32 %v2797_v36, 0.0  ;;  %v2802_v36 = vadd.f32 %v8660_v20, %v10953_v32 }
 0x3d1   : > { %v2972_v56 = vmax.f32 %v2792_v58, 0.0  ;;  %v2986_v12 = vmax.f32 %v2619_v28, 0.0  ;;  %v2884_v58 = vadd.f32 %v8621_v46, %v10950_v30  ;;  %v10954_v28 = vld [vmem:[#allocation31_spill] sm:$0xff] }
 0x3d2   : > { %v8675_v42 = vpop.f32.mrf.mxu2  ;;  %v8716_v63 = vpack.c.bf16 %v2973_v47, %v2965_v53  ;;  %v8724_v17 = vpack.c.bf16 %v2987_v40, %v2979_v26  ;;  %v2980_v47 = vmax.f32 %v2795_v0, 0.0  ;;  %v2622_v44 = vadd.f32 %v8623_v16, %v10954_v28 }
 0x3d3   : > { %v8677_v33 = vpop.f32.mrf.mxu3  ;;  %v8683_v61 = vpop.f32.mrf.mxu0  ;;  %v8714_v39 = vpack.c.bf16 %v2972_v56, %v2964_v18  ;;  %v8722_v29 = vpack.c.bf16 %v2986_v12, %v2978_v10  ;;  %v2981_v62 = vmax.f32 %v2884_v58, 0.0  ;;  %v2711_v46 = vadd.f32 %v8625_v14, %v10954_v28 }
 0x3d4   : > { %v8685_v37 = vpop.f32.mrf.mxu1  ;;  %10952 = vst [vmem:[#allocation48_spill] sm:$0xff] %v8716_v63  ;;  %v3003_v53 = vmax.f32 %v2713_v51, 0.0  ;;  %v8757_v30 = vpack.c.bf16 %v2988_v22, %v2980_v47  ;;  %v2994_v50 = vmax.f32 %v2622_v44, 0.0  ;;  %v2800_v0 = vadd.f32 %v8641_v15, %v10954_v28  ;;  %v10957_v22 = vld [vmem:[#allocation49_spill] sm:$0xff]  ;;  %v10958_v44 = vld [vmem:[#allocation7_spill] sm:$0xff] }
 0x3d5   : > { %10951 = vst [vmem:[#allocation26_spill] sm:$0xff] %v8714_v39  ;;  %v2995_v7 = vmax.f32 %v2711_v46, 0.0  ;;  %v2889_v58 = vadd.f32 %v8643_v2, %v10954_v28  ;;  %v3004_v11 = vmax.f32 %v2802_v36, 0.0  ;;  %v2627_v15 = vadd.f32 %v8646_v6, %v10958_v44  ;;  %v10962_v6 = vld [vmem:[#allocation40_spill] sm:$0xff] }
 0x3d6   : > { %2670 = vmatmul.bf16.gmra.mxu0 %v5817_v49  ;;  %10955 = vst [vmem:[#allocation9_spill] sm:$0xff] %v8757_v30  ;;  %v8765_v40 = vpack.c.bf16 %v3002_v4, %v2994_v50  ;;  %v2996_v47 = vmax.f32 %v2800_v0, 0.0  ;;  %v2716_v2 = vadd.f32 %v8648_v60, %v10958_v44  ;;  %v2632_v0 = vadd.f32 %v8683_v61, %v10962_v6 }
 0x3d7   : > { %2759 = vmatmul.bf16.gmra.mxu1 %v5817_v49  ;;  %v8767_v14 = vpack.c.bf16 %v3003_v53, %v2995_v7  ;;  %v10959_v53 = vld [vmem:[#allocation36_spill] sm:$0xff]  ;;  %v3010_v36 = vmax.f32 %v2627_v15, 0.0  ;;  %v2721_v15 = vadd.f32 %v8685_v37, %v10962_v6 }
 0x3d8   : > { %v8800_v50 = vpack.c.bf16 %v3004_v11, %v2996_v47 }
 0x3d9   : > { %v3027_v37 = vmax.f32 %v2721_v15, 0.0  ;;  %v5689_v15 = vld [vmem:[%s10483_s7 + $0x4] sm:$0xf] }
 0x3da   : > { %v8702_v3 = vpop.f32.mrf.mxu2  ;;  %10960 = vst [vmem:[#allocation33_spill] sm:$0xff] %v8800_v50 }
 0x3db   : > { %v8704_v59 = vpop.f32.mrf.mxu3  ;;  %v8710_v23 = vpop.f32.mrf.mxu0  ;;  %v2807_v47 = vadd.f32 %v8702_v3, %v10957_v22 }
 0x3dc   : > { %v8712_v1 = vpop.f32.mrf.mxu1  ;;  %v2896_v61 = vadd.f32 %v8704_v59, %v10957_v22 }
 0x3de   : > { %v3021_v59 = vmax.f32 %v2896_v61, 0.0  ;;  %v5690_v61 = vld [vmem:[%s10483_s7 + $0x4] sm:$0xf0] }
 0x3df   : > { %2848 = vmatmul.bf16.gmra.mxu2 %v5817_v49 }
 0x3e0   : > { %2937 = vmatmul.bf16.gmra.mxu3 %v5817_v49  ;;  %v2989_v49 = vmax.f32 %v2886_v25, 0.0  ;;  %v2891_v25 = vadd.f32 %v8662_v35, %v10953_v32  ;;  %v2718_v35 = vadd.f32 %v8671_v5, %v10957_v22  ;;  %v2634_v5 = vadd.f32 %v8710_v23, %v10959_v53 }
 0x3e1   : > { %v3026_v23 = vmax.f32 %v2632_v0, 0.0 }
 0x3e2   : > { %v8718_v31 = vpop.f32.mrf.mxu2  ;;  %v8759_v13 = vpack.c.bf16 %v2989_v49, %v2981_v62  ;;  %v2629_v49 = vadd.f32 %v8669_v41, %v10957_v22  ;;  %v3005_v20 = vmax.f32 %v2891_v25, 0.0  ;;  %v2997_v62 = vmax.f32 %v2889_v58, 0.0 }
 0x3e3   : > { %v8720_v54 = vpop.f32.mrf.mxu3  ;;  %v8726_v52 = vpop.f32.mrf.mxu0  ;;  %v3019_v4 = vmax.f32 %v2718_v35, 0.0  ;;  %v3011_v25 = vmax.f32 %v2716_v2, 0.0  ;;  %v3034_v60 = vmax.f32 %v2634_v5, 0.0  ;;  %v5820_v2 = vld [vmem:[%s10481_s5 + $0x78] sm:$0xff]  ;;  %v2810_v30 = vadd.f32 %v8718_v31, %v10962_v6 }
 0x3e4   : > { %v8728_v38 = vpop.f32.mrf.mxu1  ;;  %10956 = vst [vmem:[#allocation44_spill] sm:$0xff] %v8759_v13  ;;  %v3018_v46 = vmax.f32 %v2629_v49, 0.0  ;;  %v8802_v7 = vpack.c.bf16 %v3005_v20, %v2997_v62  ;;  %v2723_v20 = vadd.f32 %v8712_v1, %v10959_v53  ;;  %v2805_v1 = vadd.f32 %v8675_v42, %v10958_v44  ;;  %v10963_v13 = vld [vmem:[#allocation54_spill] sm:$0xff] }
 0x3e5   : > { %v8812_v63 = vpack.c.bf16 %v3019_v4, %v3011_v25  ;;  %v8820_v62 = vpack.c.bf16 %v3034_v60, %v3026_v23  ;;  %v3020_v4 = vmax.f32 %v2807_v47, 0.0  ;;  %v5582_v47 = vld [vmem:[%s10483_s7] sm:$0xf] }
 0x3e6   : > { %2675 = vmatmul.bf16.gmra.mxu0 %v5818_v9  ;;  %10961 = vst [vmem:[#allocation43_spill] sm:$0xff] %v8802_v7  ;;  %v8810_v35 = vpack.c.bf16 %v3018_v46, %v3010_v36  ;;  %v2894_v46 = vadd.f32 %v8677_v33, %v10958_v44  ;;  %v3035_v3 = vmax.f32 %v2723_v20, 0.0  ;;  %v3012_v36 = vmax.f32 %v2805_v1, 0.0  ;;  %v10966_v44 = vld [vmem:[#allocation16_spill] sm:$0xff]  ;;  %v5584_v1 = vld [vmem:[%s10483_s7 + $0x8] sm:$0xf0] }
 0x3e7   : > { %2764 = vmatmul.bf16.gmra.mxu1 %v5818_v9  ;;  %v8862_v7 = vor.u32 %v5689_v15, %v5584_v1  ;;  %v2899_v15 = vadd.f32 %v8720_v54, %v10962_v6  ;;  %v10970_v1 = vld [vmem:[#allocation15_spill] sm:$0xff] }
 0x3e8   : > { %v3013_v25 = vmax.f32 %v2894_v46, 0.0  ;;  %v8835_v23 = vpack.c.bf16 %v3035_v3, %v3027_v37  ;;  %v8838_v39 = vpack.c.bf16 %v3020_v4, %v3012_v36  ;;  %v10967_v46 = vld [vmem:[#allocation20_spill] sm:$0xff]  ;;  %v10968_v37 = vld [vmem:[#allocation14_spill] sm:$0xff]  ;;  %v2637_v31 = vadd.f32 %v8726_v52, %v10970_v1 }
 0x3e9   : > { %v3029_v27 = vmax.f32 %v2899_v15, 0.0 }
 0x3ea   : > { %v8745_v8 = vpop.f32.mrf.mxu2  ;;  %10964 = vst [vmem:[#allocation55_spill] sm:$0xff] %v8838_v39  ;;  %v8840_v33 = vpack.c.bf16 %v3021_v59, %v3013_v25  ;;  %v8856_v59 = vor.u32 %v5690_v61, %v5582_v47  ;;  %v10969_v47 = vld [vmem:[#allocation23_spill] sm:$0xff]  ;;  %v3042_v21 = vmax.f32 %v2637_v31, 0.0 }
 0x3eb   : > { %v8747_v56 = vpop.f32.mrf.mxu3  ;;  %v8753_v57 = vpop.f32.mrf.mxu0 }
 0x3ec   : > { %v8755_v18 = vpop.f32.mrf.mxu1  ;;  %10965 = vst [vmem:[#allocation47_spill] sm:$0xff] %v8840_v33  ;;  %v2812_v33 = vadd.f32 %v8745_v8, %v10959_v53  ;;  %v2639_v61 = vadd.f32 %v8753_v57, %v10969_v47  ;;  %v3028_v57 = vmax.f32 %v2810_v30, 0.0 }
 0x3ed   : > { %v2728_v30 = vadd.f32 %v8755_v18, %v10969_v47 }
 0x3ef   : > { %2853 = vmatmul.bf16.gmra.mxu2 %v5818_v9 }
 0x3f0   : > { %2942 = vmatmul.bf16.gmra.mxu3 %v5818_v9  ;;  %v5819_v9 = vld [vmem:[%s10481_s5 + $0x70] sm:$0xff] }
 0x3f2   : > { %v8761_v12 = vpop.f32.mrf.mxu2 }
 0x3f3   : > { %v8763_v16 = vpop.f32.mrf.mxu3  ;;  %v8769_v10 = vpop.f32.mrf.mxu0 }
 0x3f4   : > { %v8771_v26 = vpop.f32.mrf.mxu1  ;;  %v2642_v36 = vadd.f32 %v8769_v10, %v10968_v37 }
 0x3f6   : > { %2680 = vmatmul.bf16.gmra.mxu0 %v5819_v9  ;;  %v3058_v8 = vmax.f32 %v2642_v36, 0.0 }
 0x3f7   : > { %2769 = vmatmul.bf16.gmra.mxu1 %v5819_v9 }
 0x3fa   : > { %v8788_v32 = vpop.f32.mrf.mxu2 }
 0x3fb   : > { %v8790_v51 = vpop.f32.mrf.mxu3  ;;  %v2643_v28 = vpop.f32.mrf.mxu0 }
 0x3fc   : > { %v8796_v41 = vpop.f32.mrf.mxu1 }
 0x3ff   : > { %2858 = vmatmul.bf16.gmra.mxu2 %v5819_v9 }
 0x400   : > { %2947 = vmatmul.bf16.gmra.mxu3 %v5819_v9 }
 0x402   : > { %v8806_v58 = vpop.f32.mrf.mxu2 }
 0x403   : > { %v8808_v49 = vpop.f32.mrf.mxu3  ;;  %v2646_v11 = vpop.f32.mrf.mxu0 }
 0x404   : > { %v2735_v9 = vpop.f32.mrf.mxu1  ;;  %v2647_v20 = vadd.f32 %v2646_v11, %v10966_v44 }
 0x406   : > { %2685 = vmatmul.bf16.gmra.mxu0 %v5820_v2  ;;  %v3074_v25 = vmax.f32 %v2647_v20, 0.0 }
 0x407   : > { %2774 = vmatmul.bf16.gmra.mxu1 %v5820_v2 }
 0x40a   : > { %v8831_v22 = vpop.f32.mrf.mxu2 }
 0x40b   : > { %v8833_v5 = vpop.f32.mrf.mxu3  ;;  %v2648_v0 = vpop.f32.mrf.mxu0 }
 0x40c   : > { %v2737_v60 = vpop.f32.mrf.mxu1  ;;  %v2649_v42 = vadd.f32 %v2648_v0, %v10963_v13 }
 0x40d   : > { %v2738_v50 = vadd.f32 %v2737_v60, %v10963_v13 }
 0x40e   : > { %v3082_v3 = vmax.f32 %v2649_v42, 0.0 }
 0x40f   : > { %2863 = vmatmul.bf16.gmra.mxu2 %v5820_v2  ;;  %v3083_v52 = vmax.f32 %v2738_v50, 0.0 }
 0x410   : > { %2952 = vmatmul.bf16.gmra.mxu3 %v5820_v2  ;;  %v2644_v2 = vadd.f32 %v2643_v28, %v10967_v46  ;;  %v2901_v28 = vadd.f32 %v8747_v56, %v10959_v53  ;;  %v3274_v20 = vpack.c.bf16 %v3082_v3, %v3074_v25  ;;  %v2733_v56 = vadd.f32 %v8796_v41, %v10967_v46 }
 0x411   : > { %v2736_v53 = vadd.f32 %v2735_v9, %v10966_v44  ;;  %v3050_v3 = vmax.f32 %v2639_v61, 0.0 }
 0x412   : > { %v2824_v11 = vpop.f32.mrf.mxu2  ;;  %v3066_v10 = vmax.f32 %v2644_v2, 0.0  ;;  %v3036_v2 = vmax.f32 %v2812_v33, 0.0  ;;  %v3037_v6 = vmax.f32 %v2901_v28, 0.0  ;;  %v2731_v33 = vadd.f32 %v8771_v26, %v10968_v37 }
 0x413   : > { %v2913_v4 = vpop.f32.mrf.mxu3  ;;  %v8860_v0 = vpop.f32.mrf.mxu0  ;;  %v2825_v60 = vadd.f32 %v2824_v11, %v10966_v44  ;;  %v3067_v11 = vmax.f32 %v2733_v56, 0.0  ;;  %v3258_v31 = vpack.c.bf16 %v3050_v3, %v3042_v21  ;;  %v5590_v21 = vld [vmem:[%s10483_s7 + $0x10] sm:$0xf] }
 0x414   : > { %v8870_v42 = vpop.f32.mrf.mxu1  ;;  %v2914_v54 = vadd.f32 %v2913_v4, %v10966_v44  ;;  %v3266_v36 = vpack.c.bf16 %v3066_v10, %v3058_v8  ;;  %v3075_v44 = vmax.f32 %v2736_v53, 0.0  ;;  %v2726_v8 = vadd.f32 %v8728_v38, %v10970_v1  ;;  %v5691_v53 = vld [vmem:[%s10483_s7 + $0x14] sm:$0xf] }
 0x415   : > { %v3076_v50 = vmax.f32 %v2825_v60, 0.0  ;;  %v3059_v56 = vmax.f32 %v2731_v33, 0.0  ;;  %v3051_v38 = vmax.f32 %v2728_v30, 0.0  ;;  %v2815_v33 = vadd.f32 %v8761_v12, %v10970_v1 }
 0x416   : > { %3542 = vmatmul.bf16.vlgmr.msra.gmra.mxu0 %v8856_v59  ;;  %v3077_v28 = vmax.f32 %v2914_v54, 0.0  ;;  %v3275_v15 = vpack.c.bf16 %v3083_v52, %v3075_v44  ;;  %v3043_v3 = vmax.f32 %v2726_v8, 0.0 }
 0x417   : > { %3591 = vmatmul.bf16.vlgmr.msra.gmra.mxu1 %v8862_v7  ;;  %3926 = vmatpush.bf16.msra.mxu0 %v3274_v20  ;;  %v3267_v54 = vpack.c.bf16 %v3067_v11, %v3059_v56  ;;  %v2822_v56 = vadd.f32 %v8831_v22, %v10967_v46 }
 0x418   : > { %v3259_v30 = vpack.c.bf16 %v3051_v38, %v3043_v3  ;;  %v5608_v3 = vld [vmem:[%s10483_s7 + $0x38] sm:$0xf0] }
 0x41a   : > { %v2826_v25 = vpop.f32.mrf.mxu2 }
 0x41b   : > { %v2915_v39 = vpop.f32.mrf.mxu3  ;;  %v2827_v41 = vadd.f32 %v2826_v25, %v10963_v13  ;;  %3927 = vmatpush.bf16.msra.mxu0 %v3266_v36  ;;  %v8892_v4 = vpop.f32.mrf.mxu0 }
 0x41c   : > { %v2916_v9 = vadd.f32 %v2915_v39, %v10963_v13  ;;  %v8894_v20 = vpop.f32.mrf.mxu1  ;;  %v8896_v39 = vpack.c.bf16 %v3036_v2, %v3028_v57  ;;  %v8898_v13 = vpack.c.bf16 %v3037_v6, %v3029_v27  ;;  %v5692_v27 = vld [vmem:[%s10483_s7 + $0x14] sm:$0xf0]  ;;  %v5592_v57 = vld [vmem:[%s10483_s7 + $0x18] sm:$0xf0] }
 0x41d   : > { %v3084_v61 = vmax.f32 %v2827_v41, 0.0  ;;  %v8924_v6 = vor.u32 %v5692_v27, %v5590_v21  ;;  %v8929_v25 = vor.u32 %v5691_v53, %v5592_v57  ;;  %v2817_v41 = vadd.f32 %v8788_v32, %v10969_v47 }
 0x41e   : > { %v3085_v10 = vmax.f32 %v2916_v9, 0.0  ;;  %v2906_v9 = vadd.f32 %v8790_v51, %v10969_v47  ;;  %v3044_v51 = vmax.f32 %v2815_v33, 0.0  ;;  %v2911_v21 = vadd.f32 %v8833_v5, %v10967_v46 }
 0x41f   : > { %v8900_v18 = vpack.c.bf16 %v3084_v61, %v3076_v50  ;;  %3640 = vmatmul.bf16.vlgmr.msra.gmra.mxu2 %v8856_v59  ;;  %3928 = vmatpush.bf16.msra.mxu0 %v3258_v31  ;;  %v3052_v11 = vmax.f32 %v2817_v41, 0.0  ;;  %v5600_v61 = vld [vmem:[%s10483_s7 + $0x28] sm:$0xf0]  ;;  %v2820_v27 = vadd.f32 %v8806_v58, %v10968_v37 }
 0x420   : > { %v8902_v26 = vpack.c.bf16 %v3085_v10, %v3077_v28  ;;  %3689 = vmatmul.bf16.vlgmr.msra.gmra.mxu3 %v8862_v7  ;;  %4024 = vmatpush.bf16.msra.mxu2 %v3275_v15  ;;  %v3053_v44 = vmax.f32 %v2906_v9, 0.0  ;;  %v3069_v53 = vmax.f32 %v2911_v21, 0.0 }
 0x421   : > { %v3060_v38 = vmax.f32 %v2820_v27, 0.0 }
 0x422   : > { %v8920_v2 = vpop.f32.mrf.mxu2 }
 0x423   : > { %v8922_v60 = vpop.f32.mrf.mxu3  ;;  %3929 = vmatpush.bf16.msra.mxu0 %v8820_v62  ;;  %v8927_v52 = vpop.f32.mrf.mxu0  ;;  %v2904_v62 = vadd.f32 %v8763_v16, %v10970_v1  ;;  %v8954_v16 = vpack.c.bf16 %v3052_v11, %v3044_v51 }
 0x424   : > { %4025 = vmatpush.bf16.msra.mxu2 %v3267_v54  ;;  %v8931_v36 = vpop.f32.mrf.mxu1 }
 0x425   : > { %v3045_v47 = vmax.f32 %v2904_v62, 0.0 }
 0x426   : > { %3547 = vmatmul.bf16.gmra.mxu0 %v8924_v6 }
 0x427   : > { %3596 = vmatmul.bf16.gmra.mxu1 %v8929_v25  ;;  %3930 = vmatpush.bf16.msra.mxu0 %v8810_v35  ;;  %v8956_v1 = vpack.c.bf16 %v3053_v44, %v3045_v47  ;;  %v5598_v35 = vld [vmem:[%s10483_s7 + $0x20] sm:$0xf]  ;;  %v10975_v44 = vld [vmem:[#allocation52_spill] sm:$0xff] }
 0x428   : > { %4026 = vmatpush.bf16.msra.mxu2 %v3259_v30  ;;  %v2654_v51 = vadd.f32 %v8892_v4, %v10975_v44  ;;  %v2743_v47 = vadd.f32 %v8894_v20, %v10975_v44 }
 0x42a   : > { %v8944_v32 = vpop.f32.mrf.mxu2 }
 0x42b   : > { %v8946_v50 = vpop.f32.mrf.mxu3  ;;  %v8949_v28 = vpop.f32.mrf.mxu0  ;;  %3931 = vmatpush.bf16.msra.mxu0 %v8765_v40  ;;  %v5694_v40 = vld [vmem:[%s10483_s7 + $0x24] sm:$0xf0] }
 0x42c   : > { %4027 = vmatpush.bf16.msra.mxu2 %v8835_v23  ;;  %v8952_v12 = vpop.f32.mrf.mxu1  ;;  %v5693_v23 = vld [vmem:[%s10483_s7 + $0x24] sm:$0xf]  ;;  %v8978_v15 = vor.u32 %v5694_v40, %v5598_v35 }
 0x42d   : > { %v8983_v8 = vor.u32 %v5693_v23, %v5600_v61  ;;  %v10976_v23 = vld [vmem:[#allocation30_spill] sm:$0xff] }
 0x42e   : > { %10971 = vst [vmem:[#allocation35_spill] sm:$0xff] %v8978_v15  ;;  %v2652_v61 = vadd.f32 %v8860_v0, %v10976_v23  ;;  %v5698_v0 = vld [vmem:[%s10483_s7 + $0x44] sm:$0xf0] }
 0x42f   : > { %3645 = vmatmul.bf16.gmra.mxu2 %v8924_v6  ;;  %3932 = vmatpush.bf16.msra.mxu0 %v8722_v29  ;;  %10972 = vst [vmem:[#allocation50_spill] sm:$0xff] %v8983_v8 }
 0x430   : > { %3694 = vmatmul.bf16.gmra.mxu3 %v8929_v25  ;;  %4028 = vmatpush.bf16.msra.mxu2 %v8812_v63  ;;  %v3090_v4 = vmax.f32 %v2652_v61, 0.0 }
 0x432   : > { %v8974_v10 = vpop.f32.mrf.mxu2 }
 0x433   : > { %v8976_v63 = vpop.f32.mrf.mxu3  ;;  %v8981_v31 = vpop.f32.mrf.mxu0  ;;  %3933 = vmatpush.bf16.msra.mxu0 %v8679_v19  ;;  %v3068_v19 = vmax.f32 %v2822_v56, 0.0  ;;  %v2741_v56 = vadd.f32 %v8870_v42, %v10976_v23  ;;  %v5697_v42 = vld [vmem:[%s10483_s7 + $0x44] sm:$0xf] }
 0x434   : > { %4029 = vmatpush.bf16.msra.mxu2 %v8767_v14  ;;  %v8986_v29 = vpop.f32.mrf.mxu1  ;;  %v2909_v14 = vadd.f32 %v8808_v49, %v10968_v37  ;;  %v5695_v37 = vld [vmem:[%s10483_s7 + $0x34] sm:$0xf] }
 0x435   : > { %v9008_v54 = vpack.c.bf16 %v3068_v19, %v3060_v38  ;;  %v9034_v62 = vor.u32 %v5695_v37, %v5608_v3  ;;  %v3099_v19 = vmax.f32 %v2743_v47, 0.0  ;;  %v3091_v20 = vmax.f32 %v2741_v56, 0.0  ;;  %v5616_v38 = vld [vmem:[%s10483_s7 + $0x48] sm:$0xf0] }
 0x436   : > { %3552 = vmatmul.bf16.gmra.mxu0 %v8978_v15  ;;  %v3061_v5 = vmax.f32 %v2909_v14, 0.0  ;;  %v3098_v14 = vmax.f32 %v2654_v51, 0.0  ;;  %v9082_v47 = vor.u32 %v5697_v42, %v5616_v38  ;;  %v2832_v56 = vadd.f32 %v8944_v32, %v10975_v44 }
 0x437   : > { %3601 = vmatmul.bf16.gmra.mxu1 %v8983_v8  ;;  %10974 = vst [vmem:[#allocation42_spill] sm:$0xff] %v9034_v62  ;;  %v9076_v37 = vpack.c.bf16 %v3099_v19, %v3091_v20  ;;  %v2919_v19 = vadd.f32 %v8922_v60, %v10976_v23 }
 0x438   : > { %4030 = vmatpush.bf16.msra.mxu2 %v8724_v17  ;;  %v9010_v49 = vpack.c.bf16 %v3069_v53, %v3061_v5  ;;  %v5606_v17 = vld [vmem:[%s10483_s7 + $0x30] sm:$0xf]  ;;  %v5614_v53 = vld [vmem:[%s10483_s7 + $0x40] sm:$0xf]  ;;  %10980 = vst [vmem:[#allocation46_spill] sm:$0xff] %v9082_v47 }
 0x439   : > { %10978 = vst [vmem:[#allocation41_spill] sm:$0xff] %v9076_v37  ;;  %v9078_v3 = vor.u32 %v5698_v0, %v5614_v53  ;;  %v10981_v53 = vld [vmem:[#allocation37_spill] sm:$0xff]  ;;  %v3093_v38 = vmax.f32 %v2919_v19, 0.0 }
 0x43a   : > { %v8999_v57 = vpop.f32.mrf.mxu2  ;;  %v2659_v0 = vadd.f32 %v8949_v28, %v10981_v53  ;;  %v2748_v32 = vadd.f32 %v8952_v12, %v10981_v53 }
 0x43b   : > { %v9001_v22 = vpop.f32.mrf.mxu3  ;;  %v9004_v46 = vpop.f32.mrf.mxu0  ;;  %10979 = vst [vmem:[#allocation28_spill] sm:$0xff] %v9078_v3 }
 0x43c   : > { %4031 = vmatpush.bf16.msra.mxu2 %v8681_v24  ;;  %v9006_v58 = vpop.f32.mrf.mxu1  ;;  %v5696_v24 = vld [vmem:[%s10483_s7 + $0x34] sm:$0xf0]  ;;  %v3114_v28 = vmax.f32 %v2659_v0, 0.0 }
 0x43d   : > { %v9030_v30 = vor.u32 %v5696_v24, %v5606_v17  ;;  %v9074_v24 = vpack.c.bf16 %v3098_v14, %v3090_v4  ;;  %v2830_v14 = vadd.f32 %v8920_v2, %v10976_v23  ;;  %v3100_v4 = vmax.f32 %v2832_v56, 0.0  ;;  %v10982_v2 = vld [vmem:[#allocation24_spill] sm:$0xff] }
 0x43e   : > { %v2746_v60 = vadd.f32 %v8931_v36, %v10982_v2  ;;  %v3115_v56 = vmax.f32 %v2748_v32, 0.0  ;;  %v5700_v36 = vld [vmem:[%s10483_s7 + $0x54] sm:$0xf0] }
 0x43f   : > { %3650 = vmatmul.bf16.gmra.mxu2 %v8978_v15  ;;  %10973 = vst [vmem:[#allocation51_spill] sm:$0xff] %v9030_v30 }
 0x440   : > { %3699 = vmatmul.bf16.gmra.mxu3 %v8983_v8  ;;  %10977 = vst [vmem:[#allocation19_spill] sm:$0xff] %v9074_v24  ;;  %v3107_v19 = vmax.f32 %v2746_v60, 0.0 }
 0x442   : > { %v9026_v41 = vpop.f32.mrf.mxu2 }
 0x443   : > { %v9028_v9 = vpop.f32.mrf.mxu3  ;;  %v9032_v33 = vpop.f32.mrf.mxu0 }
 0x444   : > { %v9036_v11 = vpop.f32.mrf.mxu1 }
 0x446   : > { %3557 = vmatmul.bf16.gmra.mxu0 %v9030_v30 }
 0x447   : > { %3606 = vmatmul.bf16.gmra.mxu1 %v9034_v62 }
 0x44a   : > { %v9044_v35 = vpop.f32.mrf.mxu2 }
 0x44b   : > { %v9046_v40 = vpop.f32.mrf.mxu3  ;;  %v9052_v21 = vpop.f32.mrf.mxu0 }
 0x44c   : > { %v9054_v27 = vpop.f32.mrf.mxu1 }
 0x44f   : > { %3655 = vmatmul.bf16.gmra.mxu2 %v9030_v30  ;;  %v2657_v30 = vadd.f32 %v8927_v52, %v10982_v2  ;;  %v5622_v52 = vld [vmem:[%s10483_s7 + $0x50] sm:$0xf] }
 0x450   : > { %3704 = vmatmul.bf16.gmra.mxu3 %v9034_v62  ;;  %v2921_v62 = vadd.f32 %v8946_v50, %v10975_v44  ;;  %v3092_v44 = vmax.f32 %v2830_v14, 0.0 }
 0x451   : > { %v3106_v14 = vmax.f32 %v2657_v30, 0.0 }
 0x452   : > { %v9070_v5 = vpop.f32.mrf.mxu2  ;;  %v3101_v20 = vmax.f32 %v2921_v62, 0.0  ;;  %v9112_v8 = vpack.c.bf16 %v3100_v4, %v3092_v44  ;;  %v5699_v4 = vld [vmem:[%s10483_s7 + $0x54] sm:$0xf]  ;;  %v9136_v44 = vpack.c.bf16 %v3115_v56, %v3107_v19  ;;  %v2924_v56 = vadd.f32 %v8976_v63, %v10982_v2 }
 0x453   : > { %v9072_v17 = vpop.f32.mrf.mxu3  ;;  %v9080_v51 = vpop.f32.mrf.mxu0  ;;  %v9134_v32 = vpack.c.bf16 %v3114_v28, %v3106_v14  ;;  %v2835_v28 = vadd.f32 %v8974_v10, %v10982_v2  ;;  %v10990_v2 = vld [vmem:[#allocation32_spill] sm:$0xff] }
 0x454   : > { %v9084_v61 = vpop.f32.mrf.mxu1  ;;  %10983 = vst [vmem:[#allocation39_spill] sm:$0xff] %v9112_v8  ;;  %v9114_v12 = vpack.c.bf16 %v3101_v20, %v3093_v38  ;;  %v5624_v20 = vld [vmem:[%s10483_s7 + $0x58] sm:$0xf0]  ;;  %v9138_v38 = vor.u32 %v5700_v36, %v5622_v52  ;;  %v2926_v8 = vadd.f32 %v9001_v22, %v10981_v53  ;;  %v9156_v14 = vpop.permute.xlu1 %3446  ;;  %v10988_v36 = vld [vmem:[#allocation22_spill] sm:$0xff]  ;;  %v3109_v63 = vmax.f32 %v2924_v56, 0.0 }
 0x455   : > { %10987 = vst [vmem:[#allocation13_spill] sm:$0xff] %v9156_v14  ;;  %v2753_v22 = vadd.f32 %v9006_v58, %v10988_v36  ;;  %v9166_v10 = vpop.permute.xlu0 %3436  ;;  %v2662_v15 = vadd.f32 %v8981_v31, %v10990_v2  ;;  %v5630_v31 = vld [vmem:[%s10483_s7 + $0x60] sm:$0xf] }
 0x456   : > { %3562 = vmatmul.bf16.gmra.mxu0 %v9078_v3  ;;  %10984 = vst [vmem:[#allocation45_spill] sm:$0xff] %v9114_v12  ;;  %v2837_v12 = vadd.f32 %v8999_v57, %v10981_v53  ;;  %v3117_v52 = vmax.f32 %v2926_v8, 0.0  ;;  %v2664_v57 = vadd.f32 %v9004_v46, %v10988_v36  ;;  %v2751_v8 = vadd.f32 %v8986_v29, %v10990_v2  ;;  %v5702_v29 = vld [vmem:[%s10483_s7 + $0x64] sm:$0xf0] }
 0x457   : > { %3611 = vmatmul.bf16.gmra.mxu1 %v9082_v47  ;;  %10985 = vst [vmem:[#allocation8_spill] sm:$0xff] %v9138_v38  ;;  %v3131_v58 = vmax.f32 %v2753_v22, 0.0 }
 0x458   : > { %v3116_v19 = vmax.f32 %v2837_v12, 0.0  ;;  %10989 = vst [vmem:[#allocation11_spill] sm:$0xff] %v9166_v10  ;;  %v3130_v14 = vmax.f32 %v2664_v57, 0.0  ;;  %v9178_v24 = vpack.c.bf16 %v3117_v52, %v3109_v63  ;;  %v3123_v56 = vmax.f32 %v2751_v8, 0.0  ;;  %v5632_v52 = vld [vmem:[%s10483_s7 + $0x68] sm:$0xf0] }
 0x459   : > { %v9204_v8 = vor.u32 %v5702_v29, %v5630_v31  ;;  %v10999_v29 = vld [vmem:[#allocation18_spill] sm:$0xff] }
 0x45a   : > { %v9100_v42 = vpop.f32.mrf.mxu2  ;;  %10992 = vst [vmem:[#allocation38_spill] sm:$0xff] %v9178_v24 }
 0x45b   : > { %v9102_v50 = vpop.f32.mrf.mxu3  ;;  %v9108_v23 = vpop.f32.mrf.mxu0  ;;  %10996 = vst [vmem:[#allocation17_spill] sm:$0xff] %v9204_v8 }
 0x45c   : > { %v9110_v62 = vpop.f32.mrf.mxu1  ;;  %v9202_v63 = vpop.permute.xlu1 %3441 }
 0x45d   : > { %10995 = vst [vmem:[#allocation10_spill] sm:$0xff] %v9202_v63 }
 0x45f   : > { %3660 = vmatmul.bf16.gmra.mxu2 %v9078_v3 }
 0x460   : > { %3709 = vmatmul.bf16.gmra.mxu3 %v9082_v47  ;;  %v9142_v47 = vor.u32 %v5699_v4, %v5624_v20  ;;  %v3108_v20 = vmax.f32 %v2835_v28, 0.0  ;;  %v3122_v28 = vmax.f32 %v2662_v15, 0.0 }
 0x462   : > { %v9130_v0 = vpop.f32.mrf.mxu2  ;;  %10986 = vst [vmem:[#allocation21_spill] sm:$0xff] %v9142_v47  ;;  %v9176_v37 = vpack.c.bf16 %v3116_v19, %v3108_v20  ;;  %v5701_v19 = vld [vmem:[%s10483_s7 + $0x64] sm:$0xf]  ;;  %v9198_v22 = vpack.c.bf16 %v3130_v14, %v3122_v28  ;;  %v9200_v20 = vpack.c.bf16 %v3131_v58, %v3123_v56  ;;  %v2931_v14 = vadd.f32 %v9046_v40, %v10988_v36 }
 0x463   : > { %v9132_v30 = vpop.f32.mrf.mxu3  ;;  %v9140_v60 = vpop.f32.mrf.mxu0  ;;  %v2840_v58 = vadd.f32 %v9026_v41, %v10990_v2  ;;  %v2929_v28 = vadd.f32 %v9028_v9, %v10990_v2  ;;  %v11002_v41 = vld [vmem:[#allocation6_spill] sm:$0xff] }
 0x464   : > { %v9144_v3 = vpop.f32.mrf.mxu1  ;;  %10991 = vst [vmem:[#allocation27_spill] sm:$0xff] %v9176_v37  ;;  %v2842_v37 = vadd.f32 %v9044_v35, %v10988_v36  ;;  %v3133_v31 = vmax.f32 %v2931_v14, 0.0  ;;  %v2758_v35 = vadd.f32 %v9054_v27, %v10999_v29  ;;  %v2667_v63 = vadd.f32 %v9032_v33, %v11002_v41  ;;  %v9236_v2 = vpop.permute.xlu1 %3416 }
 0x465   : > { %v3124_v36 = vmax.f32 %v2840_v58, 0.0  ;;  %v2756_v9 = vadd.f32 %v9036_v11, %v11002_v41  ;;  %11003 = vst [vmem:[#allocation40_spill] sm:$0xff] %v9236_v2  ;;  %v5638_v11 = vld [vmem:[%s10483_s7 + $0x70] sm:$0xf] }
 0x466   : > { %3567 = vmatmul.bf16.gmra.mxu0 %v9138_v38  ;;  %v3132_v56 = vmax.f32 %v2842_v37, 0.0  ;;  %v3138_v33 = vmax.f32 %v2667_v63, 0.0 }
 0x467   : > { %3616 = vmatmul.bf16.gmra.mxu1 %v9142_v47  ;;  %v3139_v58 = vmax.f32 %v2756_v9, 0.0 }
 0x46a   : > { %v9162_v53 = vpop.f32.mrf.mxu2 }
 0x46b   : > { %v9164_v4 = vpop.f32.mrf.mxu3  ;;  %v9172_v12 = vpop.f32.mrf.mxu0 }
 0x46c   : > { %v9174_v46 = vpop.f32.mrf.mxu1 }
 0x46f   : > { %3665 = vmatmul.bf16.gmra.mxu2 %v9138_v38  ;;  %v9210_v38 = vpop.permute.xlu0 %3431 }
 0x470   : > { %3714 = vmatmul.bf16.gmra.mxu3 %v9142_v47  ;;  %v9208_v47 = vor.u32 %v5701_v19, %v5632_v52  ;;  %10998 = vst [vmem:[#allocation49_spill] sm:$0xff] %v9210_v38  ;;  %v2669_v19 = vadd.f32 %v9052_v21, %v10999_v29  ;;  %v3125_v38 = vmax.f32 %v2929_v28, 0.0  ;;  %v5704_v28 = vld [vmem:[%s10483_s7 + $0x74] sm:$0xf0] }
 0x471   : > { %v9268_v9 = vor.u32 %v5704_v28, %v5638_v11 }
 0x472   : > { %v9194_v57 = vpop.f32.mrf.mxu2  ;;  %10997 = vst [vmem:[#allocation31_spill] sm:$0xff] %v9208_v47  ;;  %v3146_v21 = vmax.f32 %v2669_v19, 0.0  ;;  %v9240_v27 = vpack.c.bf16 %v3133_v31, %v3125_v38  ;;  %v5703_v38 = vld [vmem:[%s10483_s7 + $0x74] sm:$0xf] }
 0x473   : > { %10993 = vst [vmem:[#allocation34_spill] sm:$0xff] %v9194_v57  ;;  %v9196_v15 = vpop.f32.mrf.mxu3  ;;  %v9206_v10 = vpop.f32.mrf.mxu0  ;;  %v9238_v57 = vpack.c.bf16 %v3132_v56, %v3124_v36  ;;  %v5640_v56 = vld [vmem:[%s10483_s7 + $0x78] sm:$0xf0] }
 0x474   : > { %10994 = vst [vmem:[#allocation53_spill] sm:$0xff] %v9196_v15  ;;  %v9212_v24 = vpop.f32.mrf.mxu1  ;;  %v3147_v15 = vmax.f32 %v2758_v35, 0.0  ;;  %v9262_v19 = vpack.c.bf16 %v3146_v21, %v3138_v33  ;;  %v9266_v36 = vpop.permute.xlu2 %3451  ;;  %v2934_v21 = vadd.f32 %v9072_v17, %v11002_v41 }
 0x475   : > { %11004 = vst [vmem:[#allocation54_spill] sm:$0xff] %v9238_v57  ;;  %v2936_v57 = vadd.f32 %v9102_v50, %v10999_v29 }
 0x476   : > { %3572 = vmatmul.bf16.gmra.mxu0 %v9204_v8  ;;  %11005 = vst [vmem:[#allocation16_spill] sm:$0xff] %v9240_v27  ;;  %v9264_v35 = vpack.c.bf16 %v3147_v15, %v3139_v58  ;;  %v2847_v27 = vadd.f32 %v9100_v42, %v10999_v29  ;;  %v2845_v15 = vadd.f32 %v9070_v5, %v11002_v41 }
 0x477   : > { %3621 = vmatmul.bf16.gmra.mxu1 %v9208_v47  ;;  %11007 = vst [vmem:[#allocation14_spill] sm:$0xff] %v9266_v36  ;;  %v3149_v11 = vmax.f32 %v2936_v57, 0.0 }
 0x478   : > { %11008 = vst [vmem:[#allocation23_spill] sm:$0xff] %v9268_v9  ;;  %v3148_v58 = vmax.f32 %v2847_v27, 0.0  ;;  %v3140_v29 = vmax.f32 %v2845_v15, 0.0 }
 0x47a   : > { %v9228_v52 = vpop.f32.mrf.mxu2 }
 0x47b   : > { %11000 = vst [vmem:[#allocation7_spill] sm:$0xff] %v9228_v52  ;;  %v9230_v40 = vpop.f32.mrf.mxu3  ;;  %v2683_v37 = vpop.f32.mrf.mxu0 }
 0x47c   : > { %11001 = vst [vmem:[#allocation36_spill] sm:$0xff] %v9230_v40  ;;  %v2772_v14 = vpop.f32.mrf.mxu1  ;;  %v9242_v52 = vpop.permute.xlu0 %3406  ;;  %v2684_v17 = vadd.f32 %v2683_v37, %v10940_v55  ;;  %v2771_v37 = vadd.f32 %v9212_v24, %v10942_v45 }
 0x47d   : > { %11006 = vst [vmem:[#allocation20_spill] sm:$0xff] %v9242_v52  ;;  %v9276_v52 = vpop.permute.xlu1 %3411  ;;  %v9292_v36 = vpop.permute.xlu2 %3426  ;;  %v2773_v57 = vadd.f32 %v2772_v14, %v10940_v55 }
 0x47e   : > { %11010 = vst [vmem:[#allocation52_spill] sm:$0xff] %v9276_v52 }
 0x47f   : > { %3670 = vmatmul.bf16.gmra.mxu2 %v9204_v8  ;;  %v9270_v8 = vor.u32 %v5703_v38, %v5640_v56  ;;  %v3141_v38 = vmax.f32 %v2934_v21, 0.0  ;;  %11012 = vst [vmem:[#allocation37_spill] sm:$0xff] %v9292_v36  ;;  %v11013_v36 = vld [vmem:[#allocation29_spill] sm:$0xff] }
 0x480   : > { %3719 = vmatmul.bf16.gmra.mxu3 %v9208_v47  ;;  %v2677_v24 = vadd.f32 %v9140_v60, %v11013_v36 }
 0x481   : > { %11009 = vst [vmem:[#allocation15_spill] sm:$0xff] %v9270_v8  ;;  %v9300_v40 = vpack.c.bf16 %v3149_v11, %v3141_v38 }
 0x482   : > { %v9258_v31 = vpop.f32.mrf.mxu2 }
 0x483   : > { %v9260_v63 = vpop.f32.mrf.mxu3  ;;  %v2686_v47 = vpop.f32.mrf.mxu0 }
 0x484   : > { %v2775_v2 = vpop.f32.mrf.mxu1  ;;  %v9284_v33 = vpop.permute.xlu0 %3401  ;;  %v2687_v50 = vadd.f32 %v2686_v47, %v10939_v48  ;;  %v2682_v47 = vadd.f32 %v9206_v10, %v10942_v45  ;;  %v2768_v10 = vadd.f32 %v9174_v46, %v10943_v34  ;;  %v11014_v46 = vld [vmem:[#allocation25_spill] sm:$0xff] }
 0x485   : > { %11011 = vst [vmem:[#allocation30_spill] sm:$0xff] %v9284_v33  ;;  %v2776_v56 = vadd.f32 %v2775_v2, %v10939_v48  ;;  %v9298_v33 = vpack.c.bf16 %v3148_v58, %v3140_v29  ;;  %v3194_v58 = vmax.f32 %v2684_v17, 0.0  ;;  %v3187_v17 = vmax.f32 %v2771_v37, 0.0 }
 0x486   : > { %3577 = vmatmul.bf16.gmra.mxu0 %v9268_v9  ;;  %v3202_v2 = vmax.f32 %v2687_v50, 0.0  ;;  %v3195_v50 = vmax.f32 %v2773_v57, 0.0  ;;  %v2674_v57 = vadd.f32 %v9108_v23, %v11014_v46  ;;  %v2852_v60 = vadd.f32 %v9162_v53, %v11014_v46 }
 0x487   : > { %3626 = vmatmul.bf16.gmra.mxu1 %v9270_v8  ;;  %v3203_v21 = vmax.f32 %v2776_v56, 0.0  ;;  %v3186_v56 = vmax.f32 %v2682_v47, 0.0  ;;  %v2941_v47 = vadd.f32 %v9164_v4, %v11014_v46  ;;  %v2763_v37 = vadd.f32 %v9110_v62, %v11014_v46 }
 0x48a   : > { %v9286_v42 = vpop.f32.mrf.mxu2 }
 0x48b   : > { %v9288_v28 = vpop.f32.mrf.mxu3  ;;  %v2688_v5 = vpop.f32.mrf.mxu0 }
 0x48c   : > { %v2689_v41 = vadd.f32 %v2688_v5, %v10941_v43  ;;  %v2777_v52 = vpop.f32.mrf.mxu1  ;;  %v9308_v5 = vpop.permute.xlu1 %3386 }
 0x48d   : > { %v2778_v27 = vadd.f32 %v2777_v52, %v10941_v43  ;;  %v2679_v52 = vadd.f32 %v9172_v12, %v10943_v34  ;;  %v2766_v12 = vadd.f32 %v9144_v3, %v11013_v36  ;;  %v9331_v3 = vpop.permute.xlu2 %3421 }
 0x48e   : > { %v3210_v15 = vmax.f32 %v2689_v41, 0.0 }
 0x48f   : > { %3675 = vmatmul.bf16.gmra.mxu2 %v9268_v9  ;;  %v3211_v14 = vmax.f32 %v2778_v27, 0.0  ;;  %v9320_v27 = vpop.permute.xlu0 %3376  ;;  %v3331_v9 = vpack.c.bf16 %v3195_v50, %v3187_v17 }
 0x490   : > { %3724 = vmatmul.bf16.gmra.mxu3 %v9270_v8  ;;  %v3338_v11 = vpack.c.bf16 %v3210_v15, %v3202_v2  ;;  %v3178_v15 = vmax.f32 %v2679_v52, 0.0  ;;  %v3330_v8 = vpack.c.bf16 %v3194_v58, %v3186_v56  ;;  %v11015_v52 = vld [vmem:[#allocation12_spill] sm:$0xff]  ;;  %v3165_v56 = vmax.f32 %v2941_v47, 0.0 }
 0x491   : > { %v3339_v29 = vpack.c.bf16 %v3211_v14, %v3203_v21  ;;  %v2672_v58 = vadd.f32 %v9080_v51, %v11015_v52  ;;  %v2850_v53 = vadd.f32 %v9130_v0, %v11015_v52  ;;  %v2939_v4 = vadd.f32 %v9132_v30, %v11015_v52 }
 0x492   : > { %v9314_v38 = vpop.f32.mrf.mxu2  ;;  %3975 = vmatpush.bf16.msra.mxu1 %v3338_v11  ;;  %v3179_v11 = vmax.f32 %v2768_v10, 0.0  ;;  %v3171_v10 = vmax.f32 %v2766_v12, 0.0  ;;  %v2761_v62 = vadd.f32 %v9084_v61, %v11015_v52  ;;  %v3163_v0 = vmax.f32 %v2763_v37, 0.0 }
 0x493   : > { %v9316_v41 = vpop.f32.mrf.mxu3  ;;  %4073 = vmatpush.bf16.msra.mxu3 %v3339_v29  ;;  %v3543_v2 = vpop.f32.mrf.mxu0  ;;  %v3170_v29 = vmax.f32 %v2677_v24, 0.0  ;;  %v3164_v24 = vmax.f32 %v2852_v60, 0.0  ;;  %v3154_v30 = vmax.f32 %v2672_v58, 0.0  ;;  %v3156_v12 = vmax.f32 %v2850_v53, 0.0 }
 0x494   : > { %v3544_v21 = vadd.f32 %v3543_v2, %v9320_v27  ;;  %v3592_v14 = vpop.f32.mrf.mxu1  ;;  %v3323_v2 = vpack.c.bf16 %v3179_v11, %v3171_v10  ;;  %v9348_v46 = vpop.permute.xlu1 %3381 }
 0x495   : > { %v3322_v50 = vpack.c.bf16 %v3178_v15, %v3170_v29  ;;  %v9352_v15 = vpack.c.bf16 %v3164_v24, %v3156_v12  ;;  %v9361_v37 = vpop.permute.xlu2 %3396 }
 0x496   : > { %v9335_v23 = vadd.f32 %v3592_v14, %v3544_v21  ;;  %3738 = vmatmul.bf16.vlgmr.msrb.gmra.mxu0 %v8856_v59  ;;  %3976 = vmatpush.bf16.msra.mxu1 %v3330_v8  ;;  %v3162_v8 = vmax.f32 %v2674_v57, 0.0  ;;  %v3157_v21 = vmax.f32 %v2939_v4, 0.0  ;;  %v3155_v14 = vmax.f32 %v2761_v62, 0.0 }
 0x497   : > { %3787 = vmatmul.bf16.vlgmr.msrb.gmra.mxu1 %v8862_v7  ;;  %4074 = vmatpush.bf16.msra.mxu3 %v3331_v9 }
 0x498   : > { %4122 = vmatpush.bf16.msrb.mxu0 %v8900_v18  ;;  %v3314_v57 = vpack.c.bf16 %v3162_v8, %v3154_v30  ;;  %v9354_v60 = vpack.c.bf16 %v3165_v56, %v3157_v21  ;;  %v3315_v11 = vpack.c.bf16 %v3163_v0, %v3155_v14  ;;  %v11019_v30 = vld [vmem:[#allocation47_spill] sm:$0xff]  ;;  %v11023_v14 = vld [vmem:[#allocation34_spill] sm:$0xff] }
 0x49a   : > { %v2866_v51 = vpop.f32.mrf.mxu2  ;;  %3977 = vmatpush.bf16.msra.mxu1 %v3322_v50  ;;  %v2954_v50 = vadd.f32 %v9316_v41, %v10939_v48 }
 0x49b   : > { %v2955_v17 = vpop.f32.mrf.mxu3  ;;  %4075 = vmatpush.bf16.msra.mxu3 %v3323_v2  ;;  %v3545_v9 = vpop.f32.mrf.mxu0 }
 0x49c   : > { %4123 = vmatpush.bf16.msrb.mxu0 %v9008_v54  ;;  %v3546_v18 = vadd.f32 %v3545_v9, %v9348_v46  ;;  %v3594_v61 = vpop.f32.mrf.mxu1 }
 0x49d   : > { %v9387_v8 = vpop.permute.xlu2 %3391 }
 0x49e   : > { %v9356_v47 = vadd.f32 %v3594_v61, %v3546_v18  ;;  %3978 = vmatpush.bf16.msra.mxu1 %v3314_v57  ;;  %v2855_v18 = vadd.f32 %v11023_v14, %v11013_v36  ;;  %v11024_v57 = vld [vmem:[#allocation9_spill] sm:$0xff] }
 0x49f   : > { %3836 = vmatmul.bf16.vlgmr.msrb.gmra.mxu2 %v8856_v59  ;;  %4076 = vmatpush.bf16.msra.mxu3 %v3315_v11 }
 0x4a0   : > { %3885 = vmatmul.bf16.vlgmr.msrb.gmra.mxu3 %v8862_v7  ;;  %4220 = vmatpush.bf16.msrb.mxu2 %v8902_v26 }
 0x4a1   : > { %4124 = vmatpush.bf16.msrb.mxu0 %v8954_v16  ;;  %v2867_v16 = vadd.f32 %v2866_v51, %v10941_v43 }
 0x4a2   : > { %v3641_v54 = vpop.f32.mrf.mxu2  ;;  %3979 = vmatpush.bf16.msra.mxu1 %v9262_v19  ;;  %v11016_v19 = vld [vmem:[#allocation55_spill] sm:$0xff] }
 0x4a3   : > { %v3690_v29 = vpop.f32.mrf.mxu3  ;;  %v3642_v52 = vadd.f32 %v3641_v54, %v9320_v27  ;;  %v3548_v58 = vpop.f32.mrf.mxu0  ;;  %4077 = vmatpush.bf16.msra.mxu3 %v9264_v35 }
 0x4a4   : > { %4221 = vmatpush.bf16.msrb.mxu2 %v9010_v49  ;;  %v3549_v26 = vadd.f32 %v3548_v58, %v9308_v5  ;;  %v3597_v4 = vpop.f32.mrf.mxu1  ;;  %v2956_v49 = vadd.f32 %v2955_v17, %v10941_v43  ;;  %v2862_v43 = vadd.f32 %v9286_v42, %v10940_v55  ;;  %v2860_v42 = vadd.f32 %v9258_v31, %v10942_v45  ;;  %v11017_v17 = vld [vmem:[#allocation33_spill] sm:$0xff]  ;;  %v11020_v31 = vld [vmem:[#allocation36_spill] sm:$0xff] }
 0x4a5   : > { %v9367_v53 = vadd.f32 %v3690_v29, %v3642_v52  ;;  %4125 = vmatpush.bf16.msrb.mxu0 %v8896_v39  ;;  %v2865_v39 = vadd.f32 %v9314_v38, %v10939_v48  ;;  %v2951_v38 = vadd.f32 %v9288_v28, %v10940_v55  ;;  %v3205_v55 = vmax.f32 %v2954_v50, 0.0  ;;  %v11025_v29 = vld [vmem:[#allocation53_spill] sm:$0xff] }
 0x4a6   : > { %v9372_v10 = vadd.f32 %v3597_v4, %v3549_v26  ;;  %3743 = vmatmul.bf16.gmra.mxu0 %v8924_v6  ;;  %3980 = vmatpush.bf16.msra.mxu1 %v9198_v22  ;;  %v3212_v22 = vmax.f32 %v2867_v16, 0.0  ;;  %v3213_v24 = vmax.f32 %v2956_v49, 0.0  ;;  %v3196_v2 = vmax.f32 %v2862_v43, 0.0  ;;  %v11026_v4 = vld [vmem:[#allocation43_spill] sm:$0xff]  ;;  %v11027_v43 = vld [vmem:[#allocation26_spill] sm:$0xff] }
 0x4a7   : > { %3792 = vmatmul.bf16.gmra.mxu1 %v8929_v25  ;;  %4078 = vmatpush.bf16.msra.mxu3 %v9200_v20  ;;  %v3204_v51 = vmax.f32 %v2865_v39, 0.0  ;;  %v2946_v12 = vadd.f32 %v11020_v31, %v10943_v34  ;;  %v3197_v21 = vmax.f32 %v2951_v38, 0.0  ;;  %v3188_v61 = vmax.f32 %v2860_v42, 0.0  ;;  %v11029_v38 = vld [vmem:[#allocation44_spill] sm:$0xff] }
 0x4a8   : > { %4222 = vmatpush.bf16.msrb.mxu2 %v8956_v1  ;;  %v3341_v9 = vpack.c.bf16 %v3213_v24, %v3205_v55  ;;  %v2944_v52 = vadd.f32 %v11025_v29, %v11013_v36  ;;  %v11030_v24 = vld [vmem:[#allocation50_spill] sm:$0xff]  ;;  %v11038_v29 = vld [vmem:[#allocation27_spill] sm:$0xff] }
 0x4a9   : > { %4126 = vmatpush.bf16.msrb.mxu0 %v11016_v19  ;;  %v3340_v0 = vpack.c.bf16 %v3212_v22, %v3204_v51  ;;  %v3332_v49 = vpack.c.bf16 %v3196_v2, %v3188_v61  ;;  %v3181_v39 = vmax.f32 %v2946_v12, 0.0  ;;  %v11035_v61 = vld [vmem:[#allocation16_spill] sm:$0xff] }
 0x4aa   : > { %v3643_v35 = vpop.f32.mrf.mxu2  ;;  %3981 = vmatpush.bf16.msra.mxu1 %v9134_v32  ;;  %v11018_v32 = vld [vmem:[#allocation7_spill] sm:$0xff]  ;;  %v3173_v36 = vmax.f32 %v2944_v52, 0.0  ;;  %v11039_v52 = vld [vmem:[#allocation38_spill] sm:$0xff] }
 0x4ab   : > { %v3692_v62 = vpop.f32.mrf.mxu3  ;;  %v3644_v1 = vadd.f32 %v3643_v35, %v9348_v46  ;;  %v3550_v20 = vpop.f32.mrf.mxu0  ;;  %4079 = vmatpush.bf16.msra.mxu3 %v9136_v44  ;;  %v2857_v44 = vadd.f32 %v11018_v32, %v10943_v34 }
 0x4ac   : > { %4223 = vmatpush.bf16.msrb.mxu2 %v8898_v13  ;;  %v3551_v48 = vadd.f32 %v3550_v20, %v9387_v8  ;;  %v3599_v41 = vpop.f32.mrf.mxu1  ;;  %v2949_v13 = vadd.f32 %v9260_v63, %v10942_v45  ;;  %v11021_v45 = vld [vmem:[#allocation19_spill] sm:$0xff]  ;;  %v11022_v63 = vld [vmem:[#allocation41_spill] sm:$0xff] }
 0x4ad   : > { %v9394_v56 = vadd.f32 %v3692_v62, %v3644_v1  ;;  %4127 = vmatpush.bf16.msrb.mxu0 %v11017_v17  ;;  %v3180_v26 = vmax.f32 %v2857_v44, 0.0  ;;  %v3172_v1 = vmax.f32 %v2855_v18, 0.0  ;;  %v11028_v20 = vld [vmem:[#allocation35_spill] sm:$0xff]  ;;  %v11032_v44 = vld [vmem:[#allocation30_spill] sm:$0xff] }
 0x4ae   : > { %v9404_v28 = vadd.f32 %v3599_v41, %v3551_v48  ;;  %3982 = vmatpush.bf16.msra.mxu1 %v11021_v45  ;;  %v3189_v58 = vmax.f32 %v2949_v13, 0.0  ;;  %v3325_v41 = vpack.c.bf16 %v3181_v39, %v3173_v36  ;;  %v11031_v13 = vld [vmem:[#allocation48_spill] sm:$0xff]  ;;  %v11034_v18 = vld [vmem:[#allocation54_spill] sm:$0xff] }
 0x4af   : > { %3841 = vmatmul.bf16.gmra.mxu2 %v8924_v6  ;;  %4080 = vmatpush.bf16.msra.mxu3 %v11022_v63  ;;  %v3324_v48 = vpack.c.bf16 %v3180_v26, %v3172_v1  ;;  %v11040_v26 = vld [vmem:[#allocation52_spill] sm:$0xff] }
 0x4b0   : > { %3890 = vmatmul.bf16.gmra.mxu3 %v8929_v25  ;;  %4224 = vmatpush.bf16.msrb.mxu2 %v11019_v30  ;;  %v3333_v50 = vpack.c.bf16 %v3197_v21, %v3189_v58 }
 0x4b1   : > { %4128 = vmatpush.bf16.msrb.mxu0 %v11024_v57  ;;  %v11036_v57 = vld [vmem:[#allocation51_spill] sm:$0xff] }
 0x4b2   : > { %v3646_v11 = vpop.f32.mrf.mxu2  ;;  %4171 = vmatpush.bf16.msrb.mxu1 %v3340_v0 }
 0x4b3   : > { %v3695_v54 = vpop.f32.mrf.mxu3  ;;  %v3647_v34 = vadd.f32 %v3646_v11, %v9308_v5  ;;  %4269 = vmatpush.bf16.msrb.mxu3 %v3341_v9  ;;  %v3553_v16 = vpop.f32.mrf.mxu0  ;;  %v11037_v11 = vld [vmem:[#allocation42_spill] sm:$0xff] }
 0x4b4   : > { %4225 = vmatpush.bf16.msrb.mxu2 %v11026_v4  ;;  %v3554_v35 = vadd.f32 %v3553_v16, %v9361_v37  ;;  %v3602_v62 = vpop.f32.mrf.mxu1 }
 0x4b5   : > { %v9422_v19 = vadd.f32 %v3695_v54, %v3647_v34  ;;  %4129 = vmatpush.bf16.msrb.mxu0 %v11027_v43 }
 0x4b6   : > { %4172 = vmatpush.bf16.msrb.mxu1 %v3332_v49  ;;  %v9426_v22 = vadd.f32 %v3602_v62, %v3554_v35  ;;  %3748 = vmatmul.bf16.gmra.mxu0 %v11028_v20  ;;  %v11041_v49 = vld [vmem:[#allocation39_spill] sm:$0xff]  ;;  %v11042_v35 = vld [vmem:[#allocation45_spill] sm:$0xff]  ;;  %v4326_v62 = vmax.f32 %v9356_v47, 0.0  ;;  %v11045_v47 = vld [vmem:[#allocation46_spill] sm:$0xff] }
 0x4b7   : > { %4270 = vmatpush.bf16.msrb.mxu3 %v3333_v50  ;;  %3797 = vmatmul.bf16.gmra.mxu1 %v11030_v24  ;;  %v4318_v50 = vmax.f32 %v9335_v23, 0.0 }
 0x4b8   : > { %4226 = vmatpush.bf16.msrb.mxu2 %v11029_v38 }
 0x4ba   : > { %v3648_v42 = vpop.f32.mrf.mxu2  ;;  %4173 = vmatpush.bf16.msrb.mxu1 %v3324_v48  ;;  %v9469_v48 = vpack.c.bf16 %v4326_v62, %v4318_v50  ;;  %v4335_v62 = vmax.f32 %v9422_v19, 0.0  ;;  %v11051_v19 = vld [vmem:[#allocation31_spill] sm:$0xff] }
 0x4bb   : > { %v3697_v51 = vpop.f32.mrf.mxu3  ;;  %v3649_v17 = vadd.f32 %v3648_v42, %v9387_v8  ;;  %4271 = vmatpush.bf16.msrb.mxu3 %v3325_v41  ;;  %v3555_v55 = vpop.f32.mrf.mxu0  ;;  %v11043_v42 = vld [vmem:[#allocation40_spill] sm:$0xff] }
 0x4bc   : > { %4227 = vmatpush.bf16.msrb.mxu2 %v11031_v13  ;;  %v3556_v2 = vadd.f32 %v3555_v55, %v11032_v44  ;;  %v3604_v0 = vpop.f32.mrf.mxu1  ;;  %v11044_v55 = vld [vmem:[#allocation28_spill] sm:$0xff] }
 0x4bd   : > { %v9433_v32 = vadd.f32 %v3697_v51, %v3649_v17 }
 0x4be   : > { %4174 = vmatpush.bf16.msrb.mxu1 %v9352_v15  ;;  %v9437_v30 = vadd.f32 %v3604_v0, %v3556_v2  ;;  %v11033_v15 = vld [vmem:[#allocation20_spill] sm:$0xff] }
 0x4bf   : > { %4272 = vmatpush.bf16.msrb.mxu3 %v9354_v60  ;;  %3846 = vmatmul.bf16.gmra.mxu2 %v11028_v20 }
 0x4c0   : > { %3895 = vmatmul.bf16.gmra.mxu3 %v11030_v24  ;;  %v4358_v50 = vmax.f32 %v9437_v30, 0.0 }
 0x4c2   : > { %v3651_v31 = vpop.f32.mrf.mxu2  ;;  %4175 = vmatpush.bf16.msrb.mxu1 %v9298_v33 }
 0x4c3   : > { %v3700_v12 = vpop.f32.mrf.mxu3  ;;  %v3652_v21 = vadd.f32 %v3651_v31, %v9361_v37  ;;  %4273 = vmatpush.bf16.msrb.mxu3 %v9300_v40  ;;  %v3558_v9 = vpop.f32.mrf.mxu0  ;;  %v4327_v31 = vmax.f32 %v9394_v56, 0.0 }
 0x4c4   : > { %v3559_v63 = vadd.f32 %v3558_v9, %v11033_v15  ;;  %v3607_v14 = vpop.f32.mrf.mxu1 }
 0x4c5   : > { %v9445_v45 = vadd.f32 %v3700_v12, %v3652_v21 }
 0x4c6   : > { %4176 = vmatpush.bf16.msrb.mxu1 %v11034_v18  ;;  %v9449_v60 = vadd.f32 %v3607_v14, %v3559_v63  ;;  %3753 = vmatmul.bf16.gmra.mxu0 %v11036_v57  ;;  %v4319_v63 = vmax.f32 %v9367_v53, 0.0  ;;  %v4342_v14 = vmax.f32 %v9404_v28, 0.0  ;;  %v11048_v28 = vld [vmem:[#allocation21_spill] sm:$0xff] }
 0x4c7   : > { %4274 = vmatpush.bf16.msrb.mxu3 %v11035_v61  ;;  %3802 = vmatmul.bf16.gmra.mxu1 %v11037_v11  ;;  %v4334_v61 = vmax.f32 %v9372_v10, 0.0  ;;  %v4343_v10 = vmax.f32 %v9433_v32, 0.0 }
 0x4c8   : > { %v9490_v18 = vpack.c.bf16 %v4327_v31, %v4319_v63  ;;  %v4351_v63 = vmax.f32 %v9445_v45, 0.0  ;;  %v11053_v45 = vld [vmem:[#allocation15_spill] sm:$0xff] }
 0x4ca   : > { %v3653_v33 = vpop.f32.mrf.mxu2  ;;  %4177 = vmatpush.bf16.msrb.mxu1 %v11038_v29  ;;  %11046 = vst [vmem:[#allocation24_spill] sm:$0xff] %v9490_v18 }
 0x4cb   : > { %v3702_v54 = vpop.f32.mrf.mxu3  ;;  %v3654_v40 = vadd.f32 %v3653_v33, %v11032_v44  ;;  %4275 = vmatpush.bf16.msrb.mxu3 %v11039_v52  ;;  %v3560_v58 = vpop.f32.mrf.mxu0 }
 0x4cc   : > { %v3561_v4 = vadd.f32 %v3560_v58, %v11040_v26  ;;  %v3609_v16 = vpop.f32.mrf.mxu1  ;;  %v11047_v58 = vld [vmem:[#allocation8_spill] sm:$0xff] }
 0x4cd   : > { %v9457_v34 = vadd.f32 %v3702_v54, %v3654_v40  ;;  %v9494_v40 = vpack.c.bf16 %v4342_v14, %v4334_v61 }
 0x4ce   : > { %4178 = vmatpush.bf16.msrb.mxu1 %v11041_v49  ;;  %v9461_v39 = vadd.f32 %v3609_v16, %v3561_v4 }
 0x4cf   : > { %4276 = vmatpush.bf16.msrb.mxu3 %v11042_v35  ;;  %3851 = vmatmul.bf16.gmra.mxu2 %v11036_v57 }
 0x4d0   : > { %3900 = vmatmul.bf16.gmra.mxu3 %v11037_v11  ;;  %v4374_v14 = vmax.f32 %v9461_v39, 0.0 }
 0x4d2   : > { %v3656_v1 = vpop.f32.mrf.mxu2 }
 0x4d3   : > { %v3705_v43 = vpop.f32.mrf.mxu3  ;;  %v3657_v36 = vadd.f32 %v3656_v1, %v11033_v15  ;;  %v3563_v38 = vpop.f32.mrf.mxu0  ;;  %v9511_v1 = vpack.c.bf16 %v4343_v10, %v4335_v62 }
 0x4d4   : > { %v3564_v51 = vadd.f32 %v3563_v38, %v11043_v42  ;;  %v3612_v17 = vpop.f32.mrf.mxu1 }
 0x4d5   : > { %v9471_v41 = vadd.f32 %v3705_v43, %v3657_v36  ;;  %11049 = vst [vmem:[#allocation22_spill] sm:$0xff] %v9511_v1  ;;  %v4350_v43 = vmax.f32 %v9426_v22, 0.0  ;;  %v11059_v1 = vld [vmem:[#allocation37_spill] sm:$0xff] }
 0x4d6   : > { %v9474_v13 = vadd.f32 %v3612_v17, %v3564_v51  ;;  %3758 = vmatmul.bf16.gmra.mxu0 %v11044_v55 }
 0x4d7   : > { %3807 = vmatmul.bf16.gmra.mxu1 %v11045_v47  ;;  %v9518_v32 = vpack.c.bf16 %v4358_v50, %v4350_v43  ;;  %v11052_v50 = vld [vmem:[#allocation23_spill] sm:$0xff] }
 0x4da   : > { %v3658_v2 = vpop.f32.mrf.mxu2 }
 0x4db   : > { %v3707_v23 = vpop.f32.mrf.mxu3  ;;  %v3659_v0 = vadd.f32 %v3658_v2, %v11040_v26  ;;  %v9480_v12 = vpop.f32.mrf.mxu0  ;;  %v11050_v2 = vld [vmem:[#allocation17_spill] sm:$0xff] }
 0x4dc   : > { %v9484_v9 = vpop.f32.mrf.mxu1 }
 0x4dd   : > { %v9482_v21 = vadd.f32 %v3707_v23, %v3659_v0  ;;  %v4359_v0 = vmax.f32 %v9457_v34, 0.0 }
 0x4df   : > { %3856 = vmatmul.bf16.gmra.mxu2 %v11044_v55  ;;  %v9531_v61 = vpack.c.bf16 %v4359_v0, %v4351_v63  ;;  %v4375_v39 = vmax.f32 %v9482_v21, 0.0  ;;  %v11056_v55 = vld [vmem:[#allocation10_spill] sm:$0xff]  ;;  %v11058_v21 = vld [vmem:[#allocation49_spill] sm:$0xff] }
 0x4e0   : > { %3905 = vmatmul.bf16.gmra.mxu3 %v11045_v47  ;;  %v4367_v47 = vmax.f32 %v9471_v41, 0.0 }
 0x4e2   : > { %v3661_v33 = vpop.f32.mrf.mxu2  ;;  %v9548_v57 = vpack.c.bf16 %v4375_v39, %v4367_v47 }
 0x4e3   : > { %v3710_v56 = vpop.f32.mrf.mxu3  ;;  %v3662_v54 = vadd.f32 %v3661_v33, %v11043_v42  ;;  %v3568_v29 = vpop.f32.mrf.mxu0  ;;  %v4366_v33 = vmax.f32 %v9449_v60, 0.0  ;;  %v11057_v42 = vld [vmem:[#allocation11_spill] sm:$0xff] }
 0x4e4   : > { %v9498_v53 = vpop.f32.mrf.mxu1  ;;  %v3569_v41 = vadd.f32 %v3568_v29, %v11059_v1 }
 0x4e5   : > { %v9496_v52 = vadd.f32 %v3710_v56, %v3662_v54  ;;  %v9536_v62 = vpack.c.bf16 %v4374_v14, %v4366_v33 }
 0x4e6   : > { %3763 = vmatmul.bf16.gmra.mxu0 %v11047_v58  ;;  %v3618_v29 = vadd.f32 %v9498_v53, %v3569_v41 }
 0x4e7   : > { %3812 = vmatmul.bf16.gmra.mxu1 %v11048_v28 }
 0x4ea   : > { %v9502_v4 = vpop.f32.mrf.mxu2 }
 0x4eb   : > { %v9504_v16 = vpop.f32.mrf.mxu3  ;;  %v3570_v49 = vpop.f32.mrf.mxu0 }
 0x4ec   : > { %v3619_v35 = vpop.f32.mrf.mxu1 }
 0x4ef   : > { %3861 = vmatmul.bf16.gmra.mxu2 %v11047_v58 }
 0x4f0   : > { %3910 = vmatmul.bf16.gmra.mxu3 %v11048_v28  ;;  %v11055_v28 = vld [vmem:[#allocation14_spill] sm:$0xff] }
 0x4f2   : > { %v9514_v36 = vpop.f32.mrf.mxu2 }
 0x4f3   : > { %v9516_v38 = vpop.f32.mrf.mxu3  ;;  %v3573_v51 = vpop.f32.mrf.mxu0 }
 0x4f4   : > { %v3622_v17 = vpop.f32.mrf.mxu1  ;;  %v3574_v26 = vadd.f32 %v3573_v51, %v11057_v42  ;;  %v3566_v51 = vadd.f32 %v9480_v12, %v9331_v3 }
 0x4f6   : > { %3768 = vmatmul.bf16.gmra.mxu0 %v11050_v2  ;;  %v3623_v24 = vadd.f32 %v3622_v17, %v3574_v26  ;;  %v3615_v17 = vadd.f32 %v9484_v9, %v3566_v51 }
 0x4f7   : > { %3817 = vmatmul.bf16.gmra.mxu1 %v11051_v19 }
 0x4f8   : > { %v4414_v26 = vmax.f32 %v3623_v24, 0.0  ;;  %v4390_v41 = vmax.f32 %v3615_v17, 0.0 }
 0x4fa   : > { %v9522_v23 = vpop.f32.mrf.mxu2 }
 0x4fb   : > { %v9524_v30 = vpop.f32.mrf.mxu3  ;;  %v3575_v31 = vpop.f32.mrf.mxu0  ;;  %v3669_v24 = vadd.f32 %v9522_v23, %v11058_v21  ;;  %v4382_v23 = vmax.f32 %v9474_v13, 0.0 }
 0x4fc   : > { %v3624_v22 = vpop.f32.mrf.mxu1  ;;  %v3576_v14 = vadd.f32 %v3575_v31, %v11056_v55 }
 0x4fe   : > { %v3625_v15 = vadd.f32 %v3624_v22, %v3576_v14 }
 0x4ff   : > { %3866 = vmatmul.bf16.gmra.mxu2 %v11050_v2 }
 0x500   : > { %3915 = vmatmul.bf16.gmra.mxu3 %v11051_v19  ;;  %v11054_v19 = vld [vmem:[#allocation13_spill] sm:$0xff]  ;;  %v4422_v47 = vmax.f32 %v3625_v15, 0.0 }
 0x502   : > { %v3671_v56 = vpop.f32.mrf.mxu2 }
 0x503   : > { %v9534_v54 = vpop.f32.mrf.mxu3  ;;  %v3578_v10 = vpop.f32.mrf.mxu0 }
 0x504   : > { %v3627_v34 = vpop.f32.mrf.mxu1  ;;  %v3579_v0 = vadd.f32 %v3578_v10, %v11054_v19  ;;  %v3571_v10 = vadd.f32 %v3570_v49, %v11058_v21 }
 0x506   : > { %3773 = vmatmul.bf16.gmra.mxu0 %v11052_v50  ;;  %v3628_v11 = vadd.f32 %v3627_v34, %v3579_v0  ;;  %v3620_v34 = vadd.f32 %v3619_v35, %v3571_v10  ;;  %v3672_v0 = vadd.f32 %v3671_v56, %v11057_v42 }
 0x507   : > { %3822 = vmatmul.bf16.gmra.mxu1 %v11053_v45 }
 0x508   : > { %v4430_v31 = vmax.f32 %v3628_v11, 0.0  ;;  %v4406_v12 = vmax.f32 %v3620_v34, 0.0  ;;  %v3718_v34 = vadd.f32 %v9524_v30, %v3669_v24 }
 0x50a   : > { %v3673_v43 = vpop.f32.mrf.mxu2  ;;  %v4407_v17 = vmax.f32 %v3718_v34, 0.0  ;;  %v11061_v34 = vld [vmem:[#allocation22_spill] sm:$0xff] }
 0x50b   : > { %v3722_v2 = vpop.f32.mrf.mxu3  ;;  %v3580_v63 = vpop.f32.mrf.mxu0  ;;  %v3674_v11 = vadd.f32 %v3673_v43, %v11056_v55 }
 0x50c   : > { %v3581_v60 = vadd.f32 %v3580_v63, %v11055_v28  ;;  %v3629_v58 = vpop.f32.mrf.mxu1 }
 0x50d   : > { %v3723_v10 = vadd.f32 %v3722_v2, %v3674_v11  ;;  %v3664_v2 = vadd.f32 %v9502_v4, %v9331_v3 }
 0x50e   : > { %v3630_v33 = vadd.f32 %v3629_v58, %v3581_v60 }
 0x50f   : > { %3871 = vmatmul.bf16.gmra.mxu2 %v11052_v50  ;;  %v3713_v13 = vadd.f32 %v9504_v16, %v3664_v2 }
 0x510   : > { %3920 = vmatmul.bf16.gmra.mxu3 %v11053_v45  ;;  %v4438_v18 = vmax.f32 %v3630_v33, 0.0  ;;  %v4398_v33 = vmax.f32 %v3618_v29, 0.0 }
 0x511   : > { %v4391_v16 = vmax.f32 %v3713_v13, 0.0 }
 0x512   : > { %v3676_v63 = vpop.f32.mrf.mxu2  ;;  %v4502_v39 = vpack.c.bf16 %v4438_v18, %v4430_v31  ;;  %v4494_v18 = vpack.c.bf16 %v4422_v47, %v4414_v26  ;;  %v3667_v31 = vadd.f32 %v9514_v36, %v11059_v1  ;;  %v4423_v36 = vmax.f32 %v3723_v10, 0.0 }
 0x513   : > { %v3725_v44 = vpop.f32.mrf.mxu3  ;;  %v3739_v58 = vpop.f32.mrf.mxu0  ;;  %v3677_v49 = vadd.f32 %v3676_v63, %v11054_v19 }
 0x514   : > { %v3740_v60 = vadd.f32 %v3739_v58, %v9320_v27  ;;  %v3788_v50 = vpop.f32.mrf.mxu1  ;;  %v4486_v58 = vpack.c.bf16 %v4406_v12, %v4398_v33  ;;  %v3716_v29 = vadd.f32 %v9516_v38, %v3667_v31  ;;  %v4383_v33 = vmax.f32 %v9496_v52, 0.0 }
 0x516   : > { %v9556_v22 = vadd.f32 %v3788_v50, %v3740_v60  ;;  %3934 = vmatmul.bf16.vlgmr.msra.gmra.mxu0 %v8856_v59  ;;  %v3726_v50 = vadd.f32 %v3725_v44, %v3677_v49  ;;  %v3721_v44 = vadd.f32 %v9534_v54, %v3672_v0  ;;  %v4478_v49 = vpack.c.bf16 %v4390_v41, %v4382_v23 }
 0x517   : > { %3983 = vmatmul.bf16.vlgmr.msra.gmra.mxu1 %v8862_v7  ;;  %4590 = vmatpush.bf16.msra.mxu0 %v4502_v39 }
 0x518   : > { %v4431_v56 = vmax.f32 %v3726_v50, 0.0  ;;  %v4415_v26 = vmax.f32 %v3721_v44, 0.0 }
 0x51a   : > { %v3678_v35 = vpop.f32.mrf.mxu2 }
 0x51b   : > { %v3727_v15 = vpop.f32.mrf.mxu3  ;;  %v3679_v14 = vadd.f32 %v3678_v35, %v11055_v28  ;;  %4591 = vmatpush.bf16.msra.mxu0 %v4494_v18  ;;  %v3741_v53 = vpop.f32.mrf.mxu0  ;;  %v4399_v18 = vmax.f32 %v3716_v29, 0.0 }
 0x51c   : > { %v3742_v43 = vadd.f32 %v3741_v53, %v9348_v46  ;;  %v3790_v9 = vpop.f32.mrf.mxu1 }
 0x51d   : > { %v3728_v63 = vadd.f32 %v3727_v15, %v3679_v14  ;;  %v4495_v15 = vpack.c.bf16 %v4423_v36, %v4415_v26  ;;  %v4487_v38 = vpack.c.bf16 %v4407_v17, %v4399_v18  ;;  %v11064_v17 = vld [vmem:[#allocation20_spill] sm:$0xff]  ;;  %v11065_v18 = vld [vmem:[#allocation51_spill] sm:$0xff] }
 0x51e   : > { %v9571_v51 = vadd.f32 %v3790_v9, %v3742_v43  ;;  %v4479_v9 = vpack.c.bf16 %v4391_v16, %v4383_v33  ;;  %v11066_v16 = vld [vmem:[#allocation42_spill] sm:$0xff] }
 0x51f   : > { %v4439_v60 = vmax.f32 %v3728_v63, 0.0  ;;  %4032 = vmatmul.bf16.vlgmr.msra.gmra.mxu2 %v8856_v59  ;;  %4592 = vmatpush.bf16.msra.mxu0 %v4486_v58 }
 0x520   : > { %4081 = vmatmul.bf16.vlgmr.msra.gmra.mxu3 %v8862_v7 }
 0x521   : > { %v4503_v47 = vpack.c.bf16 %v4439_v60, %v4431_v56 }
 0x522   : > { %v3837_v39 = vpop.f32.mrf.mxu2 }
 0x523   : > { %v3886_v54 = vpop.f32.mrf.mxu3  ;;  %v3838_v11 = vadd.f32 %v3837_v39, %v9320_v27  ;;  %4619 = vmatpush.bf16.msra.mxu1 %v4503_v47  ;;  %4593 = vmatpush.bf16.msra.mxu0 %v4478_v49  ;;  %v3744_v4 = vpop.f32.mrf.mxu0  ;;  %v11062_v47 = vld [vmem:[#allocation30_spill] sm:$0xff] }
 0x524   : > { %v3745_v30 = vadd.f32 %v3744_v4, %v9308_v5  ;;  %v3793_v35 = vpop.f32.mrf.mxu1 }
 0x525   : > { %v9582_v12 = vadd.f32 %v3886_v54, %v3838_v11 }
 0x526   : > { %v9585_v0 = vadd.f32 %v3793_v35, %v3745_v30  ;;  %3939 = vmatmul.bf16.gmra.mxu0 %v8924_v6 }
 0x527   : > { %4620 = vmatpush.bf16.msra.mxu1 %v4495_v15  ;;  %4594 = vmatpush.bf16.msra.mxu0 %v9536_v62 }
 0x528   : > { %3988 = vmatmul.bf16.gmra.mxu1 %v8929_v25 }
 0x52a   : > { %v3839_v50 = vpop.f32.mrf.mxu2 }
 0x52b   : > { %v3888_v14 = vpop.f32.mrf.mxu3  ;;  %v3840_v53 = vadd.f32 %v3839_v50, %v9348_v46  ;;  %4621 = vmatpush.bf16.msra.mxu1 %v4487_v38  ;;  %4595 = vmatpush.bf16.msra.mxu0 %v9518_v32  ;;  %v3746_v24 = vpop.f32.mrf.mxu0 }
 0x52c   : > { %v3747_v63 = vadd.f32 %v3746_v24, %v9387_v8  ;;  %v3795_v43 = vpop.f32.mrf.mxu1  ;;  %v11067_v24 = vld [vmem:[#allocation52_spill] sm:$0xff] }
 0x52d   : > { %v9593_v10 = vadd.f32 %v3888_v14, %v3840_v53 }
 0x52e   : > { %v9596_v41 = vadd.f32 %v3795_v43, %v3747_v63 }
 0x52f   : > { %4037 = vmatmul.bf16.gmra.mxu2 %v8924_v6  ;;  %4622 = vmatpush.bf16.msra.mxu1 %v4479_v9 }
 0x530   : > { %4086 = vmatmul.bf16.gmra.mxu3 %v8929_v25  ;;  %4596 = vmatpush.bf16.msra.mxu0 %v9494_v40  ;;  %v11060_v40 = vld [vmem:[#allocation50_spill] sm:$0xff] }
 0x532   : > { %v3842_v52 = vpop.f32.mrf.mxu2 }
 0x533   : > { %v3891_v62 = vpop.f32.mrf.mxu3  ;;  %v3843_v32 = vadd.f32 %v3842_v52, %v9308_v5  ;;  %4623 = vmatpush.bf16.msra.mxu1 %v9548_v57  ;;  %v3749_v31 = vpop.f32.mrf.mxu0  ;;  %v4328_v52 = vmax.f32 %v9571_v51, 0.0  ;;  %v11070_v51 = vld [vmem:[#allocation46_spill] sm:$0xff] }
 0x534   : > { %4597 = vmatpush.bf16.msra.mxu0 %v9469_v48  ;;  %v3750_v44 = vadd.f32 %v3749_v31, %v9361_v37  ;;  %v3798_v56 = vpop.f32.mrf.mxu1 }
 0x535   : > { %v9604_v58 = vadd.f32 %v3891_v62, %v3843_v32  ;;  %v4320_v62 = vmax.f32 %v9556_v22, 0.0 }
 0x536   : > { %v9607_v60 = vadd.f32 %v3798_v56, %v3750_v44  ;;  %3944 = vmatmul.bf16.gmra.mxu0 %v11028_v20 }
 0x537   : > { %4624 = vmatpush.bf16.msra.mxu1 %v9531_v61  ;;  %v11063_v61 = vld [vmem:[#allocation24_spill] sm:$0xff] }
 0x538   : > { %3993 = vmatmul.bf16.gmra.mxu1 %v11060_v40 }
 0x53a   : > { %v3844_v23 = vpop.f32.mrf.mxu2 }
 0x53b   : > { %v3893_v2 = vpop.f32.mrf.mxu3  ;;  %v3845_v57 = vadd.f32 %v3844_v23, %v9387_v8  ;;  %4625 = vmatpush.bf16.msra.mxu1 %v11061_v34  ;;  %v3751_v48 = vpop.f32.mrf.mxu0  ;;  %v9641_v23 = vpack.c.bf16 %v4328_v52, %v4320_v62 }
 0x53c   : > { %v3752_v39 = vadd.f32 %v3751_v48, %v11062_v47  ;;  %v3800_v54 = vpop.f32.mrf.mxu1 }
 0x53d   : > { %v9614_v36 = vadd.f32 %v3893_v2, %v3845_v57  ;;  %v11068_v57 = vld [vmem:[#allocation40_spill] sm:$0xff] }
 0x53e   : > { %v9617_v49 = vadd.f32 %v3800_v54, %v3752_v39  ;;  %v11069_v54 = vld [vmem:[#allocation28_spill] sm:$0xff] }
 0x53f   : > { %4042 = vmatmul.bf16.gmra.mxu2 %v11028_v20  ;;  %4626 = vmatpush.bf16.msra.mxu1 %v11063_v61 }
 0x540   : > { %4091 = vmatmul.bf16.gmra.mxu3 %v11060_v40 }
 0x542   : > { %v3847_v29 = vpop.f32.mrf.mxu2 }
 0x543   : > { %v3848_v26 = vadd.f32 %v3847_v29, %v9361_v37  ;;  %v3896_v11 = vpop.f32.mrf.mxu3  ;;  %v3754_v13 = vpop.f32.mrf.mxu0 }
 0x544   : > { %v3755_v30 = vadd.f32 %v3754_v13, %v11064_v17  ;;  %v3803_v35 = vpop.f32.mrf.mxu1 }
 0x545   : > { %v9623_v4 = vadd.f32 %v3896_v11, %v3848_v26  ;;  %v4329_v26 = vmax.f32 %v9593_v10, 0.0 }
 0x546   : > { %v9626_v15 = vadd.f32 %v3803_v35, %v3755_v30  ;;  %3949 = vmatmul.bf16.gmra.mxu0 %v11065_v18  ;;  %v4321_v35 = vmax.f32 %v9582_v12, 0.0 }
 0x548   : > { %3998 = vmatmul.bf16.gmra.mxu1 %v11066_v16 }
 0x54a   : > { %v3849_v38 = vpop.f32.mrf.mxu2 }
 0x54b   : > { %v3850_v50 = vadd.f32 %v3849_v38, %v11062_v47  ;;  %v3898_v14 = vpop.f32.mrf.mxu3  ;;  %v3756_v33 = vpop.f32.mrf.mxu0  ;;  %v4344_v38 = vmax.f32 %v9596_v41, 0.0  ;;  %v11073_v41 = vld [vmem:[#allocation21_spill] sm:$0xff] }
 0x54c   : > { %v3757_v63 = vadd.f32 %v3756_v33, %v11067_v24  ;;  %v3805_v43 = vpop.f32.mrf.mxu1 }
 0x54d   : > { %v9631_v53 = vadd.f32 %v3898_v14, %v3850_v50  ;;  %v9662_v50 = vpack.c.bf16 %v4329_v26, %v4321_v35  ;;  %v4336_v14 = vmax.f32 %v9585_v0, 0.0  ;;  %v4345_v0 = vmax.f32 %v9614_v36, 0.0 }
 0x54e   : > { %v9634_v9 = vadd.f32 %v3805_v43, %v3757_v63 }
 0x54f   : > { %4047 = vmatmul.bf16.gmra.mxu2 %v11065_v18  ;;  %11071 = vst [vmem:[#allocation32_spill] sm:$0xff] %v9662_v50  ;;  %v9666_v52 = vpack.c.bf16 %v4344_v38, %v4336_v14 }
 0x550   : > { %4096 = vmatmul.bf16.gmra.mxu3 %v11066_v16 }
 0x552   : > { %v3852_v32 = vpop.f32.mrf.mxu2 }
 0x553   : > { %v3853_v31 = vadd.f32 %v3852_v32, %v11064_v17  ;;  %v3901_v44 = vpop.f32.mrf.mxu3  ;;  %v3759_v56 = vpop.f32.mrf.mxu0  ;;  %v11072_v32 = vld [vmem:[#allocation8_spill] sm:$0xff] }
 0x554   : > { %v3760_v34 = vadd.f32 %v3759_v56, %v11068_v57  ;;  %v3808_v48 = vpop.f32.mrf.mxu1 }
 0x555   : > { %v9643_v2 = vadd.f32 %v3901_v44, %v3853_v31 }
 0x556   : > { %v9646_v39 = vadd.f32 %v3808_v48, %v3760_v34  ;;  %3954 = vmatmul.bf16.gmra.mxu0 %v11069_v54  ;;  %v4337_v48 = vmax.f32 %v9604_v58, 0.0  ;;  %v11076_v58 = vld [vmem:[#allocation31_spill] sm:$0xff] }
 0x557   : > { %v4369_v18 = vmax.f32 %v9643_v2, 0.0 }
 0x558   : > { %4003 = vmatmul.bf16.gmra.mxu1 %v11070_v51 }
 0x55a   : > { %v3854_v61 = vpop.f32.mrf.mxu2 }
 0x55b   : > { %v3855_v22 = vadd.f32 %v3854_v61, %v11067_v24  ;;  %v3903_v29 = vpop.f32.mrf.mxu3  ;;  %v9652_v11 = vpop.f32.mrf.mxu0  ;;  %v4360_v61 = vmax.f32 %v9617_v49, 0.0  ;;  %v11077_v24 = vld [vmem:[#allocation23_spill] sm:$0xff] }
 0x55c   : > { %v9656_v30 = vpop.f32.mrf.mxu1 }
 0x55d   : > { %v9654_v13 = vadd.f32 %v3903_v29, %v3855_v22  ;;  %v9683_v22 = vpack.c.bf16 %v4345_v0, %v4337_v48  ;;  %v4352_v29 = vmax.f32 %v9607_v60, 0.0  ;;  %v4353_v48 = vmax.f32 %v9623_v4, 0.0 }
 0x55f   : > { %4052 = vmatmul.bf16.gmra.mxu2 %v11069_v54  ;;  %11074 = vst [vmem:[#allocation18_spill] sm:$0xff] %v9683_v22  ;;  %v9690_v36 = vpack.c.bf16 %v4360_v61, %v4352_v29  ;;  %v4376_v61 = vmax.f32 %v9634_v9, 0.0 }
 0x560   : > { %4101 = vmatmul.bf16.gmra.mxu3 %v11070_v51 }
 0x562   : > { %v3857_v33 = vpop.f32.mrf.mxu2 }
 0x563   : > { %v3858_v10 = vadd.f32 %v3857_v33, %v11068_v57  ;;  %v3906_v63 = vpop.f32.mrf.mxu3  ;;  %v3764_v43 = vpop.f32.mrf.mxu0  ;;  %v11075_v33 = vld [vmem:[#allocation17_spill] sm:$0xff] }
 0x564   : > { %v9670_v12 = vpop.f32.mrf.mxu1 }
 0x565   : > { %v9668_v62 = vadd.f32 %v3906_v63, %v3858_v10  ;;  %v4361_v63 = vmax.f32 %v9631_v53, 0.0 }
 0x566   : > { %3959 = vmatmul.bf16.gmra.mxu0 %v11072_v32 }
 0x567   : > { %v9703_v29 = vpack.c.bf16 %v4361_v63, %v4353_v48  ;;  %v4377_v48 = vmax.f32 %v9654_v13, 0.0  ;;  %v3765_v13 = vadd.f32 %v3764_v43, %v11059_v1 }
 0x568   : > { %4008 = vmatmul.bf16.gmra.mxu1 %v11073_v41 }
 0x56a   : > { %v9674_v31 = vpop.f32.mrf.mxu2 }
 0x56b   : > { %v9676_v44 = vpop.f32.mrf.mxu3  ;;  %v3766_v56 = vpop.f32.mrf.mxu0 }
 0x56c   : > { %v3815_v34 = vpop.f32.mrf.mxu1  ;;  %v3767_v17 = vadd.f32 %v3766_v56, %v11058_v21 }
 0x56e   : > { %v3816_v2 = vadd.f32 %v3815_v34, %v3767_v17 }
 0x56f   : > { %4057 = vmatmul.bf16.gmra.mxu2 %v11072_v32 }
 0x570   : > { %4106 = vmatmul.bf16.gmra.mxu3 %v11073_v41  ;;  %v4368_v41 = vmax.f32 %v9626_v15, 0.0 }
 0x572   : > { %v9686_v26 = vpop.f32.mrf.mxu2  ;;  %v9708_v57 = vpack.c.bf16 %v4376_v61, %v4368_v41 }
 0x573   : > { %v9688_v35 = vpop.f32.mrf.mxu3  ;;  %v3769_v38 = vpop.f32.mrf.mxu0 }
 0x574   : > { %v3818_v14 = vpop.f32.mrf.mxu1 }
 0x576   : > { %3964 = vmatmul.bf16.gmra.mxu0 %v11075_v33 }
 0x578   : > { %4013 = vmatmul.bf16.gmra.mxu1 %v11076_v58 }
 0x57a   : > { %v9694_v10 = vpop.f32.mrf.mxu2 }
 0x57b   : > { %v9696_v49 = vpop.f32.mrf.mxu3  ;;  %v3771_v0 = vpop.f32.mrf.mxu0 }
 0x57c   : > { %v3820_v60 = vpop.f32.mrf.mxu1 }
 0x57f   : > { %4062 = vmatmul.bf16.gmra.mxu2 %v11075_v33  ;;  %v3770_v33 = vadd.f32 %v3769_v38, %v11057_v42 }
 0x580   : > { %4111 = vmatmul.bf16.gmra.mxu3 %v11076_v58  ;;  %v3772_v58 = vadd.f32 %v3771_v0, %v11056_v55 }
 0x581   : > { %v3819_v0 = vadd.f32 %v3818_v14, %v3770_v33 }
 0x582   : > { %v3867_v32 = vpop.f32.mrf.mxu2  ;;  %v3821_v50 = vadd.f32 %v3820_v60, %v3772_v58 }
 0x583   : > { %v9706_v51 = vpop.f32.mrf.mxu3  ;;  %v3774_v54 = vpop.f32.mrf.mxu0 }
 0x584   : > { %v3823_v53 = vpop.f32.mrf.mxu1  ;;  %v3775_v4 = vadd.f32 %v3774_v54, %v11054_v19  ;;  %v9721_v54 = vpack.c.bf16 %v4377_v48, %v4369_v18  ;;  %v4424_v22 = vmax.f32 %v3821_v50, 0.0 }
 0x586   : > { %3969 = vmatmul.bf16.gmra.mxu0 %v11077_v24  ;;  %v3824_v16 = vadd.f32 %v3823_v53, %v3775_v4  ;;  %v3762_v4 = vadd.f32 %v9652_v11, %v9331_v3 }
 0x588   : > { %4018 = vmatmul.bf16.gmra.mxu1 %v11053_v45  ;;  %v4432_v38 = vmax.f32 %v3824_v16, 0.0  ;;  %v3811_v43 = vadd.f32 %v9656_v30, %v3762_v4  ;;  %v4408_v16 = vmax.f32 %v3816_v2, 0.0 }
 0x58a   : > { %v3869_v9 = vpop.f32.mrf.mxu2  ;;  %v4392_v33 = vmax.f32 %v3811_v43, 0.0 }
 0x58b   : > { %v3918_v63 = vpop.f32.mrf.mxu3  ;;  %v3776_v15 = vpop.f32.mrf.mxu0  ;;  %v3870_v50 = vadd.f32 %v3869_v9, %v11056_v55 }
 0x58c   : > { %v3777_v41 = vadd.f32 %v3776_v15, %v11055_v28  ;;  %v3825_v61 = vpop.f32.mrf.mxu1 }
 0x58e   : > { %v3826_v47 = vadd.f32 %v3825_v61, %v3777_v41  ;;  %v3814_v41 = vadd.f32 %v9670_v12, %v3765_v13  ;;  %v4416_v61 = vmax.f32 %v3819_v0, 0.0  ;;  %v3868_v12 = vadd.f32 %v3867_v32, %v11057_v42 }
 0x58f   : > { %4067 = vmatmul.bf16.gmra.mxu2 %v11077_v24  ;;  %v3863_v32 = vadd.f32 %v9686_v26, %v11059_v1 }
 0x590   : > { %4116 = vmatmul.bf16.gmra.mxu3 %v11053_v45  ;;  %v4440_v53 = vmax.f32 %v3826_v47, 0.0  ;;  %v4496_v17 = vpack.c.bf16 %v4424_v22, %v4416_v61  ;;  %v4400_v11 = vmax.f32 %v3814_v41, 0.0  ;;  %v3865_v22 = vadd.f32 %v9694_v10, %v11058_v21 }
 0x591   : > { %v3860_v10 = vadd.f32 %v9674_v31, %v9331_v3 }
 0x592   : > { %v3872_v15 = vpop.f32.mrf.mxu2  ;;  %v4504_v56 = vpack.c.bf16 %v4440_v53, %v4432_v38  ;;  %v4488_v38 = vpack.c.bf16 %v4408_v16, %v4400_v11  ;;  %v4384_v53 = vmax.f32 %v9646_v39, 0.0 }
 0x593   : > { %v3921_v58 = vpop.f32.mrf.mxu3  ;;  %v3935_v60 = vpop.f32.mrf.mxu0  ;;  %v3873_v47 = vadd.f32 %v3872_v15, %v11054_v19  ;;  %v3919_v15 = vadd.f32 %v3918_v63, %v3870_v50  ;;  %v3914_v63 = vadd.f32 %v9696_v49, %v3865_v22 }
 0x594   : > { %v3936_v18 = vadd.f32 %v3935_v60, %v9320_v27  ;;  %v3984_v48 = vpop.f32.mrf.mxu1  ;;  %4648 = vmatpush.bf16.msra.mxu2 %v4504_v56  ;;  %v4480_v39 = vpack.c.bf16 %v4392_v33, %v4384_v53 }
 0x595   : > { %v3922_v13 = vadd.f32 %v3921_v58, %v3873_v47  ;;  %v3917_v58 = vadd.f32 %v9706_v51, %v3868_v12  ;;  %v3912_v51 = vadd.f32 %v9688_v35, %v3863_v32  ;;  %v4409_v11 = vmax.f32 %v3914_v63, 0.0 }
 0x596   : > { %v9730_v14 = vadd.f32 %v3984_v48, %v3936_v18  ;;  %4130 = vmatmul.bf16.vlgmr.msrb.gmra.mxu0 %v8856_v59  ;;  %v4425_v18 = vmax.f32 %v3919_v15, 0.0 }
 0x597   : > { %v4433_v60 = vmax.f32 %v3922_v13, 0.0  ;;  %v4417_v43 = vmax.f32 %v3917_v58, 0.0  ;;  %v4401_v12 = vmax.f32 %v3912_v51, 0.0  ;;  %v4385_v13 = vmax.f32 %v9668_v62, 0.0 }
 0x598   : > { %4179 = vmatmul.bf16.vlgmr.msrb.gmra.mxu1 %v8862_v7  ;;  %4649 = vmatpush.bf16.msra.mxu2 %v4496_v17 }
 0x599   : > { %v4497_v50 = vpack.c.bf16 %v4425_v18, %v4417_v43 }
 0x59a   : > { %v3874_v34 = vpop.f32.mrf.mxu2 }
 0x59b   : > { %v3875_v30 = vadd.f32 %v3874_v34, %v11055_v28  ;;  %v3923_v0 = vpop.f32.mrf.mxu3  ;;  %v3937_v4 = vpop.f32.mrf.mxu0 }
 0x59c   : > { %v3938_v9 = vadd.f32 %v3937_v4, %v9348_v46  ;;  %v3986_v56 = vpop.f32.mrf.mxu1  ;;  %4650 = vmatpush.bf16.msra.mxu2 %v4488_v38 }
 0x59d   : > { %v3924_v2 = vadd.f32 %v3923_v0, %v3875_v30 }
 0x59e   : > { %v9744_v61 = vadd.f32 %v3986_v56, %v3938_v9 }
 0x59f   : > { %v4441_v41 = vmax.f32 %v3924_v2, 0.0  ;;  %4228 = vmatmul.bf16.vlgmr.msrb.gmra.mxu2 %v8856_v59  ;;  %v3909_v59 = vadd.f32 %v9676_v44, %v3860_v10  ;;  %v4489_v44 = vpack.c.bf16 %v4409_v11, %v4401_v12 }
 0x5a0   : > { %4277 = vmatmul.bf16.vlgmr.msrb.gmra.mxu3 %v8862_v7  ;;  %4651 = vmatpush.bf16.msra.mxu2 %v4480_v39  ;;  %v11079_v39 = vld [vmem:[#allocation30_spill] sm:$0xff] }
 0x5a1   : > { %v4505_v48 = vpack.c.bf16 %v4441_v41, %v4433_v60  ;;  %v4393_v35 = vmax.f32 %v3909_v59, 0.0  ;;  %v11078_v60 = vld [vmem:[#allocation18_spill] sm:$0xff] }
 0x5a2   : > { %v4033_v26 = vpop.f32.mrf.mxu2 }
 0x5a3   : > { %v4034_v16 = vadd.f32 %v4033_v26, %v9320_v27  ;;  %v4082_v47 = vpop.f32.mrf.mxu3  ;;  %4677 = vmatpush.bf16.msra.mxu3 %v4505_v48  ;;  %v3940_v17 = vpop.f32.mrf.mxu0  ;;  %v4481_v22 = vpack.c.bf16 %v4393_v35, %v4385_v13 }
 0x5a4   : > { %v3941_v7 = vadd.f32 %v3940_v17, %v9308_v5  ;;  %4652 = vmatpush.bf16.msra.mxu2 %v9708_v57 }
 0x5a5   : > { %v9754_v31 = vadd.f32 %v4082_v47, %v4034_v16  ;;  %v3989_v49 = vpop.f32.mrf.mxu1  ;;  %v11081_v47 = vld [vmem:[#allocation20_spill] sm:$0xff] }
 0x5a6   : > { %v9758_v34 = vadd.f32 %v3989_v49, %v3941_v7  ;;  %4135 = vmatmul.bf16.gmra.mxu0 %v8924_v6  ;;  %v11082_v7 = vld [vmem:[#allocation51_spill] sm:$0xff]  ;;  %v11083_v49 = vld [vmem:[#allocation42_spill] sm:$0xff] }
 0x5a7   : > { %4678 = vmatpush.bf16.msra.mxu3 %v4497_v50 }
 0x5a8   : > { %4184 = vmatmul.bf16.gmra.mxu1 %v8929_v25  ;;  %4653 = vmatpush.bf16.msra.mxu2 %v9690_v36 }
 0x5aa   : > { %v4035_v33 = vpop.f32.mrf.mxu2 }
 0x5ab   : > { %v4036_v30 = vadd.f32 %v4035_v33, %v9348_v46  ;;  %v4084_v0 = vpop.f32.mrf.mxu3  ;;  %4679 = vmatpush.bf16.msra.mxu3 %v4489_v44  ;;  %v3942_v57 = vpop.f32.mrf.mxu0  ;;  %v11084_v44 = vld [vmem:[#allocation52_spill] sm:$0xff] }
 0x5ac   : > { %v3943_v53 = vadd.f32 %v3942_v57, %v9387_v8  ;;  %4654 = vmatpush.bf16.msra.mxu2 %v9666_v52  ;;  %v4322_v57 = vmax.f32 %v9730_v14, 0.0 }
 0x5ad   : > { %v9765_v38 = vadd.f32 %v4084_v0, %v4036_v30  ;;  %v3991_v4 = vpop.f32.mrf.mxu1  ;;  %v4330_v0 = vmax.f32 %v9744_v61, 0.0  ;;  %v11087_v61 = vld [vmem:[#allocation46_spill] sm:$0xff] }
 0x5ae   : > { %v9769_v15 = vadd.f32 %v3991_v4, %v3943_v53 }
 0x5af   : > { %4233 = vmatmul.bf16.gmra.mxu2 %v8924_v6  ;;  %4680 = vmatpush.bf16.msra.mxu3 %v4481_v22 }
 0x5b0   : > { %4282 = vmatmul.bf16.gmra.mxu3 %v8929_v25  ;;  %4655 = vmatpush.bf16.msra.mxu2 %v9641_v23 }
 0x5b2   : > { %v4038_v62 = vpop.f32.mrf.mxu2 }
 0x5b3   : > { %v4039_v36 = vadd.f32 %v4038_v62, %v9308_v5  ;;  %v4087_v2 = vpop.f32.mrf.mxu3  ;;  %4681 = vmatpush.bf16.msra.mxu3 %v9721_v54  ;;  %v3945_v9 = vpop.f32.mrf.mxu0 }
 0x5b4   : > { %v3946_v52 = vadd.f32 %v3945_v9, %v9361_v37  ;;  %v11085_v9 = vld [vmem:[#allocation40_spill] sm:$0xff] }
 0x5b5   : > { %v9776_v56 = vadd.f32 %v4087_v2, %v4039_v36  ;;  %v3994_v32 = vpop.f32.mrf.mxu1  ;;  %v9813_v36 = vpack.c.bf16 %v4330_v0, %v4322_v57 }
 0x5b6   : > { %v9779_v58 = vadd.f32 %v3994_v32, %v3946_v52  ;;  %4140 = vmatmul.bf16.gmra.mxu0 %v11028_v20 }
 0x5b7   : > { %4682 = vmatpush.bf16.msra.mxu3 %v9703_v29  ;;  %v11080_v29 = vld [vmem:[#allocation32_spill] sm:$0xff]  ;;  %v4339_v0 = vmax.f32 %v9776_v56, 0.0  ;;  %v11091_v56 = vld [vmem:[#allocation31_spill] sm:$0xff] }
 0x5b8   : > { %4189 = vmatmul.bf16.gmra.mxu1 %v11060_v40 }
 0x5ba   : > { %v4040_v6 = vpop.f32.mrf.mxu2 }
 0x5bb   : > { %v4041_v25 = vadd.f32 %v4040_v6, %v9387_v8  ;;  %v4089_v23 = vpop.f32.mrf.mxu3  ;;  %4683 = vmatpush.bf16.msra.mxu3 %v11078_v60  ;;  %v3947_v54 = vpop.f32.mrf.mxu0 }
 0x5bc   : > { %v3948_v10 = vadd.f32 %v3947_v54, %v11079_v39  ;;  %v4331_v54 = vmax.f32 %v9765_v38, 0.0 }
 0x5bd   : > { %v9786_v41 = vadd.f32 %v4089_v23, %v4041_v25  ;;  %v3996_v63 = vpop.f32.mrf.mxu1  ;;  %v11086_v25 = vld [vmem:[#allocation28_spill] sm:$0xff] }
 0x5be   : > { %v9789_v18 = vadd.f32 %v3996_v63, %v3948_v10 }
 0x5bf   : > { %4238 = vmatmul.bf16.gmra.mxu2 %v11028_v20  ;;  %4684 = vmatpush.bf16.msra.mxu3 %v11080_v29 }
 0x5c0   : > { %4287 = vmatmul.bf16.gmra.mxu3 %v11060_v40  ;;  %v4362_v57 = vmax.f32 %v9789_v18, 0.0 }
 0x5c2   : > { %v4043_v48 = vpop.f32.mrf.mxu2 }
 0x5c3   : > { %v4044_v26 = vadd.f32 %v4043_v48, %v9361_v37  ;;  %v4092_v51 = vpop.f32.mrf.mxu3  ;;  %v3950_v43 = vpop.f32.mrf.mxu0  ;;  %v4323_v48 = vmax.f32 %v9754_v31, 0.0 }
 0x5c4   : > { %v3951_v59 = vadd.f32 %v3950_v43, %v11081_v47  ;;  %v4338_v43 = vmax.f32 %v9758_v34, 0.0  ;;  %v4347_v34 = vmax.f32 %v9786_v41, 0.0 }
 0x5c5   : > { %v9795_v16 = vadd.f32 %v4092_v51, %v4044_v26  ;;  %v3999_v17 = vpop.f32.mrf.mxu1  ;;  %v4346_v26 = vmax.f32 %v9769_v15, 0.0  ;;  %v9834_v51 = vpack.c.bf16 %v4331_v54, %v4323_v48  ;;  %v11089_v15 = vld [vmem:[#allocation21_spill] sm:$0xff] }
 0x5c6   : > { %v9798_v11 = vadd.f32 %v3999_v17, %v3951_v59  ;;  %4145 = vmatmul.bf16.gmra.mxu0 %v11082_v7 }
 0x5c8   : > { %4194 = vmatmul.bf16.gmra.mxu1 %v11083_v49 }
 0x5ca   : > { %v4045_v20 = vpop.f32.mrf.mxu2 }
 0x5cb   : > { %v4046_v50 = vadd.f32 %v4045_v20, %v11079_v39  ;;  %v4094_v40 = vpop.f32.mrf.mxu3  ;;  %v3952_v12 = vpop.f32.mrf.mxu0 }
 0x5cc   : > { %v3953_v33 = vadd.f32 %v3952_v12, %v11084_v44 }
 0x5cd   : > { %v9803_v35 = vadd.f32 %v4094_v40, %v4046_v50  ;;  %v4001_v13 = vpop.f32.mrf.mxu1  ;;  %v11088_v50 = vld [vmem:[#allocation8_spill] sm:$0xff] }
 0x5ce   : > { %v9806_v30 = vadd.f32 %v4001_v13, %v3953_v33 }
 0x5cf   : > { %4243 = vmatmul.bf16.gmra.mxu2 %v11082_v7 }
 0x5d0   : > { %4292 = vmatmul.bf16.gmra.mxu3 %v11083_v49  ;;  %v9838_v49 = vpack.c.bf16 %v4346_v26, %v4338_v43  ;;  %v4378_v54 = vmax.f32 %v9806_v30, 0.0  ;;  %v4370_v26 = vmax.f32 %v9798_v11, 0.0 }
 0x5d2   : > { %v4048_v53 = vpop.f32.mrf.mxu2 }
 0x5d3   : > { %v4049_v4 = vadd.f32 %v4048_v53, %v11081_v47  ;;  %v4097_v22 = vpop.f32.mrf.mxu3  ;;  %v3955_v62 = vpop.f32.mrf.mxu0  ;;  %v9855_v53 = vpack.c.bf16 %v4347_v34, %v4339_v0 }
 0x5d4   : > { %v3956_v52 = vadd.f32 %v3955_v62, %v11085_v9 }
 0x5d5   : > { %v9815_v2 = vadd.f32 %v4097_v22, %v4049_v4  ;;  %v4004_v32 = vpop.f32.mrf.mxu1  ;;  %v4354_v4 = vmax.f32 %v9779_v58, 0.0 }
 0x5d6   : > { %v9818_v6 = vadd.f32 %v4004_v32, %v3956_v52  ;;  %4150 = vmatmul.bf16.gmra.mxu0 %v11086_v25 }
 0x5d7   : > { %v9862_v41 = vpack.c.bf16 %v4362_v57, %v4354_v4 }
 0x5d8   : > { %4199 = vmatmul.bf16.gmra.mxu1 %v11087_v61 }
 0x5da   : > { %v4050_v23 = vpop.f32.mrf.mxu2 }
 0x5db   : > { %v4051_v14 = vadd.f32 %v4050_v23, %v11084_v44  ;;  %v4099_v60 = vpop.f32.mrf.mxu3  ;;  %v9824_v10 = vpop.f32.mrf.mxu0  ;;  %v4363_v23 = vmax.f32 %v9803_v35, 0.0 }
 0x5dd   : > { %v9826_v63 = vadd.f32 %v4099_v60, %v4051_v14  ;;  %v9828_v29 = vpop.f32.mrf.mxu1  ;;  %v4355_v60 = vmax.f32 %v9795_v16, 0.0 }
 0x5df   : > { %4248 = vmatmul.bf16.gmra.mxu2 %v11086_v25  ;;  %v11090_v25 = vld [vmem:[#allocation17_spill] sm:$0xff]  ;;  %v9875_v48 = vpack.c.bf16 %v4363_v23, %v4355_v60  ;;  %v4379_v34 = vmax.f32 %v9826_v63, 0.0 }
 0x5e0   : > { %4297 = vmatmul.bf16.gmra.mxu3 %v11087_v61 }
 0x5e2   : > { %v4053_v59 = vpop.f32.mrf.mxu2 }
 0x5e3   : > { %v4054_v38 = vadd.f32 %v4053_v59, %v11085_v9  ;;  %v4102_v17 = vpop.f32.mrf.mxu3  ;;  %v3960_v7 = vpop.f32.mrf.mxu0 }
 0x5e4   : > { %v3961_v63 = vadd.f32 %v3960_v7, %v11059_v1 }
 0x5e5   : > { %v9840_v20 = vadd.f32 %v4102_v17, %v4054_v38  ;;  %v9842_v31 = vpop.f32.mrf.mxu1  ;;  %v9880_v17 = vpack.c.bf16 %v4378_v54, %v4370_v26 }
 0x5e6   : > { %4155 = vmatmul.bf16.gmra.mxu0 %v11088_v50 }
 0x5e8   : > { %4204 = vmatmul.bf16.gmra.mxu1 %v11089_v15 }
 0x5ea   : > { %v9846_v40 = vpop.f32.mrf.mxu2 }
 0x5eb   : > { %v9848_v12 = vpop.f32.mrf.mxu3  ;;  %v3962_v33 = vpop.f32.mrf.mxu0 }
 0x5ec   : > { %v3963_v23 = vadd.f32 %v3962_v33, %v11058_v21 }
 0x5ed   : > { %v4011_v13 = vpop.f32.mrf.mxu1 }
 0x5ef   : > { %4253 = vmatmul.bf16.gmra.mxu2 %v11088_v50 }
 0x5f0   : > { %4302 = vmatmul.bf16.gmra.mxu3 %v11089_v15 }
 0x5f2   : > { %v9858_v22 = vpop.f32.mrf.mxu2 }
 0x5f3   : > { %v9860_v62 = vpop.f32.mrf.mxu3  ;;  %v3965_v52 = vpop.f32.mrf.mxu0 }
 0x5f4   : > { %v3966_v0 = vadd.f32 %v3965_v52, %v11057_v42 }
 0x5f5   : > { %v4014_v32 = vpop.f32.mrf.mxu1 }
 0x5f6   : > { %4160 = vmatmul.bf16.gmra.mxu0 %v11090_v25  ;;  %v4015_v26 = vadd.f32 %v4014_v32, %v3966_v0 }
 0x5f8   : > { %4209 = vmatmul.bf16.gmra.mxu1 %v11091_v56  ;;  %v4418_v7 = vmax.f32 %v4015_v26, 0.0 }
 0x5fa   : > { %v9866_v61 = vpop.f32.mrf.mxu2 }
 0x5fb   : > { %v9868_v18 = vpop.f32.mrf.mxu3  ;;  %v3967_v14 = vpop.f32.mrf.mxu0 }
 0x5fc   : > { %v3968_v50 = vadd.f32 %v3967_v14, %v11056_v55 }
 0x5fd   : > { %v4016_v58 = vpop.f32.mrf.mxu1 }
 0x5fe   : > { %v4017_v60 = vadd.f32 %v4016_v58, %v3968_v50  ;;  %v4010_v50 = vadd.f32 %v9842_v31, %v3961_v63 }
 0x5ff   : > { %4258 = vmatmul.bf16.gmra.mxu2 %v11090_v25 }
 0x600   : > { %4307 = vmatmul.bf16.gmra.mxu3 %v11091_v56  ;;  %v4371_v56 = vmax.f32 %v9815_v2, 0.0  ;;  %v4012_v2 = vadd.f32 %v4011_v13, %v3963_v23 }
 0x602   : > { %v4063_v43 = vpop.f32.mrf.mxu2  ;;  %v9893_v14 = vpack.c.bf16 %v4379_v34, %v4371_v56  ;;  %v4410_v0 = vmax.f32 %v4012_v2, 0.0 }
 0x603   : > { %v9878_v59 = vpop.f32.mrf.mxu3  ;;  %v3970_v38 = vpop.f32.mrf.mxu0  ;;  %v4064_v56 = vadd.f32 %v4063_v43, %v11057_v42  ;;  %v4059_v43 = vadd.f32 %v9858_v22, %v11059_v1 }
 0x604   : > { %v3971_v16 = vadd.f32 %v3970_v38, %v11054_v19 }
 0x605   : > { %v4019_v35 = vpop.f32.mrf.mxu1 }
 0x606   : > { %4165 = vmatmul.bf16.gmra.mxu0 %v11077_v24  ;;  %v4020_v57 = vadd.f32 %v4019_v35, %v3971_v16  ;;  %v3958_v35 = vadd.f32 %v9824_v10, %v9331_v3 }
 0x608   : > { %4214 = vmatmul.bf16.gmra.mxu1 %v11053_v45  ;;  %v4434_v52 = vmax.f32 %v4020_v57, 0.0  ;;  %v4007_v10 = vadd.f32 %v9828_v29, %v3958_v35  ;;  %v4061_v35 = vadd.f32 %v9866_v61, %v11058_v21  ;;  %v4056_v61 = vadd.f32 %v9846_v40, %v9331_v3 }
 0x60a   : > { %v4065_v30 = vpop.f32.mrf.mxu2  ;;  %v4105_v40 = vadd.f32 %v9848_v12, %v4056_v61 }
 0x60b   : > { %v4114_v15 = vpop.f32.mrf.mxu3  ;;  %v3972_v11 = vpop.f32.mrf.mxu0  ;;  %v4066_v31 = vadd.f32 %v4065_v30, %v11056_v55 }
 0x60c   : > { %v3973_v4 = vadd.f32 %v3972_v11, %v11055_v28  ;;  %v4426_v11 = vmax.f32 %v4017_v60, 0.0  ;;  %v4394_v60 = vmax.f32 %v4007_v10, 0.0 }
 0x60d   : > { %v4021_v25 = vpop.f32.mrf.mxu1 }
 0x60e   : > { %v4022_v54 = vadd.f32 %v4021_v25, %v3973_v4  ;;  %v4498_v4 = vpack.c.bf16 %v4426_v11, %v4418_v7  ;;  %v4402_v25 = vmax.f32 %v4010_v50, 0.0 }
 0x60f   : > { %4263 = vmatmul.bf16.gmra.mxu2 %v11077_v24  ;;  %v9901_v24 = vld [vmem:[%s10485_s9] sm:$0xff] }
 0x610   : > { %4312 = vmatmul.bf16.gmra.mxu3 %v11053_v45  ;;  %v4442_v38 = vmax.f32 %v4022_v54, 0.0  ;;  %11092 = vst [vmem:[#allocation6_spill] sm:$0xff] %v9901_v24  ;;  %v4490_v26 = vpack.c.bf16 %v4410_v0, %v4402_v25 }
 0x612   : > { %v4068_v16 = vpop.f32.mrf.mxu2  ;;  %v4506_v33 = vpack.c.bf16 %v4442_v38, %v4434_v52  ;;  %v4386_v52 = vmax.f32 %v9818_v6, 0.0 }
 0x613   : > { %v4117_v58 = vpop.f32.mrf.mxu3  ;;  %v4131_v45 = vpop.f32.mrf.mxu0  ;;  %v4069_v13 = vadd.f32 %v4068_v16, %v11054_v19  ;;  %v4115_v16 = vadd.f32 %v4114_v15, %v4066_v31  ;;  %v4110_v15 = vadd.f32 %v9868_v18, %v4061_v35 }
 0x614   : > { %v4132_v32 = vadd.f32 %v4131_v45, %v9320_v27  ;;  %4706 = vmatpush.bf16.msrb.mxu0 %v4506_v33  ;;  %v4113_v33 = vadd.f32 %v9878_v59, %v4064_v56  ;;  %v4482_v6 = vpack.c.bf16 %v4394_v60, %v4386_v52  ;;  %v4108_v59 = vadd.f32 %v9860_v62, %v4059_v43 }
 0x615   : > { %v4180_v34 = vpop.f32.mrf.mxu1  ;;  %v4118_v54 = vadd.f32 %v4117_v58, %v4069_v13  ;;  %v4427_v7 = vmax.f32 %v4115_v16, 0.0  ;;  %v9933_v13 = vld [vmem:[%s10485_s9 + $0x8] sm:$0xff]  ;;  %v4411_v18 = vmax.f32 %v4110_v15, 0.0  ;;  %v4395_v60 = vmax.f32 %v4105_v40, 0.0 }
 0x616   : > { %v9907_v57 = vadd.f32 %v4180_v34, %v4132_v32  ;;  %4598 = vmatmul.bf16.vlgmr.msra.gmra.mxu0 %v9901_v24  ;;  %v4419_v34 = vmax.f32 %v4113_v33, 0.0  ;;  %11093 = vst [vmem:[#allocation29_spill] sm:$0xff] %v9933_v13 }
 0x617   : > { %v4435_v58 = vmax.f32 %v4118_v54, 0.0 }
 0x618   : > { %4627 = vmatmul.bf16.vlgmr.msra.gmra.mxu1 %v9901_v24  ;;  %4707 = vmatpush.bf16.msrb.mxu0 %v4498_v4  ;;  %v4499_v62 = vpack.c.bf16 %v4427_v7, %v4419_v34  ;;  %v9985_v7 = vld [vmem:[%s10485_s9 + $0x18] sm:$0xff] }
 0x619   : > { %11098 = vst [vmem:[#allocation7_spill] sm:$0xff] %v9985_v7 }
 0x61a   : > { %v4070_v23 = vpop.f32.mrf.mxu2 }
 0x61b   : > { %v4071_v29 = vadd.f32 %v4070_v23, %v11055_v28  ;;  %v4119_v63 = vpop.f32.mrf.mxu3  ;;  %v4133_v38 = vpop.f32.mrf.mxu0 }
 0x61c   : > { %v4134_v30 = vadd.f32 %v4133_v38, %v9348_v46  ;;  %4708 = vmatpush.bf16.msrb.mxu0 %v4490_v26 }
 0x61d   : > { %v4120_v2 = vadd.f32 %v4119_v63, %v4071_v29  ;;  %v4182_v11 = vpop.f32.mrf.mxu1  ;;  %v4387_v29 = vmax.f32 %v9840_v20, 0.0 }
 0x61e   : > { %v9921_v50 = vadd.f32 %v4182_v11, %v4134_v30 }
 0x61f   : > { %v4443_v45 = vmax.f32 %v4120_v2, 0.0  ;;  %4656 = vmatmul.bf16.vlgmr.msra.gmra.mxu2 %v9901_v24  ;;  %v4483_v38 = vpack.c.bf16 %v4395_v60, %v4387_v29 }
 0x620   : > { %4685 = vmatmul.bf16.vlgmr.msra.gmra.mxu3 %v9901_v24  ;;  %4709 = vmatpush.bf16.msrb.mxu0 %v4482_v6 }
 0x621   : > { %v4507_v32 = vpack.c.bf16 %v4443_v45, %v4435_v58 }
 0x622   : > { %v4229_v22 = vpop.f32.mrf.mxu2 }
 0x623   : > { %v4230_v10 = vadd.f32 %v4229_v22, %v9320_v27  ;;  %v4278_v0 = vpop.f32.mrf.mxu3  ;;  %4735 = vmatpush.bf16.msrb.mxu1 %v4507_v32  ;;  %v4136_v4 = vpop.f32.mrf.mxu0  ;;  %v4403_v27 = vmax.f32 %v4108_v59, 0.0 }
 0x624   : > { %v4137_v31 = vadd.f32 %v4136_v4, %v9308_v5  ;;  %4710 = vmatpush.bf16.msrb.mxu0 %v9880_v17 }
 0x625   : > { %v9936_v25 = vadd.f32 %v4278_v0, %v4230_v10  ;;  %v4185_v56 = vpop.f32.mrf.mxu1  ;;  %v4491_v12 = vpack.c.bf16 %v4411_v18, %v4403_v27  ;;  %v4332_v18 = vmax.f32 %v9921_v50, 0.0 }
 0x626   : > { %v9940_v23 = vadd.f32 %v4185_v56, %v4137_v31  ;;  %4603 = vmatmul.bf16.gmra.mxu0 %v9933_v13  ;;  %v4324_v31 = vmax.f32 %v9907_v57, 0.0 }
 0x627   : > { %11094 = vst [vmem:[#allocation25_spill] sm:$0xff] %v9936_v25  ;;  %4736 = vmatpush.bf16.msrb.mxu1 %v4499_v62 }
 0x628   : > { %4632 = vmatmul.bf16.gmra.mxu1 %v9933_v13  ;;  %4711 = vmatpush.bf16.msrb.mxu0 %v9862_v41 }
 0x62a   : > { %v9945_v54 = vpop.f32.mrf.mxu2 }
 0x62b   : > { %v9948_v63 = vpop.f32.mrf.mxu3  ;;  %4737 = vmatpush.bf16.msrb.mxu1 %v4491_v12  ;;  %v4138_v17 = vpop.f32.mrf.mxu0  ;;  %v10002_v12 = vpack.c.bf16 %v4332_v18, %v4324_v31 }
 0x62c   : > { %11095 = vst [vmem:[#allocation12_spill] sm:$0xff] %v9948_v63  ;;  %v4139_v26 = vadd.f32 %v4138_v17, %v9387_v8  ;;  %4712 = vmatpush.bf16.msrb.mxu0 %v9838_v49  ;;  %v9962_v49 = vld [vmem:[%s10485_s9 + $0x10] sm:$0xff] }
 0x62d   : > { %v4187_v52 = vpop.f32.mrf.mxu1  ;;  %11096 = vst [vmem:[#allocation55_spill] sm:$0xff] %v9962_v49 }
 0x62e   : > { %v9952_v35 = vadd.f32 %v4187_v52, %v4139_v26  ;;  %11100 = vst [vmem:[#allocation36_spill] sm:$0xff] %v10002_v12 }
 0x62f   : > { %4661 = vmatmul.bf16.gmra.mxu2 %v9933_v13  ;;  %4738 = vmatpush.bf16.msrb.mxu1 %v4483_v38 }
 0x630   : > { %4690 = vmatmul.bf16.gmra.mxu3 %v9933_v13  ;;  %4713 = vmatpush.bf16.msrb.mxu0 %v9813_v36 }
 0x632   : > { %v4234_v20 = vpop.f32.mrf.mxu2 }
 0x633   : > { %v4235_v41 = vadd.f32 %v4234_v20, %v9308_v5  ;;  %v4283_v16 = vpop.f32.mrf.mxu3  ;;  %4739 = vmatpush.bf16.msrb.mxu1 %v9893_v14  ;;  %v4141_v2 = vpop.f32.mrf.mxu0  ;;  %v4348_v20 = vmax.f32 %v9952_v35, 0.0 }
 0x634   : > { %v4142_v11 = vadd.f32 %v4141_v2, %v9361_v37 }
 0x635   : > { %v9964_v30 = vadd.f32 %v4283_v16, %v4235_v41  ;;  %v4190_v43 = vpop.f32.mrf.mxu1  ;;  %v4340_v41 = vmax.f32 %v9940_v23, 0.0 }
 0x636   : > { %v9967_v33 = vadd.f32 %v4190_v43, %v4142_v11  ;;  %4608 = vmatmul.bf16.gmra.mxu0 %v9962_v49 }
 0x637   : > { %11097 = vst [vmem:[#allocation33_spill] sm:$0xff] %v9964_v30  ;;  %4740 = vmatpush.bf16.msrb.mxu1 %v9875_v48 }
 0x638   : > { %4637 = vmatmul.bf16.gmra.mxu1 %v9962_v49 }
 0x63a   : > { %v9972_v5 = vpop.f32.mrf.mxu2 }
 0x63b   : > { %v9974_v36 = vpop.f32.mrf.mxu3  ;;  %4741 = vmatpush.bf16.msrb.mxu1 %v9855_v53  ;;  %v4143_v14 = vpop.f32.mrf.mxu0 }
 0x63c   : > { %v4144_v58 = vadd.f32 %v4143_v14, %v11079_v39  ;;  %v10020_v14 = vpack.c.bf16 %v4348_v20, %v4340_v41 }
 0x63d   : > { %v4192_v45 = vpop.f32.mrf.mxu1 }
 0x63e   : > { %v4193_v6 = vadd.f32 %v4192_v45, %v4144_v58 }
 0x63f   : > { %4666 = vmatmul.bf16.gmra.mxu2 %v9962_v49  ;;  %4742 = vmatpush.bf16.msrb.mxu1 %v9834_v51 }
 0x640   : > { %4695 = vmatmul.bf16.gmra.mxu3 %v9962_v49 }
 0x642   : > { %v4239_v48 = vpop.f32.mrf.mxu2 }
 0x643   : > { %v4240_v61 = vadd.f32 %v4239_v48, %v9361_v37  ;;  %v4288_v15 = vpop.f32.mrf.mxu3  ;;  %v4146_v53 = vpop.f32.mrf.mxu0 }
 0x644   : > { %v4147_v22 = vadd.f32 %v4146_v53, %v11081_v47 }
 0x645   : > { %v9987_v32 = vadd.f32 %v4288_v15, %v4240_v61  ;;  %v4195_v59 = vpop.f32.mrf.mxu1  ;;  %v4364_v15 = vmax.f32 %v4193_v6, 0.0 }
 0x646   : > { %v4196_v34 = vadd.f32 %v4195_v59, %v4147_v22  ;;  %4613 = vmatmul.bf16.gmra.mxu0 %v9985_v7 }
 0x647   : > { %11099 = vst [vmem:[#allocation47_spill] sm:$0xff] %v9987_v32 }
 0x648   : > { %4642 = vmatmul.bf16.gmra.mxu1 %v9985_v7 }
 0x64a   : > { %v9992_v51 = vpop.f32.mrf.mxu2 }
 0x64b   : > { %v9994_v37 = vpop.f32.mrf.mxu3  ;;  %v4148_v10 = vpop.f32.mrf.mxu0 }
 0x64c   : > { %v4149_v0 = vadd.f32 %v4148_v10, %v11084_v44 }
 0x64d   : > { %v4197_v40 = vpop.f32.mrf.mxu1 }
 0x64e   : > { %v4198_v4 = vadd.f32 %v4197_v40, %v4149_v0 }
 0x64f   : > { %4671 = vmatmul.bf16.gmra.mxu2 %v9985_v7 }
 0x650   : > { %4700 = vmatmul.bf16.gmra.mxu3 %v9985_v7  ;;  %v4380_v6 = vmax.f32 %v4198_v4, 0.0 }
 0x652   : > { %v4244_v56 = vpop.f32.mrf.mxu2 }
 0x653   : > { %v4245_v62 = vadd.f32 %v4244_v56, %v11081_v47  ;;  %v4293_v27 = vpop.f32.mrf.mxu3  ;;  %v4151_v60 = vpop.f32.mrf.mxu0 }
 0x654   : > { %v4152_v17 = vadd.f32 %v4151_v60, %v11085_v9 }
 0x655   : > { %v10004_v29 = vadd.f32 %v4293_v27, %v4245_v62  ;;  %v4200_v26 = vpop.f32.mrf.mxu1  ;;  %v4372_v62 = vmax.f32 %v4196_v34, 0.0 }
 0x656   : > { %v10007_v52 = vadd.f32 %v4200_v26, %v4152_v17  ;;  %4714 = vmatmul.bf16.vlgmr.msrb.gmra.mxu0 %v9901_v24 }
 0x657   : > { %v10041_v17 = vpack.c.bf16 %v4380_v6, %v4372_v62 }
 0x658   : > { %4743 = vmatmul.bf16.vlgmr.msrb.gmra.mxu1 %v9901_v24 }
 0x65a   : > { %v10011_v50 = vpop.f32.mrf.mxu2 }
 0x65b   : > { %v10013_v57 = vpop.f32.mrf.mxu3  ;;  %v4153_v47 = vpop.f32.mrf.mxu0 }
 0x65c   : > { %v4154_v30 = vadd.f32 %v4153_v47, %v9331_v3 }
 0x65d   : > { %v10015_v38 = vpop.f32.mrf.mxu1 }
 0x662   : > { %v4249_v16 = vpop.f32.mrf.mxu2 }
 0x663   : > { %v4250_v2 = vadd.f32 %v4249_v16, %v11085_v9  ;;  %v4298_v11 = vpop.f32.mrf.mxu3  ;;  %v4156_v43 = vpop.f32.mrf.mxu0  ;;  %v4356_v9 = vmax.f32 %v9967_v33, 0.0 }
 0x665   : > { %v10022_v58 = vadd.f32 %v4298_v11, %v4250_v2  ;;  %v4205_v45 = vpop.f32.mrf.mxu1  ;;  %v10035_v10 = vpack.c.bf16 %v4364_v15, %v4356_v9 }
 0x666   : > { %4719 = vmatmul.bf16.gmra.mxu0 %v9933_v13 }
 0x668   : > { %4748 = vmatmul.bf16.gmra.mxu1 %v9933_v13  ;;  %v4157_v13 = vadd.f32 %v4156_v43, %v11059_v1 }
 0x66a   : > { %v10026_v48 = vpop.f32.mrf.mxu2 }
 0x66b   : > { %v10028_v61 = vpop.f32.mrf.mxu3  ;;  %v4158_v35 = vpop.f32.mrf.mxu0 }
 0x66c   : > { %v4159_v6 = vadd.f32 %v4158_v35, %v11058_v21  ;;  %v4203_v35 = vadd.f32 %v10015_v38, %v4154_v30 }
 0x66d   : > { %v4207_v23 = vpop.f32.mrf.mxu1 }
 0x66e   : > { %v4208_v63 = vadd.f32 %v4207_v23, %v4159_v6  ;;  %v4396_v23 = vmax.f32 %v4203_v35, 0.0 }
 0x670   : > { %v4412_v43 = vmax.f32 %v4208_v63, 0.0 }
 0x672   : > { %v10031_v53 = vpop.f32.mrf.mxu2 }
 0x673   : > { %v10033_v22 = vpop.f32.mrf.mxu3  ;;  %v4161_v59 = vpop.f32.mrf.mxu0 }
 0x674   : > { %v4162_v4 = vadd.f32 %v4161_v59, %v11057_v42 }
 0x675   : > { %v4210_v0 = vpop.f32.mrf.mxu1 }
 0x676   : > { %4724 = vmatmul.bf16.gmra.mxu0 %v9962_v49 }
 0x678   : > { %4753 = vmatmul.bf16.gmra.mxu1 %v9962_v49 }
 0x67a   : > { %v4256_v40 = vpop.f32.mrf.mxu2 }
 0x67b   : > { %v10039_v18 = vpop.f32.mrf.mxu3  ;;  %v4163_v31 = vpop.f32.mrf.mxu0 }
 0x67c   : > { %v4164_v16 = vadd.f32 %v4163_v31, %v11056_v55 }
 0x67d   : > { %v4212_v56 = vpop.f32.mrf.mxu1 }
 0x67e   : > { %v4213_v62 = vadd.f32 %v4212_v56, %v4164_v16 }
 0x680   : > { %v4428_v24 = vmax.f32 %v4213_v62, 0.0 }
 0x682   : > { %v4259_v33 = vpop.f32.mrf.mxu2 }
 0x683   : > { %v4308_v27 = vpop.f32.mrf.mxu3  ;;  %v4166_v60 = vpop.f32.mrf.mxu0 }
 0x684   : > { %v4167_v20 = vadd.f32 %v4166_v60, %v11054_v19 }
 0x685   : > { %v4215_v26 = vpop.f32.mrf.mxu1 }
 0x686   : > { %4729 = vmatmul.bf16.gmra.mxu0 %v9985_v7  ;;  %v4216_v34 = vadd.f32 %v4215_v26, %v4167_v20  ;;  %v4206_v20 = vadd.f32 %v4205_v45, %v4157_v13 }
 0x688   : > { %4758 = vmatmul.bf16.gmra.mxu1 %v9985_v7  ;;  %v4211_v7 = vadd.f32 %v4210_v0, %v4162_v4  ;;  %v4436_v25 = vmax.f32 %v4216_v34, 0.0  ;;  %v4404_v56 = vmax.f32 %v4206_v20, 0.0  ;;  %v4260_v4 = vadd.f32 %v4259_v33, %v11057_v42 }
 0x68a   : > { %v4261_v41 = vpop.f32.mrf.mxu2  ;;  %v4492_v16 = vpack.c.bf16 %v4412_v43, %v4404_v56  ;;  %v4309_v42 = vadd.f32 %v4308_v27, %v4260_v4  ;;  %v11104_v56 = vld [vmem:[#allocation12_spill] sm:$0xff] }
 0x68b   : > { %v4310_v2 = vpop.f32.mrf.mxu3  ;;  %v4168_v11 = vpop.f32.mrf.mxu0  ;;  %v4262_v47 = vadd.f32 %v4261_v41, %v11056_v55  ;;  %v4255_v41 = vadd.f32 %v10031_v53, %v11059_v1  ;;  %v4247_v1 = vadd.f32 %v10011_v50, %v11084_v44  ;;  %v4389_v50 = vmax.f32 %v10022_v58, 0.0 }
 0x68c   : > { %v4169_v15 = vadd.f32 %v4168_v11, %v11055_v28  ;;  %v4420_v11 = vmax.f32 %v4211_v7, 0.0  ;;  %v4232_v58 = vadd.f32 %v9945_v54, %v9348_v46  ;;  %v11105_v46 = vld [vmem:[#allocation33_spill] sm:$0xff] }
 0x68d   : > { %v4217_v9 = vpop.f32.mrf.mxu1  ;;  %v4341_v54 = vmax.f32 %v11105_v46, 0.0 }
 0x68e   : > { %v4218_v49 = vadd.f32 %v4217_v9, %v4169_v15  ;;  %v4500_v0 = vpack.c.bf16 %v4428_v24, %v4420_v11  ;;  %v4257_v24 = vadd.f32 %v4256_v40, %v11058_v21  ;;  %v4304_v40 = vadd.f32 %v10033_v22, %v4255_v41  ;;  %v10124_v41 = vpop.permute.xlu1 %4538 }
 0x68f   : > { %v4242_v22 = vadd.f32 %v9992_v51, %v11079_v39  ;;  %v4373_v51 = vmax.f32 %v10004_v29, 0.0  ;;  %v11103_v29 = vld [vmem:[#allocation6_spill] sm:$0xff] }
 0x690   : > { %v4444_v60 = vmax.f32 %v4218_v49, 0.0  ;;  %v4405_v62 = vmax.f32 %v4304_v40, 0.0  ;;  %v11107_v40 = vld [vmem:[#allocation29_spill] sm:$0xff] }
 0x691   : > { %v4291_v20 = vadd.f32 %v9994_v37, %v4242_v22 }
 0x692   : > { %v4264_v31 = vpop.f32.mrf.mxu2  ;;  %v4508_v32 = vpack.c.bf16 %v4444_v60, %v4436_v25  ;;  %v4296_v60 = vadd.f32 %v10013_v57, %v4247_v1 }
 0x693   : > { %v4313_v59 = vpop.f32.mrf.mxu3  ;;  %v10052_v26 = vpop.f32.mrf.mxu0  ;;  %v4265_v49 = vadd.f32 %v4264_v31, %v11054_v19  ;;  %v4311_v19 = vadd.f32 %v4310_v2, %v4262_v47  ;;  %v4421_v2 = vmax.f32 %v4309_v42, 0.0  ;;  %v4365_v43 = vmax.f32 %v4291_v20, 0.0 }
 0x694   : > { %4764 = vmatpush.bf16.msrb.mxu2 %v4508_v32  ;;  %v4388_v32 = vmax.f32 %v10007_v52, 0.0  ;;  %v4306_v52 = vadd.f32 %v10039_v18, %v4257_v24  ;;  %v4381_v11 = vmax.f32 %v4296_v60, 0.0  ;;  %v4281_v47 = vadd.f32 %v11104_v56, %v4232_v58 }
 0x695   : > { %v10054_v12 = vpop.f32.mrf.mxu1  ;;  %v4314_v13 = vadd.f32 %v4313_v59, %v4265_v49  ;;  %v4429_v15 = vmax.f32 %v4311_v19, 0.0 }
 0x696   : > { %v4484_v55 = vpack.c.bf16 %v4396_v23, %v4388_v32  ;;  %v4413_v27 = vmax.f32 %v4306_v52, 0.0  ;;  %v10148_v22 = vpop.permute.xlu1 %4553 }
 0x697   : > { %v4437_v33 = vmax.f32 %v4314_v13, 0.0 }
 0x698   : > { %4765 = vmatpush.bf16.msrb.mxu2 %v4500_v0  ;;  %v4493_v59 = vpack.c.bf16 %v4413_v27, %v4405_v62  ;;  %v11102_v0 = vld [vmem:[#allocation47_spill] sm:$0xff] }
 0x69a   : > { %v4266_v25 = vpop.f32.mrf.mxu2 }
 0x69b   : > { %v4267_v7 = vadd.f32 %v4266_v25, %v11055_v28  ;;  %v4315_v45 = vpop.f32.mrf.mxu3  ;;  %v10062_v30 = vpop.f32.mrf.mxu0  ;;  %v4252_v28 = vadd.f32 %v10026_v48, %v9331_v3  ;;  %v4501_v3 = vpack.c.bf16 %v4429_v15, %v4421_v2 }
 0x69c   : > { %4766 = vmatpush.bf16.msrb.mxu2 %v4492_v16  ;;  %v4333_v16 = vmax.f32 %v4281_v47, 0.0 }
 0x69d   : > { %v4316_v63 = vadd.f32 %v4315_v45, %v4267_v7  ;;  %v10065_v38 = vpop.f32.mrf.mxu1  ;;  %v4301_v53 = vadd.f32 %v10028_v61, %v4252_v28  ;;  %v11106_v45 = vld [vmem:[#allocation25_spill] sm:$0xff] }
 0x69e   : > { %v4325_v32 = vmax.f32 %v11106_v45, 0.0  ;;  %v11108_v45 = vld [vmem:[#allocation55_spill] sm:$0xff] }
 0x69f   : > { %v4445_v34 = vmax.f32 %v4316_v63, 0.0  ;;  %v4397_v31 = vmax.f32 %v4301_v53, 0.0  ;;  %v10122_v63 = vpop.permute.xlu0 %4533 }
 0x6a0   : > { %4767 = vmatpush.bf16.msrb.mxu2 %v4484_v55  ;;  %v4453_v55 = vpack.c.bf16 %v4333_v16, %v4325_v32  ;;  %v4602_v42 = vadd.f32 %v10062_v30, %v10122_v63 }
 0x6a1   : > { %v4509_v9 = vpack.c.bf16 %v4445_v34, %v4437_v33  ;;  %v4485_v39 = vpack.c.bf16 %v4397_v31, %v4389_v50  ;;  %v4631_v33 = vadd.f32 %v10065_v38, %v10122_v63 }
 0x6a2   : > { %v10072_v21 = vpop.f32.mrf.mxu2  ;;  %v4830_v2 = vmax.f32 %v4602_v42, 0.0 }
 0x6a3   : > { %v10075_v6 = vpop.f32.mrf.mxu3  ;;  %4793 = vmatpush.bf16.msrb.mxu3 %v4509_v9  ;;  %v10081_v48 = vpop.f32.mrf.mxu0  ;;  %v4831_v1 = vmax.f32 %v4631_v33, 0.0 }
 0x6a4   : > { %4768 = vmatpush.bf16.msrb.mxu2 %v10041_v17  ;;  %v4237_v17 = vadd.f32 %v9972_v5, %v9387_v8  ;;  %v11101_v8 = vld [vmem:[#allocation36_spill] sm:$0xff]  ;;  %v4477_v5 = vpack.c.bf16 %v4381_v11, %v4373_v51  ;;  %v4605_v60 = vadd.f32 %v10081_v48, %v10124_v41 }
 0x6a5   : > { %v10083_v18 = vpop.f32.mrf.mxu1  ;;  %v4890_v62 = vpack.c.bf16 %v4831_v1, %v4830_v2 }
 0x6a6   : > { %v4286_v35 = vadd.f32 %v9974_v36, %v4237_v17  ;;  %v10115_v36 = vpop.permute.xlu2 %4528  ;;  %v4634_v31 = vadd.f32 %v10083_v18, %v10124_v41 }
 0x6a7   : > { %4794 = vmatpush.bf16.msrb.mxu3 %v4501_v3  ;;  %v4600_v28 = vadd.f32 %v10052_v26, %v10115_v36  ;;  %v4629_v52 = vadd.f32 %v10054_v12, %v10115_v36  ;;  %v10142_v38 = vpop.permute.xlu0 %4548  ;;  %v4658_v26 = vadd.f32 %v10072_v21, %v10115_v36  ;;  %v4687_v12 = vadd.f32 %v10075_v6, %v10115_v36 }
 0x6a8   : > { %4769 = vmatpush.bf16.msrb.mxu2 %v10035_v10  ;;  %v4349_v23 = vmax.f32 %v4286_v35, 0.0  ;;  %v4934_v17 = vunpack.c.l.bf16 %v4890_v62  ;;  %v4839_v51 = vmax.f32 %v4634_v31, 0.0 }
 0x6a9   : > { %v4822_v27 = vmax.f32 %v4600_v28, 0.0  ;;  %v4823_v3 = vmax.f32 %v4629_v52, 0.0  ;;  %v4824_v20 = vmax.f32 %v4658_v26, 0.0  ;;  %v4825_v11 = vmax.f32 %v4687_v12, 0.0 }
 0x6aa   : > { %v10089_v44 = vpop.f32.mrf.mxu2  ;;  %v4461_v4 = vpack.c.bf16 %v4349_v23, %v4341_v54 }
 0x6ab   : > { %v10092_v61 = vpop.f32.mrf.mxu3  ;;  %4795 = vmatpush.bf16.msrb.mxu3 %v4493_v59  ;;  %v10099_v57 = vpop.f32.mrf.mxu0  ;;  %v4886_v59 = vpack.c.bf16 %v4823_v3, %v4822_v27  ;;  %v4660_v21 = vadd.f32 %v10089_v44, %v10122_v63 }
 0x6ac   : > { %4770 = vmatpush.bf16.msrb.mxu2 %v10020_v14  ;;  %v4357_v14 = vmax.f32 %v11102_v0, 0.0  ;;  %v4689_v6 = vadd.f32 %v10092_v61, %v10122_v63  ;;  %v4935_v0 = vunpack.c.h.bf16 %v4890_v62 }
 0x6ad   : > { %v10101_v10 = vpop.f32.mrf.mxu1  ;;  %v4927_v44 = vunpack.c.h.bf16 %v4886_v59  ;;  %v4832_v47 = vmax.f32 %v4660_v21, 0.0 }
 0x6ae   : > { %v4469_v25 = vpack.c.bf16 %v4365_v43, %v4357_v14  ;;  %v10131_v34 = vpop.permute.xlu2 %4543  ;;  %v4833_v23 = vmax.f32 %v4689_v6, 0.0 }
 0x6af   : > { %4796 = vmatpush.bf16.msrb.mxu3 %v4485_v39  ;;  %v4838_v39 = vmax.f32 %v4605_v60, 0.0  ;;  %v4607_v48 = vadd.f32 %v10099_v57, %v10131_v34  ;;  %v4636_v18 = vadd.f32 %v10101_v10, %v10131_v34  ;;  %v10168_v14 = vpop.permute.xlu0 %4997  ;;  %v10172_v10 = vpop.permute.xlu1 %4558 }
 0x6b0   : > { %4771 = vmatpush.bf16.msrb.mxu2 %v11101_v8  ;;  %v5038_v61 = vmul.f32 %v10168_v14, %v4934_v17  ;;  %v5039_v54 = vmul.f32 %v10168_v14, %v4935_v0 }
 0x6b1   : > { %v4894_v56 = vpack.c.bf16 %v4839_v51, %v4838_v39  ;;  %v4846_v57 = vmax.f32 %v4607_v48, 0.0 }
 0x6b2   : > { %v10107_v37 = vpop.f32.mrf.mxu2 }
 0x6b3   : > { %v10110_v49 = vpop.f32.mrf.mxu3  ;;  %4797 = vmatpush.bf16.msrb.mxu3 %v4477_v5  ;;  %4772 = vmatmul.bf16.vlgmr.msrb.gmra.mxu2 %v11103_v29  ;;  %v4609_v13 = vpop.f32.mrf.mxu0  ;;  %v4926_v5 = vunpack.c.l.bf16 %v4886_v59  ;;  %v4942_v28 = vunpack.c.l.bf16 %v4894_v56  ;;  %v4943_v52 = vunpack.c.h.bf16 %v4894_v56  ;;  %v4663_v27 = vadd.f32 %v10107_v37, %v10124_v41 }
 0x6b4   : > { %v4610_v16 = vadd.f32 %v4609_v13, %v10142_v38  ;;  %v4692_v62 = vadd.f32 %v10110_v49, %v10124_v41 }
 0x6b5   : > { %v4638_v7 = vpop.f32.mrf.mxu1  ;;  %v4840_v48 = vmax.f32 %v4663_v27, 0.0 }
 0x6b6   : > { %v10154_v50 = vpop.permute.xlu2 %4992  ;;  %v4854_v26 = vmax.f32 %v4610_v16, 0.0  ;;  %v4841_v0 = vmax.f32 %v4692_v62, 0.0 }
 0x6b7   : > { %4798 = vmatpush.bf16.msrb.mxu3 %v4469_v25  ;;  %v4847_v25 = vmax.f32 %v4636_v18, 0.0  ;;  %v5030_v46 = vmul.f32 %v10154_v50, %v4926_v5  ;;  %v5031_v32 = vmul.f32 %v10154_v50, %v4927_v44  ;;  %v10194_v21 = vpop.permute.xlu0 %4563 }
 0x6b9   : > { %v5094_v33 = vadd.f32 %v5038_v61, %v5030_v46  ;;  %v4898_v1 = vpack.c.bf16 %v4847_v25, %v4846_v57  ;;  %v5107_v3 = vadd.f32 %v5039_v54, %v5031_v32 }
 0x6ba   : > { %v10118_v24 = vpop.f32.mrf.mxu2 }
 0x6bb   : > { %v10120_v19 = vpop.f32.mrf.mxu3  ;;  %4799 = vmatpush.bf16.msrb.mxu3 %v4461_v4  ;;  %v4611_v15 = vpop.f32.mrf.mxu0  ;;  %v4639_v4 = vadd.f32 %v4638_v7, %v10142_v38  ;;  %v4950_v6 = vunpack.c.l.bf16 %v4898_v1  ;;  %v4951_v54 = vunpack.c.h.bf16 %v4898_v1 }
 0x6bc   : > { %v4612_v13 = vadd.f32 %v4611_v15, %v10148_v22  ;;  %v4694_v61 = vadd.f32 %v10120_v19, %v10131_v34 }
 0x6bd   : > { %v4640_v9 = vpop.f32.mrf.mxu1  ;;  %v4855_v12 = vmax.f32 %v4639_v4, 0.0 }
 0x6be   : > { %v10180_v2 = vpop.permute.xlu2 %5002  ;;  %v4641_v7 = vadd.f32 %v4640_v9, %v10148_v22  ;;  %v4862_v18 = vmax.f32 %v4612_v13, 0.0  ;;  %v4849_v1 = vmax.f32 %v4694_v61, 0.0 }
 0x6bf   : > { %4800 = vmatpush.bf16.msrb.mxu3 %v4453_v55  ;;  %v5046_v9 = vmul.f32 %v10180_v2, %v4942_v28  ;;  %v5047_v39 = vmul.f32 %v10180_v2, %v4943_v52  ;;  %v10196_v44 = vpack.c.bf16 %v4855_v12, %v4854_v26 }
 0x6c0   : > { %v4863_v5 = vmax.f32 %v4641_v7, 0.0 }
 0x6c1   : > { %v5095_v57 = vadd.f32 %v5094_v33, %v5046_v9  ;;  %v5108_v25 = vadd.f32 %v5107_v3, %v5047_v39  ;;  %v4959_v52 = vunpack.c.h.bf16 %v10196_v44  ;;  %v11109_v39 = vld [vmem:[#allocation7_spill] sm:$0xff] }
 0x6c2   : > { %4801 = vmatmul.bf16.vlgmr.msrb.gmra.mxu3 %v11103_v29  ;;  %v10138_v30 = vpop.f32.mrf.mxu2  ;;  %v4887_v29 = vpack.c.bf16 %v4825_v11, %v4824_v20  ;;  %v10209_v32 = vpack.c.bf16 %v4863_v5, %v4862_v18 }
 0x6c3   : > { %4777 = vmatmul.bf16.gmra.mxu2 %v11107_v40  ;;  %v10140_v53 = vpop.f32.mrf.mxu3  ;;  %v4614_v58 = vpop.f32.mrf.mxu0 }
 0x6c4   : > { %v4928_v55 = vunpack.c.l.bf16 %v4887_v29  ;;  %v4929_v42 = vunpack.c.h.bf16 %v4887_v29  ;;  %v4615_v20 = vadd.f32 %v4614_v58, %v10172_v10  ;;  %v4665_v29 = vadd.f32 %v10118_v24, %v10131_v34 }
 0x6c5   : > { %v4643_v35 = vpop.f32.mrf.mxu1  ;;  %v4668_v24 = vadd.f32 %v10138_v30, %v10142_v38  ;;  %v4697_v19 = vadd.f32 %v10140_v53, %v10142_v38  ;;  %v4967_v26 = vunpack.c.h.bf16 %v10209_v32 }
 0x6c6   : > { %v5032_v59 = vmul.f32 %v10154_v50, %v4928_v55  ;;  %v5033_v17 = vmul.f32 %v10154_v50, %v4929_v42  ;;  %v4644_v37 = vadd.f32 %v4643_v35, %v10172_v10  ;;  %v4870_v56 = vmax.f32 %v4615_v20, 0.0  ;;  %v10215_v33 = vpop.permute.xlu2 %5012 }
 0x6c7   : > { %v4895_v55 = vpack.c.bf16 %v4841_v0, %v4840_v48  ;;  %v4856_v12 = vmax.f32 %v4668_v24, 0.0  ;;  %v4857_v20 = vmax.f32 %v4697_v19, 0.0 }
 0x6ca   : > { %v10164_v43 = vpop.f32.mrf.mxu2 }
 0x6cb   : > { %v10166_v8 = vpop.f32.mrf.mxu3  ;;  %v4616_v60 = vpop.f32.mrf.mxu0  ;;  %v4670_v30 = vadd.f32 %v10164_v43, %v10148_v22  ;;  %v4944_v43 = vunpack.c.l.bf16 %v4895_v55 }
 0x6cc   : > { %v4617_v58 = vadd.f32 %v4616_v60, %v10194_v21  ;;  %v4699_v3 = vadd.f32 %v10166_v8, %v10148_v22  ;;  %v5063_v8 = vmul.f32 %v10215_v33, %v4959_v52 }
 0x6cd   : > { %v4645_v31 = vpop.f32.mrf.mxu1 }
 0x6ce   : > { %v4646_v35 = vadd.f32 %v4645_v31, %v10194_v21  ;;  %v4878_v42 = vmax.f32 %v4617_v58, 0.0  ;;  %v4903_v58 = vpack.c.bf16 %v4857_v20, %v4856_v12 }
 0x6d0   : > { %v4879_v28 = vmax.f32 %v4646_v35, 0.0 }
 0x6d2   : > { %4806 = vmatmul.bf16.gmra.mxu3 %v11107_v40  ;;  %v4891_v40 = vpack.c.bf16 %v4833_v23, %v4832_v47  ;;  %v4672_v11 = vpop.f32.mrf.mxu2  ;;  %v4871_v47 = vmax.f32 %v4644_v37, 0.0  ;;  %v10204_v23 = vpop.permute.xlu1 %5007  ;;  %v4914_v37 = vpack.c.bf16 %v4879_v28, %v4878_v42 }
 0x6d3   : > { %4782 = vmatmul.bf16.gmra.mxu2 %v11108_v45  ;;  %v4701_v15 = vpop.f32.mrf.mxu3  ;;  %v5054_v4 = vmul.f32 %v10204_v23, %v4950_v6  ;;  %v5055_v7 = vmul.f32 %v10204_v23, %v4951_v54  ;;  %v4865_v6 = vmax.f32 %v4699_v3, 0.0  ;;  %v4966_v54 = vunpack.c.l.bf16 %v10209_v32 }
 0x6d4   : > { %v4936_v51 = vunpack.c.l.bf16 %v4891_v40  ;;  %v4937_v49 = vunpack.c.h.bf16 %v4891_v40  ;;  %v4848_v40 = vmax.f32 %v4665_v29, 0.0  ;;  %v10218_v27 = vpack.c.bf16 %v4871_v47, %v4870_v56 }
 0x6d5   : > { %v5096_v62 = vadd.f32 %v5095_v57, %v5054_v4  ;;  %v4702_v9 = vadd.f32 %v4701_v15, %v10172_v10  ;;  %v5109_v5 = vadd.f32 %v5108_v25, %v5055_v7  ;;  %v4958_v15 = vunpack.c.l.bf16 %v10196_v44  ;;  %v10243_v44 = vpop.permute.xlu2 %5027 }
 0x6d6   : > { %v5040_v46 = vmul.f32 %v10168_v14, %v4936_v51  ;;  %v5041_v16 = vmul.f32 %v10168_v14, %v4937_v49  ;;  %v4899_v51 = vpack.c.bf16 %v4849_v1, %v4848_v40  ;;  %v4864_v49 = vmax.f32 %v4670_v30, 0.0 }
 0x6d7   : > { %v4983_v35 = vunpack.c.h.bf16 %v4914_v37  ;;  %v4873_v61 = vmax.f32 %v4702_v9, 0.0  ;;  %v5048_v47 = vmul.f32 %v10180_v2, %v4944_v43  ;;  %v5110_v57 = vadd.f32 %v5109_v5, %v5063_v8 }
 0x6d8   : > { %v5120_v13 = vadd.f32 %v5040_v46, %v5032_v59  ;;  %v5133_v53 = vadd.f32 %v5041_v16, %v5033_v17  ;;  %v4673_v59 = vadd.f32 %v4672_v11, %v10172_v10  ;;  %v10232_v17 = vpop.permute.xlu0 %5017  ;;  %v4945_v11 = vunpack.c.h.bf16 %v4895_v55 }
 0x6d9   : > { %v5071_v0 = vmul.f32 %v10232_v17, %v4967_v26  ;;  %v4952_v46 = vunpack.c.l.bf16 %v4899_v51  ;;  %v4907_v25 = vpack.c.bf16 %v4865_v6, %v4864_v49  ;;  %v5062_v19 = vmul.f32 %v10215_v33, %v4958_v15 }
 0x6da   : > { %v4674_v60 = vpop.f32.mrf.mxu2  ;;  %v4872_v29 = vmax.f32 %v4673_v59, 0.0  ;;  %v10238_v56 = vpop.permute.xlu1 %5022  ;;  %v5049_v55 = vmul.f32 %v10180_v2, %v4945_v11  ;;  %v4953_v42 = vunpack.c.h.bf16 %v4899_v51  ;;  %v4974_v28 = vunpack.c.l.bf16 %v10218_v27 }
 0x6db   : > { %v4703_v31 = vpop.f32.mrf.mxu3  ;;  %v4675_v48 = vadd.f32 %v4674_v60, %v10194_v21  ;;  %v5111_v52 = vadd.f32 %v5110_v57, %v5071_v0  ;;  %v4960_v40 = vunpack.c.l.bf16 %v4903_v58  ;;  %v5087_v1 = vmul.f32 %v10243_v44, %v4983_v35 }
 0x6dc   : > { %v4704_v18 = vadd.f32 %v4703_v31, %v10194_v21  ;;  %v4911_v7 = vpack.c.bf16 %v4873_v61, %v4872_v29  ;;  %v5121_v32 = vadd.f32 %v5120_v13, %v5048_v47  ;;  %v5070_v30 = vmul.f32 %v10232_v17, %v4966_v54 }
 0x6dd   : > { %v4880_v4 = vmax.f32 %v4675_v48, 0.0  ;;  %v4961_v3 = vunpack.c.h.bf16 %v4903_v58  ;;  %v4982_v26 = vunpack.c.l.bf16 %v4914_v37  ;;  %v5056_v12 = vmul.f32 %v10204_v23, %v4952_v46 }
 0x6de   : > { %v4881_v24 = vmax.f32 %v4704_v18, 0.0  ;;  %v4968_v31 = vunpack.c.l.bf16 %v4907_v25  ;;  %v5097_v59 = vadd.f32 %v5096_v62, %v5062_v19  ;;  %v5057_v9 = vmul.f32 %v10204_v23, %v4953_v42 }
 0x6df   : > { %v4969_v43 = vunpack.c.h.bf16 %v4907_v25  ;;  %v5134_v8 = vadd.f32 %v5133_v53, %v5049_v55  ;;  %v5064_v51 = vmul.f32 %v10215_v33, %v4960_v40  ;;  %v4976_v13 = vunpack.c.l.bf16 %v4911_v7 }
 0x6e0   : > { %v4915_v20 = vpack.c.bf16 %v4881_v24, %v4880_v4  ;;  %v5098_v49 = vadd.f32 %v5097_v59, %v5070_v30  ;;  %v5065_v6 = vmul.f32 %v10215_v33, %v4961_v3  ;;  %v5086_v37 = vmul.f32 %v10243_v44, %v4982_v26  ;;  %v5202_v59 = vpop.permute.xlu0 %5201 }
 0x6e1   : > { %v4977_v48 = vunpack.c.h.bf16 %v4911_v7  ;;  %v5122_v18 = vadd.f32 %v5121_v32, %v5056_v12  ;;  %v5072_v5 = vmul.f32 %v10232_v17, %v4968_v31  ;;  %v5135_v11 = vadd.f32 %v5134_v8, %v5057_v9  ;;  %v10263_v12 = vpop.f32.mrf.mxu0  ;;  %v10265_v31 = vpop.f32.mrf.mxu1 }
 0x6e2   : > { %4811 = vmatmul.bf16.gmra.mxu3 %v11108_v45  ;;  %v4975_v45 = vunpack.c.h.bf16 %v10218_v27  ;;  %v5078_v27 = vmul.f32 %v10238_v56, %v4974_v28  ;;  %v4984_v62 = vunpack.c.l.bf16 %v4915_v20  ;;  %v5073_v53 = vmul.f32 %v10232_v17, %v4969_v43 }
 0x6e3   : > { %4787 = vmatmul.bf16.gmra.mxu2 %v11109_v39  ;;  %v4985_v0 = vunpack.c.h.bf16 %v4915_v20  ;;  %v5123_v58 = vadd.f32 %v5122_v18, %v5064_v51  ;;  %v5080_v29 = vmul.f32 %v10238_v56, %v4976_v13  ;;  %v5136_v61 = vadd.f32 %v5135_v11, %v5065_v6 }
 0x6e4   : > { %v5079_v16 = vmul.f32 %v10238_v56, %v4975_v45  ;;  %v5099_v15 = vadd.f32 %v5098_v49, %v5078_v27  ;;  %v5081_v57 = vmul.f32 %v10238_v56, %v4977_v48  ;;  %v5088_v54 = vmul.f32 %v10243_v44, %v4984_v62 }
 0x6e5   : > { %v5124_v46 = vadd.f32 %v5123_v58, %v5072_v5  ;;  %v5089_v25 = vmul.f32 %v10243_v44, %v4985_v0  ;;  %v10267_v8 = vperm.slane %v5202_v59, 0 }
 0x6e6   : > { %v5112_v60 = vadd.f32 %v5111_v52, %v5079_v16  ;;  %v5100_v47 = vadd.f32 %v5099_v15, %v5086_v37  ;;  %v5137_v16 = vadd.f32 %v5136_v61, %v5073_v53 }
 0x6e7   : > { %v5125_v4 = vadd.f32 %v5124_v46, %v5080_v29 }
 0x6e8   : > { %v5113_v45 = vadd.f32 %v5112_v60, %v5087_v1  ;;  %v5101_v24 = vrot.slane %v5100_v47, 4  ;;  %v5138_v55 = vadd.f32 %v5137_v16, %v5081_v57 }
 0x6e9   : > { %v5126_v19 = vadd.f32 %v5125_v4, %v5088_v54  ;;  %v10272_v37 = vpop.f32.mrf.mxu0  ;;  %v10274_v18 = vpop.f32.mrf.mxu1 }
 0x6ea   : > { %v5114_v35 = vrot.slane %v5113_v45, 4  ;;  %v5139_v42 = vadd.f32 %v5138_v55, %v5089_v25  ;;  %v5102_v52 = vadd.f32 %v5101_v24, %v5100_v47 }
 0x6eb   : > { %v5127_v40 = vrot.slane %v5126_v19, 4 }
 0x6ec   : > { %v5140_v1 = vrot.slane %v5139_v42, 4  ;;  %v5103_v32 = vrot.slane %v5102_v52, 2 }
 0x6ed   : > { %v5128_v30 = vadd.f32 %v5127_v40, %v5126_v19 }
 0x6ee   : > { %v5141_v3 = vadd.f32 %v5140_v1, %v5139_v42  ;;  %v5104_v60 = vadd.f32 %v5103_v32, %v5102_v52 }
 0x6ef   : > { %v5129_v20 = vrot.slane %v5128_v30, 2 }
 0x6f0   : > { %v5142_v9 = vrot.slane %v5141_v3, 2  ;;  %v5105_v43 = vrot.slane %v5104_v60, 1 }
 0x6f1   : > { %v5130_v51 = vadd.f32 %v5129_v20, %v5128_v30  ;;  %v10287_v61 = vpop.f32.mrf.mxu0  ;;  %v10289_v57 = vpop.f32.mrf.mxu1 }
 0x6f2   : > { %4816 = vmatmul.bf16.gmra.mxu3 %v11109_v39  ;;  %v5115_v39 = vadd.f32 %v5114_v35, %v5113_v45  ;;  %v5143_v45 = vadd.f32 %v5142_v9, %v5141_v3  ;;  %v5106_v49 = vadd.f32 %v5105_v43, %v5104_v60 }
 0x6f3   : > { %v5131_v6 = vrot.slane %v5130_v51, 1 }
 0x6f4   : > { %v5116_v28 = vrot.slane %v5115_v39, 2  ;;  %v5144_v48 = vrot.slane %v5143_v45, 1  ;;  %v10278_v62 = vadd.f32 %v10267_v8, %v5106_v49 }
 0x6f5   : > { %v5132_v11 = vadd.f32 %v5131_v6, %v5130_v51 }
 0x6f6   : > { %v5117_v7 = vadd.f32 %v5116_v28, %v5115_v39  ;;  %v5145_v15 = vadd.f32 %v5144_v48, %v5143_v45  ;;  %v5221_v0 = vand.u32 2147483647, %v10278_v62  ;;  %v5213_v48 = vmax.f32 %v10278_v62, 0.0 }
 0x6f7   : > { %v10282_v58 = vadd.f32 %v10267_v8, %v5132_v11 }
 0x6f8   : > { %v5118_v26 = vrot.slane %v5117_v7, 1  ;;  %v10285_v35 = vadd.f32 %v10267_v8, %v5145_v15  ;;  %v5229_v47 = vsub.f32 0.0, %v5221_v0 }
 0x6f9   : > { %v5223_v46 = vand.u32 2147483647, %v10282_v58  ;;  %v10293_v55 = vpop.f32.mrf.mxu0  ;;  %v10295_v42 = vpop.f32.mrf.mxu1 }
 0x6fa   : > { %v5119_v27 = vadd.f32 %v5118_v26, %v5117_v7  ;;  %v5224_v54 = vand.u32 2147483647, %v10285_v35  ;;  %v5237_v16 = vmul.f32 1.442695, %v5229_v47 }
 0x6fb   : > { %v5231_v25 = vsub.f32 0.0, %v5223_v46 }
 0x6fc   : > { %v10270_v13 = vadd.f32 %v10267_v8, %v5119_v27  ;;  %v5232_v39 = vsub.f32 0.0, %v5224_v54 }
 0x6fd   : > { %v5241_v24 = vmul.f32 1.442695, %v5231_v25 }
 0x6fe   : > { %v5222_v5 = vand.u32 2147483647, %v10270_v13  ;;  %v5243_v19 = vmul.f32 1.442695, %v5232_v39  ;;  %v5214_v59 = vmax.f32 %v10270_v13, 0.0 }
 0x700   : > { %v5230_v53 = vsub.f32 0.0, %v5222_v5 }
 0x701   : > { %v10297_v7 = vpop.f32.mrf.mxu0  ;;  %v10299_v30 = vpop.f32.mrf.mxu1 }
 0x702   : > { %v5239_v29 = vmul.f32 1.442695, %v5230_v53  ;;  %v5215_v53 = vmax.f32 %v10282_v58, 0.0 }
 0x704   : > { %5773 = vpow2.f32 %v5239_v29  ;;  %v5216_v29 = vmax.f32 %v10285_v35, 0.0 }
 0x705   : > { %5775 = vpow2.f32 %v5237_v16 }
 0x706   : > { %5777 = vpow2.f32 %v5241_v24 }
 0x707   : > { %5779 = vpow2.f32 %v5243_v19 }
 0x709   : > { %v10302_v43 = vpop.f32.mrf.mxu0  ;;  %v10304_v51 = vpop.f32.mrf.mxu1 }
 0x70a   : > { %v5774_v4 = vpop.eup %5773 }
 0x70b   : > { %v5254_v28 = vadd.f32 1.0, %v5774_v4  ;;  %v5776_v52 = vpop.eup %5775 }
 0x70c   : > { %v5253_v40 = vadd.f32 1.0, %v5776_v52  ;;  %v5778_v1 = vpop.eup %5777 }
 0x70d   : > { %5781 = vlog2.f32 %v5254_v28  ;;  %v5780_v32 = vpop.eup %5779  ;;  %v5255_v26 = vadd.f32 1.0, %v5778_v1 }
 0x70e   : > { %5783 = vlog2.f32 %v5253_v40  ;;  %v5256_v60 = vadd.f32 1.0, %v5780_v32  ;;  %v4718_v40 = vadd.f32 %v10272_v37, %v10122_v63  ;;  %v4745_v37 = vadd.f32 %v10265_v31, %v10115_v36 }
 0x70f   : > { %5785 = vlog2.f32 %v5255_v26  ;;  %v4723_v31 = vadd.f32 %v10293_v55, %v10131_v34  ;;  %v4726_v55 = vadd.f32 %v10297_v7, %v10142_v38 }
 0x710   : > { %5787 = vlog2.f32 %v5256_v60 }
 0x711   : > { %v4759_v26 = vpop.f32.mrf.mxu1 }
 0x713   : > { %v5782_v3 = vpop.eup %5781 }
 0x714   : > { %v5264_v20 = vmul.f32 0.6931472, %v5782_v3  ;;  %v5784_v9 = vpop.eup %5783  ;;  %v4747_v3 = vadd.f32 %v10274_v18, %v10122_v63  ;;  %v4750_v18 = vadd.f32 %v10289_v57, %v10124_v41 }
 0x715   : > { %v5262_v49 = vmul.f32 0.6931472, %v5784_v9  ;;  %v5786_v6 = vpop.eup %5785 }
 0x716   : > { %v5278_v27 = vadd.f32 %v5264_v20, %v5214_v59  ;;  %v5788_v15 = vpop.eup %5787  ;;  %v5266_v0 = vmul.f32 0.6931472, %v5786_v6  ;;  %v4721_v59 = vadd.f32 %v10287_v61, %v10124_v41 }
 0x717   : > { %v5268_v47 = vmul.f32 0.6931472, %v5788_v15  ;;  %v5277_v46 = vadd.f32 %v5262_v49, %v5213_v48  ;;  %v4752_v48 = vadd.f32 %v10295_v42, %v10131_v34  ;;  %v4755_v42 = vadd.f32 %v10299_v30, %v10142_v38 }
 0x718   : > { %v5286_v5 = vsub.f32 0.0, %v5278_v27  ;;  %v5294_v11 = vsub.f32 %v10270_v13, %v5278_v27  ;;  %v5279_v54 = vadd.f32 %v5266_v0, %v5215_v53  ;;  %v4834_v27 = vmax.f32 %v4718_v40, 0.0 }
 0x719   : > { %v5280_v16 = vadd.f32 %v5268_v47, %v5216_v29  ;;  %v5285_v13 = vsub.f32 0.0, %v5277_v46  ;;  %v5293_v28 = vsub.f32 %v10278_v62, %v5277_v46  ;;  %v4716_v62 = vadd.f32 %v10263_v12, %v10115_v36 }
 0x71a   : > { %v5303_v25 = vsel %vm5301_vm1, %v5286_v5, %v5294_v11  ;;  %v5287_v39 = vsub.f32 0.0, %v5279_v54  ;;  %v5295_v4 = vsub.f32 %v10282_v58, %v5279_v54  ;;  %v4730_v58 = vpop.f32.mrf.mxu0  ;;  %v4835_v12 = vmax.f32 %v4747_v3, 0.0 }
 0x71b   : > { %v5288_v19 = vsub.f32 0.0, %v5280_v16  ;;  %v5296_v52 = vsub.f32 %v10285_v35, %v5280_v16  ;;  %v5318_v32 = vrot.slane %v5303_v25, 6  ;;  %v5302_v9 = vsel %vm5301_vm1, %v5285_v13, %v5293_v28  ;;  %v4761_v13 = vpop.f32.mrf.mxu1 }
 0x71c   : > { %v5304_v1 = vsel %vm5301_vm1, %v5287_v39, %v5295_v4  ;;  %v4826_v57 = vmax.f32 %v4716_v62, 0.0  ;;  %v4827_v11 = vmax.f32 %v4745_v37, 0.0  ;;  %v4842_v15 = vmax.f32 %v4721_v59, 0.0 }
 0x71d   : > { %v5305_v60 = vsel %vm5301_vm1, %v5288_v19, %v5296_v52  ;;  %v5319_v20 = vrot.slane %v5304_v1, 4  ;;  %v5325_v49 = vsel %vm5324_vm2, %v5302_v9, %v5318_v32  ;;  %v4843_v53 = vmax.f32 %v4750_v18, 0.0 }
 0x71e   : > { %v5320_v35 = vrot.slane %v5305_v60, 2  ;;  %v4892_v29 = vpack.c.bf16 %v4835_v12, %v4834_v27  ;;  %v4850_v47 = vmax.f32 %v4723_v31, 0.0  ;;  %v4851_v46 = vmax.f32 %v4752_v48, 0.0 }
 0x71f   : > { %v4728_v54 = vadd.f32 %v10302_v43, %v10148_v22  ;;  %v4757_v16 = vadd.f32 %v10304_v51, %v10148_v22  ;;  %v4888_v25 = vpack.c.bf16 %v4827_v11, %v4826_v57  ;;  %v4896_v39 = vpack.c.bf16 %v4843_v53, %v4842_v15 }
 0x720   : > { %v5327_v6 = vsel %vm5326_vm3, %v5319_v20, %v5320_v35  ;;  %v4858_v19 = vmax.f32 %v4726_v55, 0.0  ;;  %v4859_v28 = vmax.f32 %v4755_v42, 0.0  ;;  %v4731_v7 = vadd.f32 %v4730_v58, %v10172_v10 }
 0x721   : > { %v5329_v61 = vsel %vm5328_vm4, %v5325_v49, %v5327_v6  ;;  %v4760_v52 = vadd.f32 %v4759_v26, %v10172_v10  ;;  %v4939_v30 = vunpack.c.h.bf16 %v4892_v29  ;;  %v4900_v40 = vpack.c.bf16 %v4851_v46, %v4850_v47 }
 0x722   : > { %5335 = vst [vmem:[%s10345_s16] sm:$0xff] %v5329_v61  ;;  %v4732_v4 = vpop.f32.mrf.mxu0  ;;  %v4866_v32 = vmax.f32 %v4728_v54, 0.0  ;;  %v4867_v3 = vmax.f32 %v4757_v16, 0.0  ;;  %v4762_v51 = vadd.f32 %v4761_v13, %v10194_v21  ;;  %v4931_v60 = vunpack.c.h.bf16 %v4888_v25 }
 0x723   : > { %v4733_v43 = vadd.f32 %v4732_v4, %v10194_v21  ;;  %v4947_v20 = vunpack.c.h.bf16 %v4896_v39  ;;  %v4904_v62 = vpack.c.bf16 %v4859_v28, %v4858_v19  ;;  %v4874_v37 = vmax.f32 %v4731_v7, 0.0 }
 0x724   : > { %v4875_v35 = vmax.f32 %v4760_v52, 0.0  ;;  %v4938_v59 = vunpack.c.l.bf16 %v4892_v29  ;;  %v5043_v58 = vmul.f32 %v10168_v14, %v4939_v30  ;;  %v4955_v26 = vunpack.c.h.bf16 %v4900_v40 }
 0x725   : > { %v4908_v9 = vpack.c.bf16 %v4867_v3, %v4866_v32  ;;  %v4882_v27 = vmax.f32 %v4733_v43, 0.0  ;;  %v4883_v49 = vmax.f32 %v4762_v51, 0.0  ;;  %v4930_v6 = vunpack.c.l.bf16 %v4888_v25 }
 0x726   : > { %v4946_v12 = vunpack.c.l.bf16 %v4896_v39  ;;  %v5035_v31 = vmul.f32 %v10154_v50, %v4931_v60  ;;  %v5051_v48 = vmul.f32 %v10180_v2, %v4947_v20  ;;  %v4963_v61 = vunpack.c.h.bf16 %v4904_v62 }
 0x727   : > { %v4912_v57 = vpack.c.bf16 %v4875_v35, %v4874_v37  ;;  %v5042_v11 = vmul.f32 %v10168_v14, %v4938_v59  ;;  %v4954_v15 = vunpack.c.l.bf16 %v4900_v40  ;;  %v5059_v42 = vmul.f32 %v10204_v23, %v4955_v26 }
 0x728   : > { %v5159_v55 = vadd.f32 %v5043_v58, %v5035_v31  ;;  %v4971_v29 = vunpack.c.h.bf16 %v4908_v9  ;;  %v4916_v47 = vpack.c.bf16 %v4883_v49, %v4882_v27  ;;  %v5034_v46 = vmul.f32 %v10154_v50, %v4930_v6 }
 0x729   : > { %v5050_v54 = vmul.f32 %v10180_v2, %v4946_v12  ;;  %v4962_v25 = vunpack.c.l.bf16 %v4904_v62  ;;  %v5067_v39 = vmul.f32 %v10215_v33, %v4963_v61  ;;  %v4979_v4 = vunpack.c.h.bf16 %v4912_v57 }
 0x72a   : > { %v5160_v16 = vadd.f32 %v5159_v55, %v5051_v48  ;;  %v5146_v13 = vadd.f32 %v5042_v11, %v5034_v46  ;;  %v5058_v19 = vmul.f32 %v10204_v23, %v4954_v15  ;;  %v4970_v7 = vunpack.c.l.bf16 %v4908_v9 }
 0x72b   : > { %v5075_v52 = vmul.f32 %v10232_v17, %v4971_v29  ;;  %v4987_v30 = vunpack.c.h.bf16 %v4916_v47  ;;  %v5066_v3 = vmul.f32 %v10215_v33, %v4962_v25  ;;  %v4978_v51 = vunpack.c.l.bf16 %v4912_v57 }
 0x72c   : > { %v5161_v28 = vadd.f32 %v5160_v16, %v5059_v42  ;;  %v5147_v40 = vadd.f32 %v5146_v13, %v5050_v54  ;;  %v5083_v60 = vmul.f32 %v10238_v56, %v4979_v4  ;;  %v5074_v37 = vmul.f32 %v10232_v17, %v4970_v7 }
 0x72d   : > { %v4986_v59 = vunpack.c.l.bf16 %v4916_v47  ;;  %v5091_v58 = vmul.f32 %v10243_v44, %v4987_v30  ;;  %v5082_v9 = vmul.f32 %v10238_v56, %v4978_v51 }
 0x72e   : > { %v5162_v43 = vadd.f32 %v5161_v28, %v5067_v39  ;;  %v5148_v20 = vadd.f32 %v5147_v40, %v5058_v19 }
 0x72f   : > { %v5090_v6 = vmul.f32 %v10243_v44, %v4986_v59 }
 0x730   : > { %v5163_v35 = vadd.f32 %v5162_v43, %v5075_v52  ;;  %v5149_v26 = vadd.f32 %v5148_v20, %v5066_v3 }
 0x732   : > { %v5164_v27 = vadd.f32 %v5163_v35, %v5083_v60  ;;  %v5150_v49 = vadd.f32 %v5149_v26, %v5074_v37 }
 0x734   : > { %v5165_v12 = vadd.f32 %v5164_v27, %v5091_v58  ;;  %v5151_v31 = vadd.f32 %v5150_v49, %v5082_v9 }
 0x736   : > { %v10306_v45 = vpop.f32.mrf.mxu2  ;;  %v5152_v57 = vadd.f32 %v5151_v31, %v5090_v6  ;;  %v5166_v11 = vrot.slane %v5165_v12, 4 }
 0x737   : > { %v4774_v54 = vadd.f32 %v10306_v45, %v10115_v36 }
 0x738   : > { %v5153_v47 = vrot.slane %v5152_v57, 4  ;;  %v5167_v46 = vadd.f32 %v5166_v11, %v5165_v12 }
 0x739   : > { %v4828_v28 = vmax.f32 %v4774_v54, 0.0 }
 0x73a   : > { %v5168_v19 = vrot.slane %v5167_v46, 2 }
 0x73e   : > { %v10315_v24 = vpop.f32.mrf.mxu2 }
 0x73f   : > { %v4776_v42 = vadd.f32 %v10315_v24, %v10122_v63 }
 0x741   : > { %v4836_v4 = vmax.f32 %v4776_v42, 0.0 }
 0x745   : > { %v10342_v5 = vpop.f32.mrf.mxu3 }
 0x746   : > { %v10348_v0 = vpop.f32.mrf.mxu2  ;;  %v4803_v55 = vadd.f32 %v10342_v5, %v10115_v36 }
 0x747   : > { %v4779_v16 = vadd.f32 %v10348_v0, %v10124_v41 }
 0x749   : > { %v4844_v7 = vmax.f32 %v4779_v16, 0.0 }
 0x74d   : > { %v10360_v1 = vpop.f32.mrf.mxu3 }
 0x74e   : > { %v10365_v18 = vpop.f32.mrf.mxu2  ;;  %v4805_v15 = vadd.f32 %v10360_v1, %v10122_v63  ;;  %v4829_v1 = vmax.f32 %v4803_v55, 0.0 }
 0x74f   : > { %v4781_v5 = vadd.f32 %v10365_v18, %v10131_v34  ;;  %v5169_v18 = vadd.f32 %v5168_v19, %v5167_v46 }
 0x750   : > { %v4837_v25 = vmax.f32 %v4805_v15, 0.0  ;;  %v4889_v52 = vpack.c.bf16 %v4829_v1, %v4828_v28 }
 0x751   : > { %v4852_v40 = vmax.f32 %v4781_v5, 0.0  ;;  %v5170_v6 = vrot.slane %v5169_v18, 1 }
 0x752   : > { %v4893_v36 = vpack.c.bf16 %v4837_v25, %v4836_v4  ;;  %v4932_v35 = vunpack.c.l.bf16 %v4889_v52 }
 0x754   : > { %v4940_v60 = vunpack.c.l.bf16 %v4893_v36  ;;  %v4941_v20 = vunpack.c.h.bf16 %v4893_v36  ;;  %v5036_v11 = vmul.f32 %v10154_v50, %v4932_v35 }
 0x755   : > { %v4807_v53 = vpop.f32.mrf.mxu3 }
 0x756   : > { %v4783_v32 = vpop.f32.mrf.mxu2  ;;  %v4808_v29 = vadd.f32 %v4807_v53, %v10124_v41  ;;  %v5154_v53 = vadd.f32 %v5153_v47, %v5152_v57 }
 0x757   : > { %v4784_v45 = vadd.f32 %v4783_v32, %v10142_v38  ;;  %v4933_v32 = vunpack.c.h.bf16 %v4889_v52 }
 0x758   : > { %v4845_v13 = vmax.f32 %v4808_v29, 0.0 }
 0x759   : > { %v5037_v29 = vmul.f32 %v10154_v50, %v4933_v32 }
 0x75a   : > { %v4897_v3 = vpack.c.bf16 %v4845_v13, %v4844_v7 }
 0x75c   : > { %v4948_v58 = vunpack.c.l.bf16 %v4897_v3  ;;  %v4949_v26 = vunpack.c.h.bf16 %v4897_v3 }
 0x75d   : > { %v4809_v62 = vpop.f32.mrf.mxu3 }
 0x75e   : > { %v4785_v48 = vpop.f32.mrf.mxu2  ;;  %v4810_v39 = vadd.f32 %v4809_v62, %v10131_v34  ;;  %v5155_v34 = vrot.slane %v5154_v53, 2  ;;  %v4860_v62 = vmax.f32 %v4784_v45, 0.0  ;;  %v5052_v47 = vmul.f32 %v10180_v2, %v4948_v58 }
 0x75f   : > { %v4786_v51 = vadd.f32 %v4785_v48, %v10148_v22  ;;  %v5045_v48 = vmul.f32 %v10168_v14, %v4941_v20  ;;  %v5053_v46 = vmul.f32 %v10180_v2, %v4949_v26 }
 0x760   : > { %v4853_v41 = vmax.f32 %v4810_v39, 0.0  ;;  %v5156_v49 = vadd.f32 %v5155_v34, %v5154_v53 }
 0x761   : > { %v4868_v12 = vmax.f32 %v4786_v51, 0.0 }
 0x762   : > { %v4901_v37 = vpack.c.bf16 %v4853_v41, %v4852_v40  ;;  %v5157_v50 = vrot.slane %v5156_v49, 1 }
 0x764   : > { %v4957_v57 = vunpack.c.h.bf16 %v4901_v37  ;;  %v5158_v34 = vadd.f32 %v5157_v50, %v5156_v49 }
 0x765   : > { %v4812_v61 = vpop.f32.mrf.mxu3 }
 0x766   : > { %v4813_v63 = vadd.f32 %v4812_v61, %v10142_v38  ;;  %v4788_v0 = vpop.f32.mrf.mxu2  ;;  %v4956_v61 = vunpack.c.l.bf16 %v4901_v37  ;;  %v5061_v5 = vmul.f32 %v10204_v23, %v4957_v57 }
 0x767   : > { %v4789_v59 = vadd.f32 %v4788_v0, %v10172_v10 }
 0x768   : > { %v4861_v43 = vmax.f32 %v4813_v63, 0.0  ;;  %v5060_v4 = vmul.f32 %v10204_v23, %v4956_v61 }
 0x769   : > { %v4876_v15 = vmax.f32 %v4789_v59, 0.0 }
 0x76a   : > { %v4905_v9 = vpack.c.bf16 %v4861_v43, %v4860_v62 }
 0x76c   : > { %v4964_v54 = vunpack.c.l.bf16 %v4905_v9  ;;  %v4965_v25 = vunpack.c.h.bf16 %v4905_v9 }
 0x76d   : > { %v4814_v24 = vpop.f32.mrf.mxu3 }
 0x76e   : > { %v4815_v30 = vadd.f32 %v4814_v24, %v10148_v22  ;;  %v5044_v22 = vmul.f32 %v10168_v14, %v4940_v60  ;;  %v4790_v16 = vpop.f32.mrf.mxu2  ;;  %v5185_v14 = vadd.f32 %v5045_v48, %v5037_v29  ;;  %v5068_v2 = vmul.f32 %v10215_v33, %v4964_v54 }
 0x76f   : > { %v4791_v24 = vadd.f32 %v4790_v16, %v10194_v21  ;;  %v5069_v7 = vmul.f32 %v10215_v33, %v4965_v25 }
 0x770   : > { %v4869_v38 = vmax.f32 %v4815_v30, 0.0  ;;  %v5172_v1 = vadd.f32 %v5044_v22, %v5036_v11  ;;  %v5186_v19 = vadd.f32 %v5185_v14, %v5053_v46 }
 0x771   : > { %v4884_v3 = vmax.f32 %v4791_v24, 0.0 }
 0x772   : > { %v4909_v55 = vpack.c.bf16 %v4869_v38, %v4868_v12  ;;  %v5173_v53 = vadd.f32 %v5172_v1, %v5052_v47  ;;  %v5187_v52 = vadd.f32 %v5186_v19, %v5061_v5  ;;  %v10423_v38 = vadd.f32 %v10267_v8, %v5158_v34 }
 0x774   : > { %v4972_v13 = vunpack.c.l.bf16 %v4909_v55  ;;  %v4973_v63 = vunpack.c.h.bf16 %v4909_v55  ;;  %v5174_v23 = vadd.f32 %v5173_v53, %v5060_v4  ;;  %v5188_v51 = vadd.f32 %v5187_v52, %v5069_v7 }
 0x775   : > { %v4817_v27 = vpop.f32.mrf.mxu3  ;;  %v5217_v52 = vmax.f32 %v10423_v38, 0.0 }
 0x776   : > { %v4818_v31 = vadd.f32 %v4817_v27, %v10172_v10  ;;  %v5171_v10 = vadd.f32 %v5170_v6, %v5169_v18  ;;  %v5076_v30 = vmul.f32 %v10232_v17, %v4972_v13  ;;  %v5077_v40 = vmul.f32 %v10232_v17, %v4973_v63 }
 0x777   : > { %v5175_v18 = vadd.f32 %v5174_v23, %v5068_v2 }
 0x778   : > { %v4877_v42 = vmax.f32 %v4818_v31, 0.0  ;;  %v10415_v0 = vadd.f32 %v10267_v8, %v5171_v10  ;;  %v5189_v37 = vadd.f32 %v5188_v51, %v5077_v40 }
 0x779   : > { %v5176_v62 = vadd.f32 %v5175_v18, %v5076_v30 }
 0x77a   : > { %v4913_v39 = vpack.c.bf16 %v4877_v42, %v4876_v15 }
 0x77c   : > { %v4980_v36 = vunpack.c.l.bf16 %v4913_v39  ;;  %v4981_v45 = vunpack.c.h.bf16 %v4913_v39 }
 0x77d   : > { %v4819_v28 = vpop.f32.mrf.mxu3 }
 0x77e   : > { %v4820_v41 = vadd.f32 %v4819_v28, %v10194_v21  ;;  %v5084_v33 = vmul.f32 %v10238_v56, %v4980_v36  ;;  %v5085_v60 = vmul.f32 %v10238_v56, %v4981_v45  ;;  %v5226_v21 = vand.u32 2147483647, %v10415_v0 }
 0x77f   : > { %v5225_v56 = vand.u32 2147483647, %v10423_v38 }
 0x780   : > { %v4885_v43 = vmax.f32 %v4820_v41, 0.0  ;;  %v5177_v17 = vadd.f32 %v5176_v62, %v5084_v33  ;;  %v5190_v32 = vadd.f32 %v5189_v37, %v5085_v60  ;;  %v5234_v9 = vsub.f32 0.0, %v5226_v21 }
 0x781   : > { %v5233_v61 = vsub.f32 0.0, %v5225_v56 }
 0x782   : > { %v4917_v20 = vpack.c.bf16 %v4885_v43, %v4884_v3  ;;  %v5247_v31 = vmul.f32 1.442695, %v5234_v9 }
 0x783   : > { %v5245_v42 = vmul.f32 1.442695, %v5233_v61 }
 0x784   : > { %v4988_v35 = vunpack.c.l.bf16 %v4917_v20  ;;  %v4989_v59 = vunpack.c.h.bf16 %v4917_v20  ;;  %5789 = vpow2.f32 %v5247_v31 }
 0x785   : > { %5791 = vpow2.f32 %v5245_v42 }
 0x786   : > { %v5092_v58 = vmul.f32 %v10243_v44, %v4988_v35  ;;  %v5093_v26 = vmul.f32 %v10243_v44, %v4989_v59 }
 0x788   : > { %v5178_v27 = vadd.f32 %v5177_v17, %v5092_v58  ;;  %v5191_v49 = vadd.f32 %v5190_v32, %v5093_v26 }
 0x78a   : > { %v5179_v6 = vrot.slane %v5178_v27, 4  ;;  %v5192_v12 = vrot.slane %v5191_v49, 4  ;;  %v5790_v54 = vpop.eup %5789 }
 0x78b   : > { %v5258_v1 = vadd.f32 1.0, %v5790_v54  ;;  %v5792_v5 = vpop.eup %5791 }
 0x78c   : > { %v5180_v22 = vadd.f32 %v5179_v6, %v5178_v27  ;;  %v5193_v48 = vadd.f32 %v5192_v12, %v5191_v49  ;;  %v5257_v24 = vadd.f32 1.0, %v5792_v5 }
 0x78d   : > { %5793 = vlog2.f32 %v5258_v1 }
 0x78e   : > { %v5181_v57 = vrot.slane %v5180_v22, 2  ;;  %v5194_v11 = vrot.slane %v5193_v48, 2 }
 0x790   : > { %v5182_v15 = vadd.f32 %v5181_v57, %v5180_v22  ;;  %v5195_v55 = vadd.f32 %v5194_v11, %v5193_v48 }
 0x792   : > { %v5183_v29 = vrot.slane %v5182_v15, 1  ;;  %v5196_v47 = vrot.slane %v5195_v55, 1 }
 0x793   : > { %v5794_v50 = vpop.eup %5793 }
 0x794   : > { %v5184_v44 = vadd.f32 %v5183_v29, %v5182_v15  ;;  %v5197_v46 = vadd.f32 %v5196_v47, %v5195_v55  ;;  %v5272_v28 = vmul.f32 0.6931472, %v5794_v50 }
 0x796   : > { %v5211_v16 = vadd.f32 %v10267_v8, %v5184_v44  ;;  %v5212_v10 = vadd.f32 %v10267_v8, %v5197_v46  ;;  %v5218_v8 = vmax.f32 %v10415_v0, 0.0 }
 0x798   : > { %v5227_v25 = vand.u32 2147483647, %v5211_v16  ;;  %v5228_v39 = vand.u32 2147483647, %v5212_v10  ;;  %v5282_v45 = vadd.f32 %v5272_v28, %v5218_v8  ;;  %v5219_v43 = vmax.f32 %v5211_v16, 0.0 }
 0x799   : > { %v5220_v18 = vmax.f32 %v5212_v10, 0.0 }
 0x79a   : > { %v5235_v14 = vsub.f32 0.0, %v5227_v25  ;;  %v5236_v4 = vsub.f32 0.0, %v5228_v39  ;;  %v5290_v30 = vsub.f32 0.0, %v5282_v45  ;;  %v5298_v40 = vsub.f32 %v10415_v0, %v5282_v45 }
 0x79c   : > { %v5249_v13 = vmul.f32 1.442695, %v5235_v14  ;;  %v5251_v63 = vmul.f32 1.442695, %v5236_v4  ;;  %v5307_v21 = vsel %vm5301_vm1, %v5290_v30, %v5298_v40 }
 0x79d   : > { %v5321_v58 = vrot.slane %v5307_v21, 6 }
 0x79e   : > { %5795 = vpow2.f32 %v5249_v13 }
 0x79f   : > { %5797 = vpow2.f32 %v5251_v63 }
 0x7a0   : > { %5799 = vlog2.f32 %v5257_v24 }
 0x7a4   : > { %v5796_v53 = vpop.eup %5795 }
 0x7a5   : > { %v5798_v19 = vpop.eup %5797  ;;  %v5259_v2 = vadd.f32 1.0, %v5796_v53 }
 0x7a6   : > { %v5260_v7 = vadd.f32 1.0, %v5798_v19  ;;  %v5800_v36 = vpop.eup %5799 }
 0x7a7   : > { %5801 = vlog2.f32 %v5259_v2  ;;  %v5270_v41 = vmul.f32 0.6931472, %v5800_v36 }
 0x7a8   : > { %5803 = vlog2.f32 %v5260_v7 }
 0x7a9   : > { %v5281_v33 = vadd.f32 %v5270_v41, %v5217_v52 }
 0x7ab   : > { %v5289_v35 = vsub.f32 0.0, %v5281_v33  ;;  %v5297_v59 = vsub.f32 %v10423_v38, %v5281_v33 }
 0x7ad   : > { %v5802_v23 = vpop.eup %5801  ;;  %v5306_v49 = vsel %vm5301_vm1, %v5289_v35, %v5297_v59 }
 0x7ae   : > { %v5804_v3 = vpop.eup %5803  ;;  %v5274_v34 = vmul.f32 0.6931472, %v5802_v23  ;;  %v5330_v56 = vsel %vm5324_vm2, %v5306_v49, %v5321_v58 }
 0x7af   : > { %v5276_v51 = vmul.f32 0.6931472, %v5804_v3 }
 0x7b0   : > { %v5283_v60 = vadd.f32 %v5274_v34, %v5219_v43 }
 0x7b1   : > { %v5284_v20 = vadd.f32 %v5276_v51, %v5220_v18 }
 0x7b2   : > { %v5291_v62 = vsub.f32 0.0, %v5283_v60  ;;  %v5299_v37 = vsub.f32 %v5211_v16, %v5283_v60 }
 0x7b3   : > { %v5292_v0 = vsub.f32 0.0, %v5284_v20  ;;  %v5300_v17 = vsub.f32 %v5212_v10, %v5284_v20 }
 0x7b4   : > { %v5308_v32 = vsel %vm5301_vm1, %v5291_v62, %v5299_v37 }
 0x7b5   : > { %v5309_v26 = vsel %vm5301_vm1, %v5292_v0, %v5300_v17  ;;  %v5322_v9 = vrot.slane %v5308_v32, 4 }
 0x7b6   : > { %v5323_v27 = vrot.slane %v5309_v26, 2 }
 0x7b8   : > { %v5331_v6 = vsel %vm5326_vm3, %v5322_v9, %v5323_v27 }
 0x7b9   : > { %v5332_v38 = vsel %vm5328_vm4, %v5330_v56, %v5331_v6 }
 0x7ba   : > { %5336 = vst [vmem:[%s10345_s16 + $0x8] sm:$0xff] %v5332_v38 }
 0x7bb   : > { %5848 = shalt.err (!%p5845_p3)
}
 0x7bc   : > { %5710 = dma.vmem_to_hbm [thread:$0]  (%p5999_p5), %s5352_s12, 256, %s5354_s24, %s5338_s25  }
 0x7bd PF: > { %p5716_p4 = scmp.ge.s32.totalorder %s5883_s30, 2  ;;  %s5365_s2 = sand.u32 1, %s5871_s27  }
 0x7be   : > { %s5366_s16 = scalar_lea.sflag [#allocation4], %s5365_s2 }
 0x7bf   : > { %p5713_p7 = pnand %p5716_p4, %p6003_p6 }
 0x7c1   : > { %p5714_p8 = pneg %p5713_p7 }
 0x7c3   : > { %5866 = dma.done.wait (%p5714_p8), %s5366_s16, 256  }
 0x7c4   : > { %5868 = vsyncadd (%p5714_p8), %s5366_s16, 4294967040  ;;  %p25_p9 = scmp.ge.s32.totalorder %s5986_s15, 4   ;;  %s11110_s27 = smov %s5875_s28 }
 0x7c5   : > { %s11111_s28 = smov %s5879_s29  ;;  %s11112_s29 = smov %s5997_s18 }
 0x7c6   : > { %s11113_s30 = smov %s5986_s15  ;;  %27 = sbr.rel (!%p25_p9) target bundleno = 6 (0x6), region = 107 }
 0x7cb   :  { %5372 = vsyncpa [#allocation4], 1 }
 0x7cc   :  { %5374 = vsyncpa [#allocation4 + $0x1], 1 }

</bundles_post_ra>
